<compile_context>
chip_gen: v7x
topology: tpu7x:2x2x1
jax: 0.10.0
libtpu: 0.0.40
codegen_flags: <defaults>
</compile_context>

<pallas_src>
import functools

import jax
import jax.numpy as jnp
from jax import lax
from jax.experimental import pallas as pl
from jax.experimental.pallas import tpu as pltpu

EPS = 1e-6


def _layer_norm(v):
    # LayerNorm with elementwise_affine=False, eps=1e-6 (biased variance,
    # matching torch.nn.LayerNorm).
    mu = jnp.mean(v, axis=-1, keepdims=True)
    var = jnp.mean((v - mu) ** 2, axis=-1, keepdims=True)
    return (v - mu) * lax.rsqrt(var + EPS)


def dit_block_kernel(
    x_ref, mod_ref,
    qkvw_ref, qkvb_ref, havg_ref, hsel_ref,
    ow_ref, ob_ref,
    dw_ref, db_ref,
    m1w_ref, m1b_ref, m2w_ref, m2b_ref,
    out_ref,
    *, num_heads, head_dim, kernel_size, n_padded,
):
    f32 = jnp.float32
    bf16 = jnp.bfloat16

    x = x_ref[...]                       # (N, D) f32
    mod = mod_ref[...]                   # (6, D) f32  (precomputed adaLN rows)
    n, d = x.shape
    hd = head_dim

    shift_msa, scale_msa, gate_msa = mod[0:1], mod[1:2], mod[2:3]
    shift_mlp, scale_mlp, gate_mlp = mod[3:4], mod[4:5], mod[5:6]

    # ---- attn_norm (AdaLayerNormZero modulation of LN(x)) -------------------
    norm = _layer_norm(x) * (1.0 + scale_msa) + shift_msa
    norm_bf = norm.astype(bf16)

    # ---- fused q/k/v projection (one MXU-dense matmul) ----------------------
    qkv = jnp.dot(norm_bf, qkvw_ref[...],
                  preferred_element_type=f32) + qkvb_ref[...]   # (N, 3D)
    q = qkv[:, 0:d]                      # lane-aligned slices (D % 128 == 0)
    k = qkv[:, d:2 * d]
    v = qkv[:, 2 * d:3 * d]

    # ---- per-head LayerNorm on (N, D) without relayouts ----------------------
    # mean / var per head via tiny f32 matmuls with a block-averaging matrix
    # (D, Hp) and a 0/1 broadcast-back matrix (Hp, D).
    havg = havg_ref[...]
    hsel = hsel_ref[...]

    def head_layer_norm(z):
        m = jnp.dot(jnp.dot(z, havg, preferred_element_type=f32), hsel,
                    preferred_element_type=f32)
        c = z - m
        var = jnp.dot(jnp.dot(c * c, havg, preferred_element_type=f32), hsel,
                      preferred_element_type=f32)
        return c * lax.rsqrt(var + EPS)

    scale = 1.0 / d                      # Attention.scale = 1 / dim (as in torch)
    qn = head_layer_norm(q) * scale      # fold 1/dim into q
    kn = head_layer_norm(k)

    # ---- multi-head attention (mask=None, rope=None) ------------------------
    attn = jnp.zeros((n, d), f32) + ob_ref[...]
    for h in range(num_heads):
        sl = slice(h * hd, (h + 1) * hd)
        qh = qn[:, sl].astype(bf16)                               # (N, hd)
        kh = kn[:, sl].astype(bf16)
        vh = v[:, sl].astype(bf16)
        s = lax.dot_general(qh, kh, (((1,), (1,)), ((), ())),
                            preferred_element_type=f32)           # (N, N)
        s = s - jnp.max(s, axis=-1, keepdims=True)
        p = jnp.exp(s)
        p = p * pl.reciprocal(jnp.sum(p, axis=-1, keepdims=True), approx=True)
        oh = jnp.dot(p.astype(bf16), vh, preferred_element_type=f32)   # (N, hd)
        # concat_h(head_h) @ W_o == sum_h head_h @ W_o[h]  (no lane concat)
        attn = attn + jnp.dot(oh.astype(bf16), ow_ref[h],
                              preferred_element_type=f32)              # (N, D)

    x1 = x + gate_msa * attn

    # ---- mlp_norm + adaLN modulation ----------------------------------------
    norm2 = _layer_norm(x1) * (1.0 + scale_mlp) + shift_mlp

    # ---- depthwise Conv1d over sequence (groups=dim, padding=K//2) ----------
    # Zero-extend to n_padded >= N + pad rows (multiple of 8); every tap is an
    # XLU roll of the slab, no sublane-unaligned slices.  Wrapped rows only
    # contaminate rows >= N, which are discarded.
    pad = kernel_size // 2
    if n_padded > n:
        xp = jnp.concatenate(
            [norm2, jnp.zeros((n_padded - n, d), f32)], axis=0)       # (NP, D)
    else:
        xp = norm2
    dw = dw_ref[...]                                                  # (K, D)
    acc = jnp.zeros((n_padded, d), f32)
    for kk in range(kernel_size):
        shift = (pad - kk) % n_padded
        tap = xp if shift == 0 else pltpu.roll(xp, shift=shift, axis=0)
        acc = acc + tap * dw[kk:kk + 1, :]
    conv = _layer_norm(acc[0:n, :] + db_ref[...])

    # ---- MLP (ReLU^2), chunked over the inner dim ----------------------------
    conv_bf = conv.astype(bf16)
    mlp = jnp.zeros((n, d), f32) + m2b_ref[...]
    for c in range(m1w_ref.shape[0]):
        h1 = jnp.dot(conv_bf, m1w_ref[c], preferred_element_type=f32) + m1b_ref[c]
        h1 = jnp.square(jnp.maximum(h1, 0.0)).astype(bf16)            # ReLU2
        mlp = mlp + jnp.dot(h1, m2w_ref[c], preferred_element_type=f32)

    out_ref[...] = (x1 + gate_mlp * mlp).astype(out_ref.dtype)


def dit_block_forward(x, t, params, *, num_heads, head_dim, kernel_size):
    B, N, D = x.shape
    H, hd = num_heads, head_dim
    inner = params['m1w'].shape[1]
    assert D == H * hd
    assert D % 128 == 0, "pad model dim to a multiple of 128 (lane-dense vregs)"
    assert N % 8 == 0, "pad sequence length to a multiple of 8 sublanes"
    assert kernel_size % 2 == 1, "even K changes Conv1d output length"

    f32, bf16 = jnp.float32, jnp.bfloat16

    # ---- Hoisted AdaLayerNormZero projection: (B, 6, D) modulation rows ------
    silu_t = t * jax.nn.sigmoid(t)
    mod = (silu_t @ params['adaln_w'] + params['adaln_b']).reshape(B, 6, D)
    mod = mod.astype(f32)

    # ---- Fused QKV weights (one dense matmul in-kernel) -----------------------
    qkv_w = jnp.concatenate([params['qw'], params['kw'], params['vw']],
                            axis=1).astype(bf16)                      # (D, 3D)
    qkv_b = jnp.concatenate([params['qb'], params['kb'], params['vb']],
                            axis=1).astype(f32)                       # (1, 3D)

    # Head-averaging / broadcast matrices for the per-head LayerNorm.
    Hp = ((H + 7) // 8) * 8
    head_ids = jnp.arange(D) // hd
    havg = (head_ids[:, None] == jnp.arange(Hp)[None, :]).astype(f32) / float(hd)
    hsel = (jnp.arange(Hp)[:, None] == head_ids[None, :]).astype(f32)

    ow3 = params['ow'].reshape(H, hd, D).astype(bf16)                 # (H, hd, D)
    ob = params['ob'].astype(f32)

    dw = params['dw'].astype(f32)
    db = params['db'].astype(f32)

    # ---- Chunk the MLP inner dim so (N, inner) is never materialized ---------
    fc = 256 if inner % 256 == 0 else (128 if inner % 128 == 0 else inner)
    nc = inner // fc
    m1w3 = params['m1w'].reshape(D, nc, fc).transpose(1, 0, 2).astype(bf16)
    m1b3 = params['m1b'].reshape(nc, 1, fc).astype(f32)
    m2w3 = params['m2w'].reshape(nc, fc, D).astype(bf16)
    m2b = params['m2b'].astype(f32)

    pad = kernel_size // 2
    n_padded = ((N + pad + 7) // 8) * 8

    weights = [qkv_w, qkv_b, havg, hsel, ow3, ob, dw, db,
               m1w3, m1b3, m2w3, m2b]

    kernel = functools.partial(dit_block_kernel, num_heads=H, head_dim=hd,
                               kernel_size=kernel_size, n_padded=n_padded)

    # Whole-array VMEM residency for weights: loaded once, single-buffered
    # (no per-grid-step double buffering).
    vmem_spec = pl.BlockSpec(memory_space=pltpu.MemorySpace.VMEM)
    in_specs = [
        pl.BlockSpec((None, N, D), lambda b: (b, 0, 0)),   # x (batch squeezed)
        pl.BlockSpec((None, 6, D), lambda b: (b, 0, 0)),   # adaLN modulation rows
    ] + [vmem_spec] * len(weights)

    flops = B * (8 * N * D * D          # q/k/v/out projections
                 + 4 * N * N * D        # scores + p@v
                 + 2 * N * kernel_size * D
                 + 4 * N * D * inner)   # MLP
    weight_bytes = (2 * (4 * D * D + 2 * D * inner)            # bf16 matmul weights
                    + 4 * (kernel_size * D + 8 * D + inner + 2 * D * Hp))
    bytes_accessed = 4 * (2 * B * N * D + 6 * B * D) + weight_bytes

    return pl.pallas_call(
        kernel,
        out_shape=jax.ShapeDtypeStruct((B, N, D), x.dtype),
        grid=(B,),
        in_specs=in_specs,
        out_specs=pl.BlockSpec((None, N, D), lambda b: (b, 0, 0)),
        compiler_params=pltpu.CompilerParams(
            dimension_semantics=("parallel",),
            # TODO(synk): re-derive for v7x (64 MiB VMEM) at production D / seq.
            vmem_limit_bytes=48 * 1024 * 1024,
        ),
        cost_estimate=pl.CostEstimate(
            flops=flops,
            transcendentals=B * H * N * N,
            bytes_accessed=bytes_accessed),
    )(x, mod, *weights)


def make_params(key, dim, ff_mult, kernel_size):
    inner = int(dim * ff_mult)
    ks = jax.random.split(key, 16)

    def w(k, shape, scale=0.02):
        return (scale * jax.random.normal(k, shape)).astype(jnp.float32)

    # Linear weights stored as (in, out); biases as (1, out); depthwise conv
    # weight stored as (K, dim) (= torch's (dim, 1, K) transposed).
    return dict(
        adaln_w=w(ks[0], (dim, 6 * dim)), adaln_b=w(ks[1], (1, 6 * dim)),
        qw=w(ks[2], (dim, dim)), qb=w(ks[3], (1, dim)),
        kw=w(ks[4], (dim, dim)), kb=w(ks[5], (1, dim)),
        vw=w(ks[6], (dim, dim)), vb=w(ks[7], (1, dim)),
        ow=w(ks[8], (dim, dim)), ob=w(ks[9], (1, dim)),
        dw=w(ks[10], (kernel_size, dim)), db=w(ks[11], (1, dim)),
        m1w=w(ks[12], (dim, inner)), m1b=w(ks[13], (1, inner)),
        m2w=w(ks[14], (inner, dim)), m2b=w(ks[15], (1, dim)),
    )


def dit_block_reference(x, t, params, *, num_heads, head_dim, kernel_size):
    # Pure-JAX reference mirroring the PyTorch forward (mask=None, rope=None),
    # with the same bf16-matmul / f32-accumulate precision as the kernel.
    B, N, D = x.shape
    f32, bf16 = jnp.float32, jnp.bfloat16
    bf = lambda a: a.astype(bf16)

    def ln(v):
        mu = v.mean(-1, keepdims=True)
        var = ((v - mu) ** 2).mean(-1, keepdims=True)
        return (v - mu) / jnp.sqrt(var + EPS)

    def mm(a, b):
        return jnp.dot(bf(a), bf(b), preferred_element_type=f32)

    silu_t = t * jax.nn.sigmoid(t)
    emb = silu_t @ params['adaln_w'] + params['adaln_b']
    (shift_msa, scale_msa, gate_msa,
     shift_mlp, scale_mlp, gate_mlp) = jnp.split(emb, 6, axis=1)

    norm = ln(x) * (1 + scale_msa[:, None]) + shift_msa[:, None]
    q = mm(norm, params['qw']) + params['qb']
    k = mm(norm, params['kw']) + params['kb']
    v = mm(norm, params['vw']) + params['vb']

    def heads(z):
        return z.reshape(B, N, num_heads, head_dim).transpose(0, 2, 1, 3)

    qh, kh, vh = ln(heads(q)), ln(heads(k)), heads(v)
    s = jnp.einsum('bhqd,bhkd->bhqk', bf(qh * (1.0 / D)), bf(kh),
                   preferred_element_type=f32)
    p = jax.nn.softmax(s, axis=-1)
    o = jnp.einsum('bhqk,bhkd->bhqd', bf(p), bf(vh),
                   preferred_element_type=f32)
    o = o.transpose(0, 2, 1, 3).reshape(B, N, D)
    attn = mm(o, params['ow']) + params['ob']
    x1 = x + gate_msa[:, None] * attn

    norm2 = ln(x1) * (1 + scale_mlp[:, None]) + shift_mlp[:, None]
    pad = kernel_size // 2
    xp = jnp.pad(norm2, ((0, 0), (pad, pad), (0, 0)))
    conv = jnp.zeros_like(norm2) + params['db']
    for kk in range(kernel_size):
        conv = conv + xp[:, kk:kk + N, :] * params['dw'][kk]
    conv = ln(conv)
    h1 = jnp.square(jnp.maximum(mm(conv, params['m1w']) + params['m1b'], 0.0))
    mlp = mm(h1, params['m2w']) + params['m2b']
    return x1 + gate_mlp[:, None] * mlp


if __name__ == "__main__":
    # Small but lane/sublane-aligned config (D multiple of 128, N multiple of 8,
    # B even so both v7x TensorCores would be fed).
    B, N, DIM, HEAD_DIM, FF_MULT, KS = 2, 128, 128, 64, 4, 31
    NUM_HEADS = DIM // HEAD_DIM

    key = jax.random.PRNGKey(0)
    kx, kt, kp = jax.random.split(key, 3)
    x = jax.random.normal(kx, (B, N, DIM), jnp.float32)
    t = jax.random.normal(kt, (B, DIM), jnp.float32)
    params = make_params(kp, DIM, FF_MULT, KS)

    out = dit_block_forward(x, t, params, num_heads=NUM_HEADS,
                            head_dim=HEAD_DIM, kernel_size=KS)
    out = jax.block_until_ready(out)

    ref = dit_block_reference(x, t, params, num_heads=NUM_HEADS,
                              head_dim=HEAD_DIM, kernel_size=KS)
    assert out.shape == (B, N, DIM)
    err = float(jnp.max(jnp.abs(out - ref)))
    assert err < 1e-2, f"max abs err {err}"
    print("KERNEL_OK")
</pallas_src>

<mosaic_0001>
module attributes {stable_mosaic.version = 11 : i64} {
  func.func @dit_block_kernel(%arg0: i32, %arg1: memref<1x128x128xf32, #tpu.memory_space<vmem>>, %arg2: memref<1x6x128xf32, #tpu.memory_space<vmem>>, %arg3: memref<128x384xbf16, #tpu.memory_space<vmem>>, %arg4: memref<1x384xf32, #tpu.memory_space<vmem>>, %arg5: memref<128x8xf32, #tpu.memory_space<vmem>>, %arg6: memref<8x128xf32, #tpu.memory_space<vmem>>, %arg7: memref<2x64x128xbf16, #tpu.memory_space<vmem>>, %arg8: memref<1x128xf32, #tpu.memory_space<vmem>>, %arg9: memref<31x128xf32, #tpu.memory_space<vmem>>, %arg10: memref<1x128xf32, #tpu.memory_space<vmem>>, %arg11: memref<2x128x256xbf16, #tpu.memory_space<vmem>>, %arg12: memref<2x1x256xf32, #tpu.memory_space<vmem>>, %arg13: memref<2x256x128xbf16, #tpu.memory_space<vmem>>, %arg14: memref<1x128xf32, #tpu.memory_space<vmem>>, %arg15: memref<1x128x128xf32, #tpu.memory_space<vmem>>) attributes {dimension_semantics = [#tpu.dimension_semantics<parallel>], iteration_bounds = array<i64: 2>, scalar_prefetch = 0 : i64, scratch_operands = 0 : i64, tpu.core_type = #tpu.core_type<tc>, window_params = [{transform_indices = @transform_0, window_bounds = array<i64: 1, 128, 128>}, {transform_indices = @transform_1, window_bounds = array<i64: 1, 6, 128>}, {pipeline_mode = #tpu.pipeline_mode<synchronous>, transform_indices = @transform_2, window_bounds = array<i64: 128, 384>}, {pipeline_mode = #tpu.pipeline_mode<synchronous>, transform_indices = @transform_3, window_bounds = array<i64: 1, 384>}, {pipeline_mode = #tpu.pipeline_mode<synchronous>, transform_indices = @transform_4, window_bounds = array<i64: 128, 8>}, {pipeline_mode = #tpu.pipeline_mode<synchronous>, transform_indices = @transform_5, window_bounds = array<i64: 8, 128>}, {pipeline_mode = #tpu.pipeline_mode<synchronous>, transform_indices = @transform_6, window_bounds = array<i64: 2, 64, 128>}, {pipeline_mode = #tpu.pipeline_mode<synchronous>, transform_indices = @transform_7, window_bounds = array<i64: 1, 128>}, {pipeline_mode = #tpu.pipeline_mode<synchronous>, transform_indices = @transform_8, window_bounds = array<i64: 31, 128>}, {pipeline_mode = #tpu.pipeline_mode<synchronous>, transform_indices = @transform_9, window_bounds = array<i64: 1, 128>}, {pipeline_mode = #tpu.pipeline_mode<synchronous>, transform_indices = @transform_10, window_bounds = array<i64: 2, 128, 256>}, {pipeline_mode = #tpu.pipeline_mode<synchronous>, transform_indices = @transform_11, window_bounds = array<i64: 2, 1, 256>}, {pipeline_mode = #tpu.pipeline_mode<synchronous>, transform_indices = @transform_12, window_bounds = array<i64: 2, 256, 128>}, {pipeline_mode = #tpu.pipeline_mode<synchronous>, transform_indices = @transform_13, window_bounds = array<i64: 1, 128>}, {transform_indices = @transform_14, window_bounds = array<i64: 1, 128, 128>}]} {
    %c0 = arith.constant 0 : index
    %c0_0 = arith.constant 0 : index
    %c0_1 = arith.constant 0 : index
    %0 = vector.load %arg1[%c0, %c0_0, %c0_1] : memref<1x128x128xf32, #tpu.memory_space<vmem>>, vector<1x128x128xf32>
    %1 = vector.shape_cast %0 : vector<1x128x128xf32> to vector<128x128xf32>
    %c0_2 = arith.constant 0 : index
    %c0_3 = arith.constant 0 : index
    %c0_4 = arith.constant 0 : index
    %2 = vector.load %arg2[%c0_2, %c0_3, %c0_4] : memref<1x6x128xf32, #tpu.memory_space<vmem>>, vector<1x6x128xf32>
    %3 = vector.shape_cast %2 : vector<1x6x128xf32> to vector<6x128xf32>
    %4 = vector.extract_strided_slice %3 {offsets = [0, 0], sizes = [1, 128], strides = [1, 1]} : vector<6x128xf32> to vector<1x128xf32>
    %5 = vector.extract_strided_slice %3 {offsets = [1, 0], sizes = [1, 128], strides = [1, 1]} : vector<6x128xf32> to vector<1x128xf32>
    %6 = vector.extract_strided_slice %3 {offsets = [2, 0], sizes = [1, 128], strides = [1, 1]} : vector<6x128xf32> to vector<1x128xf32>
    %7 = vector.extract_strided_slice %3 {offsets = [3, 0], sizes = [1, 128], strides = [1, 1]} : vector<6x128xf32> to vector<1x128xf32>
    %8 = vector.extract_strided_slice %3 {offsets = [4, 0], sizes = [1, 128], strides = [1, 1]} : vector<6x128xf32> to vector<1x128xf32>
    %9 = vector.extract_strided_slice %3 {offsets = [5, 0], sizes = [1, 128], strides = [1, 1]} : vector<6x128xf32> to vector<1x128xf32>
    %cst = arith.constant dense<0.000000e+00> : vector<128xf32>
    %10 = vector.multi_reduction <add>, %1, %cst [1] : vector<128x128xf32> to vector<128xf32>
    %11 = vector.shape_cast %10 : vector<128xf32> to vector<128x1xf32>
    %cst_5 = arith.constant 1.280000e+02 : f32
    %12 = vector.broadcast %cst_5 : f32 to vector<128x1xf32>
    %13 = arith.divf %11, %12 : vector<128x1xf32>
    %14 = vector.broadcast %13 : vector<128x1xf32> to vector<128x128xf32>
    %15 = arith.subf %1, %14 : vector<128x128xf32>
    %16 = arith.mulf %15, %15 : vector<128x128xf32>
    %cst_6 = arith.constant dense<0.000000e+00> : vector<128xf32>
    %17 = vector.multi_reduction <add>, %16, %cst_6 [1] : vector<128x128xf32> to vector<128xf32>
    %18 = vector.shape_cast %17 : vector<128xf32> to vector<128x1xf32>
    %cst_7 = arith.constant 1.280000e+02 : f32
    %19 = vector.broadcast %cst_7 : f32 to vector<128x1xf32>
    %20 = arith.divf %18, %19 : vector<128x1xf32>
    %21 = vector.broadcast %13 : vector<128x1xf32> to vector<128x128xf32>
    %22 = arith.subf %1, %21 : vector<128x128xf32>
    %cst_8 = arith.constant 9.99999997E-7 : f32
    %23 = vector.broadcast %cst_8 : f32 to vector<128x1xf32>
    %24 = arith.addf %20, %23 : vector<128x1xf32>
    %25 = math.rsqrt %24 : vector<128x1xf32>
    %26 = vector.broadcast %25 : vector<128x1xf32> to vector<128x128xf32>
    %27 = arith.mulf %22, %26 : vector<128x128xf32>
    %cst_9 = arith.constant 1.000000e+00 : f32
    %28 = vector.broadcast %cst_9 : f32 to vector<1x128xf32>
    %29 = arith.addf %28, %5 : vector<1x128xf32>
    %30 = vector.broadcast %29 : vector<1x128xf32> to vector<128x128xf32>
    %31 = arith.mulf %27, %30 : vector<128x128xf32>
    %32 = vector.broadcast %4 : vector<1x128xf32> to vector<128x128xf32>
    %33 = arith.addf %31, %32 : vector<128x128xf32>
    %34 = arith.truncf %33 : vector<128x128xf32> to vector<128x128xbf16>
    %c0_10 = arith.constant 0 : index
    %c0_11 = arith.constant 0 : index
    %35 = vector.load %arg3[%c0_10, %c0_11] : memref<128x384xbf16, #tpu.memory_space<vmem>>, vector<128x384xbf16>
    %cst_12 = arith.constant dense<0.000000e+00> : vector<128x384xf32>
    %36 = tpu.matmul %34, %35, %cst_12 {dimension_numbers = #tpu.dot_dimension_numbers<[1], [0], [0], [1], [0, 0, 1, 1], [], []>} : vector<128x128xbf16>, vector<128x384xbf16>, vector<128x384xf32> -> vector<128x384xf32>
    %c0_13 = arith.constant 0 : index
    %c0_14 = arith.constant 0 : index
    %37 = vector.load %arg4[%c0_13, %c0_14] : memref<1x384xf32, #tpu.memory_space<vmem>>, vector<1x384xf32>
    %38 = vector.broadcast %37 : vector<1x384xf32> to vector<128x384xf32>
    %39 = arith.addf %36, %38 : vector<128x384xf32>
    %40 = vector.extract_strided_slice %39 {offsets = [0, 0], sizes = [128, 128], strides = [1, 1]} : vector<128x384xf32> to vector<128x128xf32>
    %41 = vector.extract_strided_slice %39 {offsets = [0, 128], sizes = [128, 128], strides = [1, 1]} : vector<128x384xf32> to vector<128x128xf32>
    %42 = vector.extract_strided_slice %39 {offsets = [0, 256], sizes = [128, 128], strides = [1, 1]} : vector<128x384xf32> to vector<128x128xf32>
    %c0_15 = arith.constant 0 : index
    %c0_16 = arith.constant 0 : index
    %43 = vector.load %arg5[%c0_15, %c0_16] : memref<128x8xf32, #tpu.memory_space<vmem>>, vector<128x8xf32>
    %c0_17 = arith.constant 0 : index
    %c0_18 = arith.constant 0 : index
    %44 = vector.load %arg6[%c0_17, %c0_18] : memref<8x128xf32, #tpu.memory_space<vmem>>, vector<8x128xf32>
    %cst_19 = arith.constant dense<0.000000e+00> : vector<128x8xf32>
    %45 = tpu.matmul %40, %43, %cst_19 {dimension_numbers = #tpu.dot_dimension_numbers<[1], [0], [0], [1], [0, 0, 1, 1], [], []>} : vector<128x128xf32>, vector<128x8xf32>, vector<128x8xf32> -> vector<128x8xf32>
    %cst_20 = arith.constant dense<0.000000e+00> : vector<128x128xf32>
    %46 = tpu.matmul %45, %44, %cst_20 {dimension_numbers = #tpu.dot_dimension_numbers<[1], [0], [0], [1], [0, 0, 1, 1], [], []>} : vector<128x8xf32>, vector<8x128xf32>, vector<128x128xf32> -> vector<128x128xf32>
    %47 = arith.subf %40, %46 : vector<128x128xf32>
    %48 = arith.mulf %47, %47 : vector<128x128xf32>
    %cst_21 = arith.constant dense<0.000000e+00> : vector<128x8xf32>
    %49 = tpu.matmul %48, %43, %cst_21 {dimension_numbers = #tpu.dot_dimension_numbers<[1], [0], [0], [1], [0, 0, 1, 1], [], []>} : vector<128x128xf32>, vector<128x8xf32>, vector<128x8xf32> -> vector<128x8xf32>
    %cst_22 = arith.constant dense<0.000000e+00> : vector<128x128xf32>
    %50 = tpu.matmul %49, %44, %cst_22 {dimension_numbers = #tpu.dot_dimension_numbers<[1], [0], [0], [1], [0, 0, 1, 1], [], []>} : vector<128x8xf32>, vector<8x128xf32>, vector<128x128xf32> -> vector<128x128xf32>
    %cst_23 = arith.constant 9.99999997E-7 : f32
    %51 = vector.broadcast %cst_23 : f32 to vector<128x128xf32>
    %52 = arith.addf %50, %51 : vector<128x128xf32>
    %53 = math.rsqrt %52 : vector<128x128xf32>
    %54 = arith.mulf %47, %53 : vector<128x128xf32>
    %cst_24 = arith.constant 7.812500e-03 : f32
    %55 = vector.broadcast %cst_24 : f32 to vector<128x128xf32>
    %56 = arith.mulf %54, %55 : vector<128x128xf32>
    %cst_25 = arith.constant dense<0.000000e+00> : vector<128x8xf32>
    %57 = tpu.matmul %41, %43, %cst_25 {dimension_numbers = #tpu.dot_dimension_numbers<[1], [0], [0], [1], [0, 0, 1, 1], [], []>} : vector<128x128xf32>, vector<128x8xf32>, vector<128x8xf32> -> vector<128x8xf32>
    %cst_26 = arith.constant dense<0.000000e+00> : vector<128x128xf32>
    %58 = tpu.matmul %57, %44, %cst_26 {dimension_numbers = #tpu.dot_dimension_numbers<[1], [0], [0], [1], [0, 0, 1, 1], [], []>} : vector<128x8xf32>, vector<8x128xf32>, vector<128x128xf32> -> vector<128x128xf32>
    %59 = arith.subf %41, %58 : vector<128x128xf32>
    %60 = arith.mulf %59, %59 : vector<128x128xf32>
    %cst_27 = arith.constant dense<0.000000e+00> : vector<128x8xf32>
    %61 = tpu.matmul %60, %43, %cst_27 {dimension_numbers = #tpu.dot_dimension_numbers<[1], [0], [0], [1], [0, 0, 1, 1], [], []>} : vector<128x128xf32>, vector<128x8xf32>, vector<128x8xf32> -> vector<128x8xf32>
    %cst_28 = arith.constant dense<0.000000e+00> : vector<128x128xf32>
    %62 = tpu.matmul %61, %44, %cst_28 {dimension_numbers = #tpu.dot_dimension_numbers<[1], [0], [0], [1], [0, 0, 1, 1], [], []>} : vector<128x8xf32>, vector<8x128xf32>, vector<128x128xf32> -> vector<128x128xf32>
    %cst_29 = arith.constant 9.99999997E-7 : f32
    %63 = vector.broadcast %cst_29 : f32 to vector<128x128xf32>
    %64 = arith.addf %62, %63 : vector<128x128xf32>
    %65 = math.rsqrt %64 : vector<128x128xf32>
    %66 = arith.mulf %59, %65 : vector<128x128xf32>
    %cst_30 = arith.constant 0.000000e+00 : f32
    %67 = vector.broadcast %cst_30 : f32 to vector<128x128xf32>
    %c0_31 = arith.constant 0 : index
    %c0_32 = arith.constant 0 : index
    %68 = vector.load %arg8[%c0_31, %c0_32] : memref<1x128xf32, #tpu.memory_space<vmem>>, vector<1x128xf32>
    %69 = vector.broadcast %68 : vector<1x128xf32> to vector<128x128xf32>
    %70 = arith.addf %67, %69 : vector<128x128xf32>
    %71 = vector.extract_strided_slice %56 {offsets = [0, 0], sizes = [128, 64], strides = [1, 1]} : vector<128x128xf32> to vector<128x64xf32>
    %72 = arith.truncf %71 : vector<128x64xf32> to vector<128x64xbf16>
    %73 = vector.extract_strided_slice %66 {offsets = [0, 0], sizes = [128, 64], strides = [1, 1]} : vector<128x128xf32> to vector<128x64xf32>
    %74 = arith.truncf %73 : vector<128x64xf32> to vector<128x64xbf16>
    %75 = vector.extract_strided_slice %42 {offsets = [0, 0], sizes = [128, 64], strides = [1, 1]} : vector<128x128xf32> to vector<128x64xf32>
    %76 = arith.truncf %75 : vector<128x64xf32> to vector<128x64xbf16>
    %cst_33 = arith.constant dense<0.000000e+00> : vector<128x128xf32>
    %77 = tpu.matmul %72, %74, %cst_33 {dimension_numbers = #tpu.dot_dimension_numbers<[1], [1], [0], [0], [0, 0, 1, 0], [], []>} : vector<128x64xbf16>, vector<128x64xbf16>, vector<128x128xf32> -> vector<128x128xf32>
    %cst_34 = arith.constant dense<0xFF800000> : vector<128xf32>
    %78 = vector.multi_reduction <maximumf>, %77, %cst_34 [1] : vector<128x128xf32> to vector<128xf32>
    %79 = vector.shape_cast %78 : vector<128xf32> to vector<128x1xf32>
    %80 = vector.broadcast %79 : vector<128x1xf32> to vector<128x128xf32>
    %81 = arith.subf %77, %80 : vector<128x128xf32>
    %82 = math.exp %81 : vector<128x128xf32>
    %cst_35 = arith.constant dense<0.000000e+00> : vector<128xf32>
    %83 = vector.multi_reduction <add>, %82, %cst_35 [1] : vector<128x128xf32> to vector<128xf32>
    %84 = vector.shape_cast %83 : vector<128xf32> to vector<128x1xf32>
    %85 = tpu.reciprocal %84 {approx = true} : vector<128x1xf32> -> vector<128x1xf32>
    %86 = vector.broadcast %85 : vector<128x1xf32> to vector<128x128xf32>
    %87 = arith.mulf %82, %86 : vector<128x128xf32>
    %88 = arith.truncf %87 : vector<128x128xf32> to vector<128x128xbf16>
    %cst_36 = arith.constant dense<0.000000e+00> : vector<128x64xf32>
    %89 = tpu.matmul %88, %76, %cst_36 {dimension_numbers = #tpu.dot_dimension_numbers<[1], [0], [0], [1], [0, 0, 1, 1], [], []>} : vector<128x128xbf16>, vector<128x64xbf16>, vector<128x64xf32> -> vector<128x64xf32>
    %90 = arith.truncf %89 : vector<128x64xf32> to vector<128x64xbf16>
    %c0_37 = arith.constant 0 : index
    %c0_38 = arith.constant 0 : index
    %c0_39 = arith.constant 0 : index
    %91 = vector.load %arg7[%c0_37, %c0_38, %c0_39] : memref<2x64x128xbf16, #tpu.memory_space<vmem>>, vector<1x64x128xbf16>
    %92 = vector.shape_cast %91 : vector<1x64x128xbf16> to vector<64x128xbf16>
    %cst_40 = arith.constant dense<0.000000e+00> : vector<128x128xf32>
    %93 = tpu.matmul %90, %92, %cst_40 {dimension_numbers = #tpu.dot_dimension_numbers<[1], [0], [0], [1], [0, 0, 1, 1], [], []>} : vector<128x64xbf16>, vector<64x128xbf16>, vector<128x128xf32> -> vector<128x128xf32>
    %94 = arith.addf %70, %93 : vector<128x128xf32>
    %95 = vector.extract_strided_slice %56 {offsets = [0, 64], sizes = [128, 64], strides = [1, 1]} : vector<128x128xf32> to vector<128x64xf32>
    %96 = arith.truncf %95 : vector<128x64xf32> to vector<128x64xbf16>
    %97 = vector.extract_strided_slice %66 {offsets = [0, 64], sizes = [128, 64], strides = [1, 1]} : vector<128x128xf32> to vector<128x64xf32>
    %98 = arith.truncf %97 : vector<128x64xf32> to vector<128x64xbf16>
    %99 = vector.extract_strided_slice %42 {offsets = [0, 64], sizes = [128, 64], strides = [1, 1]} : vector<128x128xf32> to vector<128x64xf32>
    %100 = arith.truncf %99 : vector<128x64xf32> to vector<128x64xbf16>
    %cst_41 = arith.constant dense<0.000000e+00> : vector<128x128xf32>
    %101 = tpu.matmul %96, %98, %cst_41 {dimension_numbers = #tpu.dot_dimension_numbers<[1], [1], [0], [0], [0, 0, 1, 0], [], []>} : vector<128x64xbf16>, vector<128x64xbf16>, vector<128x128xf32> -> vector<128x128xf32>
    %cst_42 = arith.constant dense<0xFF800000> : vector<128xf32>
    %102 = vector.multi_reduction <maximumf>, %101, %cst_42 [1] : vector<128x128xf32> to vector<128xf32>
    %103 = vector.shape_cast %102 : vector<128xf32> to vector<128x1xf32>
    %104 = vector.broadcast %103 : vector<128x1xf32> to vector<128x128xf32>
    %105 = arith.subf %101, %104 : vector<128x128xf32>
    %106 = math.exp %105 : vector<128x128xf32>
    %cst_43 = arith.constant dense<0.000000e+00> : vector<128xf32>
    %107 = vector.multi_reduction <add>, %106, %cst_43 [1] : vector<128x128xf32> to vector<128xf32>
    %108 = vector.shape_cast %107 : vector<128xf32> to vector<128x1xf32>
    %109 = tpu.reciprocal %108 {approx = true} : vector<128x1xf32> -> vector<128x1xf32>
    %110 = vector.broadcast %109 : vector<128x1xf32> to vector<128x128xf32>
    %111 = arith.mulf %106, %110 : vector<128x128xf32>
    %112 = arith.truncf %111 : vector<128x128xf32> to vector<128x128xbf16>
    %cst_44 = arith.constant dense<0.000000e+00> : vector<128x64xf32>
    %113 = tpu.matmul %112, %100, %cst_44 {dimension_numbers = #tpu.dot_dimension_numbers<[1], [0], [0], [1], [0, 0, 1, 1], [], []>} : vector<128x128xbf16>, vector<128x64xbf16>, vector<128x64xf32> -> vector<128x64xf32>
    %114 = arith.truncf %113 : vector<128x64xf32> to vector<128x64xbf16>
    %c1 = arith.constant 1 : index
    %c0_45 = arith.constant 0 : index
    %c0_46 = arith.constant 0 : index
    %115 = vector.load %arg7[%c1, %c0_45, %c0_46] : memref<2x64x128xbf16, #tpu.memory_space<vmem>>, vector<1x64x128xbf16>
    %116 = vector.shape_cast %115 : vector<1x64x128xbf16> to vector<64x128xbf16>
    %cst_47 = arith.constant dense<0.000000e+00> : vector<128x128xf32>
    %117 = tpu.matmul %114, %116, %cst_47 {dimension_numbers = #tpu.dot_dimension_numbers<[1], [0], [0], [1], [0, 0, 1, 1], [], []>} : vector<128x64xbf16>, vector<64x128xbf16>, vector<128x128xf32> -> vector<128x128xf32>
    %118 = arith.addf %94, %117 : vector<128x128xf32>
    %119 = vector.broadcast %6 : vector<1x128xf32> to vector<128x128xf32>
    %120 = arith.mulf %119, %118 : vector<128x128xf32>
    %121 = arith.addf %1, %120 : vector<128x128xf32>
    %cst_48 = arith.constant dense<0.000000e+00> : vector<128xf32>
    %122 = vector.multi_reduction <add>, %121, %cst_48 [1] : vector<128x128xf32> to vector<128xf32>
    %123 = vector.shape_cast %122 : vector<128xf32> to vector<128x1xf32>
    %cst_49 = arith.constant 1.280000e+02 : f32
    %124 = vector.broadcast %cst_49 : f32 to vector<128x1xf32>
    %125 = arith.divf %123, %124 : vector<128x1xf32>
    %126 = vector.broadcast %125 : vector<128x1xf32> to vector<128x128xf32>
    %127 = arith.subf %121, %126 : vector<128x128xf32>
    %128 = arith.mulf %127, %127 : vector<128x128xf32>
    %cst_50 = arith.constant dense<0.000000e+00> : vector<128xf32>
    %129 = vector.multi_reduction <add>, %128, %cst_50 [1] : vector<128x128xf32> to vector<128xf32>
    %130 = vector.shape_cast %129 : vector<128xf32> to vector<128x1xf32>
    %cst_51 = arith.constant 1.280000e+02 : f32
    %131 = vector.broadcast %cst_51 : f32 to vector<128x1xf32>
    %132 = arith.divf %130, %131 : vector<128x1xf32>
    %133 = vector.broadcast %125 : vector<128x1xf32> to vector<128x128xf32>
    %134 = arith.subf %121, %133 : vector<128x128xf32>
    %cst_52 = arith.constant 9.99999997E-7 : f32
    %135 = vector.broadcast %cst_52 : f32 to vector<128x1xf32>
    %136 = arith.addf %132, %135 : vector<128x1xf32>
    %137 = math.rsqrt %136 : vector<128x1xf32>
    %138 = vector.broadcast %137 : vector<128x1xf32> to vector<128x128xf32>
    %139 = arith.mulf %134, %138 : vector<128x128xf32>
    %cst_53 = arith.constant 1.000000e+00 : f32
    %140 = vector.broadcast %cst_53 : f32 to vector<1x128xf32>
    %141 = arith.addf %140, %8 : vector<1x128xf32>
    %142 = vector.broadcast %141 : vector<1x128xf32> to vector<128x128xf32>
    %143 = arith.mulf %139, %142 : vector<128x128xf32>
    %144 = vector.broadcast %7 : vector<1x128xf32> to vector<128x128xf32>
    %145 = arith.addf %143, %144 : vector<128x128xf32>
    %cst_54 = arith.constant 0.000000e+00 : f32
    %146 = vector.broadcast %cst_54 : f32 to vector<16x128xf32>
    %147 = tpu.concatenate %145, %146 in 0 : vector<128x128xf32>, vector<16x128xf32> -> vector<144x128xf32>
    %c0_55 = arith.constant 0 : index
    %c0_56 = arith.constant 0 : index
    %148 = vector.load %arg9[%c0_55, %c0_56] : memref<31x128xf32, #tpu.memory_space<vmem>>, vector<31x128xf32>
    %cst_57 = arith.constant 0.000000e+00 : f32
    %149 = vector.broadcast %cst_57 : f32 to vector<144x128xf32>
    %c15_i32 = arith.constant 15 : i32
    %150 = tpu.dynamic_rotate %147 by %c15_i32 dim 0 : vector<144x128xf32>, i32 -> vector<144x128xf32>
    %151 = vector.extract_strided_slice %148 {offsets = [0, 0], sizes = [1, 128], strides = [1, 1]} : vector<31x128xf32> to vector<1x128xf32>
    %152 = vector.broadcast %151 : vector<1x128xf32> to vector<144x128xf32>
    %153 = arith.mulf %150, %152 : vector<144x128xf32>
    %154 = arith.addf %149, %153 : vector<144x128xf32>
    %c14_i32 = arith.constant 14 : i32
    %155 = tpu.dynamic_rotate %147 by %c14_i32 dim 0 : vector<144x128xf32>, i32 -> vector<144x128xf32>
    %156 = vector.extract_strided_slice %148 {offsets = [1, 0], sizes = [1, 128], strides = [1, 1]} : vector<31x128xf32> to vector<1x128xf32>
    %157 = vector.broadcast %156 : vector<1x128xf32> to vector<144x128xf32>
    %158 = arith.mulf %155, %157 : vector<144x128xf32>
    %159 = arith.addf %154, %158 : vector<144x128xf32>
    %c13_i32 = arith.constant 13 : i32
    %160 = tpu.dynamic_rotate %147 by %c13_i32 dim 0 : vector<144x128xf32>, i32 -> vector<144x128xf32>
    %161 = vector.extract_strided_slice %148 {offsets = [2, 0], sizes = [1, 128], strides = [1, 1]} : vector<31x128xf32> to vector<1x128xf32>
    %162 = vector.broadcast %161 : vector<1x128xf32> to vector<144x128xf32>
    %163 = arith.mulf %160, %162 : vector<144x128xf32>
    %164 = arith.addf %159, %163 : vector<144x128xf32>
    %c12_i32 = arith.constant 12 : i32
    %165 = tpu.dynamic_rotate %147 by %c12_i32 dim 0 : vector<144x128xf32>, i32 -> vector<144x128xf32>
    %166 = vector.extract_strided_slice %148 {offsets = [3, 0], sizes = [1, 128], strides = [1, 1]} : vector<31x128xf32> to vector<1x128xf32>
    %167 = vector.broadcast %166 : vector<1x128xf32> to vector<144x128xf32>
    %168 = arith.mulf %165, %167 : vector<144x128xf32>
    %169 = arith.addf %164, %168 : vector<144x128xf32>
    %c11_i32 = arith.constant 11 : i32
    %170 = tpu.dynamic_rotate %147 by %c11_i32 dim 0 : vector<144x128xf32>, i32 -> vector<144x128xf32>
    %171 = vector.extract_strided_slice %148 {offsets = [4, 0], sizes = [1, 128], strides = [1, 1]} : vector<31x128xf32> to vector<1x128xf32>
    %172 = vector.broadcast %171 : vector<1x128xf32> to vector<144x128xf32>
    %173 = arith.mulf %170, %172 : vector<144x128xf32>
    %174 = arith.addf %169, %173 : vector<144x128xf32>
    %c10_i32 = arith.constant 10 : i32
    %175 = tpu.dynamic_rotate %147 by %c10_i32 dim 0 : vector<144x128xf32>, i32 -> vector<144x128xf32>
    %176 = vector.extract_strided_slice %148 {offsets = [5, 0], sizes = [1, 128], strides = [1, 1]} : vector<31x128xf32> to vector<1x128xf32>
    %177 = vector.broadcast %176 : vector<1x128xf32> to vector<144x128xf32>
    %178 = arith.mulf %175, %177 : vector<144x128xf32>
    %179 = arith.addf %174, %178 : vector<144x128xf32>
    %c9_i32 = arith.constant 9 : i32
    %180 = tpu.dynamic_rotate %147 by %c9_i32 dim 0 : vector<144x128xf32>, i32 -> vector<144x128xf32>
    %181 = vector.extract_strided_slice %148 {offsets = [6, 0], sizes = [1, 128], strides = [1, 1]} : vector<31x128xf32> to vector<1x128xf32>
    %182 = vector.broadcast %181 : vector<1x128xf32> to vector<144x128xf32>
    %183 = arith.mulf %180, %182 : vector<144x128xf32>
    %184 = arith.addf %179, %183 : vector<144x128xf32>
    %c8_i32 = arith.constant 8 : i32
    %185 = tpu.dynamic_rotate %147 by %c8_i32 dim 0 : vector<144x128xf32>, i32 -> vector<144x128xf32>
    %186 = vector.extract_strided_slice %148 {offsets = [7, 0], sizes = [1, 128], strides = [1, 1]} : vector<31x128xf32> to vector<1x128xf32>
    %187 = vector.broadcast %186 : vector<1x128xf32> to vector<144x128xf32>
    %188 = arith.mulf %185, %187 : vector<144x128xf32>
    %189 = arith.addf %184, %188 : vector<144x128xf32>
    %c7_i32 = arith.constant 7 : i32
    %190 = tpu.dynamic_rotate %147 by %c7_i32 dim 0 : vector<144x128xf32>, i32 -> vector<144x128xf32>
    %191 = vector.extract_strided_slice %148 {offsets = [8, 0], sizes = [1, 128], strides = [1, 1]} : vector<31x128xf32> to vector<1x128xf32>
    %192 = vector.broadcast %191 : vector<1x128xf32> to vector<144x128xf32>
    %193 = arith.mulf %190, %192 : vector<144x128xf32>
    %194 = arith.addf %189, %193 : vector<144x128xf32>
    %c6_i32 = arith.constant 6 : i32
    %195 = tpu.dynamic_rotate %147 by %c6_i32 dim 0 : vector<144x128xf32>, i32 -> vector<144x128xf32>
    %196 = vector.extract_strided_slice %148 {offsets = [9, 0], sizes = [1, 128], strides = [1, 1]} : vector<31x128xf32> to vector<1x128xf32>
    %197 = vector.broadcast %196 : vector<1x128xf32> to vector<144x128xf32>
    %198 = arith.mulf %195, %197 : vector<144x128xf32>
    %199 = arith.addf %194, %198 : vector<144x128xf32>
    %c5_i32 = arith.constant 5 : i32
    %200 = tpu.dynamic_rotate %147 by %c5_i32 dim 0 : vector<144x128xf32>, i32 -> vector<144x128xf32>
    %201 = vector.extract_strided_slice %148 {offsets = [10, 0], sizes = [1, 128], strides = [1, 1]} : vector<31x128xf32> to vector<1x128xf32>
    %202 = vector.broadcast %201 : vector<1x128xf32> to vector<144x128xf32>
    %203 = arith.mulf %200, %202 : vector<144x128xf32>
    %204 = arith.addf %199, %203 : vector<144x128xf32>
    %c4_i32 = arith.constant 4 : i32
    %205 = tpu.dynamic_rotate %147 by %c4_i32 dim 0 : vector<144x128xf32>, i32 -> vector<144x128xf32>
    %206 = vector.extract_strided_slice %148 {offsets = [11, 0], sizes = [1, 128], strides = [1, 1]} : vector<31x128xf32> to vector<1x128xf32>
    %207 = vector.broadcast %206 : vector<1x128xf32> to vector<144x128xf32>
    %208 = arith.mulf %205, %207 : vector<144x128xf32>
    %209 = arith.addf %204, %208 : vector<144x128xf32>
    %c3_i32 = arith.constant 3 : i32
    %210 = tpu.dynamic_rotate %147 by %c3_i32 dim 0 : vector<144x128xf32>, i32 -> vector<144x128xf32>
    %211 = vector.extract_strided_slice %148 {offsets = [12, 0], sizes = [1, 128], strides = [1, 1]} : vector<31x128xf32> to vector<1x128xf32>
    %212 = vector.broadcast %211 : vector<1x128xf32> to vector<144x128xf32>
    %213 = arith.mulf %210, %212 : vector<144x128xf32>
    %214 = arith.addf %209, %213 : vector<144x128xf32>
    %c2_i32 = arith.constant 2 : i32
    %215 = tpu.dynamic_rotate %147 by %c2_i32 dim 0 : vector<144x128xf32>, i32 -> vector<144x128xf32>
    %216 = vector.extract_strided_slice %148 {offsets = [13, 0], sizes = [1, 128], strides = [1, 1]} : vector<31x128xf32> to vector<1x128xf32>
    %217 = vector.broadcast %216 : vector<1x128xf32> to vector<144x128xf32>
    %218 = arith.mulf %215, %217 : vector<144x128xf32>
    %219 = arith.addf %214, %218 : vector<144x128xf32>
    %c1_i32 = arith.constant 1 : i32
    %220 = tpu.dynamic_rotate %147 by %c1_i32 dim 0 : vector<144x128xf32>, i32 -> vector<144x128xf32>
    %221 = vector.extract_strided_slice %148 {offsets = [14, 0], sizes = [1, 128], strides = [1, 1]} : vector<31x128xf32> to vector<1x128xf32>
    %222 = vector.broadcast %221 : vector<1x128xf32> to vector<144x128xf32>
    %223 = arith.mulf %220, %222 : vector<144x128xf32>
    %224 = arith.addf %219, %223 : vector<144x128xf32>
    %225 = vector.extract_strided_slice %148 {offsets = [15, 0], sizes = [1, 128], strides = [1, 1]} : vector<31x128xf32> to vector<1x128xf32>
    %226 = vector.broadcast %225 : vector<1x128xf32> to vector<144x128xf32>
    %227 = arith.mulf %147, %226 : vector<144x128xf32>
    %228 = arith.addf %224, %227 : vector<144x128xf32>
    %c143_i32 = arith.constant 143 : i32
    %229 = tpu.dynamic_rotate %147 by %c143_i32 dim 0 : vector<144x128xf32>, i32 -> vector<144x128xf32>
    %230 = vector.extract_strided_slice %148 {offsets = [16, 0], sizes = [1, 128], strides = [1, 1]} : vector<31x128xf32> to vector<1x128xf32>
    %231 = vector.broadcast %230 : vector<1x128xf32> to vector<144x128xf32>
    %232 = arith.mulf %229, %231 : vector<144x128xf32>
    %233 = arith.addf %228, %232 : vector<144x128xf32>
    %c142_i32 = arith.constant 142 : i32
    %234 = tpu.dynamic_rotate %147 by %c142_i32 dim 0 : vector<144x128xf32>, i32 -> vector<144x128xf32>
    %235 = vector.extract_strided_slice %148 {offsets = [17, 0], sizes = [1, 128], strides = [1, 1]} : vector<31x128xf32> to vector<1x128xf32>
    %236 = vector.broadcast %235 : vector<1x128xf32> to vector<144x128xf32>
    %237 = arith.mulf %234, %236 : vector<144x128xf32>
    %238 = arith.addf %233, %237 : vector<144x128xf32>
    %c141_i32 = arith.constant 141 : i32
    %239 = tpu.dynamic_rotate %147 by %c141_i32 dim 0 : vector<144x128xf32>, i32 -> vector<144x128xf32>
    %240 = vector.extract_strided_slice %148 {offsets = [18, 0], sizes = [1, 128], strides = [1, 1]} : vector<31x128xf32> to vector<1x128xf32>
    %241 = vector.broadcast %240 : vector<1x128xf32> to vector<144x128xf32>
    %242 = arith.mulf %239, %241 : vector<144x128xf32>
    %243 = arith.addf %238, %242 : vector<144x128xf32>
    %c140_i32 = arith.constant 140 : i32
    %244 = tpu.dynamic_rotate %147 by %c140_i32 dim 0 : vector<144x128xf32>, i32 -> vector<144x128xf32>
    %245 = vector.extract_strided_slice %148 {offsets = [19, 0], sizes = [1, 128], strides = [1, 1]} : vector<31x128xf32> to vector<1x128xf32>
    %246 = vector.broadcast %245 : vector<1x128xf32> to vector<144x128xf32>
    %247 = arith.mulf %244, %246 : vector<144x128xf32>
    %248 = arith.addf %243, %247 : vector<144x128xf32>
    %c139_i32 = arith.constant 139 : i32
    %249 = tpu.dynamic_rotate %147 by %c139_i32 dim 0 : vector<144x128xf32>, i32 -> vector<144x128xf32>
    %250 = vector.extract_strided_slice %148 {offsets = [20, 0], sizes = [1, 128], strides = [1, 1]} : vector<31x128xf32> to vector<1x128xf32>
    %251 = vector.broadcast %250 : vector<1x128xf32> to vector<144x128xf32>
    %252 = arith.mulf %249, %251 : vector<144x128xf32>
    %253 = arith.addf %248, %252 : vector<144x128xf32>
    %c138_i32 = arith.constant 138 : i32
    %254 = tpu.dynamic_rotate %147 by %c138_i32 dim 0 : vector<144x128xf32>, i32 -> vector<144x128xf32>
    %255 = vector.extract_strided_slice %148 {offsets = [21, 0], sizes = [1, 128], strides = [1, 1]} : vector<31x128xf32> to vector<1x128xf32>
    %256 = vector.broadcast %255 : vector<1x128xf32> to vector<144x128xf32>
    %257 = arith.mulf %254, %256 : vector<144x128xf32>
    %258 = arith.addf %253, %257 : vector<144x128xf32>
    %c137_i32 = arith.constant 137 : i32
    %259 = tpu.dynamic_rotate %147 by %c137_i32 dim 0 : vector<144x128xf32>, i32 -> vector<144x128xf32>
    %260 = vector.extract_strided_slice %148 {offsets = [22, 0], sizes = [1, 128], strides = [1, 1]} : vector<31x128xf32> to vector<1x128xf32>
    %261 = vector.broadcast %260 : vector<1x128xf32> to vector<144x128xf32>
    %262 = arith.mulf %259, %261 : vector<144x128xf32>
    %263 = arith.addf %258, %262 : vector<144x128xf32>
    %c136_i32 = arith.constant 136 : i32
    %264 = tpu.dynamic_rotate %147 by %c136_i32 dim 0 : vector<144x128xf32>, i32 -> vector<144x128xf32>
    %265 = vector.extract_strided_slice %148 {offsets = [23, 0], sizes = [1, 128], strides = [1, 1]} : vector<31x128xf32> to vector<1x128xf32>
    %266 = vector.broadcast %265 : vector<1x128xf32> to vector<144x128xf32>
    %267 = arith.mulf %264, %266 : vector<144x128xf32>
    %268 = arith.addf %263, %267 : vector<144x128xf32>
    %c135_i32 = arith.constant 135 : i32
    %269 = tpu.dynamic_rotate %147 by %c135_i32 dim 0 : vector<144x128xf32>, i32 -> vector<144x128xf32>
    %270 = vector.extract_strided_slice %148 {offsets = [24, 0], sizes = [1, 128], strides = [1, 1]} : vector<31x128xf32> to vector<1x128xf32>
    %271 = vector.broadcast %270 : vector<1x128xf32> to vector<144x128xf32>
    %272 = arith.mulf %269, %271 : vector<144x128xf32>
    %273 = arith.addf %268, %272 : vector<144x128xf32>
    %c134_i32 = arith.constant 134 : i32
    %274 = tpu.dynamic_rotate %147 by %c134_i32 dim 0 : vector<144x128xf32>, i32 -> vector<144x128xf32>
    %275 = vector.extract_strided_slice %148 {offsets = [25, 0], sizes = [1, 128], strides = [1, 1]} : vector<31x128xf32> to vector<1x128xf32>
    %276 = vector.broadcast %275 : vector<1x128xf32> to vector<144x128xf32>
    %277 = arith.mulf %274, %276 : vector<144x128xf32>
    %278 = arith.addf %273, %277 : vector<144x128xf32>
    %c133_i32 = arith.constant 133 : i32
    %279 = tpu.dynamic_rotate %147 by %c133_i32 dim 0 : vector<144x128xf32>, i32 -> vector<144x128xf32>
    %280 = vector.extract_strided_slice %148 {offsets = [26, 0], sizes = [1, 128], strides = [1, 1]} : vector<31x128xf32> to vector<1x128xf32>
    %281 = vector.broadcast %280 : vector<1x128xf32> to vector<144x128xf32>
    %282 = arith.mulf %279, %281 : vector<144x128xf32>
    %283 = arith.addf %278, %282 : vector<144x128xf32>
    %c132_i32 = arith.constant 132 : i32
    %284 = tpu.dynamic_rotate %147 by %c132_i32 dim 0 : vector<144x128xf32>, i32 -> vector<144x128xf32>
    %285 = vector.extract_strided_slice %148 {offsets = [27, 0], sizes = [1, 128], strides = [1, 1]} : vector<31x128xf32> to vector<1x128xf32>
    %286 = vector.broadcast %285 : vector<1x128xf32> to vector<144x128xf32>
    %287 = arith.mulf %284, %286 : vector<144x128xf32>
    %288 = arith.addf %283, %287 : vector<144x128xf32>
    %c131_i32 = arith.constant 131 : i32
    %289 = tpu.dynamic_rotate %147 by %c131_i32 dim 0 : vector<144x128xf32>, i32 -> vector<144x128xf32>
    %290 = vector.extract_strided_slice %148 {offsets = [28, 0], sizes = [1, 128], strides = [1, 1]} : vector<31x128xf32> to vector<1x128xf32>
    %291 = vector.broadcast %290 : vector<1x128xf32> to vector<144x128xf32>
    %292 = arith.mulf %289, %291 : vector<144x128xf32>
    %293 = arith.addf %288, %292 : vector<144x128xf32>
    %c130_i32 = arith.constant 130 : i32
    %294 = tpu.dynamic_rotate %147 by %c130_i32 dim 0 : vector<144x128xf32>, i32 -> vector<144x128xf32>
    %295 = vector.extract_strided_slice %148 {offsets = [29, 0], sizes = [1, 128], strides = [1, 1]} : vector<31x128xf32> to vector<1x128xf32>
    %296 = vector.broadcast %295 : vector<1x128xf32> to vector<144x128xf32>
    %297 = arith.mulf %294, %296 : vector<144x128xf32>
    %298 = arith.addf %293, %297 : vector<144x128xf32>
    %c129_i32 = arith.constant 129 : i32
    %299 = tpu.dynamic_rotate %147 by %c129_i32 dim 0 : vector<144x128xf32>, i32 -> vector<144x128xf32>
    %300 = vector.extract_strided_slice %148 {offsets = [30, 0], sizes = [1, 128], strides = [1, 1]} : vector<31x128xf32> to vector<1x128xf32>
    %301 = vector.broadcast %300 : vector<1x128xf32> to vector<144x128xf32>
    %302 = arith.mulf %299, %301 : vector<144x128xf32>
    %303 = arith.addf %298, %302 : vector<144x128xf32>
    %304 = vector.extract_strided_slice %303 {offsets = [0, 0], sizes = [128, 128], strides = [1, 1]} : vector<144x128xf32> to vector<128x128xf32>
    %c0_58 = arith.constant 0 : index
    %c0_59 = arith.constant 0 : index
    %305 = vector.load %arg10[%c0_58, %c0_59] : memref<1x128xf32, #tpu.memory_space<vmem>>, vector<1x128xf32>
    %306 = vector.broadcast %305 : vector<1x128xf32> to vector<128x128xf32>
    %307 = arith.addf %304, %306 : vector<128x128xf32>
    %cst_60 = arith.constant dense<0.000000e+00> : vector<128xf32>
    %308 = vector.multi_reduction <add>, %307, %cst_60 [1] : vector<128x128xf32> to vector<128xf32>
    %309 = vector.shape_cast %308 : vector<128xf32> to vector<128x1xf32>
    %cst_61 = arith.constant 1.280000e+02 : f32
    %310 = vector.broadcast %cst_61 : f32 to vector<128x1xf32>
    %311 = arith.divf %309, %310 : vector<128x1xf32>
    %312 = vector.broadcast %311 : vector<128x1xf32> to vector<128x128xf32>
    %313 = arith.subf %307, %312 : vector<128x128xf32>
    %314 = arith.mulf %313, %313 : vector<128x128xf32>
    %cst_62 = arith.constant dense<0.000000e+00> : vector<128xf32>
    %315 = vector.multi_reduction <add>, %314, %cst_62 [1] : vector<128x128xf32> to vector<128xf32>
    %316 = vector.shape_cast %315 : vector<128xf32> to vector<128x1xf32>
    %cst_63 = arith.constant 1.280000e+02 : f32
    %317 = vector.broadcast %cst_63 : f32 to vector<128x1xf32>
    %318 = arith.divf %316, %317 : vector<128x1xf32>
    %319 = vector.broadcast %311 : vector<128x1xf32> to vector<128x128xf32>
    %320 = arith.subf %307, %319 : vector<128x128xf32>
    %cst_64 = arith.constant 9.99999997E-7 : f32
    %321 = vector.broadcast %cst_64 : f32 to vector<128x1xf32>
    %322 = arith.addf %318, %321 : vector<128x1xf32>
    %323 = math.rsqrt %322 : vector<128x1xf32>
    %324 = vector.broadcast %323 : vector<128x1xf32> to vector<128x128xf32>
    %325 = arith.mulf %320, %324 : vector<128x128xf32>
    %326 = arith.truncf %325 : vector<128x128xf32> to vector<128x128xbf16>
    %cst_65 = arith.constant 0.000000e+00 : f32
    %327 = vector.broadcast %cst_65 : f32 to vector<128x128xf32>
    %c0_66 = arith.constant 0 : index
    %c0_67 = arith.constant 0 : index
    %328 = vector.load %arg14[%c0_66, %c0_67] : memref<1x128xf32, #tpu.memory_space<vmem>>, vector<1x128xf32>
    %329 = vector.broadcast %328 : vector<1x128xf32> to vector<128x128xf32>
    %330 = arith.addf %327, %329 : vector<128x128xf32>
    %c0_68 = arith.constant 0 : index
    %c0_69 = arith.constant 0 : index
    %c0_70 = arith.constant 0 : index
    %331 = vector.load %arg11[%c0_68, %c0_69, %c0_70] : memref<2x128x256xbf16, #tpu.memory_space<vmem>>, vector<1x128x256xbf16>
    %332 = vector.shape_cast %331 : vector<1x128x256xbf16> to vector<128x256xbf16>
    %cst_71 = arith.constant dense<0.000000e+00> : vector<128x256xf32>
    %333 = tpu.matmul %326, %332, %cst_71 {dimension_numbers = #tpu.dot_dimension_numbers<[1], [0], [0], [1], [0, 0, 1, 1], [], []>} : vector<128x128xbf16>, vector<128x256xbf16>, vector<128x256xf32> -> vector<128x256xf32>
    %c0_72 = arith.constant 0 : index
    %c0_73 = arith.constant 0 : index
    %c0_74 = arith.constant 0 : index
    %334 = vector.load %arg12[%c0_72, %c0_73, %c0_74] : memref<2x1x256xf32, #tpu.memory_space<vmem>>, vector<1x1x256xf32>
    %335 = vector.shape_cast %334 : vector<1x1x256xf32> to vector<1x256xf32>
    %336 = vector.broadcast %335 : vector<1x256xf32> to vector<128x256xf32>
    %337 = arith.addf %333, %336 : vector<128x256xf32>
    %cst_75 = arith.constant 0.000000e+00 : f32
    %338 = vector.broadcast %cst_75 : f32 to vector<128x256xf32>
    %339 = arith.maximumf %337, %338 : vector<128x256xf32>
    %340 = arith.mulf %339, %339 : vector<128x256xf32>
    %341 = arith.truncf %340 : vector<128x256xf32> to vector<128x256xbf16>
    %c0_76 = arith.constant 0 : index
    %c0_77 = arith.constant 0 : index
    %c0_78 = arith.constant 0 : index
    %342 = vector.load %arg13[%c0_76, %c0_77, %c0_78] : memref<2x256x128xbf16, #tpu.memory_space<vmem>>, vector<1x256x128xbf16>
    %343 = vector.shape_cast %342 : vector<1x256x128xbf16> to vector<256x128xbf16>
    %cst_79 = arith.constant dense<0.000000e+00> : vector<128x128xf32>
    %344 = tpu.matmul %341, %343, %cst_79 {dimension_numbers = #tpu.dot_dimension_numbers<[1], [0], [0], [1], [0, 0, 1, 1], [], []>} : vector<128x256xbf16>, vector<256x128xbf16>, vector<128x128xf32> -> vector<128x128xf32>
    %345 = arith.addf %330, %344 : vector<128x128xf32>
    %c1_80 = arith.constant 1 : index
    %c0_81 = arith.constant 0 : index
    %c0_82 = arith.constant 0 : index
    %346 = vector.load %arg11[%c1_80, %c0_81, %c0_82] : memref<2x128x256xbf16, #tpu.memory_space<vmem>>, vector<1x128x256xbf16>
    %347 = vector.shape_cast %346 : vector<1x128x256xbf16> to vector<128x256xbf16>
    %cst_83 = arith.constant dense<0.000000e+00> : vector<128x256xf32>
    %348 = tpu.matmul %326, %347, %cst_83 {dimension_numbers = #tpu.dot_dimension_numbers<[1], [0], [0], [1], [0, 0, 1, 1], [], []>} : vector<128x128xbf16>, vector<128x256xbf16>, vector<128x256xf32> -> vector<128x256xf32>
    %c1_84 = arith.constant 1 : index
    %c0_85 = arith.constant 0 : index
    %c0_86 = arith.constant 0 : index
    %349 = vector.load %arg12[%c1_84, %c0_85, %c0_86] : memref<2x1x256xf32, #tpu.memory_space<vmem>>, vector<1x1x256xf32>
    %350 = vector.shape_cast %349 : vector<1x1x256xf32> to vector<1x256xf32>
    %351 = vector.broadcast %350 : vector<1x256xf32> to vector<128x256xf32>
    %352 = arith.addf %348, %351 : vector<128x256xf32>
    %cst_87 = arith.constant 0.000000e+00 : f32
    %353 = vector.broadcast %cst_87 : f32 to vector<128x256xf32>
    %354 = arith.maximumf %352, %353 : vector<128x256xf32>
    %355 = arith.mulf %354, %354 : vector<128x256xf32>
    %356 = arith.truncf %355 : vector<128x256xf32> to vector<128x256xbf16>
    %c1_88 = arith.constant 1 : index
    %c0_89 = arith.constant 0 : index
    %c0_90 = arith.constant 0 : index
    %357 = vector.load %arg13[%c1_88, %c0_89, %c0_90] : memref<2x256x128xbf16, #tpu.memory_space<vmem>>, vector<1x256x128xbf16>
    %358 = vector.shape_cast %357 : vector<1x256x128xbf16> to vector<256x128xbf16>
    %cst_91 = arith.constant dense<0.000000e+00> : vector<128x128xf32>
    %359 = tpu.matmul %356, %358, %cst_91 {dimension_numbers = #tpu.dot_dimension_numbers<[1], [0], [0], [1], [0, 0, 1, 1], [], []>} : vector<128x256xbf16>, vector<256x128xbf16>, vector<128x128xf32> -> vector<128x128xf32>
    %360 = arith.addf %345, %359 : vector<128x128xf32>
    %361 = vector.broadcast %9 : vector<1x128xf32> to vector<128x128xf32>
    %362 = arith.mulf %361, %360 : vector<128x128xf32>
    %363 = arith.addf %121, %362 : vector<128x128xf32>
    %c0_92 = arith.constant 0 : index
    %c0_93 = arith.constant 0 : index
    %c0_94 = arith.constant 0 : index
    %364 = vector.load %arg15[%c0_92, %c0_93, %c0_94] : memref<1x128x128xf32, #tpu.memory_space<vmem>>, vector<1x128x128xf32>
    %365 = vector.shape_cast %364 : vector<1x128x128xf32> to vector<128x128xf32>
    %366 = vector.shape_cast %363 : vector<128x128xf32> to vector<1x128x128xf32>
    tpu.vector_store %arg15[%c0_92, %c0_93, %c0_94], %366 {strides = array<i32>} : memref<1x128x128xf32, #tpu.memory_space<vmem>>, vector<1x128x128xf32>,
    return
  }
  func.func @transform_0(%arg0: i32) -> (i32, i32, i32) {
    %c0_i32 = arith.constant 0 : i32
    %c0_i32_0 = arith.constant 0 : i32
    %c0_i32_1 = arith.constant 0 : i32
    return %arg0, %c0_i32, %c0_i32_0 : i32, i32, i32
  }
  func.func @transform_1(%arg0: i32) -> (i32, i32, i32) {
    %c0_i32 = arith.constant 0 : i32
    %c0_i32_0 = arith.constant 0 : i32
    %c0_i32_1 = arith.constant 0 : i32
    return %arg0, %c0_i32, %c0_i32_0 : i32, i32, i32
  }
  func.func @transform_2(%arg0: i32) -> (i32, i32) {
    %c0_i32 = arith.constant 0 : i32
    %c0_i32_0 = arith.constant 0 : i32
    %c0_i32_1 = arith.constant 0 : i32
    return %c0_i32, %c0_i32_0 : i32, i32
  }
  func.func @transform_3(%arg0: i32) -> (i32, i32) {
    %c0_i32 = arith.constant 0 : i32
    %c0_i32_0 = arith.constant 0 : i32
    %c0_i32_1 = arith.constant 0 : i32
    return %c0_i32, %c0_i32_0 : i32, i32
  }
  func.func @transform_4(%arg0: i32) -> (i32, i32) {
    %c0_i32 = arith.constant 0 : i32
    %c0_i32_0 = arith.constant 0 : i32
    %c0_i32_1 = arith.constant 0 : i32
    return %c0_i32, %c0_i32_0 : i32, i32
  }
  func.func @transform_5(%arg0: i32) -> (i32, i32) {
    %c0_i32 = arith.constant 0 : i32
    %c0_i32_0 = arith.constant 0 : i32
    %c0_i32_1 = arith.constant 0 : i32
    return %c0_i32, %c0_i32_0 : i32, i32
  }
  func.func @transform_6(%arg0: i32) -> (i32, i32, i32) {
    %c0_i32 = arith.constant 0 : i32
    %c0_i32_0 = arith.constant 0 : i32
    %c0_i32_1 = arith.constant 0 : i32
    %c0_i32_2 = arith.constant 0 : i32
    return %c0_i32, %c0_i32_0, %c0_i32_1 : i32, i32, i32
  }
  func.func @transform_7(%arg0: i32) -> (i32, i32) {
    %c0_i32 = arith.constant 0 : i32
    %c0_i32_0 = arith.constant 0 : i32
    %c0_i32_1 = arith.constant 0 : i32
    return %c0_i32, %c0_i32_0 : i32, i32
  }
  func.func @transform_8(%arg0: i32) -> (i32, i32) {
    %c0_i32 = arith.constant 0 : i32
    %c0_i32_0 = arith.constant 0 : i32
    %c0_i32_1 = arith.constant 0 : i32
    return %c0_i32, %c0_i32_0 : i32, i32
  }
  func.func @transform_9(%arg0: i32) -> (i32, i32) {
    %c0_i32 = arith.constant 0 : i32
    %c0_i32_0 = arith.constant 0 : i32
    %c0_i32_1 = arith.constant 0 : i32
    return %c0_i32, %c0_i32_0 : i32, i32
  }
  func.func @transform_10(%arg0: i32) -> (i32, i32, i32) {
    %c0_i32 = arith.constant 0 : i32
    %c0_i32_0 = arith.constant 0 : i32
    %c0_i32_1 = arith.constant 0 : i32
    %c0_i32_2 = arith.constant 0 : i32
    return %c0_i32, %c0_i32_0, %c0_i32_1 : i32, i32, i32
  }
  func.func @transform_11(%arg0: i32) -> (i32, i32, i32) {
    %c0_i32 = arith.constant 0 : i32
    %c0_i32_0 = arith.constant 0 : i32
    %c0_i32_1 = arith.constant 0 : i32
    %c0_i32_2 = arith.constant 0 : i32
    return %c0_i32, %c0_i32_0, %c0_i32_1 : i32, i32, i32
  }
  func.func @transform_12(%arg0: i32) -> (i32, i32, i32) {
    %c0_i32 = arith.constant 0 : i32
    %c0_i32_0 = arith.constant 0 : i32
    %c0_i32_1 = arith.constant 0 : i32
    %c0_i32_2 = arith.constant 0 : i32
    return %c0_i32, %c0_i32_0, %c0_i32_1 : i32, i32, i32
  }
  func.func @transform_13(%arg0: i32) -> (i32, i32) {
    %c0_i32 = arith.constant 0 : i32
    %c0_i32_0 = arith.constant 0 : i32
    %c0_i32_1 = arith.constant 0 : i32
    return %c0_i32, %c0_i32_0 : i32, i32
  }
  func.func @transform_14(%arg0: i32) -> (i32, i32, i32) {
    %c0_i32 = arith.constant 0 : i32
    %c0_i32_0 = arith.constant 0 : i32
    %c0_i32_1 = arith.constant 0 : i32
    return %arg0, %c0_i32, %c0_i32_0 : i32, i32, i32
  }
}

</mosaic_0001>

<bundles_post_ra>
// kernel: tpu_custom_call.1
= control target key start
LH: loop header
LB: loop body
LE: loop exit
PB: predicated region body
PF: predicated region fallthrough
CT: control target
= control target key end

     0   :  { %s12990_s0 = inlined_call_operand.hbm [shape: f32[2,128,128], index: 0, kind: input, shape index: {}]   ;;  %s12991_s1 = inlined_call_operand.vmem [shape: f32[2,6,128], index: 1, kind: input, shape index: {}]   ;;  %s12992_s2 = inlined_call_operand.hbm [shape: bf16[128,384], index: 2, kind: input, shape index: {}]   ;;  %s12993_s3 = inlined_call_operand.vmem [shape: f32[1,384], index: 3, kind: input, shape index: {}]   ;;  %s12994_s4 = inlined_call_operand.vmem [shape: f32[128,8], index: 4, kind: input, shape index: {}]   ;;  %s12995_s5 = inlined_call_operand.vmem [shape: f32[8,128], index: 5, kind: input, shape index: {}]   ;;  %s12996_s6 = inlined_call_operand.vmem [shape: bf16[2,64,128], index: 6, kind: input, shape index: {}]   ;;  %s12997_s7 = inlined_call_operand.vmem [shape: f32[1,128], index: 7, kind: input, shape index: {}]   ;;  %s12998_s8 = inlined_call_operand.vmem [shape: f32[31,128], index: 8, kind: input, shape index: {}]   ;;  %s12999_s9 = inlined_call_operand.vmem [shape: f32[1,128], index: 9, kind: input, shape index: {}]   ;;  %s13000_s10 = inlined_call_operand.hbm [shape: bf16[2,128,256], index: 10, kind: input, shape index: {}]   ;;  %s13001_s11 = inlined_call_operand.vmem [shape: f32[2,1,256], index: 11, kind: input, shape index: {}]   ;;  %s13002_s12 = inlined_call_operand.hbm [shape: bf16[2,256,128], index: 12, kind: input, shape index: {}]   ;;  %s13003_s13 = inlined_call_operand.vmem [shape: f32[1,128], index: 13, kind: input, shape index: {}]   ;;  %s13004_s14 = inlined_call_operand.hbm [shape: f32[2,128,128], index: 14, kind: output, shape index: {}]  }
   0x1   :  { %13230 = sst [smem:[#allocation78_spill]] %s12992_s2 }
   0x2   :  { %13231 = sst [smem:[#allocation79_spill]] %s12998_s8 }
   0x3   :  { %13232 = sst [smem:[#allocation80_spill]] %s12999_s9 }
   0x4   :  { %13233 = sst [smem:[#allocation81_spill]] %s13001_s11 }
   0x5   :  { %13234 = sst [smem:[#allocation82_spill]] %s13003_s13 }
   0x6   :  { %13235 = sst [smem:[#allocation83_spill]] %s13004_s14 }
   0x7   :  { %19 = vsyncpa [#allocation3], 0 }
   0x8   :  { %21 = vsyncpa [#allocation3 + $0x1], 0 }
   0x9   :  { %22 = vsyncpa [#allocation6], 0 }
   0xa   :  { %23 = vsyncpa [#allocation9], 0 }
   0xb   :  { %24 = vsyncpa [#allocation4], 0 }
   0xc   :  { %26 = vsyncpa [#allocation4 + $0x1], 0  ;;  %s9220_s29 = smov 0   ;;  %s9222_s30 = smov 0  }
   0xd   :  { %s9224_s15 = smov 0   ;;  %s9226_s16 = smov 0  }
   0xe LB: > { %13236 = sst [smem:[#allocation15_spill]] %s9116_s29  ;;  %s9241_s17 = sadd.s32 4294967295, %s9128_s16   ;;  %s9128_s16 = sphi %s9226_s16, %s13606_s16   ;;  %s9124_s15 = sphi %s9224_s15, %s13605_s15   ;;  %s9120_s30 = sphi %s9222_s30, %s13604_s30   ;;  %s9116_s29 = sphi %s9220_s29, %s13603_s29  }
   0xf   : > { %s7042_s18 = sadd.s32 4294967294, %s9128_s16   ;;  %p52_p0 = scmp.ne.s32.totalorder %s9120_s30, %s9116_s29 }
  0x10   : > { %p13008_p1 = scmp.eq.s32.totalorder %s9241_s17, 0  ;;  %p360_p3 = scmp.eq.s32.totalorder %s7042_s18, 1 }
  0x11   : > { %p7043_p5 = scmp.ge.s32.totalorder %s9128_s16, 1  ;;  %p367_p7 = scmp.lt.s32.totalorder %s9128_s16, 3 }
  0x12   : > { %p9250_p4 = por %p13008_p1, %p52_p0  ;;  %p9255_p6 = por %p360_p3, %p52_p0 }
  0x13   : > { %p9260_p8 = pnand %p7043_p5, %p367_p7  ;;  %s9130_s22 = smov [#allocation5]  }
  0x14   : > { %s13237_s19 = scalar_select %p9250_p4, 1, 0 }
  0x15   : > { %s13238_s20 = scalar_select %p9255_p6, 1, 0 }
  0x16   : > { %s13240_s21 = scalar_select %p9260_p8, 1, 0 }
  0x17   : > { %13239 = sst [smem:[#allocation16_spill]] %s13238_s20  ;;  %s379_s23 = sshll.u32 %s9130_s22, 4  ;;  %s9264_s23 = int_to_ptr.vmem [resolvable:$true] %s379_s23 }
  0x18   : > { %p8441_p9 = pneg %p9260_p8  ;;  %s9131_s25 = smov [#allocation7]  }
  0x19   : > { %s413_s26 = sshll.u32 %s9131_s25, 4  ;;  %s13242_s2 = sld [smem:[#allocation78_spill]]  ;;  %s9275_s26 = int_to_ptr.vmem [resolvable:$true] %s413_s26 }
  0x1a   : > { %p9271_p11 = pnand %p8441_p9, %p13008_p1 }
  0x1c   : > { %p9285_p13 = pneg %p9271_p11 }
  0x1f   : > { %s8940_s18 = scalar_lea.hbm %s13242_s2, 3072 }
  0x20   : > { %p8941_p12 = scmp.ne.s32.totalorder %s13242_s2, %s8940_s18  ;;  %p8947_p5 = scmp.lt.u32.totalorder %s8940_s18, %s13242_s2 }
  0x22   : > { %p8943_p0 = pnand %p9285_p13, %p8941_p12 }
  0x24   : > { %p8944_p3 = pneg %p8943_p0 }
  0x26   : > { %p8949_p7 = pnand %p8947_p5, %p8944_p3 }
  0x28   : > { %8952 = shalt.err (!%p8949_p7)
}
  0x29   : > { %s8953_s20 = scalar_lea.vmem %s9264_s23, 3072  ;;  %p8961_p2 = scmp.lt.s32.totalorder %s9264_s23, %s9264_s23 }
  0x2a   : > { %p8954_p9 = scmp.ne.s32.totalorder %s9264_s23, %s8953_s20  ;;  %p8962_p6 = scmp.lt.s32.totalorder %s8953_s20, %s8953_s20 }
  0x2c   : > { %p8956_p10 = pnand %p8954_p9, %p9285_p13  ;;  %p8963_p12 = por %p8962_p6, %p8961_p2 }
  0x2e   : > { %p8957_p1 = pneg %p8956_p10 }
  0x30   : > { %p8964_p0 = pnand %p8963_p12, %p8957_p1 }
  0x32   : > { %8967 = shalt.err (!%p8964_p0)
}
  0x33   : > { %s9132_s27 = smov 192   ;;  %s9133_s14 = smov 12  }
  0x34   : > { %8444 = dma.hbm_to_vmem [thread:$0]  (!%p9271_p11), %s13242_s2, 3072, %s9264_s23, [#allocation6], %s9132_s27, %s9132_s27, %s9133_s14  }
  0x35   : > { %s8968_s13 = scalar_lea.hbm %s13000_s10, 4096 }
  0x36   : > { %p8969_p2 = scmp.ne.s32.totalorder %s13000_s10, %s8968_s13  ;;  %p8975_p10 = scmp.lt.u32.totalorder %s8968_s13, %s13000_s10 }
  0x38   : > { %p8971_p1 = pnand %p8969_p2, %p9285_p13 }
  0x3a   : > { %p8972_p6 = pneg %p8971_p1 }
  0x3c   : > { %p8977_p3 = pnand %p8975_p10, %p8972_p6 }
  0x3e   : > { %8980 = shalt.err (!%p8977_p3)
}
  0x3f   : > { %s8981_s23 = scalar_lea.vmem %s9275_s26, 4096  ;;  %p8989_p12 = scmp.lt.s32.totalorder %s9275_s26, %s9275_s26 }
  0x40   : > { %p8982_p5 = scmp.ne.s32.totalorder %s9275_s26, %s8981_s23  ;;  %p8990_p0 = scmp.lt.s32.totalorder %s8981_s23, %s8981_s23 }
  0x42   : > { %p8984_p7 = pnand %p8982_p5, %p9285_p13  ;;  %p8991_p2 = por %p8990_p0, %p8989_p12 }
  0x44   : > { %p8985_p9 = pneg %p8984_p7 }
  0x46   : > { %p8992_p1 = pnand %p8991_p2, %p8985_p9 }
  0x48   : > { %8995 = shalt.err (!%p8992_p1)
}
  0x49   : > { %s9134_s9 = smov 128   ;;  %s9135_s8 = smov 8  }
  0x4a   : > { %8447 = dma.hbm_to_vmem [thread:$0]  (!%p9271_p11), %s13000_s10, 4096, %s9275_s26, [#allocation6], %s9134_s9, %s9134_s9, %s9135_s8  }
  0x4b   : > { %s9136_s27 = smov [#allocation8]   ;;  %s8996_s22 = scalar_lea.hbm %s13002_s12, 4096 }
  0x4c   : > { %s429_s14 = sshll.u32 %s9136_s27, 4  ;;  %p8997_p6 = scmp.ne.s32.totalorder %s13002_s12, %s8996_s22  ;;  %s430_s14 = int_to_ptr.vmem [resolvable:$true] %s429_s14 }
  0x4d   : > { %p9003_p5 = scmp.lt.u32.totalorder %s8996_s22, %s13002_s12 }
  0x4e   : > { %p8999_p10 = pnand %p8997_p6, %p9285_p13 }
  0x50   : > { %p9000_p3 = pneg %p8999_p10 }
  0x52   : > { %p9005_p7 = pnand %p9003_p5, %p9000_p3 }
  0x54   : > { %9008 = shalt.err (!%p9005_p7)
}
  0x55   : > { %s9009_s26 = scalar_lea.vmem %s430_s14, 4096  ;;  %p9017_p2 = scmp.lt.s32.totalorder %s430_s14, %s430_s14 }
  0x56   : > { %p9010_p9 = scmp.ne.s32.totalorder %s430_s14, %s9009_s26  ;;  %p9018_p1 = scmp.lt.s32.totalorder %s9009_s26, %s9009_s26 }
  0x58   : > { %p9012_p12 = pnand %p9010_p9, %p9285_p13  ;;  %p9019_p4 = por %p9018_p1, %p9017_p2 }
  0x5a   : > { %p9013_p0 = pneg %p9012_p12 }
  0x5c   : > { %p9020_p8 = pnand %p9019_p4, %p9013_p0 }
  0x5e   : > { %9023 = shalt.err (!%p9020_p8)
}
  0x5f   : > { %s9137_s11 = smov 64   ;;  %s9138_s2 = smov 4  }
  0x60   : > { %8450 = dma.hbm_to_vmem [thread:$0]  (!%p9271_p11), %s13002_s12, 4096, %s430_s14, [#allocation9], %s9137_s11, %s9137_s11, %s9138_s2  }
  0x61   : > { %s9351_s27 = sadd.s32 1, %s9128_s16   ;;  %s39_s18 = sadd.s32 1, %s9124_s15 }
  0x62   : > { %s36_s28 = ssub.s32 %s9128_s16, %s9351_s27  ;;  %p46_p8 = scmp.ne.s32.totalorder %s9124_s15, %s9120_s30 }
  0x63   : > { %p37_p4 = scmp.eq.s32.totalorder %s36_s28, 0  ;;  %p47_p13 = scmp.eq.s32.totalorder %s9128_s16, 0 }
  0x64   : > { %p8462_p6 = scmp.lt.s32.totalorder %s9128_s16, 2  ;;  %p13244_p3 = scmp.eq.s32.totalorder %s9241_s17, 1 }
  0x65   : > { %s9361_s22 = scalar_select %p37_p4, %s9124_s15, %s39_s18  }
  0x66   : > { %p48_p10 = por %p47_p13, %p46_p8  ;;  %p9365_p5 = por %p13244_p3, %p46_p8 }
  0x67   : > { %s446_s24 = sand.u32 1, %s9124_s15   ;;  %s7267_s20 = sshll.u32 %s9128_s16, 11 }
  0x68   : > { %s7048_s14 = sshll.u32 %s446_s24, 7  ;;  %s9374_s11 = scalar_lea.hbm %s12990_s0, %s7267_s20 }
  0x69   : > { %s450_s2 = scalar_lea.vmem [#allocation2], %s7048_s14  ;;  %p9376_p11 = pnand %p8462_p6, %p48_p10 }
  0x6a   : > { %s457_s29 = sshll.u32 %s450_s2, 4  ;;  %s9382_s28 = scalar_lea.sflag [#allocation3], %s446_s24  ;;  %s9380_s29 = int_to_ptr.vmem [resolvable:$true] %s457_s29 }
  0x6b   : > { %s9024_s18 = scalar_lea.hbm %s9374_s11, 2048  ;;  %p9026_p9 = pneg %p9376_p11 }
  0x6c   : > { %p9025_p7 = scmp.ne.s32.totalorder %s9374_s11, %s9024_s18  ;;  %s9029_s23 = scalar_lea.hbm %s12990_s0, 4096 }
  0x6d   : > { %p9030_p2 = scmp.lt.u32.totalorder %s9374_s11, %s12990_s0  ;;  %p9031_p1 = scmp.lt.u32.totalorder %s9029_s23, %s9024_s18 }
  0x6e   : > { %p9027_p12 = pnand %p9026_p9, %p9025_p7  ;;  %p9033_p8 = scmp.lt.u32.totalorder %s9024_s18, %s9374_s11 }
  0x6f   : > { %p9032_p4 = por %p9031_p1, %p9030_p2 }
  0x70   : > { %p9028_p0 = pneg %p9027_p12 }
  0x71   : > { %p9034_p13 = por %p9033_p8, %p9032_p4 }
  0x73   : > { %p9035_p6 = pnand %p9034_p13, %p9028_p0 }
  0x75   : > { %9038 = shalt.err (!%p9035_p6)
}
  0x76   : > { %s9039_s24 = scalar_lea.vmem %s9380_s29, 2048  ;;  %s9139_s20 = smov [#allocation2]  }
  0x77   : > { %p9040_p10 = scmp.ne.s32.totalorder %s9380_s29, %s9039_s24  ;;  %s9044_s14 = sshll.u32 %s9139_s20, 4  ;;  %s9045_s14 = int_to_ptr.vmem [resolvable:$false] %s9044_s14 }
  0x78   : > { %s9046_s26 = scalar_lea.vmem %s9045_s14, 4096  ;;  %p9047_p12 = scmp.lt.s32.totalorder %s9380_s29, %s9045_s14 }
  0x79   : > { %p9042_p3 = pnand %p9040_p10, %p9026_p9  ;;  %p9048_p2 = scmp.lt.s32.totalorder %s9046_s26, %s9039_s24 }
  0x7b   : > { %p9043_p7 = pneg %p9042_p3  ;;  %p9049_p1 = por %p9048_p2, %p9047_p12 }
  0x7d   : > { %p9050_p4 = pnand %p9049_p1, %p9043_p7 }
  0x7f   : > { %9053 = shalt.err (!%p9050_p4)
}
  0x80   : > { %8454 = dma.hbm_to_vmem [thread:$0]  (!%p9376_p11), %s9374_s11, 2048, %s9380_s29, %s9382_s28, %s9134_s9, %s9134_s9, %s9135_s8  }
  0x81   : > { %p13247_p9 = scmp.ne.s32.totalorder %s13240_s21, 0 }
  0x83   : > { %476 = sbr.rel (%p13247_p9) target bundleno = 4900 (0x1324), region = 76 }
  0x8a   : > { %s9416_s18 = sand.u32 1, %s9120_s30   ;;  %p13248_p0 = scmp.ne.s32.totalorder %s13237_s19, 0 }
  0x8b   : > { %s7052_s23 = sshll.u32 %s9416_s18, 7  ;;  %s479_s2 = scalar_lea.sflag [#allocation3], %s9416_s18 }
  0x8c   : > { %s9422_s13 = scalar_lea.vmem [#allocation2], %s7052_s23 }
  0x8d   : > { %9099 = dma.done.wait (%p13248_p0), %s479_s2, 2048  }
  0x8e   : > { %9101 = vsyncadd (%p13248_p0), %s479_s2, 4294965248  ;;  %p13249_p11 = scmp.eq.s32.totalorder %s9241_s17, 0 }
  0x90   : > { %9103 = dma.done.wait (%p13249_p11), [#allocation6], 7168   ;;  %p13250_p8 = pmov %p13249_p11 }
  0x92   : > { %9105 = vsyncadd (%p13250_p8), [#allocation6], 4294960128  ;;  %p13251_p13 = pmov %p13250_p8 }
  0x93   : > { %p13252_p6 = pmov %p13250_p8 }
  0x94   : > { %9107 = dma.done.wait (%p13251_p13), [#allocation9], 4096  }
  0x95   : > { %9109 = vsyncadd (%p13252_p6), [#allocation9], 4294963200  ;;  %v548_v0 = vld [vmem:[%s9422_s13] sm:$0xff]  ;;  %v550_v1 = vld [vmem:[%s9422_s13 + $0x10] sm:$0xff]  ;;  %p543_p10 = scmp.lt.s32.totalorder %s9241_s17, 1  ;;  %vm1340_vm0 = vcmask 64512  }
  0x96   : > { %565 = vadd.xlane.f32.xlu0 %v548_v0  ;;  %569 = vadd.xlane.f32.xlu1 %v550_v1  ;;  %v549_v2 = vld [vmem:[%s9422_s13 + $0x8] sm:$0xff]  ;;  %v551_v3 = vld [vmem:[%s9422_s13 + $0x18] sm:$0xff]  ;;  %v552_v4 = vld [vmem:[%s9422_s13 + $0x20] sm:$0xff]  ;;  %s9141_s24 = smov 64   ;;  %vm2724_vm1 = vcmask 523264   ;;  %s13577_s19 = sld [smem:[#allocation81_spill]] }
  0x97   : > { %v553_v5 = vld [vmem:[%s9422_s13 + $0x28] sm:$0xff]  ;;  %v9443_v6 = vld [vmem:[%s9422_s13 + $0x30] sm:$0xff]  ;;  %v9446_v7 = vld [vmem:[%s9422_s13 + $0x38] sm:$0xff]  ;;  %s544_s11 = scalar_select %p543_p10, %s9241_s17, 1 }
  0x98   : > { %v9449_v8 = vld [vmem:[%s9422_s13 + $0x40] sm:$0xff]  ;;  %v9452_v9 = vld [vmem:[%s9422_s13 + $0x48] sm:$0xff]  ;;  %v9457_v10 = vld [vmem:[%s9422_s13 + $0x50] sm:$0xff]  ;;  %s13597_s2 = sld [smem:[#allocation83_spill]]  ;;  %s9142_s8 = smov [#allocation10]  }
  0x99   : > { %v9460_v11 = vld [vmem:[%s9422_s13 + $0x58] sm:$0xff]  ;;  %v9465_v12 = vld [vmem:[%s9422_s13 + $0x60] sm:$0xff]  ;;  %v9468_v13 = vld [vmem:[%s9422_s13 + $0x68] sm:$0xff]  ;;  %s7057_s29 = sshll.u32 %s544_s11, 3  ;;  %s9058_s11 = sshll.u32 %s9142_s8, 4  ;;  %s9059_s11 = int_to_ptr.vmem [resolvable:$false] %s9058_s11 }
  0x9a   : > { %567 = vadd.xlane.f32.xlu0 %v549_v2  ;;  %571 = vadd.xlane.f32.xlu1 %v551_v3  ;;  %v9473_v14 = vld [vmem:[%s9422_s13 + $0x70] sm:$0xff]  ;;  %v9476_v15 = vld [vmem:[%s9422_s13 + $0x78] sm:$0xff]  ;;  %v8514_v17 = vld [vmem:[#allocation5] ss:$12 sps:$4 sm:$0xff]   ;;  %s9571_s20 = scalar_lea.vmem %s12991_s1, %s7057_s29  ;;  %s13280_s29 = sld [smem:[#allocation79_spill]] }
  0x9b   : > { %v8512_v16 = vld [vmem:[#allocation5 + $0x4] ss:$12 sps:$4 sm:$0xff]   ;;  %v8515_v18 = vld [vmem:[#allocation5 + $0x1c] ss:$12 sps:$4 sm:$0xff]  }
  0x9c   : > { %v8517_v19 = vld [vmem:[#allocation5 + $0x8] ss:$12 sps:$4 sm:$0xff]   ;;  %968 = vmatprep.subr.bf16.mxu0 %v8512_v16  ;;  %v8518_v58 = vld [vmem:[#allocation5 + $0x18] ss:$12 sps:$4 sm:$0xff]  }
  0x9d   : > { %969 = vmatpush1.bf16.msra.mxu0 %v8514_v17  ;;  %7697 = vmatprep.subr.bf16.mxu1 %v8517_v19 }
  0x9e   : > { %573 = vadd.xlane.f32.xlu0 %v552_v4  ;;  %575 = vadd.xlane.f32.xlu1 %v553_v5 }
  0x9f   : > { %970 = vmatprep.subr.bf16.mxu0 %v8515_v18  ;;  %7698 = vmatpush3.bf16.msra.mxu1 %v8517_v19  ;;  %v8523_v18 = vld [vmem:[#allocation5 + $0x4c] ss:$12 sps:$4 sm:$0xff]  }
  0xa0   : > { %v8525_v19 = vld [vmem:[#allocation5 + $0x38] ss:$12 sps:$4 sm:$0xff]   ;;  %s13281_s28 = smov %s13280_s29 }
  0xa1   : > { %971 = vmatpush1.bf16.msra.mxu0 %v8518_v58 }
  0xa2   : > { %577 = vadd.xlane.f32.xlu0 %v9443_v6  ;;  %579 = vadd.xlane.f32.xlu1 %v9446_v7 }
  0xa6   : > { %581 = vadd.xlane.f32.xlu0 %v9449_v8  ;;  %583 = vadd.xlane.f32.xlu1 %v9452_v9 }
  0xaa   : > { %585 = vadd.xlane.f32.xlu0 %v9457_v10  ;;  %587 = vadd.xlane.f32.xlu1 %v9460_v11 }
  0xae   : > { %589 = vadd.xlane.f32.xlu0 %v9465_v12  ;;  %591 = vadd.xlane.f32.xlu1 %v9468_v13 }
  0xb2   : > { %593 = vadd.xlane.f32.xlu0 %v9473_v14  ;;  %595 = vadd.xlane.f32.xlu1 %v9476_v15 }
 0x123   : > { %v566_v20 = vpop.xlane.xlu0 %565  ;;  %v570_v21 = vpop.xlane.xlu1 %569 }
 0x124   : > { %v598_v22 = vmul.f32 0.0078125, %v566_v20  ;;  %v600_v23 = vmul.f32 0.0078125, %v570_v21 }
 0x126   : > { %v9482_v24 = vsub.f32 %v548_v0, %v598_v22  ;;  %v9484_v25 = vsub.f32 %v550_v1, %v600_v23  ;;  %v8519_v0 = vld [vmem:[#allocation5 + $0x34] ss:$12 sps:$4 sm:$0xff]  }
 0x127   : > { %v568_v26 = vpop.xlane.xlu0 %567  ;;  %v572_v27 = vpop.xlane.xlu1 %571  ;;  %v8521_v1 = vld [vmem:[#allocation5 + $0x20] ss:$12 sps:$4 sm:$0xff]   ;;  %972 = vmatprep.subr.bf16.mxu0 %v8519_v0  ;;  %v8526_v22 = vld [vmem:[#allocation5 + $0x48] ss:$12 sps:$4 sm:$0xff]  }
 0x128   : > { %v599_v28 = vmul.f32 0.0078125, %v568_v26  ;;  %v630_v29 = vmul.f32 %v9482_v24, %v9482_v24  ;;  %v601_v30 = vmul.f32 0.0078125, %v572_v27  ;;  %v632_v31 = vmul.f32 %v9484_v25, %v9484_v25  ;;  %7699 = vmatprep.subr.bf16.mxu1 %v8521_v1 }
 0x129   : > { %7700 = vmatpush3.bf16.msra.mxu1 %v8521_v1 }
 0x12a   : > { %646 = vadd.xlane.f32.xlu0 %v630_v29  ;;  %v9490_v32 = vsub.f32 %v549_v2, %v599_v28  ;;  %v9492_v33 = vsub.f32 %v551_v3, %v601_v30  ;;  %7701 = vmatprep.subr.bf16.mxu1 %v8525_v19  ;;  %v8527_v29 = vld [vmem:[#allocation5 + $0x64] ss:$12 sps:$4 sm:$0xff]  }
 0x12b   : > { %v574_v34 = vpop.xlane.xlu0 %573  ;;  %v576_v35 = vpop.xlane.xlu1 %575  ;;  %v8529_v30 = vld [vmem:[#allocation5 + $0x50] ss:$12 sps:$4 sm:$0xff]  }
 0x12c   : > { %v602_v36 = vmul.f32 0.0078125, %v574_v34  ;;  %v631_v37 = vmul.f32 %v9490_v32, %v9490_v32  ;;  %v603_v38 = vmul.f32 0.0078125, %v576_v35  ;;  %v633_v39 = vmul.f32 %v9492_v33, %v9492_v33 }
 0x12d   : > { %7702 = vmatpush3.bf16.msra.mxu1 %v8525_v19 }
 0x12e   : > { %650 = vadd.xlane.f32.xlu0 %v632_v31  ;;  %648 = vadd.xlane.f32.xlu1 %v631_v37  ;;  %v9498_v40 = vsub.f32 %v552_v4, %v602_v36  ;;  %v9500_v41 = vsub.f32 %v553_v5, %v603_v38  ;;  %v8530_v31 = vld [vmem:[#allocation5 + $0x60] ss:$12 sps:$4 sm:$0xff]   ;;  %v8533_v36 = vld [vmem:[#allocation5 + $0x68] ss:$12 sps:$4 sm:$0xff]   ;;  %v8534_v37 = vld [vmem:[#allocation5 + $0x78] ss:$12 sps:$4 sm:$0xff]  }
 0x12f   : > { %v578_v42 = vpop.xlane.xlu0 %577  ;;  %v580_v43 = vpop.xlane.xlu1 %579  ;;  %7703 = vmatprep.subr.bf16.mxu1 %v8529_v30  ;;  %v8537_v38 = vld [vmem:[#allocation5 + $0x80] ss:$12 sps:$4 sm:$0xff]  }
 0x130   : > { %v604_v44 = vmul.f32 0.0078125, %v578_v42  ;;  %v634_v45 = vmul.f32 %v9498_v40, %v9498_v40  ;;  %v605_v46 = vmul.f32 0.0078125, %v580_v43  ;;  %v635_v47 = vmul.f32 %v9500_v41, %v9500_v41  ;;  %v8539_v42 = vld [vmem:[#allocation5 + $0xac] ss:$12 sps:$4 sm:$0xff]  }
 0x131   : > { %7704 = vmatpush3.bf16.msra.mxu1 %v8529_v30  ;;  %v8541_v43 = vld [vmem:[#allocation5 + $0x98] ss:$12 sps:$4 sm:$0xff]  }
 0x132   : > { %652 = vadd.xlane.f32.xlu1 %v633_v39  ;;  %654 = vadd.xlane.f32.xlu0 %v634_v45  ;;  %v9507_v48 = vsub.f32 %v9443_v6, %v604_v44  ;;  %v9510_v49 = vsub.f32 %v9446_v7, %v605_v46  ;;  %v8522_v7 = vld [vmem:[#allocation5 + $0x30] ss:$12 sps:$4 sm:$0xff]   ;;  %v8542_v44 = vld [vmem:[#allocation5 + $0xa8] ss:$12 sps:$4 sm:$0xff]   ;;  %v13014_v46 = vmov 0  }
 0x133   : > { %v582_v50 = vpop.xlane.xlu0 %581  ;;  %v584_v51 = vpop.xlane.xlu1 %583  ;;  %973 = vmatpush1.bf16.msra.mxu0 %v8522_v7  ;;  %7705 = vmatprep.subr.bf16.mxu1 %v8533_v36  ;;  %v8538_v39 = vld [vmem:[#allocation5 + $0x90] ss:$12 sps:$4 sm:$0xff]   ;;  %v564_v7 = vld [vmem:[%s9571_s20] sm:$0x3f] }
 0x134   : > { %v606_v52 = vmul.f32 0.0078125, %v582_v50  ;;  %v636_v53 = vmul.f32 %v9507_v48, %v9507_v48  ;;  %v607_v54 = vmul.f32 0.0078125, %v584_v51  ;;  %v637_v55 = vmul.f32 %v9510_v49, %v9510_v49  ;;  %974 = vmatprep.subr.bf16.mxu0 %v8523_v18  ;;  %v8543_v45 = vld [vmem:[#allocation5 + $0xb0] ss:$12 sps:$4 sm:$0xff]   ;;  %1000 = vmatprep.mubr.bf16.mxu0 %v13014_v46  ;;  %v1179_v50 = vld [vmem:[%s12994_s4 + $0x8] sm:$0xff] }
 0x135   : > { %7706 = vmatpush3.bf16.msra.mxu1 %v8533_v36  ;;  %v9576_v18 = vadd.f32 1.0, %v564_v7 }
 0x136   : > { %656 = vadd.xlane.f32.xlu1 %v635_v47  ;;  %658 = vadd.xlane.f32.xlu0 %v636_v53  ;;  %v9517_v56 = vsub.f32 %v9449_v8, %v606_v52  ;;  %v9520_v57 = vsub.f32 %v9452_v9, %v607_v54  ;;  %v1178_v47 = vld [vmem:[%s12994_s4] sm:$0xff] }
 0x137   : > { %v586_v59 = vpop.xlane.xlu0 %585  ;;  %v588_v60 = vpop.xlane.xlu1 %587  ;;  %975 = vmatpush1.bf16.msra.mxu0 %v8526_v22  ;;  %7707 = vmatprep.subr.bf16.mxu1 %v8537_v38  ;;  %v9563_v51 = vpack.c.bf16 %v1179_v50, %v1178_v47 }
 0x138   : > { %v608_v61 = vmul.f32 0.0078125, %v586_v59  ;;  %v638_v62 = vmul.f32 %v9517_v56, %v9517_v56  ;;  %v609_v63 = vmul.f32 0.0078125, %v588_v60  ;;  %v639_v2 = vmul.f32 %v9520_v57, %v9520_v57  ;;  %976 = vmatprep.subr.bf16.mxu0 %v8527_v29 }
 0x139   : > { %7708 = vmatpush3.bf16.msra.mxu1 %v8537_v38  ;;  %v743_v59 = vlaneseq }
 0x13a   : > { %660 = vadd.xlane.f32.xlu1 %v637_v55  ;;  %662 = vadd.xlane.f32.xlu0 %v638_v62  ;;  %v9527_v3 = vsub.f32 %v9457_v10, %v608_v61  ;;  %v9530_v4 = vsub.f32 %v9460_v11, %v609_v63 }
 0x13b   : > { %v590_v5 = vpop.xlane.xlu0 %589  ;;  %v592_v6 = vpop.xlane.xlu1 %591  ;;  %977 = vmatpush1.bf16.msra.mxu0 %v8530_v31  ;;  %7709 = vmatprep.subr.bf16.mxu1 %v8541_v43 }
 0x13c   : > { %v610_v8 = vmul.f32 0.0078125, %v590_v5  ;;  %v640_v9 = vmul.f32 %v9527_v3, %v9527_v3  ;;  %v611_v16 = vmul.f32 0.0078125, %v592_v6  ;;  %v641_v10 = vmul.f32 %v9530_v4, %v9530_v4 }
 0x13d   : > { %7710 = vmatpush3.bf16.msra.mxu1 %v8541_v43 }
 0x13e   : > { %664 = vadd.xlane.f32.xlu1 %v639_v2  ;;  %666 = vadd.xlane.f32.xlu0 %v640_v9  ;;  %v9537_v11 = vsub.f32 %v9465_v12, %v610_v8  ;;  %v9540_v17 = vsub.f32 %v9468_v13, %v611_v16  ;;  %v9573_v2 = vshrl.u32 %v743_v59, 7 }
 0x13f   : > { %v594_v20 = vpop.xlane.xlu0 %593  ;;  %v596_v21 = vpop.xlane.xlu1 %595  ;;  %7711 = vmatprep.subr.bf16.mxu1 %v8543_v45 }
 0x140   : > { %v612_v23 = vmul.f32 0.0078125, %v594_v20  ;;  %v642_v26 = vmul.f32 %v9537_v11, %v9537_v11  ;;  %v613_v27 = vmul.f32 0.0078125, %v596_v21  ;;  %v643_v12 = vmul.f32 %v9540_v17, %v9540_v17 }
 0x141   : > { %7712 = vmatpush3.bf16.msra.mxu1 %v8543_v45  ;;  %v9579_v19 = vsub.s32 1, %v9573_v2  ;;  %v9587_v31 = vsub.s32 0, %v9573_v2  ;;  %vm4221_vm2 = vcmp.lt.s32.totalorder %v9573_v2, 7  ;;  %vm4288_vm3 = vcmp.lt.s32.totalorder %v9573_v2, 6 }
 0x142   : > { %668 = vadd.xlane.f32.xlu1 %v641_v10  ;;  %670 = vadd.xlane.f32.xlu0 %v642_v26  ;;  %v9547_v13 = vsub.f32 %v9473_v14, %v612_v23  ;;  %v9550_v28 = vsub.f32 %v9476_v15, %v613_v27  ;;  %v8531_v14 = vld [vmem:[#allocation5 + $0x7c] ss:$12 sps:$4 sm:$0xff]   ;;  %v8535_v15 = vld [vmem:[#allocation5 + $0x94] ss:$12 sps:$4 sm:$0xff]   ;;  %vm4355_vm4 = vcmp.lt.s32.totalorder %v9573_v2, 5  ;;  %vm4422_vm5 = vcmp.lt.s32.totalorder %v9573_v2, 4 }
 0x143   : > { %978 = vmatprep.subr.bf16.mxu0 %v8531_v14  ;;  %8234 = vmatprep.subr.bf16.mxu1 %v9563_v51  ;;  %13253 = vst [vmem:[#allocation17_spill] sm:$0xff] %v9579_v19  ;;  %v9584_v30 = vrot.slane %v9576_v18, %v9579_v19  ;;  %13254 = vst [vmem:[#allocation18_spill] sm:$0xff] %v9587_v31  ;;  %v9592_v43 = vrot.slane %v564_v7, %v9587_v31  ;;  %vm4489_vm6 = vcmp.lt.s32.totalorder %v9573_v2, 3 }
 0x144   : > { %v644_v34 = vmul.f32 %v9547_v13, %v9547_v13  ;;  %v645_v35 = vmul.f32 %v9550_v28, %v9550_v28  ;;  %979 = vmatpush1.bf16.msra.mxu0 %v8534_v37  ;;  %vm4556_vm7 = vcmp.lt.s32.totalorder %v9573_v2, 2  ;;  %vm4623_vm8 = vcmp.lt.s32.totalorder %v9573_v2, 1 }
 0x145   : > { %980 = vmatprep.subr.bf16.mxu0 %v8535_v15 }
 0x146   : > { %672 = vadd.xlane.f32.xlu1 %v643_v12  ;;  %674 = vadd.xlane.f32.xlu0 %v644_v34 }
 0x148   : > { %981 = vmatpush1.bf16.msra.mxu0 %v8538_v39 }
 0x149   : > { %982 = vmatprep.subr.bf16.mxu0 %v8539_v42 }
 0x14a   : > { %676 = vadd.xlane.f32.xlu1 %v645_v35 }
 0x14c   : > { %983 = vmatpush1.bf16.msra.mxu0 %v8542_v44 }
 0x1b7   : > { %v647_v52 = vpop.xlane.xlu0 %646 }
 0x1b8   : > { %v678_v53 = vmul.f32 0.0078125, %v647_v52 }
 0x1ba   : > { %v694_v54 = vadd.f32 1e-06, %v678_v53 }
 0x1bb   : > { %v649_v55 = vpop.xlane.xlu1 %648  ;;  %v651_v58 = vpop.xlane.xlu0 %650 }
 0x1bc   : > { %8632 = vrsqrt.f32 %v694_v54  ;;  %v679_v60 = vmul.f32 0.0078125, %v649_v55  ;;  %v680_v61 = vmul.f32 0.0078125, %v651_v58 }
 0x1be   : > { %v695_v62 = vadd.f32 1e-06, %v679_v60  ;;  %v696_v63 = vadd.f32 1e-06, %v680_v61 }
 0x1bf   : > { %v653_v0 = vpop.xlane.xlu1 %652  ;;  %v655_v1 = vpop.xlane.xlu0 %654 }
 0x1c0   : > { %8634 = vrsqrt.f32 %v695_v62  ;;  %v681_v5 = vmul.f32 0.0078125, %v653_v0  ;;  %v682_v6 = vmul.f32 0.0078125, %v655_v1 }
 0x1c1   : > { %8636 = vrsqrt.f32 %v696_v63 }
 0x1c2   : > { %v697_v8 = vadd.f32 1e-06, %v681_v5  ;;  %v698_v9 = vadd.f32 1e-06, %v682_v6 }
 0x1c3   : > { %v657_v16 = vpop.xlane.xlu1 %656  ;;  %v659_v10 = vpop.xlane.xlu0 %658 }
 0x1c4   : > { %8638 = vrsqrt.f32 %v697_v8  ;;  %v683_v20 = vmul.f32 0.0078125, %v657_v16  ;;  %v684_v21 = vmul.f32 0.0078125, %v659_v10  ;;  %v1180_v16 = vld [vmem:[%s12994_s4 + $0x10] sm:$0xff] }
 0x1c5   : > { %8640 = vrsqrt.f32 %v698_v9 }
 0x1c6   : > { %v8633_v22 = vpop.eup %8632  ;;  %v699_v23 = vadd.f32 1e-06, %v683_v20  ;;  %v700_v26 = vadd.f32 1e-06, %v684_v21 }
 0x1c7   : > { %v661_v27 = vpop.xlane.xlu1 %660  ;;  %v663_v12 = vpop.xlane.xlu0 %662  ;;  %v726_v29 = vmul.f32 %v8633_v22, %v9482_v24 }
 0x1c8   : > { %8642 = vrsqrt.f32 %v699_v23  ;;  %v685_v34 = vmul.f32 0.0078125, %v661_v27  ;;  %v686_v35 = vmul.f32 0.0078125, %v663_v12 }
 0x1c9   : > { %8644 = vrsqrt.f32 %v700_v26  ;;  %v747_v24 = vmul.f32 %v9584_v30, %v726_v29 }
 0x1ca   : > { %v8635_v14 = vpop.eup %8634  ;;  %v701_v36 = vadd.f32 1e-06, %v685_v34  ;;  %v702_v37 = vadd.f32 1e-06, %v686_v35 }
 0x1cb   : > { %v8637_v15 = vpop.eup %8636  ;;  %v665_v38 = vpop.xlane.xlu1 %664  ;;  %v727_v42 = vmul.f32 %v8635_v14, %v9490_v32  ;;  %v767_v60 = vadd.f32 %v9592_v43, %v747_v24 }
 0x1cc   : > { %v667_v39 = vpop.xlane.xlu0 %666  ;;  %8646 = vrsqrt.f32 %v701_v36  ;;  %v687_v44 = vmul.f32 0.0078125, %v665_v38  ;;  %v728_v47 = vmul.f32 %v8637_v15, %v9484_v25  ;;  %v1182_v15 = vld [vmem:[%s12994_s4 + $0x20] sm:$0xff]  ;;  %v1183_v38 = vld [vmem:[%s12994_s4 + $0x28] sm:$0xff] }
 0x1cd   : > { %v688_v45 = vmul.f32 0.0078125, %v667_v39  ;;  %8648 = vrsqrt.f32 %v702_v37  ;;  %v748_v50 = vmul.f32 %v9584_v30, %v727_v42 }
 0x1ce   : > { %v8639_v52 = vpop.eup %8638  ;;  %v703_v53 = vadd.f32 1e-06, %v687_v44  ;;  %v749_v55 = vmul.f32 %v9584_v30, %v728_v47 }
 0x1cf   : > { %v704_v54 = vadd.f32 1e-06, %v688_v45  ;;  %v8641_v58 = vpop.eup %8640  ;;  %v669_v32 = vpop.xlane.xlu1 %668  ;;  %v768_v61 = vadd.f32 %v9592_v43, %v748_v50  ;;  %v729_v62 = vmul.f32 %v8639_v52, %v9492_v33  ;;  %v1181_v33 = vld [vmem:[%s12994_s4 + $0x18] sm:$0xff] }
 0x1d0   : > { %v671_v59 = vpop.xlane.xlu0 %670  ;;  %8650 = vrsqrt.f32 %v703_v53  ;;  %v689_v63 = vmul.f32 0.0078125, %v669_v32  ;;  %v730_v5 = vmul.f32 %v8641_v58, %v9498_v40  ;;  %v769_v9 = vadd.f32 %v9592_v43, %v749_v55 }
 0x1d1   : > { %v690_v25 = vmul.f32 0.0078125, %v671_v59  ;;  %8652 = vrsqrt.f32 %v704_v54  ;;  %v783_v0 = vpack.c.bf16 %v768_v61, %v767_v60  ;;  %v750_v1 = vmul.f32 %v9584_v30, %v729_v62 }
 0x1d2   : > { %v8643_v6 = vpop.eup %8642  ;;  %v705_v7 = vadd.f32 1e-06, %v689_v63  ;;  %v751_v23 = vmul.f32 %v9584_v30, %v730_v5  ;;  %v9615_v35 = vpack.c.bf16 %v1181_v33, %v1180_v16  ;;  %v9631_v53 = vpack.c.bf16 %v1183_v38, %v1182_v15 }
 0x1d3   : > { %v706_v8 = vadd.f32 1e-06, %v690_v25  ;;  %v8645_v10 = vpop.eup %8644  ;;  %v673_v20 = vpop.xlane.xlu1 %672  ;;  %1001 = vmatmul.mubr.bf16.vlgmr.msra.gmra.mrb[0].mxu0 %v783_v0  ;;  %7713 = vmatprep.mubr.bf16.mxu1 %v783_v0  ;;  %v770_v40 = vadd.f32 %v9592_v43, %v750_v1  ;;  %v731_v22 = vmul.f32 %v8643_v6, %v9500_v41 }
 0x1d4   : > { %v675_v21 = vpop.xlane.xlu0 %674  ;;  %8654 = vrsqrt.f32 %v705_v7  ;;  %v691_v26 = vmul.f32 0.0078125, %v673_v20  ;;  %1010 = vmatprep.mubr.bf16.mxu0 %v13014_v46  ;;  %v732_v12 = vmul.f32 %v8645_v10, %v9507_v48  ;;  %v771_v42 = vadd.f32 %v9592_v43, %v751_v23 }
 0x1d5   : > { %v692_v27 = vmul.f32 0.0078125, %v675_v21  ;;  %8656 = vrsqrt.f32 %v706_v8  ;;  %v784_v29 = vpack.c.bf16 %v770_v40, %v769_v9  ;;  %v752_v34 = vmul.f32 %v9584_v30, %v731_v22  ;;  %v1188_v22 = vld [vmem:[%s12994_s4 + $0x50] sm:$0xff] }
 0x1d6   : > { %v8647_v14 = vpop.eup %8646  ;;  %v707_v36 = vadd.f32 1e-06, %v691_v26  ;;  %v753_v41 = vmul.f32 %v9584_v30, %v732_v12 }
 0x1d7   : > { %v708_v37 = vadd.f32 1e-06, %v692_v27  ;;  %v8649_v48 = vpop.eup %8648  ;;  %v677_v39 = vpop.xlane.xlu1 %676  ;;  %7714 = vmatmul.mubr.bf16.vlgmr.msra.gmra.mrb[0].mxu1 %v784_v29  ;;  %v772_v24 = vadd.f32 %v9592_v43, %v752_v34  ;;  %v733_v44 = vmul.f32 %v8647_v14, %v9510_v49  ;;  %v1184_v49 = vld [vmem:[%s12994_s4 + $0x30] sm:$0xff] }
 0x1d8   : > { %8658 = vrsqrt.f32 %v707_v36  ;;  %v693_v45 = vmul.f32 0.0078125, %v677_v39  ;;  %v734_v47 = vmul.f32 %v8649_v48, %v9517_v56  ;;  %8236 = vmatpush3.bf16.msra.mxu1 %v9563_v51  ;;  %v773_v58 = vadd.f32 %v9592_v43, %v753_v41  ;;  %v1185_v56 = vld [vmem:[%s12994_s4 + $0x38] sm:$0xff] }
 0x1d9   : > { %8660 = vrsqrt.f32 %v708_v37  ;;  %v785_v50 = vpack.c.bf16 %v772_v24, %v771_v42  ;;  %v754_v52 = vmul.f32 %v9584_v30, %v733_v44  ;;  %8238 = vmatprep.subr.bf16.mxu1 %v9615_v35  ;;  %v9648_v0 = vpack.c.bf16 %v1185_v56, %v1184_v49  ;;  %v1191_v37 = vld [vmem:[%s12994_s4 + $0x68] sm:$0xff] }
 0x1da   : > { %v8651_v54 = vpop.eup %8650  ;;  %v709_v55 = vadd.f32 1e-06, %v693_v45  ;;  %v755_v61 = vmul.f32 %v9584_v30, %v734_v47  ;;  %v9721_v47 = vld [vmem:[%s12995_s5] sm:$0xff] }
 0x1db   : > { %v8653_v32 = vpop.eup %8652  ;;  %1011 = vmatmul.mubr.bf16.gmra.mrb[4].mxu0 %v784_v29  ;;  %7717 = vmatprep.mubr.bf16.mxu1 %v785_v50  ;;  %v774_v59 = vadd.f32 %v9592_v43, %v754_v52  ;;  %v735_v60 = vmul.f32 %v8651_v54, %v9520_v57  ;;  %v1186_v57 = vld [vmem:[%s12994_s4 + $0x40] sm:$0xff]  ;;  %v9736_v54 = vsub.s32 2, %v9573_v2 }
 0x1dc   : > { %8662 = vrsqrt.f32 %v709_v55  ;;  %1020 = vmatprep.mubr.bf16.mxu0 %v13014_v46  ;;  %v736_v62 = vmul.f32 %v8653_v32, %v9527_v3  ;;  %8240 = vmatpush3.bf16.msra.mxu1 %v9615_v35  ;;  %v1187_v3 = vld [vmem:[%s12994_s4 + $0x48] sm:$0xff]  ;;  %v775_v7 = vadd.f32 %v9592_v43, %v755_v61 }
 0x1dd   : > { %v786_v63 = vpack.c.bf16 %v774_v59, %v773_v58  ;;  %v756_v25 = vmul.f32 %v9584_v30, %v735_v60  ;;  %8242 = vmatprep.subr.bf16.mxu1 %v9631_v53  ;;  %v9664_v20 = vpack.c.bf16 %v1187_v3, %v1186_v57  ;;  %7785 = vmatprep.subr.mxu0 %v9721_v47 }
 0x1de   : > { %v8655_v1 = vpop.eup %8654  ;;  %v757_v5 = vmul.f32 %v9584_v30, %v736_v62  ;;  %7786 = vmatpush3.msra.mxu0 %v9721_v47 }
 0x1df   : > { %v8657_v6 = vpop.eup %8656  ;;  %7718 = vmatmul.mubr.bf16.gmra.mrb[4].mxu1 %v786_v63  ;;  %v776_v8 = vadd.f32 %v9592_v43, %v756_v25  ;;  %v737_v9 = vmul.f32 %v8655_v1, %v9530_v4  ;;  %v1189_v4 = vld [vmem:[%s12994_s4 + $0x58] sm:$0xff]  ;;  %7867 = vmatprep.subr.mxu0 %v9721_v47 }
 0x1e0   : > { %v738_v16 = vmul.f32 %v8657_v6, %v9537_v11  ;;  %8244 = vmatpush3.bf16.msra.mxu1 %v9631_v53  ;;  %v777_v40 = vadd.f32 %v9592_v43, %v757_v5  ;;  %v9681_v14 = vpack.c.bf16 %v1189_v4, %v1188_v22 }
 0x1e1   : > { %v787_v33 = vpack.c.bf16 %v776_v8, %v775_v7  ;;  %v758_v10 = vmul.f32 %v9584_v30, %v737_v9  ;;  %8246 = vmatprep.subr.bf16.mxu1 %v9648_v0 }
 0x1e2   : > { %v8659_v21 = vpop.eup %8658  ;;  %v759_v27 = vmul.f32 %v9584_v30, %v738_v16 }
 0x1e3   : > { %v8661_v11 = vpop.eup %8660  ;;  %1021 = vmatmul.mubr.bf16.gmra.mrb[8].mxu0 %v785_v50  ;;  %7721 = vmatprep.mubr.bf16.mxu1 %v787_v33  ;;  %v778_v23 = vadd.f32 %v9592_v43, %v758_v10  ;;  %v739_v26 = vmul.f32 %v8659_v21, %v9540_v17  ;;  %v1190_v17 = vld [vmem:[%s12994_s4 + $0x60] sm:$0xff] }
 0x1e4   : > { %1030 = vmatprep.mubr.bf16.mxu0 %v13014_v46  ;;  %v740_v12 = vmul.f32 %v8661_v11, %v9547_v13  ;;  %8248 = vmatpush3.bf16.msra.mxu1 %v9648_v0  ;;  %v779_v13 = vadd.f32 %v9592_v43, %v759_v27  ;;  %v9696_v42 = vpack.c.bf16 %v1191_v37, %v1190_v17  ;;  %v9729_v50 = vld [vmem:[%s12993_s3] sm:$0x7] }
 0x1e5   : > { %v788_v29 = vpack.c.bf16 %v778_v23, %v777_v40  ;;  %v760_v34 = vmul.f32 %v9584_v30, %v739_v26  ;;  %8250 = vmatprep.subr.bf16.mxu1 %v9664_v20  ;;  %v9733_v52 = vrot.slane %v9729_v50, %v9587_v31  ;;  %v9745_v56 = vrot.slane %v9729_v50, %v9736_v54 }
 0x1e6   : > { %v8663_v36 = vpop.eup %8662  ;;  %v761_v38 = vmul.f32 %v9584_v30, %v740_v12 }
 0x1e7   : > { %7722 = vmatmul.mubr.bf16.gmra.mrb[8].mxu1 %v788_v29  ;;  %v780_v41 = vadd.f32 %v9592_v43, %v760_v34  ;;  %v741_v15 = vmul.f32 %v8663_v36, %v9550_v28 }
 0x1e8   : > { %8252 = vmatpush3.bf16.msra.mxu1 %v9664_v20  ;;  %v781_v24 = vadd.f32 %v9592_v43, %v761_v38 }
 0x1e9   : > { %v789_v48 = vpack.c.bf16 %v780_v41, %v779_v13  ;;  %v762_v39 = vmul.f32 %v9584_v30, %v741_v15  ;;  %8254 = vmatprep.subr.bf16.mxu1 %v9681_v14  ;;  %v1192_v30 = vld [vmem:[%s12994_s4 + $0x70] sm:$0xff] }
 0x1eb   : > { %1031 = vmatmul.mubr.bf16.gmra.mrb[12].mxu0 %v786_v63  ;;  %7725 = vmatprep.mubr.bf16.mxu1 %v789_v48  ;;  %v782_v44 = vadd.f32 %v9592_v43, %v762_v39  ;;  %v1193_v43 = vld [vmem:[%s12994_s4 + $0x78] sm:$0xff] }
 0x1ec   : > { %1040 = vmatprep.mubr.bf16.mxu0 %v13014_v46  ;;  %8256 = vmatpush3.bf16.msra.mxu1 %v9681_v14  ;;  %v9713_v45 = vpack.c.bf16 %v1193_v43, %v1192_v30 }
 0x1ed   : > { %v790_v28 = vpack.c.bf16 %v782_v44, %v781_v24  ;;  %8258 = vmatprep.subr.bf16.mxu1 %v9696_v42 }
 0x1ef   : > { %7726 = vmatmul.mubr.bf16.gmra.mrb[12].mxu1 %v790_v28 }
 0x1f0   : > { %8260 = vmatpush3.bf16.msra.mxu1 %v9696_v42 }
 0x1f1   : > { %8262 = vmatprep.subr.bf16.mxu1 %v9713_v45 }
 0x1f3   : > { %1041 = vmatmul.mubr.bf16.gmra.mrb[16].mxu0 %v787_v33 }
 0x1f4   : > { %1050 = vmatprep.mubr.bf16.mxu0 %v13014_v46  ;;  %8264 = vmatpush3.bf16.msra.mxu1 %v9713_v45 }
 0x1f5   : > { %8266 = vmatprep.subr.bf16.mxu1 %v9563_v51 }
 0x1fb   : > { %1051 = vmatmul.mubr.bf16.gmra.mrb[20].mxu0 %v788_v29 }
 0x1fc   : > { %1060 = vmatprep.mubr.bf16.mxu0 %v13014_v46 }
 0x203   : > { %1061 = vmatmul.mubr.bf16.gmra.mrb[24].mxu0 %v789_v48 }
 0x204   : > { %1070 = vmatprep.mubr.bf16.mxu0 %v13014_v46 }
 0x20b   : > { %1071 = vmatmul.mubr.bf16.gmra.mrb[28].mxu0 %v790_v28 }
 0x2a6   : > { %v1002_v55 = vpop.f32.mrb[0].mxu0 }
 0x2a7   : > { %v9739_v58 = vadd.f32 %v1002_v55, %v9733_v52  ;;  %v9741_v49 = vpop.f32.mrb[1].mxu0 }
 0x2a8   : > { %v1006_v32 = vpop.f32.mrb[2].mxu0 }
 0x2a9   : > { %v9748_v59 = vadd.f32 %v1006_v32, %v9733_v52  ;;  %v9750_v60 = vpop.f32.mrb[3].mxu0  ;;  %7761 = vmatprep.mubr.f32.mxu1 %v9739_v58 }
 0x2aa   : > { %v7715_v61 = vpop.f32.mrb[0].mxu1 }
 0x2ab   : > { %v1124_v62 = vadd.f32 %v7715_v61, %v9745_v56  ;;  %v1115_v63 = vpop.f32.mrb[1].mxu1  ;;  %7762 = vmatmul.mubr.f32.vlgmr.msra.gmra.mrb[16].mxu1 %v9748_v59 }
 0x2ac   : > { %v7716_v25 = vpop.f32.mrb[2].mxu1  ;;  %8268 = vmatpush3.bf16.msra.mxu1 %v9563_v51  ;;  %v1116_v57 = vadd.f32 %v1115_v63, %v9745_v56 }
 0x2ad   : > { %v1127_v1 = vadd.f32 %v7716_v25, %v9745_v56  ;;  %v1118_v5 = vpop.f32.mrb[3].mxu1  ;;  %8270 = vmatprep.subr.bf16.mxu1 %v9615_v35 }
 0x2ae   : > { %v1119_v3 = vadd.f32 %v1118_v5, %v9745_v56  ;;  %v1012_v6 = vpop.f32.mrb[4].mxu0 }
 0x2af   : > { %v9760_v7 = vpack.c.bf16 %v1127_v1, %v1124_v62  ;;  %v9763_v8 = vadd.f32 %v1012_v6, %v9733_v52  ;;  %v9765_v9 = vpop.f32.mrb[5].mxu0 }
 0x2b0   : > { %v9767_v16 = vpack.c.bf16 %v1119_v3, %v1116_v57  ;;  %v1016_v33 = vpop.f32.mrb[6].mxu0  ;;  %8272 = vmatpush3.bf16.msra.mxu1 %v9615_v35 }
 0x2b1   : > { %v9771_v10 = vadd.f32 %v1016_v33, %v9733_v52  ;;  %v9773_v21 = vpop.f32.mrb[7].mxu0  ;;  %7764 = vmatprep.mubr.f32.mxu1 %v9763_v8  ;;  %8274 = vmatprep.subr.bf16.mxu1 %v9631_v53 }
 0x2b2   : > { %v7719_v40 = vpop.f32.mrb[4].mxu1 }
 0x2b3   : > { %v1140_v22 = vadd.f32 %v7719_v40, %v9745_v56  ;;  %v1131_v4 = vpop.f32.mrb[5].mxu1  ;;  %7765 = vmatmul.mubr.f32.gmra.mrb[18].mxu1 %v9771_v10 }
 0x2b4   : > { %v1132_v11 = vadd.f32 %v1131_v4, %v9745_v56  ;;  %v7720_v23 = vpop.f32.mrb[6].mxu1  ;;  %8276 = vmatpush3.bf16.msra.mxu1 %v9631_v53 }
 0x2b5   : > { %v1143_v26 = vadd.f32 %v7720_v23, %v9745_v56  ;;  %v1134_v27 = vpop.f32.mrb[7].mxu1  ;;  %8278 = vmatprep.subr.bf16.mxu1 %v9648_v0 }
 0x2b6   : > { %v1135_v12 = vadd.f32 %v1134_v27, %v9745_v56  ;;  %v1022_v29 = vpop.f32.mrb[8].mxu0 }
 0x2b7   : > { %v9784_v34 = vpack.c.bf16 %v1143_v26, %v1140_v22  ;;  %v9787_v36 = vadd.f32 %v1022_v29, %v9733_v52  ;;  %v9789_v17 = vpop.f32.mrb[9].mxu0 }
 0x2b8   : > { %v9791_v37 = vpack.c.bf16 %v1135_v12, %v1132_v11  ;;  %v1026_v13 = vpop.f32.mrb[10].mxu0  ;;  %8280 = vmatpush3.bf16.msra.mxu1 %v9648_v0 }
 0x2b9   : > { %v9795_v41 = vadd.f32 %v1026_v13, %v9733_v52  ;;  %v9797_v15 = vpop.f32.mrb[11].mxu0  ;;  %7767 = vmatprep.mubr.f32.mxu1 %v9787_v36  ;;  %8282 = vmatprep.subr.bf16.mxu1 %v9664_v20 }
 0x2ba   : > { %v7723_v38 = vpop.f32.mrb[8].mxu1 }
 0x2bb   : > { %v1156_v48 = vadd.f32 %v7723_v38, %v9745_v56  ;;  %v1147_v39 = vpop.f32.mrb[9].mxu1  ;;  %7768 = vmatmul.mubr.f32.gmra.mrb[20].mxu1 %v9795_v41 }
 0x2bc   : > { %v1148_v24 = vadd.f32 %v1147_v39, %v9745_v56  ;;  %v7724_v44 = vpop.f32.mrb[10].mxu1  ;;  %8284 = vmatpush3.bf16.msra.mxu1 %v9664_v20 }
 0x2bd   : > { %v1159_v28 = vadd.f32 %v7724_v44, %v9745_v56  ;;  %v1150_v30 = vpop.f32.mrb[11].mxu1  ;;  %8286 = vmatprep.subr.bf16.mxu1 %v9681_v14 }
 0x2be   : > { %v1151_v43 = vadd.f32 %v1150_v30, %v9745_v56  ;;  %v1032_v55 = vpop.f32.mrb[12].mxu0 }
 0x2bf   : > { %v9808_v32 = vpack.c.bf16 %v1159_v28, %v1156_v48  ;;  %v9811_v61 = vadd.f32 %v1032_v55, %v9733_v52  ;;  %v9813_v62 = vpop.f32.mrb[13].mxu0 }
 0x2c0   : > { %v9815_v63 = vpack.c.bf16 %v1151_v43, %v1148_v24  ;;  %v1036_v25 = vpop.f32.mrb[14].mxu0  ;;  %8288 = vmatpush3.bf16.msra.mxu1 %v9681_v14 }
 0x2c1   : > { %v9819_v1 = vadd.f32 %v1036_v25, %v9733_v52  ;;  %v9821_v5 = vpop.f32.mrb[15].mxu0  ;;  %7770 = vmatprep.mubr.f32.mxu1 %v9811_v61  ;;  %8290 = vmatprep.subr.bf16.mxu1 %v9696_v42 }
 0x2c2   : > { %v7727_v57 = vpop.f32.mrb[12].mxu1 }
 0x2c3   : > { %v1172_v3 = vadd.f32 %v7727_v57, %v9745_v56  ;;  %v1163_v6 = vpop.f32.mrb[13].mxu1  ;;  %7771 = vmatmul.mubr.f32.gmra.mrb[22].mxu1 %v9819_v1 }
 0x2c4   : > { %v1164_v33 = vadd.f32 %v1163_v6, %v9745_v56  ;;  %v7728_v40 = vpop.f32.mrb[14].mxu1  ;;  %8292 = vmatpush3.bf16.msra.mxu1 %v9696_v42 }
 0x2c5   : > { %v1175_v22 = vadd.f32 %v7728_v40, %v9745_v56  ;;  %v1166_v4 = vpop.f32.mrb[15].mxu1  ;;  %8294 = vmatprep.subr.bf16.mxu1 %v9713_v45 }
 0x2c6   : > { %v1167_v11 = vadd.f32 %v1166_v4, %v9745_v56  ;;  %v1042_v23 = vpop.f32.mrb[16].mxu0 }
 0x2c7   : > { %v9832_v26 = vpack.c.bf16 %v1175_v22, %v1172_v3  ;;  %v9835_v27 = vadd.f32 %v1042_v23, %v9733_v52  ;;  %v9837_v12 = vpop.f32.mrb[17].mxu0 }
 0x2c8   : > { %v9839_v29 = vpack.c.bf16 %v1167_v11, %v1164_v33  ;;  %v1046_v13 = vpop.f32.mrb[18].mxu0  ;;  %8296 = vmatpush3.bf16.msra.mxu1 %v9713_v45 }
 0x2c9   : > { %v9843_v38 = vadd.f32 %v1046_v13, %v9733_v52  ;;  %v9845_v48 = vpop.f32.mrb[19].mxu0  ;;  %7773 = vmatprep.mubr.f32.mxu1 %v9835_v27  ;;  %8298 = vmatprep.subr.bf16.mxu1 %v9563_v51 }
 0x2cb   : > { %7774 = vmatmul.mubr.f32.gmra.mrb[24].mxu1 %v9843_v38 }
 0x2ce   : > { %v1052_v56 = vpop.f32.mrb[20].mxu0 }
 0x2cf   : > { %v9851_v39 = vadd.f32 %v1052_v56, %v9733_v52  ;;  %v9853_v24 = vpop.f32.mrb[21].mxu0 }
 0x2d0   : > { %v1056_v44 = vpop.f32.mrb[22].mxu0 }
 0x2d1   : > { %v9856_v28 = vadd.f32 %v1056_v44, %v9733_v52  ;;  %v9858_v30 = vpop.f32.mrb[23].mxu0  ;;  %7776 = vmatprep.mubr.f32.mxu1 %v9851_v39 }
 0x2d3   : > { %7777 = vmatmul.mubr.f32.gmra.mrb[26].mxu1 %v9856_v28 }
 0x2d6   : > { %v1062_v43 = vpop.f32.mrb[24].mxu0 }
 0x2d7   : > { %v9863_v55 = vadd.f32 %v1062_v43, %v9733_v52  ;;  %v9865_v25 = vpop.f32.mrb[25].mxu0 }
 0x2d8   : > { %v1066_v57 = vpop.f32.mrb[26].mxu0 }
 0x2d9   : > { %v9868_v3 = vadd.f32 %v1066_v57, %v9733_v52  ;;  %v9870_v6 = vpop.f32.mrb[27].mxu0  ;;  %7779 = vmatprep.mubr.f32.mxu1 %v9863_v55 }
 0x2db   : > { %7780 = vmatmul.mubr.f32.gmra.mrb[28].mxu1 %v9868_v3 }
 0x2de   : > { %v1072_v33 = vpop.f32.mrb[28].mxu0 }
 0x2df   : > { %v9875_v40 = vadd.f32 %v1072_v33, %v9733_v52  ;;  %v9877_v22 = vpop.f32.mrb[29].mxu0 }
 0x2e0   : > { %v1076_v4 = vpop.f32.mrb[30].mxu0 }
 0x2e1   : > { %v9880_v11 = vadd.f32 %v1076_v4, %v9733_v52  ;;  %v9882_v23 = vpop.f32.mrb[31].mxu0  ;;  %7782 = vmatprep.mubr.f32.mxu1 %v9875_v40 }
 0x2e3   : > { %7783 = vmatmul.mubr.f32.gmra.mrb[30].mxu1 %v9880_v11 }
 0x37e   : > { %v7763_v13 = vpop.f32.mrb[16].mxu1 }
 0x37f   : > { %v1261_v56 = vpop.f32.mrb[17].mxu1 }
 0x380   : > { %7787 = vmatprep.mubr.msk.f32.mxu0 %vm1340_vm0, %v1261_v56 }
 0x381   : > { %7788 = vmatmul.mubr.msk.f32.vlgmr.msra.gmra.mrb[32].mxu0 %vm1340_vm0, %v7763_v13 }
 0x382   : > { %7868 = vmatpush3.msra.mxu0 %v9721_v47 }
 0x383   : > { %7949 = vmatprep.subr.mxu0 %v9721_v47 }
 0x386   : > { %v7766_v44 = vpop.f32.mrb[18].mxu1 }
 0x387   : > { %v1271_v52 = vpop.f32.mrb[19].mxu1 }
 0x388   : > { %7790 = vmatprep.mubr.msk.f32.mxu0 %vm1340_vm0, %v1271_v52 }
 0x389   : > { %7791 = vmatmul.mubr.msk.f32.gmra.mrb[34].mxu0 %vm1340_vm0, %v7766_v44 }
 0x38e   : > { %v7769_v43 = vpop.f32.mrb[20].mxu1 }
 0x38f   : > { %v1281_v57 = vpop.f32.mrb[21].mxu1 }
 0x390   : > { %7793 = vmatprep.mubr.msk.f32.mxu0 %vm1340_vm0, %v1281_v57 }
 0x391   : > { %7794 = vmatmul.mubr.msk.f32.gmra.mrb[36].mxu0 %vm1340_vm0, %v7769_v43 }
 0x396   : > { %v7772_v33 = vpop.f32.mrb[22].mxu1 }
 0x397   : > { %v1291_v4 = vpop.f32.mrb[23].mxu1 }
 0x398   : > { %7796 = vmatprep.mubr.msk.f32.mxu0 %vm1340_vm0, %v1291_v4 }
 0x399   : > { %7797 = vmatmul.mubr.msk.f32.gmra.mrb[38].mxu0 %vm1340_vm0, %v7772_v33 }
 0x39e   : > { %v7775_v13 = vpop.f32.mrb[24].mxu1 }
 0x39f   : > { %v1301_v56 = vpop.f32.mrb[25].mxu1 }
 0x3a0   : > { %7799 = vmatprep.mubr.msk.f32.mxu0 %vm1340_vm0, %v1301_v56 }
 0x3a1   : > { %7800 = vmatmul.mubr.msk.f32.gmra.mrb[40].mxu0 %vm1340_vm0, %v7775_v13 }
 0x3a6   : > { %v7778_v52 = vpop.f32.mrb[26].mxu1 }
 0x3a7   : > { %v1311_v44 = vpop.f32.mrb[27].mxu1 }
 0x3a8   : > { %7802 = vmatprep.mubr.msk.f32.mxu0 %vm1340_vm0, %v1311_v44 }
 0x3a9   : > { %7803 = vmatmul.mubr.msk.f32.gmra.mrb[42].mxu0 %vm1340_vm0, %v7778_v52 }
 0x3ae   : > { %v7781_v57 = vpop.f32.mrb[28].mxu1 }
 0x3af   : > { %v1321_v43 = vpop.f32.mrb[29].mxu1 }
 0x3b0   : > { %7805 = vmatprep.mubr.msk.f32.mxu0 %vm1340_vm0, %v1321_v43 }
 0x3b1   : > { %7806 = vmatmul.mubr.msk.f32.gmra.mrb[44].mxu0 %vm1340_vm0, %v7781_v57 }
 0x3b6   : > { %v7784_v4 = vpop.f32.mrb[30].mxu1 }
 0x3b7   : > { %v1331_v33 = vpop.f32.mrb[31].mxu1 }
 0x3b8   : > { %7808 = vmatprep.mubr.msk.f32.mxu0 %vm1340_vm0, %v1331_v33 }
 0x3b9   : > { %7809 = vmatmul.mubr.msk.f32.gmra.mrb[46].mxu0 %vm1340_vm0, %v7784_v4 }
 0x454   : > { %v7789_v56 = vpop.f32.mrb[32].mxu0 }
 0x455   : > { %v9905_v13 = vsub.f32 %v9748_v59, %v7789_v56  ;;  %v1455_v46 = vpop.f32.mrb[33].mxu0 }
 0x456   : > { %v9908_v44 = vsub.f32 %v9739_v58, %v1455_v46 }
 0x457   : > { %v1551_v57 = vmul.f32 %v9905_v13, %v9905_v13 }
 0x458   : > { %v1550_v52 = vmul.f32 %v9908_v44, %v9908_v44 }
 0x45a   : > { %7843 = vmatprep.mubr.f32.mxu1 %v1550_v52 }
 0x45b   : > { %7844 = vmatmul.mubr.f32.vlgmr.msra.gmra.mrb[32].mxu1 %v1551_v57 }
 0x45c   : > { %v7792_v43 = vpop.f32.mrb[34].mxu0  ;;  %8300 = vmatpush3.bf16.msra.mxu1 %v9563_v51 }
 0x45d   : > { %v9916_v4 = vsub.f32 %v9771_v10, %v7792_v43  ;;  %v1465_v59 = vpop.f32.mrb[35].mxu0  ;;  %8302 = vmatprep.subr.bf16.mxu1 %v9615_v35 }
 0x45e   : > { %v9920_v46 = vsub.f32 %v9763_v8, %v1465_v59 }
 0x45f   : > { %v1553_v33 = vmul.f32 %v9916_v4, %v9916_v4 }
 0x460   : > { %v1552_v58 = vmul.f32 %v9920_v46, %v9920_v46  ;;  %8304 = vmatpush3.bf16.msra.mxu1 %v9615_v35 }
 0x461   : > { %8306 = vmatprep.subr.bf16.mxu1 %v9631_v53 }
 0x462   : > { %7846 = vmatprep.mubr.f32.mxu1 %v1552_v58 }
 0x463   : > { %7847 = vmatmul.mubr.f32.gmra.mrb[34].mxu1 %v1553_v33 }
 0x464   : > { %v7795_v10 = vpop.f32.mrb[36].mxu0  ;;  %8308 = vmatpush3.bf16.msra.mxu1 %v9631_v53 }
 0x465   : > { %v9930_v56 = vsub.f32 %v9795_v41, %v7795_v10  ;;  %v1475_v8 = vpop.f32.mrb[37].mxu0  ;;  %8310 = vmatprep.subr.bf16.mxu1 %v9648_v0 }
 0x466   : > { %v9934_v52 = vsub.f32 %v9787_v36, %v1475_v8 }
 0x467   : > { %v1555_v43 = vmul.f32 %v9930_v56, %v9930_v56 }
 0x468   : > { %v1554_v57 = vmul.f32 %v9934_v52, %v9934_v52  ;;  %8312 = vmatpush3.bf16.msra.mxu1 %v9648_v0 }
 0x469   : > { %8314 = vmatprep.subr.bf16.mxu1 %v9664_v20 }
 0x46a   : > { %7849 = vmatprep.mubr.f32.mxu1 %v1554_v57 }
 0x46b   : > { %7850 = vmatmul.mubr.f32.gmra.mrb[36].mxu1 %v1555_v43 }
 0x46c   : > { %v7798_v41 = vpop.f32.mrb[38].mxu0  ;;  %8316 = vmatpush3.bf16.msra.mxu1 %v9664_v20 }
 0x46d   : > { %v9944_v59 = vsub.f32 %v9819_v1, %v7798_v41  ;;  %v1485_v36 = vpop.f32.mrb[39].mxu0  ;;  %8318 = vmatprep.subr.bf16.mxu1 %v9681_v14 }
 0x46e   : > { %v9948_v58 = vsub.f32 %v9811_v61, %v1485_v36 }
 0x46f   : > { %v1557_v10 = vmul.f32 %v9944_v59, %v9944_v59 }
 0x470   : > { %v1556_v33 = vmul.f32 %v9948_v58, %v9948_v58  ;;  %8320 = vmatpush3.bf16.msra.mxu1 %v9681_v14 }
 0x471   : > { %8322 = vmatprep.subr.bf16.mxu1 %v9696_v42 }
 0x472   : > { %7852 = vmatprep.mubr.f32.mxu1 %v1556_v33 }
 0x473   : > { %7853 = vmatmul.mubr.f32.gmra.mrb[38].mxu1 %v1557_v10 }
 0x474   : > { %v7801_v1 = vpop.f32.mrb[40].mxu0  ;;  %8324 = vmatpush3.bf16.msra.mxu1 %v9696_v42 }
 0x475   : > { %v9958_v8 = vsub.f32 %v9843_v38, %v7801_v1  ;;  %v1495_v61 = vpop.f32.mrb[41].mxu0  ;;  %8326 = vmatprep.subr.bf16.mxu1 %v9713_v45 }
 0x476   : > { %v9962_v57 = vsub.f32 %v9835_v27, %v1495_v61 }
 0x477   : > { %v1559_v41 = vmul.f32 %v9958_v8, %v9958_v8 }
 0x478   : > { %v1558_v43 = vmul.f32 %v9962_v57, %v9962_v57  ;;  %8328 = vmatpush3.bf16.msra.mxu1 %v9713_v45 }
 0x479   : > { %8330 = vmatprep.subr.bf16.mxu1 %v9563_v51 }
 0x47a   : > { %7855 = vmatprep.mubr.f32.mxu1 %v1558_v43 }
 0x47b   : > { %7856 = vmatmul.mubr.f32.gmra.mrb[40].mxu1 %v1559_v41 }
 0x47c   : > { %v7804_v38 = vpop.f32.mrb[42].mxu0 }
 0x47d   : > { %v9971_v36 = vsub.f32 %v9856_v28, %v7804_v38  ;;  %v1505_v33 = vpop.f32.mrb[43].mxu0 }
 0x47e   : > { %v9974_v27 = vsub.f32 %v9851_v39, %v1505_v33 }
 0x47f   : > { %v1561_v1 = vmul.f32 %v9971_v36, %v9971_v36 }
 0x480   : > { %v1560_v10 = vmul.f32 %v9974_v27, %v9974_v27 }
 0x482   : > { %7858 = vmatprep.mubr.f32.mxu1 %v1560_v10 }
 0x483   : > { %7859 = vmatmul.mubr.f32.gmra.mrb[42].mxu1 %v1561_v1 }
 0x484   : > { %v7807_v61 = vpop.f32.mrb[44].mxu0 }
 0x485   : > { %v9981_v43 = vsub.f32 %v9868_v3, %v7807_v61  ;;  %v1515_v41 = vpop.f32.mrb[45].mxu0  ;;  %v832_v3 = vrot.slane %v9729_v50, %v9579_v19 }
 0x486   : > { %v9984_v28 = vsub.f32 %v9863_v55, %v1515_v41 }
 0x487   : > { %v1563_v38 = vmul.f32 %v9981_v43, %v9981_v43  ;;  %v10010_v50 = vadd.f32 %v9765_v9, %v832_v3  ;;  %v10036_v9 = vadd.f32 %v9821_v5, %v832_v3 }
 0x488   : > { %v1562_v39 = vmul.f32 %v9984_v28, %v9984_v28 }
 0x48a   : > { %7861 = vmatprep.mubr.f32.mxu1 %v1562_v39  ;;  %v10003_v39 = vadd.f32 %v9741_v49, %v832_v3  ;;  %v10020_v49 = vadd.f32 %v9789_v17, %v832_v3  ;;  %v10056_v17 = vadd.f32 %v9858_v30, %v832_v3 }
 0x48b   : > { %7862 = vmatmul.mubr.f32.gmra.mrb[44].mxu1 %v1563_v38 }
 0x48c   : > { %v7810_v33 = vpop.f32.mrb[46].mxu0 }
 0x48d   : > { %v9991_v10 = vsub.f32 %v9880_v11, %v7810_v33  ;;  %v1525_v1 = vpop.f32.mrb[47].mxu0  ;;  %v10007_v11 = vadd.f32 %v9750_v60, %v832_v3  ;;  %v10026_v60 = vadd.f32 %v9797_v15, %v832_v3  ;;  %v10066_v15 = vadd.f32 %v9870_v6, %v832_v3 }
 0x48e   : > { %v9996_v61 = vsub.f32 %v9875_v40, %v1525_v1  ;;  %v10016_v40 = vadd.f32 %v9773_v21, %v832_v3  ;;  %v10046_v21 = vadd.f32 %v9845_v48, %v832_v3 }
 0x48f   : > { %v1565_v41 = vmul.f32 %v9991_v10, %v9991_v10 }
 0x490   : > { %v1564_v55 = vmul.f32 %v9996_v61, %v9996_v61 }
 0x492   : > { %7864 = vmatprep.mubr.f32.mxu1 %v1564_v55 }
 0x493   : > { %7865 = vmatmul.mubr.f32.gmra.mrb[46].mxu1 %v1565_v41 }
 0x494   : > { %7925 = vmatprep.mubr.f32.mxu1 %v10003_v39 }
 0x497   : > { %7926 = vmatmul.mubr.f32.vlgmr.msra.gmra.mrb[48].mxu1 %v10007_v11 }
 0x498   : > { %7928 = vmatprep.mubr.f32.mxu1 %v10010_v50  ;;  %8332 = vmatpush3.bf16.msra.mxu1 %v9563_v51  ;;  %v10030_v51 = vadd.f32 %v9813_v62, %v832_v3  ;;  %v10076_v62 = vadd.f32 %v9882_v23, %v832_v3 }
 0x499   : > { %8334 = vmatprep.subr.bf16.mxu1 %v9615_v35 }
 0x49b   : > { %7929 = vmatmul.mubr.f32.gmra.mrb[50].mxu1 %v10016_v40 }
 0x49c   : > { %7931 = vmatprep.mubr.f32.mxu1 %v10020_v49  ;;  %8336 = vmatpush3.bf16.msra.mxu1 %v9615_v35  ;;  %v10040_v35 = vadd.f32 %v9837_v12, %v832_v3 }
 0x49d   : > { %8338 = vmatprep.subr.bf16.mxu1 %v9631_v53 }
 0x49f   : > { %7932 = vmatmul.mubr.f32.gmra.mrb[52].mxu1 %v10026_v60 }
 0x4a0   : > { %7934 = vmatprep.mubr.f32.mxu1 %v10030_v51  ;;  %8340 = vmatpush3.bf16.msra.mxu1 %v9631_v53  ;;  %v10050_v53 = vadd.f32 %v9853_v24, %v832_v3 }
 0x4a1   : > { %8342 = vmatprep.subr.bf16.mxu1 %v9648_v0 }
 0x4a3   : > { %7935 = vmatmul.mubr.f32.gmra.mrb[54].mxu1 %v10036_v9 }
 0x4a4   : > { %7937 = vmatprep.mubr.f32.mxu1 %v10040_v35  ;;  %8344 = vmatpush3.bf16.msra.mxu1 %v9648_v0  ;;  %v10060_v0 = vadd.f32 %v9865_v25, %v832_v3 }
 0x4a5   : > { %8346 = vmatprep.subr.bf16.mxu1 %v9664_v20 }
 0x4a7   : > { %7938 = vmatmul.mubr.f32.gmra.mrb[56].mxu1 %v10046_v21 }
 0x4a8   : > { %7940 = vmatprep.mubr.f32.mxu1 %v10050_v53  ;;  %8348 = vmatpush3.bf16.msra.mxu1 %v9664_v20  ;;  %v10070_v20 = vadd.f32 %v9877_v22, %v832_v3 }
 0x4a9   : > { %8350 = vmatprep.subr.bf16.mxu1 %v9681_v14 }
 0x4ab   : > { %7941 = vmatmul.mubr.f32.gmra.mrb[58].mxu1 %v10056_v17 }
 0x4ac   : > { %7943 = vmatprep.mubr.f32.mxu1 %v10060_v0  ;;  %8352 = vmatpush3.bf16.msra.mxu1 %v9681_v14 }
 0x4ad   : > { %8354 = vmatprep.subr.bf16.mxu1 %v9696_v42 }
 0x4af   : > { %7944 = vmatmul.mubr.f32.gmra.mrb[60].mxu1 %v10066_v15 }
 0x4b0   : > { %7946 = vmatprep.mubr.f32.mxu1 %v10070_v20  ;;  %8356 = vmatpush3.bf16.msra.mxu1 %v9696_v42 }
 0x4b1   : > { %8358 = vmatprep.subr.bf16.mxu1 %v9713_v45 }
 0x4b3   : > { %7947 = vmatmul.mubr.f32.gmra.mrb[62].mxu1 %v10076_v62 }
 0x4b4   : > { %8360 = vmatpush3.bf16.msra.mxu1 %v9713_v45 }
 0x52e   : > { %v7845_v14 = vpop.f32.mrb[32].mxu1 }
 0x52f   : > { %v1632_v5 = vpop.f32.mrb[33].mxu1 }
 0x530   : > { %7869 = vmatprep.mubr.msk.f32.mxu0 %vm1340_vm0, %v1632_v5 }
 0x531   : > { %7870 = vmatmul.mubr.msk.f32.vlgmr.msra.gmra.mrb[48].mxu0 %vm1340_vm0, %v7845_v14 }
 0x532   : > { %7950 = vmatpush3.msra.mxu0 %v9721_v47 }
 0x533   : > { %8031 = vmatprep.subr.mxu0 %v9721_v47 }
 0x536   : > { %v7848_v42 = vpop.f32.mrb[34].mxu1 }
 0x537   : > { %v1642_v12 = vpop.f32.mrb[35].mxu1 }
 0x538   : > { %7872 = vmatprep.mubr.msk.f32.mxu0 %vm1340_vm0, %v1642_v12 }
 0x539   : > { %7873 = vmatmul.mubr.msk.f32.gmra.mrb[50].mxu0 %vm1340_vm0, %v7848_v42 }
 0x53e   : > { %v7851_v48 = vpop.f32.mrb[36].mxu1 }
 0x53f   : > { %v1652_v24 = vpop.f32.mrb[37].mxu1 }
 0x540   : > { %7875 = vmatprep.mubr.msk.f32.mxu0 %vm1340_vm0, %v1652_v24 }
 0x541   : > { %7876 = vmatmul.mubr.msk.f32.gmra.mrb[52].mxu0 %vm1340_vm0, %v7851_v48 }
 0x546   : > { %v7854_v45 = vpop.f32.mrb[38].mxu1 }
 0x547   : > { %v1662_v30 = vpop.f32.mrb[39].mxu1 }
 0x548   : > { %7878 = vmatprep.mubr.msk.f32.mxu0 %vm1340_vm0, %v1662_v30 }
 0x549   : > { %7879 = vmatmul.mubr.msk.f32.gmra.mrb[54].mxu0 %vm1340_vm0, %v7854_v45 }
 0x54e   : > { %v7857_v25 = vpop.f32.mrb[40].mxu1 }
 0x54f   : > { %v1672_v6 = vpop.f32.mrb[41].mxu1 }
 0x550   : > { %7881 = vmatprep.mubr.msk.f32.mxu0 %vm1340_vm0, %v1672_v6 }
 0x551   : > { %7882 = vmatmul.mubr.msk.f32.gmra.mrb[56].mxu0 %vm1340_vm0, %v7857_v25 }
 0x556   : > { %v7860_v22 = vpop.f32.mrb[42].mxu1 }
 0x557   : > { %v1682_v23 = vpop.f32.mrb[43].mxu1 }
 0x558   : > { %7884 = vmatprep.mubr.msk.f32.mxu0 %vm1340_vm0, %v1682_v23 }
 0x559   : > { %7885 = vmatmul.mubr.msk.f32.gmra.mrb[58].mxu0 %vm1340_vm0, %v7860_v22 }
 0x55e   : > { %v7863_v38 = vpop.f32.mrb[44].mxu1 }
 0x55f   : > { %v1692_v33 = vpop.f32.mrb[45].mxu1 }
 0x560   : > { %7887 = vmatprep.mubr.msk.f32.mxu0 %vm1340_vm0, %v1692_v33 }
 0x561   : > { %7888 = vmatmul.mubr.msk.f32.gmra.mrb[60].mxu0 %vm1340_vm0, %v7863_v38 }
 0x566   : > { %v7866_v1 = vpop.f32.mrb[46].mxu1 }
 0x567   : > { %v1702_v3 = vpop.f32.mrb[47].mxu1 }
 0x568   : > { %7890 = vmatprep.mubr.msk.f32.mxu0 %vm1340_vm0, %v1702_v3 }
 0x569   : > { %7891 = vmatmul.mubr.msk.f32.gmra.mrb[62].mxu0 %vm1340_vm0, %v7866_v1 }
 0x56a   : > { %v7927_v55 = vpop.f32.mrb[48].mxu1 }
 0x56b   : > { %v2018_v41 = vpop.f32.mrb[49].mxu1 }
 0x56c   : > { %7951 = vmatprep.mubr.msk.f32.mxu0 %vm1340_vm0, %v2018_v41 }
 0x56d   : > { %7952 = vmatmul.mubr.msk.f32.vlgmr.msra.gmra.mrb[64].mxu0 %vm1340_vm0, %v7927_v55 }
 0x56e   : > { %8032 = vmatpush3.msra.mxu0 %v9721_v47  ;;  %v7930_v14 = vpop.f32.mrb[50].mxu1 }
 0x56f   : > { %8089 = vmatprep.subr.bf16.mxu0 %v9767_v16  ;;  %v2028_v5 = vpop.f32.mrb[51].mxu1 }
 0x570   : > { %7954 = vmatprep.mubr.msk.f32.mxu0 %vm1340_vm0, %v2028_v5 }
 0x571   : > { %7955 = vmatmul.mubr.msk.f32.gmra.mrb[66].mxu0 %vm1340_vm0, %v7930_v14 }
 0x572   : > { %v7933_v42 = vpop.f32.mrb[52].mxu1 }
 0x573   : > { %v2038_v12 = vpop.f32.mrb[53].mxu1 }
 0x574   : > { %7957 = vmatprep.mubr.msk.f32.mxu0 %vm1340_vm0, %v2038_v12 }
 0x575   : > { %7958 = vmatmul.mubr.msk.f32.gmra.mrb[68].mxu0 %vm1340_vm0, %v7933_v42 }
 0x576   : > { %v7936_v48 = vpop.f32.mrb[54].mxu1 }
 0x577   : > { %v2048_v24 = vpop.f32.mrb[55].mxu1 }
 0x578   : > { %7960 = vmatprep.mubr.msk.f32.mxu0 %vm1340_vm0, %v2048_v24 }
 0x579   : > { %7961 = vmatmul.mubr.msk.f32.gmra.mrb[70].mxu0 %vm1340_vm0, %v7936_v48 }
 0x57a   : > { %v7939_v47 = vpop.f32.mrb[56].mxu1 }
 0x57b   : > { %v2058_v45 = vpop.f32.mrb[57].mxu1 }
 0x57c   : > { %7963 = vmatprep.mubr.msk.f32.mxu0 %vm1340_vm0, %v2058_v45 }
 0x57d   : > { %7964 = vmatmul.mubr.msk.f32.gmra.mrb[72].mxu0 %vm1340_vm0, %v7939_v47 }
 0x57e   : > { %v7942_v30 = vpop.f32.mrb[58].mxu1 }
 0x57f   : > { %v2068_v25 = vpop.f32.mrb[59].mxu1 }
 0x580   : > { %7966 = vmatprep.mubr.msk.f32.mxu0 %vm1340_vm0, %v2068_v25 }
 0x581   : > { %7967 = vmatmul.mubr.msk.f32.gmra.mrb[74].mxu0 %vm1340_vm0, %v7942_v30 }
 0x582   : > { %v7945_v6 = vpop.f32.mrb[60].mxu1 }
 0x583   : > { %v2078_v22 = vpop.f32.mrb[61].mxu1 }
 0x584   : > { %7969 = vmatprep.mubr.msk.f32.mxu0 %vm1340_vm0, %v2078_v22 }
 0x585   : > { %7970 = vmatmul.mubr.msk.f32.gmra.mrb[76].mxu0 %vm1340_vm0, %v7945_v6 }
 0x586   : > { %v7948_v23 = vpop.f32.mrb[62].mxu1 }
 0x587   : > { %v2088_v38 = vpop.f32.mrb[63].mxu1 }
 0x588   : > { %7972 = vmatprep.mubr.msk.f32.mxu0 %vm1340_vm0, %v2088_v38 }
 0x589   : > { %7973 = vmatmul.mubr.msk.f32.gmra.mrb[78].mxu0 %vm1340_vm0, %v7948_v23 }
 0x604   : > { %v7871_v33 = vpop.f32.mrb[48].mxu0 }
 0x605   : > { %v1831_v1 = vadd.f32 1e-06, %v7871_v33  ;;  %v1825_v3 = vpop.f32.mrb[49].mxu0 }
 0x606   : > { %v1826_v55 = vadd.f32 1e-06, %v1825_v3 }
 0x607   : > { %8664 = vrsqrt.f32 %v1831_v1 }
 0x608   : > { %8666 = vrsqrt.f32 %v1826_v55 }
 0x60c   : > { %v7874_v41 = vpop.f32.mrb[50].mxu0 }
 0x60d   : > { %v1841_v14 = vadd.f32 1e-06, %v7874_v41  ;;  %v1835_v5 = vpop.f32.mrb[51].mxu0 }
 0x60e   : > { %v1836_v42 = vadd.f32 1e-06, %v1835_v5 }
 0x60f   : > { %8668 = vrsqrt.f32 %v1841_v14 }
 0x610   : > { %8670 = vrsqrt.f32 %v1836_v42 }
 0x611   : > { %v8665_v12 = vpop.eup %8664 }
 0x612   : > { %v8667_v48 = vpop.eup %8666  ;;  %v1921_v24 = vmul.f32 %v8665_v12, %v9905_v13 }
 0x613   : > { %v1920_v47 = vmul.f32 %v8667_v48, %v9908_v44 }
 0x614   : > { %v7877_v45 = vpop.f32.mrb[52].mxu0  ;;  %v1937_v30 = vmul.f32 0.0078125, %v1921_v24 }
 0x615   : > { %v1851_v25 = vadd.f32 1e-06, %v7877_v45  ;;  %v1845_v6 = vpop.f32.mrb[53].mxu0  ;;  %v1936_v22 = vmul.f32 0.0078125, %v1920_v47 }
 0x616   : > { %v1846_v23 = vadd.f32 1e-06, %v1845_v6 }
 0x617   : > { %8672 = vrsqrt.f32 %v1851_v25  ;;  %v10119_v38 = vpack.c.bf16 %v1937_v30, %v1936_v22 }
 0x618   : > { %8674 = vrsqrt.f32 %v1846_v23 }
 0x619   : > { %v8669_v33 = vpop.eup %8668 }
 0x61a   : > { %v8671_v1 = vpop.eup %8670  ;;  %v1923_v3 = vmul.f32 %v8669_v33, %v9916_v4 }
 0x61b   : > { %v1922_v55 = vmul.f32 %v8671_v1, %v9920_v46 }
 0x61c   : > { %v7880_v41 = vpop.f32.mrb[54].mxu0  ;;  %v1939_v13 = vmul.f32 0.0078125, %v1923_v3 }
 0x61d   : > { %v1861_v14 = vadd.f32 1e-06, %v7880_v41  ;;  %v1855_v44 = vpop.f32.mrb[55].mxu0  ;;  %v1938_v5 = vmul.f32 0.0078125, %v1922_v55 }
 0x61e   : > { %v1856_v42 = vadd.f32 1e-06, %v1855_v44 }
 0x61f   : > { %8676 = vrsqrt.f32 %v1861_v14  ;;  %v10123_v12 = vpack.c.bf16 %v1939_v13, %v1938_v5 }
 0x620   : > { %8678 = vrsqrt.f32 %v1856_v42 }
 0x621   : > { %v8673_v48 = vpop.eup %8672  ;;  %3306 = vrot.lane.b32.xlu1 %v10123_v12, %s9141_s24 }
 0x622   : > { %v8675_v24 = vpop.eup %8674  ;;  %v1925_v4 = vmul.f32 %v8673_v48, %v9930_v56 }
 0x623   : > { %v1924_v46 = vmul.f32 %v8675_v24, %v9934_v52 }
 0x624   : > { %v7883_v47 = vpop.f32.mrb[56].mxu0  ;;  %v1941_v45 = vmul.f32 0.0078125, %v1925_v4 }
 0x625   : > { %v1871_v30 = vadd.f32 1e-06, %v7883_v47  ;;  %v1865_v25 = vpop.f32.mrb[57].mxu0  ;;  %v1940_v6 = vmul.f32 0.0078125, %v1924_v46 }
 0x626   : > { %v1866_v22 = vadd.f32 1e-06, %v1865_v25 }
 0x627   : > { %8680 = vrsqrt.f32 %v1871_v30  ;;  %v10129_v23 = vpack.c.bf16 %v1941_v45, %v1940_v6 }
 0x628   : > { %8682 = vrsqrt.f32 %v1866_v22 }
 0x629   : > { %v8677_v33 = vpop.eup %8676 }
 0x62a   : > { %v8679_v1 = vpop.eup %8678  ;;  %v1927_v3 = vmul.f32 %v8677_v33, %v9944_v59 }
 0x62b   : > { %v1926_v55 = vmul.f32 %v8679_v1, %v9948_v58 }
 0x62c   : > { %v7886_v41 = vpop.f32.mrb[58].mxu0  ;;  %v1943_v56 = vmul.f32 0.0078125, %v1927_v3 }
 0x62d   : > { %v1881_v13 = vadd.f32 1e-06, %v7886_v41  ;;  %v1875_v52 = vpop.f32.mrb[59].mxu0  ;;  %v1942_v14 = vmul.f32 0.0078125, %v1926_v55 }
 0x62e   : > { %v1876_v44 = vadd.f32 1e-06, %v1875_v52 }
 0x62f   : > { %8684 = vrsqrt.f32 %v1881_v13  ;;  %v10133_v5 = vpack.c.bf16 %v1943_v56, %v1942_v14 }
 0x630   : > { %8686 = vrsqrt.f32 %v1876_v44 }
 0x631   : > { %v8681_v42 = vpop.eup %8680 }
 0x632   : > { %v8683_v48 = vpop.eup %8682  ;;  %v1929_v24 = vmul.f32 %v8681_v42, %v9958_v8 }
 0x633   : > { %v1928_v4 = vmul.f32 %v8683_v48, %v9962_v57 }
 0x634   : > { %v7889_v46 = vpop.f32.mrb[60].mxu0  ;;  %v1945_v59 = vmul.f32 0.0078125, %v1929_v24 }
 0x635   : > { %v1891_v47 = vadd.f32 1e-06, %v7889_v46  ;;  %v1885_v58 = vpop.f32.mrb[61].mxu0  ;;  %v1944_v45 = vmul.f32 0.0078125, %v1928_v4 }
 0x636   : > { %v1886_v30 = vadd.f32 1e-06, %v1885_v58 }
 0x637   : > { %8688 = vrsqrt.f32 %v1891_v47  ;;  %v10137_v25 = vpack.c.bf16 %v1945_v59, %v1944_v45 }
 0x638   : > { %8690 = vrsqrt.f32 %v1886_v30 }
 0x639   : > { %v8685_v6 = vpop.eup %8684 }
 0x63a   : > { %v8687_v22 = vpop.eup %8686  ;;  %v1931_v33 = vmul.f32 %v8685_v6, %v9971_v36 }
 0x63b   : > { %v1930_v1 = vmul.f32 %v8687_v22, %v9974_v27 }
 0x63c   : > { %v7892_v3 = vpop.f32.mrb[62].mxu0  ;;  %v1947_v8 = vmul.f32 0.0078125, %v1931_v33 }
 0x63d   : > { %v1901_v55 = vadd.f32 1e-06, %v7892_v3  ;;  %v1895_v57 = vpop.f32.mrb[63].mxu0  ;;  %v1946_v41 = vmul.f32 0.0078125, %v1930_v1 }
 0x63e   : > { %v1896_v56 = vadd.f32 1e-06, %v1895_v57 }
 0x63f   : > { %8692 = vrsqrt.f32 %v1901_v55  ;;  %v10141_v13 = vpack.c.bf16 %v1947_v8, %v1946_v41 }
 0x640   : > { %8694 = vrsqrt.f32 %v1896_v56  ;;  %v7953_v52 = vpop.f32.mrb[64].mxu0 }
 0x641   : > { %v8689_v14 = vpop.eup %8688  ;;  %v10144_v44 = vsub.f32 %v10007_v11, %v7953_v52  ;;  %v2211_v42 = vpop.f32.mrb[65].mxu0 }
 0x642   : > { %v8691_v48 = vpop.eup %8690  ;;  %v10147_v36 = vsub.f32 %v10003_v39, %v2211_v42  ;;  %v1933_v27 = vmul.f32 %v8689_v14, %v9981_v43 }
 0x643   : > { %v1932_v24 = vmul.f32 %v8691_v48, %v9984_v28  ;;  %v2307_v47 = vmul.f32 %v10144_v44, %v10144_v44 }
 0x644   : > { %v2306_v4 = vmul.f32 %v10147_v36, %v10147_v36  ;;  %v7956_v46 = vpop.f32.mrb[66].mxu0  ;;  %v1949_v59 = vmul.f32 0.0078125, %v1933_v27 }
 0x645   : > { %v10156_v11 = vsub.f32 %v10016_v40, %v7956_v46  ;;  %v2221_v58 = vpop.f32.mrb[67].mxu0  ;;  %v1948_v45 = vmul.f32 0.0078125, %v1932_v24 }
 0x646   : > { %v10159_v39 = vsub.f32 %v10010_v50, %v2221_v58  ;;  %8007 = vmatprep.mubr.f32.mxu1 %v2306_v4 }
 0x647   : > { %8008 = vmatmul.mubr.f32.vlgmr.msra.gmra.mrb[64].mxu1 %v2307_v47  ;;  %v10161_v43 = vpack.c.bf16 %v1949_v59, %v1948_v45  ;;  %v2309_v22 = vmul.f32 %v10156_v11, %v10156_v11 }
 0x648   : > { %v2308_v28 = vmul.f32 %v10159_v39, %v10159_v39  ;;  %v7959_v30 = vpop.f32.mrb[68].mxu0 }
 0x649   : > { %v8693_v6 = vpop.eup %8692  ;;  %v10168_v40 = vsub.f32 %v10026_v60, %v7959_v30  ;;  %v2231_v33 = vpop.f32.mrb[69].mxu0 }
 0x64a   : > { %v8695_v1 = vpop.eup %8694  ;;  %v10171_v50 = vsub.f32 %v10020_v49, %v2231_v33  ;;  %8010 = vmatprep.mubr.f32.mxu1 %v2308_v28  ;;  %v1935_v3 = vmul.f32 %v8693_v6, %v9991_v10 }
 0x64b   : > { %8011 = vmatmul.mubr.f32.gmra.mrb[66].mxu1 %v2309_v22  ;;  %v1934_v8 = vmul.f32 %v8695_v1, %v9996_v61  ;;  %v2311_v60 = vmul.f32 %v10168_v40, %v10168_v40 }
 0x64c   : > { %v2310_v55 = vmul.f32 %v10171_v50, %v10171_v50  ;;  %v7962_v57 = vpop.f32.mrb[70].mxu0  ;;  %v1951_v41 = vmul.f32 0.0078125, %v1935_v3 }
 0x64d   : > { %v10180_v56 = vsub.f32 %v10036_v9, %v7962_v57  ;;  %v2241_v52 = vpop.f32.mrb[71].mxu0  ;;  %v1950_v49 = vmul.f32 0.0078125, %v1934_v8 }
 0x64e   : > { %v10183_v14 = vsub.f32 %v10030_v51, %v2241_v52  ;;  %8013 = vmatprep.mubr.f32.mxu1 %v2310_v55 }
 0x64f   : > { %8014 = vmatmul.mubr.f32.gmra.mrb[68].mxu1 %v2311_v60  ;;  %v10185_v10 = vpack.c.bf16 %v1951_v41, %v1950_v49  ;;  %v2313_v48 = vmul.f32 %v10180_v56, %v10180_v56 }
 0x650   : > { %v2312_v61 = vmul.f32 %v10183_v14, %v10183_v14  ;;  %v7965_v42 = vpop.f32.mrb[72].mxu0 }
 0x651   : > { %v10192_v27 = vsub.f32 %v10046_v21, %v7965_v42  ;;  %v2251_v9 = vpop.f32.mrb[73].mxu0 }
 0x652   : > { %v10195_v24 = vsub.f32 %v10040_v35, %v2251_v9  ;;  %8016 = vmatprep.mubr.f32.mxu1 %v2312_v61 }
 0x653   : > { %8017 = vmatmul.mubr.f32.gmra.mrb[70].mxu1 %v2313_v48  ;;  %v2315_v46 = vmul.f32 %v10192_v27, %v10192_v27 }
 0x654   : > { %v2314_v51 = vmul.f32 %v10195_v24, %v10195_v24  ;;  %v7968_v4 = vpop.f32.mrb[74].mxu0 }
 0x655   : > { %v10202_v59 = vsub.f32 %v10056_v17, %v7968_v4  ;;  %v2261_v47 = vpop.f32.mrb[75].mxu0 }
 0x656   : > { %v10205_v21 = vsub.f32 %v10050_v53, %v2261_v47  ;;  %8019 = vmatprep.mubr.f32.mxu1 %v2314_v51 }
 0x657   : > { %8020 = vmatmul.mubr.f32.gmra.mrb[72].mxu1 %v2315_v46  ;;  %v2317_v45 = vmul.f32 %v10202_v59, %v10202_v59 }
 0x658   : > { %v2316_v35 = vmul.f32 %v10205_v21, %v10205_v21  ;;  %v7971_v58 = vpop.f32.mrb[76].mxu0 }
 0x659   : > { %v10212_v28 = vsub.f32 %v10066_v15, %v7971_v58  ;;  %v2271_v30 = vpop.f32.mrb[77].mxu0 }
 0x65a   : > { %v10215_v17 = vsub.f32 %v10060_v0, %v2271_v30  ;;  %8022 = vmatprep.mubr.f32.mxu1 %v2316_v35 }
 0x65b   : > { %8023 = vmatmul.mubr.f32.gmra.mrb[74].mxu1 %v2317_v45  ;;  %v2319_v22 = vmul.f32 %v10212_v28, %v10212_v28 }
 0x65c   : > { %v2318_v53 = vmul.f32 %v10215_v17, %v10215_v17  ;;  %v7974_v6 = vpop.f32.mrb[78].mxu0 }
 0x65d   : > { %v10222_v33 = vsub.f32 %v10076_v62, %v7974_v6  ;;  %v2281_v1 = vpop.f32.mrb[79].mxu0 }
 0x65e   : > { %v10225_v15 = vsub.f32 %v10070_v20, %v2281_v1  ;;  %8025 = vmatprep.mubr.f32.mxu1 %v2318_v53 }
 0x65f   : > { %8026 = vmatmul.mubr.f32.gmra.mrb[76].mxu1 %v2319_v22  ;;  %v2321_v3 = vmul.f32 %v10222_v33, %v10222_v33 }
 0x660   : > { %v2320_v0 = vmul.f32 %v10225_v15, %v10225_v15 }
 0x662   : > { %8028 = vmatprep.mubr.f32.mxu1 %v2320_v0 }
 0x663   : > { %8029 = vmatmul.mubr.f32.gmra.mrb[78].mxu1 %v2321_v3 }
 0x664   : > { %8073 = vmatprep.mubr.msk.bf16.mxu1 %vm2724_vm1, %v10119_v38 }
 0x71a   : > { %v8009_v62 = vpop.f32.mrb[64].mxu1 }
 0x71b   : > { %v2388_v8 = vpop.f32.mrb[65].mxu1 }
 0x71c   : > { %8033 = vmatprep.mubr.msk.f32.mxu0 %vm1340_vm0, %v2388_v8 }
 0x71d   : > { %8034 = vmatmul.mubr.msk.f32.vlgmr.msra.gmra.mrb[80].mxu0 %vm1340_vm0, %v8009_v62 }
 0x71e   : > { %8090 = vmatpush3.bf16.msra.mxu0 %v9767_v16  ;;  %v8012_v20 = vpop.f32.mrb[66].mxu1 }
 0x71f   : > { %8091 = vmatprep.subr.bf16.mxu0 %v9760_v7  ;;  %v2398_v55 = vpop.f32.mrb[67].mxu1 }
 0x720   : > { %8036 = vmatprep.mubr.msk.f32.mxu0 %vm1340_vm0, %v2398_v55 }
 0x721   : > { %8037 = vmatmul.mubr.msk.f32.gmra.mrb[82].mxu0 %vm1340_vm0, %v8012_v20 }
 0x722   : > { %8092 = vmatpush3.bf16.msra.mxu0 %v9760_v7  ;;  %v8015_v57 = vpop.f32.mrb[68].mxu1 }
 0x723   : > { %8093 = vmatprep.subr.bf16.mxu0 %v9791_v37  ;;  %v2408_v41 = vpop.f32.mrb[69].mxu1 }
 0x724   : > { %8039 = vmatprep.mubr.msk.f32.mxu0 %vm1340_vm0, %v2408_v41 }
 0x725   : > { %8040 = vmatmul.mubr.msk.f32.gmra.mrb[84].mxu0 %vm1340_vm0, %v8015_v57 }
 0x726   : > { %8094 = vmatpush3.bf16.msra.mxu0 %v9791_v37  ;;  %v8018_v60 = vpop.f32.mrb[70].mxu1 }
 0x727   : > { %8095 = vmatprep.subr.bf16.mxu0 %v9784_v34  ;;  %v2418_v52 = vpop.f32.mrb[71].mxu1 }
 0x728   : > { %8042 = vmatprep.mubr.msk.f32.mxu0 %vm1340_vm0, %v2418_v52 }
 0x729   : > { %8043 = vmatmul.mubr.msk.f32.gmra.mrb[86].mxu0 %vm1340_vm0, %v8018_v60 }
 0x72a   : > { %8096 = vmatpush3.bf16.msra.mxu0 %v9784_v34  ;;  %v8021_v49 = vpop.f32.mrb[72].mxu1 }
 0x72b   : > { %8097 = vmatprep.subr.bf16.mxu0 %v9815_v63  ;;  %v2428_v61 = vpop.f32.mrb[73].mxu1 }
 0x72c   : > { %8045 = vmatprep.mubr.msk.f32.mxu0 %vm1340_vm0, %v2428_v61 }
 0x72d   : > { %8046 = vmatmul.mubr.msk.f32.gmra.mrb[88].mxu0 %vm1340_vm0, %v8021_v49 }
 0x72e   : > { %8098 = vmatpush3.bf16.msra.mxu0 %v9815_v63  ;;  %v8024_v42 = vpop.f32.mrb[74].mxu1 }
 0x72f   : > { %8099 = vmatprep.subr.bf16.mxu0 %v9808_v32  ;;  %v2438_v48 = vpop.f32.mrb[75].mxu1 }
 0x730   : > { %8048 = vmatprep.mubr.msk.f32.mxu0 %vm1340_vm0, %v2438_v48 }
 0x731   : > { %8049 = vmatmul.mubr.msk.f32.gmra.mrb[90].mxu0 %vm1340_vm0, %v8024_v42 }
 0x732   : > { %8100 = vmatpush3.bf16.msra.mxu0 %v9808_v32  ;;  %v8027_v9 = vpop.f32.mrb[76].mxu1 }
 0x733   : > { %8101 = vmatprep.subr.bf16.mxu0 %v9839_v29  ;;  %v2448_v51 = vpop.f32.mrb[77].mxu1 }
 0x734   : > { %8051 = vmatprep.mubr.msk.f32.mxu0 %vm1340_vm0, %v2448_v51 }
 0x735   : > { %8052 = vmatmul.mubr.msk.f32.gmra.mrb[92].mxu0 %vm1340_vm0, %v8027_v9 }
 0x736   : > { %8102 = vmatpush3.bf16.msra.mxu0 %v9839_v29  ;;  %v8030_v4 = vpop.f32.mrb[78].mxu1 }
 0x737   : > { %8103 = vmatprep.subr.bf16.mxu0 %v9832_v26  ;;  %v2458_v46 = vpop.f32.mrb[79].mxu1 }
 0x738   : > { %8054 = vmatprep.mubr.msk.f32.mxu0 %vm1340_vm0, %v2458_v46 }
 0x739   : > { %8055 = vmatmul.mubr.msk.f32.gmra.mrb[94].mxu0 %vm1340_vm0, %v8030_v4 }
 0x73a   : > { %8104 = vmatpush3.bf16.msra.mxu0 %v9832_v26 }
 0x7f0   : > { %v8035_v47 = vpop.f32.mrb[80].mxu0 }
 0x7f1   : > { %v2587_v35 = vadd.f32 1e-06, %v8035_v47  ;;  %v2581_v58 = vpop.f32.mrb[81].mxu0 }
 0x7f2   : > { %v2582_v45 = vadd.f32 1e-06, %v2581_v58 }
 0x7f3   : > { %8696 = vrsqrt.f32 %v2587_v35 }
 0x7f4   : > { %8698 = vrsqrt.f32 %v2582_v45  ;;  %v8038_v30 = vpop.f32.mrb[82].mxu0 }
 0x7f5   : > { %v2597_v53 = vadd.f32 1e-06, %v8038_v30  ;;  %v2591_v6 = vpop.f32.mrb[83].mxu0 }
 0x7f6   : > { %v2592_v22 = vadd.f32 1e-06, %v2591_v6 }
 0x7f7   : > { %8700 = vrsqrt.f32 %v2597_v53 }
 0x7f8   : > { %8702 = vrsqrt.f32 %v2592_v22  ;;  %v8041_v1 = vpop.f32.mrb[84].mxu0 }
 0x7f9   : > { %v2607_v0 = vadd.f32 1e-06, %v8041_v1  ;;  %v2601_v3 = vpop.f32.mrb[85].mxu0 }
 0x7fa   : > { %v2602_v62 = vadd.f32 1e-06, %v2601_v3 }
 0x7fb   : > { %8704 = vrsqrt.f32 %v2607_v0 }
 0x7fc   : > { %8706 = vrsqrt.f32 %v2602_v62  ;;  %v8044_v8 = vpop.f32.mrb[86].mxu0 }
 0x7fd   : > { %v8697_v20 = vpop.eup %8696  ;;  %v2617_v55 = vadd.f32 1e-06, %v8044_v8  ;;  %v2611_v57 = vpop.f32.mrb[87].mxu0 }
 0x7fe   : > { %v8699_v41 = vpop.eup %8698  ;;  %v2612_v60 = vadd.f32 1e-06, %v2611_v57  ;;  %v2677_v52 = vmul.f32 %v8697_v20, %v10144_v44 }
 0x7ff   : > { %8708 = vrsqrt.f32 %v2617_v55  ;;  %v2676_v49 = vmul.f32 %v8699_v41, %v10147_v36 }
 0x800   : > { %8710 = vrsqrt.f32 %v2612_v60  ;;  %v8047_v61 = vpop.f32.mrb[88].mxu0 }
 0x801   : > { %v8701_v42 = vpop.eup %8700  ;;  %v2627_v48 = vadd.f32 1e-06, %v8047_v61  ;;  %v2621_v9 = vpop.f32.mrb[89].mxu0  ;;  %v2708_v51 = vpack.c.bf16 %v2677_v52, %v2676_v49 }
 0x802   : > { %v8703_v4 = vpop.eup %8702  ;;  %v2622_v46 = vadd.f32 1e-06, %v2621_v9  ;;  %v2679_v47 = vmul.f32 %v8701_v42, %v10156_v11 }
 0x803   : > { %8712 = vrsqrt.f32 %v2627_v48  ;;  %3328 = vrot.lane.b32.xlu0 %v2708_v51, %s9141_s24  ;;  %8409 = vmatprep.subr.msk.bf16.mxu1 %vm2724_vm1, %v2708_v51  ;;  %v2750_v44 = vsel %vm2724_vm1, %v2708_v51, 0  ;;  %v2678_v35 = vmul.f32 %v8703_v4, %v10159_v39 }
 0x804   : > { %8714 = vrsqrt.f32 %v2622_v46  ;;  %v8050_v36 = vpop.f32.mrb[90].mxu0  ;;  %8058 = vmatpush3.bf16.xpose.msra.mxu1 %v2750_v44 }
 0x805   : > { %v8705_v58 = vpop.eup %8704  ;;  %v2637_v45 = vadd.f32 1e-06, %v8050_v36  ;;  %v2631_v30 = vpop.f32.mrb[91].mxu0  ;;  %v2709_v53 = vpack.c.bf16 %v2679_v47, %v2678_v35 }
 0x806   : > { %v8707_v6 = vpop.eup %8706  ;;  %v2632_v22 = vadd.f32 1e-06, %v2631_v30  ;;  %v2681_v11 = vmul.f32 %v8705_v58, %v10168_v40 }
 0x807   : > { %8716 = vrsqrt.f32 %v2637_v45  ;;  %3330 = vrot.lane.b32.xlu1 %v2709_v53, %s9141_s24  ;;  %3304 = vrot.lane.b32.xlu0 %v10119_v38, %s9141_s24  ;;  %v2680_v1 = vmul.f32 %v8707_v6, %v10171_v50  ;;  %v2753_v38 = vsel %vm2724_vm1, %v2709_v53, 0 }
 0x808   : > { %8718 = vrsqrt.f32 %v2632_v22  ;;  %8410 = vmatprep.subr.msk.bf16.mxu1 %vm2724_vm1, %v2709_v53  ;;  %v8053_v39 = vpop.f32.mrb[92].mxu0  ;;  %v3307_v22 = vpop.permute.xlu1 %3306 }
 0x809   : > { %v8709_v0 = vpop.eup %8708  ;;  %v2647_v3 = vadd.f32 1e-06, %v8053_v39  ;;  %v2641_v62 = vpop.f32.mrb[93].mxu0  ;;  %v2710_v8 = vpack.c.bf16 %v2681_v11, %v2680_v1 }
 0x80a   : > { %v8711_v20 = vpop.eup %8710  ;;  %v2642_v55 = vadd.f32 1e-06, %v2641_v62  ;;  %v2683_v40 = vmul.f32 %v8709_v0, %v10180_v56 }
 0x80b   : > { %8720 = vrsqrt.f32 %v2647_v3  ;;  %3310 = vrot.lane.b32.xlu1 %v10133_v5, %s9141_s24  ;;  %3308 = vrot.lane.b32.xlu0 %v10129_v23, %s9141_s24  ;;  %v2682_v50 = vmul.f32 %v8711_v20, %v10183_v14 }
 0x80c   : > { %8722 = vrsqrt.f32 %v2642_v55  ;;  %v8056_v57 = vpop.f32.mrb[94].mxu0  ;;  %8060 = vmatpush3.bf16.xpose.msra.mxu1 %v2753_v38 }
 0x80d   : > { %v8713_v41 = vpop.eup %8712  ;;  %v2657_v60 = vadd.f32 1e-06, %v8056_v57  ;;  %v2651_v52 = vpop.f32.mrb[95].mxu0  ;;  %8411 = vmatprep.subr.msk.bf16.mxu1 %vm2724_vm1, %v2710_v8  ;;  %v2711_v56 = vpack.c.bf16 %v2683_v40, %v2682_v50 }
 0x80e   : > { %v8715_v49 = vpop.eup %8714  ;;  %v2652_v61 = vadd.f32 1e-06, %v2651_v52  ;;  %v2685_v42 = vmul.f32 %v8713_v41, %v10192_v27  ;;  %v2756_v27 = vsel %vm2724_vm1, %v2710_v8, 0 }
 0x80f   : > { %8724 = vrsqrt.f32 %v2657_v60  ;;  %3332 = vrot.lane.b32.xlu1 %v2710_v8, %s9141_s24  ;;  %3312 = vrot.lane.b32.xlu0 %v10137_v25, %s9141_s24  ;;  %v2684_v14 = vmul.f32 %v8715_v49, %v10195_v24 }
 0x810   : > { %8726 = vrsqrt.f32 %v2652_v61 }
 0x811   : > { %v8717_v48 = vpop.eup %8716  ;;  %v2712_v9 = vpack.c.bf16 %v2685_v42, %v2684_v14 }
 0x812   : > { %v8719_v51 = vpop.eup %8718  ;;  %v2687_v4 = vmul.f32 %v8717_v48, %v10202_v59 }
 0x813   : > { %3314 = vrot.lane.b32.xlu1 %v10141_v13, %s9141_s24  ;;  %3336 = vrot.lane.b32.xlu0 %v2712_v9, %s9141_s24  ;;  %v2686_v46 = vmul.f32 %v8719_v51, %v10205_v21  ;;  %v2759_v21 = vsel %vm2724_vm1, %v2711_v56, 0 }
 0x814   : > { %8062 = vmatpush3.bf16.xpose.msra.mxu1 %v2756_v27 }
 0x815   : > { %v8721_v47 = vpop.eup %8720  ;;  %8412 = vmatprep.subr.msk.bf16.mxu1 %vm2724_vm1, %v2711_v56  ;;  %v2713_v24 = vpack.c.bf16 %v2687_v4, %v2686_v46 }
 0x816   : > { %v8723_v44 = vpop.eup %8722  ;;  %v2689_v35 = vmul.f32 %v8721_v47, %v10212_v28 }
 0x817   : > { %3334 = vrot.lane.b32.xlu1 %v2711_v56, %s9141_s24  ;;  %v2688_v59 = vmul.f32 %v8723_v44, %v10215_v17  ;;  %v2762_v17 = vsel %vm2724_vm1, %v2712_v9, 0 }
 0x819   : > { %v8725_v36 = vpop.eup %8724  ;;  %v2714_v58 = vpack.c.bf16 %v2689_v35, %v2688_v59 }
 0x81a   : > { %v8727_v45 = vpop.eup %8726  ;;  %v2691_v30 = vmul.f32 %v8725_v36, %v10222_v33  ;;  %v2765_v33 = vsel %vm2724_vm1, %v2713_v24, 0 }
 0x81b   : > { %3338 = vrot.lane.b32.xlu1 %v2713_v24, %s9141_s24  ;;  %3340 = vrot.lane.b32.xlu0 %v2714_v58, %s9141_s24  ;;  %v2690_v53 = vmul.f32 %v8727_v45, %v10225_v15  ;;  %v2768_v6 = vsel %vm2724_vm1, %v2714_v58, 0 }
 0x81c   : > { %8064 = vmatpush3.bf16.xpose.msra.mxu1 %v2759_v21 }
 0x81d   : > { %8413 = vmatprep.subr.msk.bf16.mxu1 %vm2724_vm1, %v2712_v9  ;;  %v2715_v28 = vpack.c.bf16 %v2691_v30, %v2690_v53 }
 0x81f   : > { %3342 = vrot.lane.b32.xlu1 %v2715_v28, %s9141_s24  ;;  %v2771_v15 = vsel %vm2724_vm1, %v2715_v28, 0 }
 0x824   : > { %8066 = vmatpush3.bf16.xpose.msra.mxu1 %v2762_v17 }
 0x825   : > { %8414 = vmatprep.subr.msk.bf16.mxu1 %vm2724_vm1, %v2713_v24 }
 0x82c   : > { %8068 = vmatpush3.bf16.xpose.msra.mxu1 %v2765_v33 }
 0x82d   : > { %8415 = vmatprep.subr.msk.bf16.mxu1 %vm2724_vm1, %v2714_v58 }
 0x834   : > { %8070 = vmatpush3.bf16.xpose.msra.mxu1 %v2768_v6 }
 0x835   : > { %8416 = vmatprep.subr.msk.bf16.mxu1 %vm2724_vm1, %v2715_v28 }
 0x83c   : > { %8072 = vmatpush3.bf16.xpose.msra.mxu1 %v2771_v15 }
 0x843   : > { %8074 = vmatmul.mubr.msk.bf16.vlgmr.msra.gmra.mrb[80].mxu1 %vm2724_vm1, %v10123_v12 }
 0x844   : > { %8077 = vmatprep.mubr.msk.bf16.mxu1 %vm2724_vm1, %v10129_v23 }
 0x84b   : > { %8078 = vmatmul.mubr.msk.bf16.gmra.mrb[84].mxu1 %vm2724_vm1, %v10133_v5 }
 0x84c   : > { %8081 = vmatprep.mubr.msk.bf16.mxu1 %vm2724_vm1, %v10137_v25 }
 0x853   : > { %8082 = vmatmul.mubr.msk.bf16.gmra.mrb[88].mxu1 %vm2724_vm1, %v10141_v13 }
 0x854   : > { %8085 = vmatprep.mubr.msk.bf16.mxu1 %vm2724_vm1, %v10161_v43 }
 0x85b   : > { %8086 = vmatmul.mubr.msk.bf16.gmra.mrb[92].mxu1 %vm2724_vm1, %v10185_v10 }
 0x875   : > { %v3329_v12 = vpop.permute.xlu0 %3328 }
 0x876   : > { %8417 = vmatprep.subr.msk.bf16.mxu1 %vm2724_vm1, %v3329_v12  ;;  %v3369_v23 = vsel %vm2724_vm1, %v3329_v12, 0 }
 0x877   : > { %8146 = vmatpush3.bf16.xpose.msra.mxu1 %v3369_v23 }
 0x879   : > { %v3331_v5 = vpop.permute.xlu1 %3330  ;;  %v3305_v11 = vpop.permute.xlu0 %3304 }
 0x87a   : > { %8418 = vmatprep.subr.msk.bf16.mxu1 %vm2724_vm1, %v3331_v5  ;;  %8161 = vmatprep.mubr.msk.bf16.mxu1 %vm2724_vm1, %v3305_v11  ;;  %v3372_v13 = vsel %vm2724_vm1, %v3331_v5, 0 }
 0x87d   : > { %v3311_v25 = vpop.permute.xlu1 %3310  ;;  %v3309_v39 = vpop.permute.xlu0 %3308 }
 0x87f   : > { %8148 = vmatpush3.bf16.xpose.msra.mxu1 %v3372_v13 }
 0x881   : > { %v3333_v1 = vpop.permute.xlu1 %3332  ;;  %v3313_v62 = vpop.permute.xlu0 %3312 }
 0x882   : > { %8419 = vmatprep.subr.msk.bf16.mxu1 %vm2724_vm1, %v3333_v1  ;;  %v3375_v3 = vsel %vm2724_vm1, %v3333_v1, 0 }
 0x885   : > { %v3315_v0 = vpop.permute.xlu1 %3314  ;;  %v3337_v55 = vpop.permute.xlu0 %3336 }
 0x886   : > { %v3381_v40 = vsel %vm2724_vm1, %v3337_v55, 0 }
 0x887   : > { %8150 = vmatpush3.bf16.xpose.msra.mxu1 %v3375_v3 }
 0x889   : > { %v3335_v8 = vpop.permute.xlu1 %3334 }
 0x88a   : > { %8420 = vmatprep.subr.msk.bf16.mxu1 %vm2724_vm1, %v3335_v8  ;;  %v3378_v20 = vsel %vm2724_vm1, %v3335_v8, 0 }
 0x88d   : > { %v3339_v38 = vpop.permute.xlu1 %3338  ;;  %v3341_v57 = vpop.permute.xlu0 %3340 }
 0x88e   : > { %v3384_v50 = vsel %vm2724_vm1, %v3339_v38, 0  ;;  %v3387_v41 = vsel %vm2724_vm1, %v3341_v57, 0 }
 0x88f   : > { %8152 = vmatpush3.bf16.xpose.msra.mxu1 %v3378_v20 }
 0x890   : > { %8421 = vmatprep.subr.msk.bf16.mxu1 %vm2724_vm1, %v3337_v55 }
 0x891   : > { %v3343_v60 = vpop.permute.xlu1 %3342 }
 0x892   : > { %v3390_v52 = vsel %vm2724_vm1, %v3343_v60, 0 }
 0x897   : > { %8154 = vmatpush3.bf16.xpose.msra.mxu1 %v3381_v40 }
 0x898   : > { %8422 = vmatprep.subr.msk.bf16.mxu1 %vm2724_vm1, %v3339_v38 }
 0x89f   : > { %8156 = vmatpush3.bf16.xpose.msra.mxu1 %v3384_v50 }
 0x8a0   : > { %8423 = vmatprep.subr.msk.bf16.mxu1 %vm2724_vm1, %v3341_v57 }
 0x8a7   : > { %8158 = vmatpush3.bf16.xpose.msra.mxu1 %v3387_v41 }
 0x8a8   : > { %8424 = vmatprep.subr.msk.bf16.mxu1 %vm2724_vm1, %v3343_v60 }
 0x8af   : > { %8160 = vmatpush3.bf16.xpose.msra.mxu1 %v3390_v52 }
 0x8b6   : > { %8162 = vmatmul.mubr.msk.bf16.vlgmr.msra.gmra.mrb[96].mxu1 %vm2724_vm1, %v3307_v22 }
 0x8b7   : > { %8165 = vmatprep.mubr.msk.bf16.mxu1 %vm2724_vm1, %v3309_v39 }
 0x8be   : > { %8166 = vmatmul.mubr.msk.bf16.gmra.mrb[100].mxu1 %vm2724_vm1, %v3311_v25 }
 0x8bf   : > { %8169 = vmatprep.mubr.msk.bf16.mxu1 %vm2724_vm1, %v3313_v62 }
 0x8c6   : > { %8170 = vmatmul.mubr.msk.bf16.gmra.mrb[104].mxu1 %vm2724_vm1, %v3315_v0 }
 0x916   : > { %v8075_v56 = vpop.f32.mrb[80].mxu1 }
 0x917   : > { %2874 = vmax.xlane.f32.xlu0 %v8075_v56  ;;  %v2807_v49 = vpop.f32.mrb[81].mxu1 }
 0x918   : > { %v8076_v61 = vpop.f32.mrb[82].mxu1 }
 0x919   : > { %v2810_v42 = vpop.f32.mrb[83].mxu1 }
 0x91a   : > { %2872 = vmax.xlane.f32.xlu1 %v2810_v42 }
 0x91b   : > { %2870 = vmax.xlane.f32.xlu0 %v2807_v49 }
 0x91e   : > { %v10350_v14 = vpop.f32.mrb[84].mxu1 }
 0x91f   : > { %2876 = vmax.xlane.f32.xlu0 %v8076_v61  ;;  %2882 = vmax.xlane.f32.xlu1 %v10350_v14  ;;  %v2823_v48 = vpop.f32.mrb[85].mxu1 }
 0x920   : > { %v10353_v9 = vpop.f32.mrb[86].mxu1 }
 0x921   : > { %v2826_v51 = vpop.f32.mrb[87].mxu1 }
 0x923   : > { %2878 = vmax.xlane.f32.xlu0 %v2823_v48  ;;  %2884 = vmax.xlane.f32.xlu1 %v10353_v9 }
 0x926   : > { %v10356_v4 = vpop.f32.mrb[88].mxu1 }
 0x927   : > { %2880 = vmax.xlane.f32.xlu1 %v2826_v51  ;;  %2890 = vmax.xlane.f32.xlu0 %v10356_v4  ;;  %v10359_v27 = vpop.f32.mrb[89].mxu1 }
 0x928   : > { %v10361_v46 = vpop.f32.mrb[90].mxu1 }
 0x929   : > { %v10363_v47 = vpop.f32.mrb[91].mxu1 }
 0x92b   : > { %2886 = vmax.xlane.f32.xlu0 %v10359_v27  ;;  %2888 = vmax.xlane.f32.xlu1 %v10363_v47 }
 0x92e   : > { %v10367_v24 = vpop.f32.mrb[92].mxu1 }
 0x92f   : > { %2892 = vmax.xlane.f32.xlu0 %v10361_v46  ;;  %2898 = vmax.xlane.f32.xlu1 %v10367_v24  ;;  %v10371_v44 = vpop.f32.mrb[93].mxu1 }
 0x930   : > { %v10373_v35 = vpop.f32.mrb[94].mxu1 }
 0x931   : > { %v10375_v59 = vpop.f32.mrb[95].mxu1 }
 0x933   : > { %2894 = vmax.xlane.f32.xlu0 %v10371_v44  ;;  %2900 = vmax.xlane.f32.xlu1 %v10373_v35 }
 0x937   : > { %2896 = vmax.xlane.f32.xlu1 %v10375_v59 }
 0x948   : > { %3318 = vrot.lane.b32.xlu1 %v10185_v10, %s9141_s24 }
 0x949   : > { %3316 = vrot.lane.b32.xlu0 %v10161_v43, %s9141_s24 }
 0x989   : > { %v10384_v36 = vpop.f32.mrb[96].mxu1 }
 0x98a   : > { %v10386_v58 = vpop.f32.mrb[97].mxu1 }
 0x98b   : > { %v10388_v45 = vpop.f32.mrb[98].mxu1 }
 0x98c   : > { %v10390_v30 = vpop.f32.mrb[99].mxu1 }
 0x991   : > { %v10392_v21 = vpop.f32.mrb[100].mxu1 }
 0x992   : > { %v10394_v53 = vpop.f32.mrb[101].mxu1 }
 0x993   : > { %v10396_v28 = vpop.f32.mrb[102].mxu1 }
 0x994   : > { %v10398_v17 = vpop.f32.mrb[103].mxu1 }
 0x999   : > { %v10400_v10 = vpop.f32.mrb[104].mxu1 }
 0x99a   : > { %v10402_v33 = vpop.f32.mrb[105].mxu1 }
 0x99b   : > { %v10404_v43 = vpop.f32.mrb[106].mxu1 }
 0x99c   : > { %v10406_v6 = vpop.f32.mrb[107].mxu1 }
 0x9a4   : > { %v2875_v15 = vpop.xlane.xlu0 %2874 }
 0x9a5   : > { %v2904_v5 = vsub.f32 %v8075_v56, %v2875_v15 }
 0x9a7   : > { %v2873_v22 = vpop.xlane.xlu1 %2872  ;;  %v2922_v0 = vmul.f32 1.442695, %v2904_v5 }
 0x9a8   : > { %v2903_v12 = vsub.f32 %v2810_v42, %v2873_v22  ;;  %v2871_v23 = vpop.xlane.xlu0 %2870 }
 0x9a9   : > { %v2902_v11 = vsub.f32 %v2807_v49, %v2871_v23 }
 0x9aa   : > { %v2920_v25 = vmul.f32 1.442695, %v2903_v12 }
 0x9ab   : > { %v2918_v13 = vmul.f32 1.442695, %v2902_v11 }
 0x9ac   : > { %8728 = vpow2.f32 %v2920_v25  ;;  %v2877_v1 = vpop.xlane.xlu0 %2876  ;;  %v2883_v39 = vpop.xlane.xlu1 %2882 }
 0x9ad   : > { %8730 = vpow2.f32 %v2918_v13  ;;  %v2905_v3 = vsub.f32 %v8076_v61, %v2877_v1  ;;  %v2908_v40 = vsub.f32 %v10350_v14, %v2883_v39 }
 0x9ae   : > { %8732 = vpow2.f32 %v2922_v0 }
 0x9af   : > { %v2924_v20 = vmul.f32 1.442695, %v2905_v3  ;;  %v2930_v61 = vmul.f32 1.442695, %v2908_v40 }
 0x9b0   : > { %v2879_v62 = vpop.xlane.xlu0 %2878  ;;  %v2885_v8 = vpop.xlane.xlu1 %2884 }
 0x9b1   : > { %v2906_v55 = vsub.f32 %v2823_v48, %v2879_v62  ;;  %8734 = vpow2.f32 %v2924_v20  ;;  %v2909_v41 = vsub.f32 %v10353_v9, %v2885_v8 }
 0x9b3   : > { %v2926_v38 = vmul.f32 1.442695, %v2906_v55  ;;  %v2932_v14 = vmul.f32 1.442695, %v2909_v41 }
 0x9b4   : > { %v2881_v50 = vpop.xlane.xlu1 %2880  ;;  %v2891_v57 = vpop.xlane.xlu0 %2890 }
 0x9b5   : > { %v2907_v60 = vsub.f32 %v2826_v51, %v2881_v50  ;;  %8736 = vpow2.f32 %v2926_v38  ;;  %v2912_v22 = vsub.f32 %v10356_v4, %v2891_v57 }
 0x9b6   : > { %v10410_v52 = vpop.eup %8728 }
 0x9b7   : > { %v10412_v56 = vpop.eup %8730  ;;  %v2928_v49 = vmul.f32 1.442695, %v2907_v60  ;;  %2952 = vadd.xlane.f32.xlu1 %v10410_v52  ;;  %v2938_v1 = vmul.f32 1.442695, %v2912_v22 }
 0x9b8   : > { %v2887_v42 = vpop.xlane.xlu0 %2886  ;;  %v2889_v48 = vpop.xlane.xlu1 %2888  ;;  %2950 = vadd.xlane.f32.xlu0 %v10412_v56 }
 0x9b9   : > { %8738 = vpow2.f32 %v2928_v49  ;;  %v2910_v15 = vsub.f32 %v10359_v27, %v2887_v42  ;;  %v2911_v9 = vsub.f32 %v10363_v47, %v2889_v48  ;;  %v10418_v51 = vpop.eup %8732 }
 0x9ba   : > { %8740 = vpow2.f32 %v2930_v61 }
 0x9bb   : > { %v2934_v12 = vmul.f32 1.442695, %v2910_v15  ;;  %8742 = vpow2.f32 %v2932_v14  ;;  %v2936_v11 = vmul.f32 1.442695, %v2911_v9  ;;  %v10423_v13 = vpop.eup %8734 }
 0x9bc   : > { %v2893_v23 = vpop.xlane.xlu0 %2892  ;;  %v2899_v5 = vpop.xlane.xlu1 %2898  ;;  %2954 = vadd.xlane.f32.xlu0 %v10418_v51 }
 0x9bd   : > { %v2913_v25 = vsub.f32 %v10361_v46, %v2893_v23  ;;  %8744 = vpow2.f32 %v2934_v12  ;;  %v2916_v62 = vsub.f32 %v10367_v24, %v2899_v5 }
 0x9be   : > { %8746 = vpow2.f32 %v2936_v11 }
 0x9bf   : > { %v2940_v39 = vmul.f32 1.442695, %v2913_v25  ;;  %v10427_v0 = vpop.eup %8736  ;;  %8748 = vpow2.f32 %v2938_v1  ;;  %v2946_v24 = vmul.f32 1.442695, %v2916_v62 }
 0x9c0   : > { %2956 = vadd.xlane.f32.xlu0 %v10423_v13  ;;  %v2895_v27 = vpop.xlane.xlu0 %2894  ;;  %v2901_v47 = vpop.xlane.xlu1 %2900 }
 0x9c1   : > { %v2914_v4 = vsub.f32 %v10371_v44, %v2895_v27  ;;  %8750 = vpow2.f32 %v2940_v39  ;;  %v2917_v55 = vsub.f32 %v10373_v35, %v2901_v47 }
 0x9c3   : > { %v10429_v3 = vpop.eup %8738  ;;  %v2942_v46 = vmul.f32 1.442695, %v2914_v4  ;;  %v2948_v41 = vmul.f32 1.442695, %v2917_v55 }
 0x9c4   : > { %2958 = vadd.xlane.f32.xlu0 %v10427_v0  ;;  %v3317_v8 = vpop.permute.xlu0 %3316  ;;  %2960 = vadd.xlane.f32.xlu1 %v10429_v3  ;;  %v2897_v20 = vpop.xlane.xlu1 %2896 }
 0x9c5   : > { %v2915_v40 = vsub.f32 %v10375_v59, %v2897_v20  ;;  %8173 = vmatprep.mubr.msk.bf16.mxu1 %vm2724_vm1, %v3317_v8  ;;  %v10437_v44 = vpop.eup %8740  ;;  %8752 = vpow2.f32 %v2942_v46  ;;  %v13255_v59 = vmov 0  }
 0x9c6   : > { %v10439_v38 = vpop.eup %8742 }
 0x9c7   : > { %v2944_v50 = vmul.f32 1.442695, %v2915_v40  ;;  %v10444_v35 = vpop.eup %8744 }
 0x9c8   : > { %2962 = vadd.xlane.f32.xlu0 %v10437_v44  ;;  %2964 = vadd.xlane.f32.xlu1 %v10439_v38  ;;  %v3319_v57 = vpop.permute.xlu1 %3318  ;;  %v10447_v60 = vpop.eup %8746 }
 0x9c9   : > { %8754 = vpow2.f32 %v2944_v50  ;;  %8174 = vmatmul.mubr.msk.bf16.gmra.mrb[108].mxu1 %vm2724_vm1, %v3319_v57  ;;  %v10451_v49 = vpop.eup %8748 }
 0x9ca   : > { %5915 = vmatprep.mubr.bf16.mxu1 %v13255_v59  ;;  %8756 = vpow2.f32 %v2946_v24 }
 0x9cb   : > { %8758 = vpow2.f32 %v2948_v41  ;;  %v10453_v61 = vpop.eup %8750 }
 0x9cc   : > { %2966 = vadd.xlane.f32.xlu0 %v10444_v35  ;;  %2968 = vadd.xlane.f32.xlu1 %v10447_v60 }
 0x9cf   : > { %v10457_v42 = vpop.eup %8752 }
 0x9d0   : > { %2970 = vadd.xlane.f32.xlu0 %v10451_v49  ;;  %2972 = vadd.xlane.f32.xlu1 %v10453_v61 }
 0x9d3   : > { %v10459_v48 = vpop.eup %8754 }
 0x9d4   : > { %2974 = vadd.xlane.f32.xlu0 %v10457_v42  ;;  %2976 = vadd.xlane.f32.xlu1 %v10459_v48  ;;  %v10463_v14 = vpop.eup %8756 }
 0x9d5   : > { %v10465_v15 = vpop.eup %8758 }
 0x9d8   : > { %2978 = vadd.xlane.f32.xlu0 %v10463_v14  ;;  %2980 = vadd.xlane.f32.xlu1 %v10465_v15 }
 0x9dc   : > { %3489 = vmax.xlane.f32.xlu0 %v10386_v58  ;;  %3491 = vmax.xlane.f32.xlu1 %v10390_v30 }
 0x9e0   : > { %3493 = vmax.xlane.f32.xlu0 %v10384_v36  ;;  %3495 = vmax.xlane.f32.xlu1 %v10388_v45 }
 0x9e4   : > { %3497 = vmax.xlane.f32.xlu0 %v10394_v53  ;;  %3499 = vmax.xlane.f32.xlu1 %v10398_v17 }
 0x9e8   : > { %3501 = vmax.xlane.f32.xlu0 %v10392_v21  ;;  %3503 = vmax.xlane.f32.xlu1 %v10396_v28 }
 0x9ec   : > { %3505 = vmax.xlane.f32.xlu0 %v10402_v33  ;;  %3507 = vmax.xlane.f32.xlu1 %v10406_v6 }
 0x9f0   : > { %3509 = vmax.xlane.f32.xlu0 %v10400_v10  ;;  %3511 = vmax.xlane.f32.xlu1 %v10404_v43 }
 0xa44   : > { %v2953_v9 = vpop.xlane.xlu1 %2952 }
 0xa45   : > { %8760 = vrcp.f32 %v2953_v9  ;;  %v2951_v22 = vpop.xlane.xlu0 %2950 }
 0xa46   : > { %8762 = vrcp.f32 %v2951_v22 }
 0xa49   : > { %v2955_v12 = vpop.xlane.xlu0 %2954 }
 0xa4a   : > { %8764 = vrcp.f32 %v2955_v12 }
 0xa4d   : > { %v2957_v23 = vpop.xlane.xlu0 %2956 }
 0xa4e   : > { %8766 = vrcp.f32 %v2957_v23 }
 0xa4f   : > { %v8761_v5 = vpop.eup %8760 }
 0xa50   : > { %v8763_v11 = vpop.eup %8762  ;;  %v2999_v25 = vmul.f32 %v8761_v5, %v10410_v52 }
 0xa51   : > { %v2959_v1 = vpop.xlane.xlu0 %2958  ;;  %v2961_v27 = vpop.xlane.xlu1 %2960  ;;  %v2998_v47 = vmul.f32 %v8763_v11, %v10412_v56 }
 0xa52   : > { %8768 = vrcp.f32 %v2959_v1 }
 0xa53   : > { %8770 = vrcp.f32 %v2961_v27  ;;  %v3014_v39 = vpack.c.bf16 %v2999_v25, %v2998_v47 }
 0xa54   : > { %v8765_v46 = vpop.eup %8764 }
 0xa55   : > { %v2963_v4 = vpop.xlane.xlu0 %2962  ;;  %8105 = vmatprep.mubr.bf16.mxu0 %v3014_v39  ;;  %v2965_v62 = vpop.xlane.xlu1 %2964  ;;  %v3000_v20 = vmul.f32 %v8765_v46, %v10418_v51 }
 0xa56   : > { %8772 = vrcp.f32 %v2963_v4 }
 0xa57   : > { %8774 = vrcp.f32 %v2965_v62 }
 0xa58   : > { %v8767_v8 = vpop.eup %8766 }
 0xa59   : > { %v3001_v55 = vmul.f32 %v8767_v8, %v10423_v13  ;;  %v2967_v40 = vpop.xlane.xlu0 %2966  ;;  %v2969_v52 = vpop.xlane.xlu1 %2968 }
 0xa5a   : > { %8776 = vrcp.f32 %v2967_v40 }
 0xa5b   : > { %8778 = vrcp.f32 %v2969_v52  ;;  %v3015_v50 = vpack.c.bf16 %v3001_v55, %v3000_v20 }
 0xa5c   : > { %v8769_v56 = vpop.eup %8768 }
 0xa5d   : > { %v8771_v24 = vpop.eup %8770  ;;  %v2971_v57 = vpop.xlane.xlu0 %2970  ;;  %8106 = vmatmul.mubr.bf16.vlgmr.msra.gmra.mrb[96].mxu0 %v3015_v50  ;;  %v3002_v9 = vmul.f32 %v8769_v56, %v10427_v0 }
 0xa5e   : > { %v2973_v41 = vpop.xlane.xlu1 %2972  ;;  %8780 = vrcp.f32 %v2971_v57  ;;  %v3003_v22 = vmul.f32 %v8771_v24, %v10429_v3 }
 0xa5f   : > { %8782 = vrcp.f32 %v2973_v41 }
 0xa60   : > { %v8773_v12 = vpop.eup %8772  ;;  %v3016_v51 = vpack.c.bf16 %v3003_v22, %v3002_v9  ;;  %v8547_v22 = vld [vmem:[%s12996_s6 + $0x18] sm:$0xff]  }
 0xa61   : > { %v8775_v23 = vpop.eup %8774  ;;  %v2975_v13 = vpop.xlane.xlu0 %2974  ;;  %v3004_v11 = vmul.f32 %v8773_v12, %v10437_v44 }
 0xa62   : > { %v2977_v5 = vpop.xlane.xlu1 %2976  ;;  %8784 = vrcp.f32 %v2975_v13  ;;  %8109 = vmatprep.mubr.bf16.mxu0 %v3016_v51  ;;  %v3005_v25 = vmul.f32 %v8775_v23, %v10439_v38 }
 0xa63   : > { %8786 = vrcp.f32 %v2977_v5 }
 0xa64   : > { %v8777_v1 = vpop.eup %8776  ;;  %v3017_v27 = vpack.c.bf16 %v3005_v25, %v3004_v11 }
 0xa65   : > { %v8779_v47 = vpop.eup %8778  ;;  %v2979_v0 = vpop.xlane.xlu0 %2978  ;;  %v3006_v3 = vmul.f32 %v8777_v1, %v10444_v35 }
 0xa66   : > { %v2981_v39 = vpop.xlane.xlu1 %2980  ;;  %8788 = vrcp.f32 %v2979_v0  ;;  %8110 = vmatmul.mubr.bf16.gmra.mrb[100].mxu0 %v3017_v27  ;;  %v3007_v4 = vmul.f32 %v8779_v47, %v10447_v60 }
 0xa67   : > { %8790 = vrcp.f32 %v2981_v39 }
 0xa68   : > { %v8781_v62 = vpop.eup %8780  ;;  %v3018_v46 = vpack.c.bf16 %v3007_v4, %v3006_v3 }
 0xa69   : > { %v8783_v44 = vpop.eup %8782  ;;  %v3008_v8 = vmul.f32 %v8781_v62, %v10451_v49  ;;  %v3490_v12 = vpop.xlane.xlu0 %3489 }
 0xa6a   : > { %8113 = vmatprep.mubr.bf16.mxu0 %v3018_v46  ;;  %v3009_v38 = vmul.f32 %v8783_v44, %v10453_v61  ;;  %v3492_v51 = vpop.xlane.xlu1 %3491 }
 0xa6c   : > { %v8785_v20 = vpop.eup %8784  ;;  %v3019_v55 = vpack.c.bf16 %v3009_v38, %v3008_v8 }
 0xa6d   : > { %v8787_v40 = vpop.eup %8786  ;;  %v3010_v52 = vmul.f32 %v8785_v20, %v10457_v42  ;;  %v3494_v23 = vpop.xlane.xlu0 %3493 }
 0xa6e   : > { %8114 = vmatmul.mubr.bf16.gmra.mrb[104].mxu0 %v3019_v55  ;;  %v3011_v35 = vmul.f32 %v8787_v40, %v10459_v48  ;;  %v8544_v48 = vld [vmem:[%s12996_s6] sm:$0xff]   ;;  %v3523_v5 = vsub.f32 %v10384_v36, %v3494_v23 }
 0xa6f   : > { %8121 = vmatprep.subr.bf16.mxu0 %v8544_v48 }
 0xa70   : > { %v8789_v50 = vpop.eup %8788  ;;  %v3020_v56 = vpack.c.bf16 %v3011_v35, %v3010_v52  ;;  %8122 = vmatpush3.bf16.msra.mxu0 %v8544_v48  ;;  %v3541_v25 = vmul.f32 1.442695, %v3523_v5 }
 0xa71   : > { %v8791_v60 = vpop.eup %8790  ;;  %v3012_v24 = vmul.f32 %v8789_v50, %v10463_v14  ;;  %v8545_v14 = vld [vmem:[%s12996_s6 + $0x8] sm:$0xff]   ;;  %v3498_v13 = vpop.xlane.xlu0 %3497 }
 0xa72   : > { %8117 = vmatprep.mubr.bf16.mxu0 %v3020_v56  ;;  %v3013_v57 = vmul.f32 %v8791_v60, %v10465_v15  ;;  %8123 = vmatprep.subr.bf16.mxu0 %v8545_v14  ;;  %v8546_v15 = vld [vmem:[%s12996_s6 + $0x10] sm:$0xff]   ;;  %8792 = vpow2.f32 %v3541_v25 }
 0xa74   : > { %v3021_v49 = vpack.c.bf16 %v3013_v57, %v3012_v24  ;;  %8124 = vmatpush3.bf16.msra.mxu0 %v8545_v14 }
 0xa75   : > { %8125 = vmatprep.subr.bf16.mxu0 %v8546_v15  ;;  %v3502_v11 = vpop.xlane.xlu0 %3501 }
 0xa76   : > { %8118 = vmatmul.mubr.bf16.gmra.mrb[108].mxu0 %v3021_v49  ;;  %v3527_v1 = vsub.f32 %v10392_v21, %v3502_v11  ;;  %v3525_v21 = vsub.f32 %v10394_v53, %v3498_v13 }
 0xa78   : > { %8126 = vmatpush3.bf16.msra.mxu0 %v8546_v15  ;;  %v3549_v47 = vmul.f32 1.442695, %v3527_v1 }
 0xa79   : > { %8127 = vmatprep.subr.bf16.mxu0 %v8547_v22  ;;  %v3506_v38 = vpop.xlane.xlu0 %3505 }
 0xa7a   : > { %v3529_v52 = vsub.f32 %v10402_v33, %v3506_v38 }
 0xa7c   : > { %8128 = vmatpush3.bf16.msra.mxu0 %v8547_v22  ;;  %v10541_v4 = vpop.eup %8792  ;;  %v3553_v60 = vmul.f32 1.442695, %v3529_v52 }
 0xa7d   : > { %v3510_v40 = vpop.xlane.xlu0 %3509 }
 0xa7e   : > { %v3531_v56 = vsub.f32 %v10400_v10, %v3510_v40 }
 0xa80   : > { %v3557_v57 = vmul.f32 1.442695, %v3531_v56 }
 0xa9c   : > { %v10497_v41 = vpop.f32.mrb[108].mxu1 }
 0xa9d   : > { %v10499_v61 = vpop.f32.mrb[109].mxu1 }
 0xa9e   : > { %3513 = vmax.xlane.f32.xlu0 %v10499_v61  ;;  %v10502_v42 = vpop.f32.mrb[110].mxu1 }
 0xa9f   : > { %v10504_v9 = vpop.f32.mrb[111].mxu1 }
 0xaa0   : > { %3515 = vmax.xlane.f32.xlu1 %v10504_v9 }
 0xaa2   : > { %3517 = vmax.xlane.f32.xlu0 %v10497_v41 }
 0xaa4   : > { %3519 = vmax.xlane.f32.xlu1 %v10502_v42 }
 0xab5   : > { %3651 = vrot.lane.b32.xlu1 %v9760_v7, %s9141_s24  ;;  %v3496_v7 = vpop.xlane.xlu1 %3495 }
 0xab8   : > { %3649 = vrot.lane.b32.xlu0 %v9767_v16, %s9141_s24 }
 0xab9   : > { %3659 = vrot.lane.b32.xlu1 %v9808_v32, %s9141_s24  ;;  %v3500_v16 = vpop.xlane.xlu1 %3499  ;;  %v3521_v32 = vsub.f32 %v10386_v58, %v3490_v12 }
 0xaba   : > { %v3526_v36 = vsub.f32 %v10398_v17, %v3500_v16 }
 0xabb   : > { %v3537_v27 = vmul.f32 1.442695, %v3521_v32 }
 0xabc   : > { %3653 = vrot.lane.b32.xlu0 %v9791_v37, %s9141_s24  ;;  %v3547_v62 = vmul.f32 1.442695, %v3526_v36 }
 0xabd   : > { %v3504_v37 = vpop.xlane.xlu1 %3503  ;;  %8794 = vpow2.f32 %v3537_v27 }
 0xabe   : > { %v3528_v0 = vsub.f32 %v10396_v28, %v3504_v37  ;;  %8796 = vpow2.f32 %v3549_v47 }
 0xac0   : > { %3655 = vrot.lane.b32.xlu0 %v9784_v34, %s9141_s24  ;;  %v3524_v34 = vsub.f32 %v10388_v45, %v3496_v7  ;;  %v3551_v3 = vmul.f32 1.442695, %v3528_v0  ;;  %v3545_v45 = vmul.f32 1.442695, %v3525_v21 }
 0xac1   : > { %v3508_v20 = vpop.xlane.xlu1 %3507 }
 0xac2   : > { %v3543_v39 = vmul.f32 1.442695, %v3524_v34  ;;  %v3530_v55 = vsub.f32 %v10406_v6, %v3508_v20 }
 0xac4   : > { %3657 = vrot.lane.b32.xlu0 %v9815_v63, %s9141_s24  ;;  %v3522_v63 = vsub.f32 %v10390_v30, %v3492_v51  ;;  %8798 = vpow2.f32 %v3543_v39  ;;  %v3555_v50 = vmul.f32 1.442695, %v3530_v55 }
 0xac5   : > { %8800 = vpow2.f32 %v3551_v3  ;;  %v3512_v35 = vpop.xlane.xlu1 %3511 }
 0xac6   : > { %v3539_v58 = vmul.f32 1.442695, %v3522_v63  ;;  %v3532_v24 = vsub.f32 %v10404_v43, %v3512_v35 }
 0xac7   : > { %v10544_v28 = vpop.eup %8794 }
 0xac8   : > { %8802 = vpow2.f32 %v3539_v58  ;;  %v10547_v30 = vpop.eup %8796 }
 0xac9   : > { %8804 = vpow2.f32 %v3547_v62 }
 0xaca   : > { %8806 = vpow2.f32 %v3545_v45 }
 0xacb   : > { %8808 = vpow2.f32 %v3555_v50 }
 0xacc   : > { %8810 = vpow2.f32 %v3553_v60 }
 0xacd   : > { %8812 = vpow2.f32 %v3557_v57 }
 0xace   : > { %v10550_v17 = vpop.eup %8798 }
 0xacf   : > { %v10553_v53 = vpop.eup %8800 }
 0xad2   : > { %v10556_v46 = vpop.eup %8802 }
 0xad3   : > { %v10559_v44 = vpop.eup %8804 }
 0xad4   : > { %v10562_v8 = vpop.eup %8806 }
 0xadd   : > { %3573 = vadd.xlane.f32.xlu1 %v10541_v4 }
 0xae1   : > { %3569 = vadd.xlane.f32.xlu1 %v10544_v28 }
 0xae3   : > { %3581 = vadd.xlane.f32.xlu0 %v10547_v30 }
 0xae5   : > { %3575 = vadd.xlane.f32.xlu1 %v10550_v17 }
 0xae7   : > { %3583 = vadd.xlane.f32.xlu0 %v10553_v53 }
 0xae9   : > { %3571 = vadd.xlane.f32.xlu1 %v10556_v46 }
 0xaeb   : > { %3579 = vadd.xlane.f32.xlu0 %v10559_v44 }
 0xaed   : > { %3577 = vadd.xlane.f32.xlu1 %v10562_v8 }
 0xafe   : > { %3663 = vrot.lane.b32.xlu1 %v9832_v26, %s9141_s24  ;;  %v3559_v26 = vmul.f32 1.442695, %v3532_v24 }
 0xb00   : > { %8814 = vpow2.f32 %v3559_v26 }
 0xb01   : > { %3661 = vrot.lane.b32.xlu0 %v9839_v29, %s9141_s24  ;;  %v10573_v29 = vpop.eup %8808 }
 0xb02   : > { %v10576_v6 = vpop.eup %8810 }
 0xb03   : > { %v10579_v33 = vpop.eup %8812 }
 0xb0a   : > { %v10582_v10 = vpop.eup %8814 }
 0xb20   : > { %3587 = vadd.xlane.f32.xlu0 %v10573_v29 }
 0xb22   : > { %3585 = vadd.xlane.f32.xlu1 %v10576_v6 }
 0xb24   : > { %3589 = vadd.xlane.f32.xlu0 %v10579_v33 }
 0xb26   : > { %3591 = vadd.xlane.f32.xlu1 %v10582_v10 }
 0xb2b   : > { %v3514_v43 = vpop.xlane.xlu0 %3513 }
 0xb2c   : > { %v3533_v49 = vsub.f32 %v10499_v61, %v3514_v43 }
 0xb2d   : > { %v3516_v48 = vpop.xlane.xlu1 %3515 }
 0xb2e   : > { %v3561_v14 = vmul.f32 1.442695, %v3533_v49  ;;  %v3534_v15 = vsub.f32 %v10504_v9, %v3516_v48 }
 0xb2f   : > { %v3518_v22 = vpop.xlane.xlu0 %3517 }
 0xb30   : > { %8816 = vpow2.f32 %v3561_v14  ;;  %v3563_v12 = vmul.f32 1.442695, %v3534_v15  ;;  %v3535_v51 = vsub.f32 %v10497_v41, %v3518_v22  ;;  %v8107_v23 = vpop.f32.mrb[96].mxu0 }
 0xb31   : > { %v3056_v7 = vpop.f32.mrb[97].mxu0  ;;  %v3520_v13 = vpop.xlane.xlu1 %3519 }
 0xb32   : > { %8818 = vpow2.f32 %v3563_v12  ;;  %v3565_v5 = vmul.f32 1.442695, %v3535_v51  ;;  %v3536_v16 = vsub.f32 %v10502_v42, %v3520_v13  ;;  %v8108_v11 = vpop.f32.mrb[98].mxu0 }
 0xb33   : > { %v3120_v32 = vpack.c.bf16 %v8108_v11, %v8107_v23  ;;  %v3059_v25 = vpop.f32.mrb[99].mxu0  ;;  %v3650_v61 = vpop.permute.xlu0 %3649 }
 0xb34   : > { %8820 = vpow2.f32 %v3565_v5  ;;  %v3567_v1 = vmul.f32 1.442695, %v3536_v16  ;;  %v3119_v37 = vpack.c.bf16 %v3059_v25, %v3056_v7  ;;  %8177 = vmatprep.subr.bf16.mxu0 %v3650_v61  ;;  %v8548_v16 = vld [vmem:[%s12996_s6 + $0x20] sm:$0xff]  }
 0xb35   : > { %v3652_v41 = vpop.permute.xlu1 %3651 }
 0xb36   : > { %8822 = vpow2.f32 %v3567_v1  ;;  %8129 = vmatprep.mubr.msk.bf16.mxu0 %vm2724_vm1, %v3119_v37 }
 0xb37   : > { %8130 = vmatmul.mubr.msk.bf16.vlgmr.msra.gmra.mrb[112].mxu0 %vm2724_vm1, %v3120_v32  ;;  %v3654_v9 = vpop.permute.xlu0 %3653 }
 0xb38   : > { %8178 = vmatpush3.bf16.msra.mxu0 %v3650_v61 }
 0xb39   : > { %v8111_v27 = vpop.f32.mrb[100].mxu0  ;;  %8179 = vmatprep.subr.bf16.mxu0 %v3652_v41  ;;  %v3660_v35 = vpop.permute.xlu1 %3659 }
 0xb3a   : > { %v10591_v34 = vpop.eup %8816  ;;  %v3072_v42 = vpop.f32.mrb[101].mxu0 }
 0xb3b   : > { %v8112_v47 = vpop.f32.mrb[102].mxu0  ;;  %3593 = vadd.xlane.f32.xlu0 %v10591_v34  ;;  %v3656_v58 = vpop.permute.xlu0 %3655 }
 0xb3c   : > { %v10594_v0 = vpop.eup %8818  ;;  %v3122_v63 = vpack.c.bf16 %v8112_v47, %v8111_v27  ;;  %v3075_v39 = vpop.f32.mrb[103].mxu0  ;;  %8180 = vmatpush3.bf16.msra.mxu0 %v3652_v41  ;;  %v8549_v47 = vld [vmem:[%s12996_s6 + $0x28] sm:$0xff]  }
 0xb3d   : > { %v3121_v36 = vpack.c.bf16 %v3075_v39, %v3072_v42  ;;  %8181 = vmatprep.subr.bf16.mxu0 %v3654_v9  ;;  %3595 = vadd.xlane.f32.xlu1 %v10594_v0 }
 0xb3e   : > { %v10597_v3 = vpop.eup %8820 }
 0xb3f   : > { %8133 = vmatprep.mubr.msk.bf16.mxu0 %vm2724_vm1, %v3121_v36  ;;  %3597 = vadd.xlane.f32.xlu0 %v10597_v3  ;;  %v3658_v40 = vpop.permute.xlu0 %3657  ;;  %v8550_v36 = vld [vmem:[%s12996_s6 + $0x30] sm:$0xff]  }
 0xb40   : > { %v10601_v21 = vpop.eup %8822  ;;  %8134 = vmatmul.mubr.msk.bf16.gmra.mrb[116].mxu0 %vm2724_vm1, %v3122_v63 }
 0xb41   : > { %8182 = vmatpush3.bf16.msra.mxu0 %v3654_v9  ;;  %v8115_v62 = vpop.f32.mrb[104].mxu0  ;;  %3599 = vadd.xlane.f32.xlu1 %v10601_v21 }
 0xb42   : > { %8183 = vmatprep.subr.bf16.mxu0 %v3656_v58  ;;  %v3088_v45 = vpop.f32.mrb[105].mxu0 }
 0xb43   : > { %v8116_v38 = vpop.f32.mrb[106].mxu0 }
 0xb44   : > { %v3124_v20 = vpack.c.bf16 %v8116_v38, %v8115_v62  ;;  %v3091_v55 = vpop.f32.mrb[107].mxu0 }
 0xb45   : > { %v3123_v52 = vpack.c.bf16 %v3091_v55, %v3088_v45  ;;  %8184 = vmatpush3.bf16.msra.mxu0 %v3656_v58 }
 0xb46   : > { %8185 = vmatprep.subr.bf16.mxu0 %v3658_v40 }
 0xb47   : > { %8137 = vmatprep.mubr.msk.bf16.mxu0 %vm2724_vm1, %v3123_v52 }
 0xb48   : > { %8138 = vmatmul.mubr.msk.bf16.gmra.mrb[120].mxu0 %vm2724_vm1, %v3124_v20 }
 0xb49   : > { %8186 = vmatpush3.bf16.msra.mxu0 %v3658_v40  ;;  %v8119_v50 = vpop.f32.mrb[108].mxu0 }
 0xb4a   : > { %8187 = vmatprep.subr.bf16.mxu0 %v3660_v35  ;;  %v3104_v56 = vpop.f32.mrb[109].mxu0 }
 0xb4b   : > { %v8120_v60 = vpop.f32.mrb[110].mxu0 }
 0xb4c   : > { %v3126_v24 = vpack.c.bf16 %v8120_v60, %v8119_v50  ;;  %v3107_v57 = vpop.f32.mrb[111].mxu0 }
 0xb4d   : > { %v3125_v26 = vpack.c.bf16 %v3107_v57, %v3104_v56  ;;  %8188 = vmatpush3.bf16.msra.mxu0 %v3660_v35 }
 0xb4f   : > { %8141 = vmatprep.mubr.msk.bf16.mxu0 %vm2724_vm1, %v3125_v26 }
 0xb50   : > { %8142 = vmatmul.mubr.msk.bf16.gmra.mrb[124].mxu0 %vm2724_vm1, %v3126_v24 }
 0xb6a   : > { %v3574_v43 = vpop.xlane.xlu1 %3573 }
 0xb6e   : > { %v3570_v49 = vpop.xlane.xlu1 %3569 }
 0xb70   : > { %v3582_v48 = vpop.xlane.xlu0 %3581 }
 0xb72   : > { %v3576_v14 = vpop.xlane.xlu1 %3575 }
 0xb73   : > { %8824 = vrcp.f32 %v3576_v14 }
 0xb74   : > { %v3584_v15 = vpop.xlane.xlu0 %3583  ;;  %8826 = vrcp.f32 %v3570_v49 }
 0xb75   : > { %8828 = vrcp.f32 %v3574_v43 }
 0xb76   : > { %v3572_v22 = vpop.xlane.xlu1 %3571 }
 0xb77   : > { %8830 = vrcp.f32 %v3572_v22 }
 0xb78   : > { %v3580_v12 = vpop.xlane.xlu0 %3579 }
 0xb79   : > { %8832 = vrcp.f32 %v3580_v12 }
 0xb7a   : > { %v3578_v51 = vpop.xlane.xlu1 %3577 }
 0xb7b   : > { %8834 = vrcp.f32 %v3578_v51  ;;  %v8551_v51 = vld [vmem:[%s12996_s6 + $0x38] sm:$0xff]  }
 0xb7c   : > { %8836 = vrcp.f32 %v3584_v15  ;;  %v3662_v23 = vpop.permute.xlu0 %3661 }
 0xb7d   : > { %8189 = vmatprep.subr.bf16.mxu0 %v3662_v23  ;;  %v8825_v7 = vpop.eup %8824  ;;  %8838 = vrcp.f32 %v3582_v48 }
 0xb7e   : > { %8190 = vmatpush3.bf16.msra.mxu0 %v3662_v23  ;;  %v3664_v13 = vpop.permute.xlu1 %3663  ;;  %v8827_v5 = vpop.eup %8826  ;;  %v3620_v25 = vmul.f32 %v8825_v7, %v10550_v17 }
 0xb7f   : > { %8191 = vmatprep.subr.bf16.mxu0 %v3664_v13  ;;  %v8829_v11 = vpop.eup %8828  ;;  %v3617_v61 = vmul.f32 %v8827_v5, %v10544_v28 }
 0xb80   : > { %v3619_v41 = vmul.f32 %v8829_v11, %v10541_v4 }
 0xb81   : > { %v8831_v32 = vpop.eup %8830 }
 0xb82   : > { %8192 = vmatpush3.bf16.msra.mxu0 %v3664_v13  ;;  %v3618_v1 = vmul.f32 %v8831_v32, %v10556_v46  ;;  %v3634_v42 = vpack.c.bf16 %v3620_v25, %v3619_v41 }
 0xb83   : > { %v8833_v37 = vpop.eup %8832  ;;  %8209 = vmatprep.subr.bf16.mxu0 %v8548_v16 }
 0xb84   : > { %v3633_v9 = vpack.c.bf16 %v3618_v1, %v3617_v61  ;;  %v3622_v39 = vmul.f32 %v8833_v37, %v10559_v44 }
 0xb85   : > { %v8835_v27 = vpop.eup %8834 }
 0xb86   : > { %v8837_v63 = vpop.eup %8836  ;;  %8193 = vmatprep.mubr.bf16.mxu0 %v3633_v9  ;;  %v3621_v17 = vmul.f32 %v8835_v27, %v10562_v8 }
 0xb87   : > { %8194 = vmatmul.mubr.bf16.vlgmr.msra.gmra.mrb[128].mxu0 %v3634_v42  ;;  %v8839_v28 = vpop.eup %8838  ;;  %v3624_v4 = vmul.f32 %v8837_v63, %v10553_v53 }
 0xb88   : > { %v3635_v46 = vpack.c.bf16 %v3622_v39, %v3621_v17  ;;  %8210 = vmatpush3.bf16.msra.mxu0 %v8548_v16  ;;  %v3623_v58 = vmul.f32 %v8839_v28, %v10547_v30 }
 0xb89   : > { %8211 = vmatprep.subr.bf16.mxu0 %v8549_v47 }
 0xb8a   : > { %8197 = vmatprep.mubr.bf16.mxu0 %v3635_v46  ;;  %v3636_v62 = vpack.c.bf16 %v3624_v4, %v3623_v58  ;;  %v10648_v46 = vld [vmem:[%s12997_s7] ss:$0 sm:$0xff] }
 0xb8c   : > { %8212 = vmatpush3.bf16.msra.mxu0 %v8549_v47 }
 0xb8d   : > { %8213 = vmatprep.subr.bf16.mxu0 %v8550_v36 }
 0xb8f   : > { %8198 = vmatmul.mubr.bf16.gmra.mrb[132].mxu0 %v3636_v62 }
 0xb90   : > { %8214 = vmatpush3.bf16.msra.mxu0 %v8550_v36  ;;  %v10651_v36 = vld [vmem:[%s9571_s20] sm:$0x3f] }
 0xb91   : > { %8215 = vmatprep.subr.bf16.mxu0 %v8551_v51  ;;  %v10655_v58 = vrot.slane %v10651_v36, %v9736_v54 }
 0xb94   : > { %8216 = vmatpush3.bf16.msra.mxu0 %v8551_v51 }
 0xbad   : > { %v3588_v44 = vpop.xlane.xlu0 %3587 }
 0xbae   : > { %8840 = vrcp.f32 %v3588_v44 }
 0xbaf   : > { %v3586_v8 = vpop.xlane.xlu1 %3585 }
 0xbb0   : > { %8842 = vrcp.f32 %v3586_v8 }
 0xbb1   : > { %v3590_v45 = vpop.xlane.xlu0 %3589 }
 0xbb2   : > { %8844 = vrcp.f32 %v3590_v45 }
 0xbb3   : > { %v3592_v53 = vpop.xlane.xlu1 %3591 }
 0xbb4   : > { %8846 = vrcp.f32 %v3592_v53 }
 0xbb8   : > { %v8841_v38 = vpop.eup %8840 }
 0xbb9   : > { %v3626_v40 = vmul.f32 %v8841_v38, %v10573_v29 }
 0xbba   : > { %v8843_v20 = vpop.eup %8842 }
 0xbbb   : > { %v3625_v55 = vmul.f32 %v8843_v20, %v10576_v6 }
 0xbbc   : > { %v8845_v30 = vpop.eup %8844 }
 0xbbd   : > { %v3637_v52 = vpack.c.bf16 %v3626_v40, %v3625_v55  ;;  %v3627_v50 = vmul.f32 %v8845_v30, %v10579_v33 }
 0xbbe   : > { %v8847_v35 = vpop.eup %8846 }
 0xbbf   : > { %8201 = vmatprep.mubr.bf16.mxu0 %v3637_v52  ;;  %v3628_v56 = vmul.f32 %v8847_v35, %v10582_v10  ;;  %v8921_v52 = vld [vmem:[%s9422_s13] sm:$0xff] }
 0xbc1   : > { %v3638_v60 = vpack.c.bf16 %v3628_v56, %v3627_v50 }
 0xbc3   : > { %8202 = vmatmul.mubr.bf16.gmra.mrb[136].mxu0 %v3638_v60  ;;  %v8922_v60 = vld [vmem:[%s9422_s13 + $0x8] sm:$0xff] }
 0xbc8   : > { %v3594_v24 = vpop.xlane.xlu0 %3593 }
 0xbc9   : > { %8848 = vrcp.f32 %v3594_v24 }
 0xbca   : > { %v3596_v57 = vpop.xlane.xlu1 %3595 }
 0xbcb   : > { %8850 = vrcp.f32 %v3596_v57 }
 0xbcc   : > { %v3598_v26 = vpop.xlane.xlu0 %3597 }
 0xbcd   : > { %8852 = vrcp.f32 %v3598_v26 }
 0xbce   : > { %v3600_v43 = vpop.xlane.xlu1 %3599 }
 0xbcf   : > { %8854 = vrcp.f32 %v3600_v43 }
 0xbd3   : > { %v8849_v6 = vpop.eup %8848 }
 0xbd4   : > { %v3629_v49 = vmul.f32 %v8849_v6, %v10591_v34 }
 0xbd5   : > { %v8851_v29 = vpop.eup %8850 }
 0xbd6   : > { %v3630_v48 = vmul.f32 %v8851_v29, %v10594_v0  ;;  %v8923_v29 = vld [vmem:[%s9422_s13 + $0x10] sm:$0xff] }
 0xbd7   : > { %v8853_v14 = vpop.eup %8852 }
 0xbd8   : > { %v3639_v33 = vpack.c.bf16 %v3630_v48, %v3629_v49  ;;  %v3631_v10 = vmul.f32 %v8853_v14, %v10597_v3 }
 0xbd9   : > { %v8855_v15 = vpop.eup %8854 }
 0xbda   : > { %8205 = vmatprep.mubr.bf16.mxu0 %v3639_v33  ;;  %v3632_v22 = vmul.f32 %v8855_v15, %v10601_v21 }
 0xbdc   : > { %v3640_v12 = vpack.c.bf16 %v3632_v22, %v3631_v10  ;;  %v8924_v10 = vld [vmem:[%s9422_s13 + $0x18] sm:$0xff] }
 0xbde   : > { %8206 = vmatmul.mubr.bf16.gmra.mrb[140].mxu0 %v3640_v12 }
 0xc5a   : > { %v8195_v23 = vpop.f32.mrb[128].mxu0 }
 0xc5b   : > { %v3707_v34 = vpop.f32.mrb[129].mxu0 }
 0xc5c   : > { %v8196_v7 = vpop.f32.mrb[130].mxu0 }
 0xc5d   : > { %v3771_v0 = vpack.c.bf16 %v8196_v7, %v8195_v23  ;;  %v3710_v13 = vpop.f32.mrb[131].mxu0  ;;  %v8925_v23 = vld [vmem:[%s9422_s13 + $0x20] sm:$0xff] }
 0xc5e   : > { %v3770_v5 = vpack.c.bf16 %v3710_v13, %v3707_v34 }
 0xc60   : > { %8217 = vmatprep.mubr.msk.bf16.mxu0 %vm2724_vm1, %v3770_v5  ;;  %v8927_v5 = vld [vmem:[%s9422_s13 + $0x30] sm:$0xff] }
 0xc61   : > { %8218 = vmatmul.mubr.msk.bf16.vlgmr.msra.gmra.mrb[112].mxu0 %vm2724_vm1, %v3771_v0  ;;  %v8926_v0 = vld [vmem:[%s9422_s13 + $0x28] sm:$0xff] }
 0xc62   : > { %v8199_v3 = vpop.f32.mrb[132].mxu0 }
 0xc63   : > { %v3723_v21 = vpop.f32.mrb[133].mxu0 }
 0xc64   : > { %v8200_v16 = vpop.f32.mrb[134].mxu0 }
 0xc65   : > { %v3773_v11 = vpack.c.bf16 %v8200_v16, %v8199_v3  ;;  %v3726_v32 = vpop.f32.mrb[135].mxu0 }
 0xc66   : > { %v3772_v25 = vpack.c.bf16 %v3726_v32, %v3723_v21  ;;  %v8928_v21 = vld [vmem:[%s9422_s13 + $0x38] sm:$0xff] }
 0xc68   : > { %8221 = vmatprep.mubr.msk.bf16.mxu0 %vm2724_vm1, %v3772_v25 }
 0xc69   : > { %8222 = vmatmul.mubr.msk.bf16.gmra.mrb[116].mxu0 %vm2724_vm1, %v3773_v11 }
 0xc96   : > { %v8203_v61 = vpop.f32.mrb[136].mxu0 }
 0xc97   : > { %v3739_v1 = vpop.f32.mrb[137].mxu0 }
 0xc98   : > { %v8204_v37 = vpop.f32.mrb[138].mxu0 }
 0xc99   : > { %v3775_v41 = vpack.c.bf16 %v8204_v37, %v8203_v61  ;;  %v3742_v9 = vpop.f32.mrb[139].mxu0 }
 0xc9a   : > { %v3774_v27 = vpack.c.bf16 %v3742_v9, %v3739_v1 }
 0xc9c   : > { %8225 = vmatprep.mubr.msk.bf16.mxu0 %vm2724_vm1, %v3774_v27 }
 0xc9d   : > { %8226 = vmatmul.mubr.msk.bf16.gmra.mrb[120].mxu0 %vm2724_vm1, %v3775_v41 }
 0xcb1   : > { %v8207_v42 = vpop.f32.mrb[140].mxu0 }
 0xcb2   : > { %v3755_v47 = vpop.f32.mrb[141].mxu0 }
 0xcb3   : > { %v8208_v63 = vpop.f32.mrb[142].mxu0 }
 0xcb4   : > { %v3777_v17 = vpack.c.bf16 %v8208_v63, %v8207_v42  ;;  %v3758_v39 = vpop.f32.mrb[143].mxu0  ;;  %v8929_v63 = vld [vmem:[%s9422_s13 + $0x40] sm:$0xff] }
 0xcb5   : > { %v3776_v28 = vpack.c.bf16 %v3758_v39, %v3755_v47 }
 0xcb7   : > { %8229 = vmatprep.mubr.msk.bf16.mxu0 %vm2724_vm1, %v3776_v28  ;;  %v8930_v28 = vld [vmem:[%s9422_s13 + $0x48] sm:$0xff] }
 0xcb8   : > { %8230 = vmatmul.mubr.msk.bf16.gmra.mrb[124].mxu0 %vm2724_vm1, %v3777_v17 }
 0xd34   : > { %v8219_v4 = vpop.f32.mrb[112].mxu0 }
 0xd35   : > { %v3869_v62 = vpop.f32.mrb[113].mxu0  ;;  %v8377_v44 = vadd.f32 %v8219_v4, %v10648_v46 }
 0xd36   : > { %v8378_v8 = vadd.f32 %v10648_v46, %v3869_v62  ;;  %v8220_v45 = vpop.f32.mrb[114].mxu0  ;;  %v8931_v62 = vld [vmem:[%s9422_s13 + $0x50] sm:$0xff] }
 0xd37   : > { %v3872_v53 = vpop.f32.mrb[115].mxu0  ;;  %v8379_v20 = vadd.f32 %v8220_v45, %v10648_v46  ;;  %v3954_v40 = vmul.f32 %v8377_v44, %v10655_v58 }
 0xd38   : > { %v3952_v38 = vmul.f32 %v8378_v8, %v10655_v58  ;;  %v8380_v55 = vadd.f32 %v10648_v46, %v3872_v53  ;;  %v8932_v8 = vld [vmem:[%s9422_s13 + $0x58] sm:$0xff] }
 0xd39   : > { %v3955_v50 = vmul.f32 %v8379_v20, %v10655_v58  ;;  %v10676_v49 = vadd.f32 %v8923_v29, %v3954_v40  ;;  %v8934_v29 = vld [vmem:[%s9422_s13 + $0x68] sm:$0xff] }
 0xd3a   : > { %v3953_v30 = vmul.f32 %v8380_v55, %v10655_v58  ;;  %v10665_v35 = vadd.f32 %v8921_v52, %v3952_v38 }
 0xd3b   : > { %13258 = vst [vmem:[#allocation21_spill] sm:$0xff] %v10676_v49  ;;  %v10683_v22 = vadd.f32 %v8924_v10, %v3955_v50 }
 0xd3c   : > { %13256 = vst [vmem:[#allocation19_spill] sm:$0xff] %v10665_v35  ;;  %3984 = vadd.xlane.f32.xlu0 %v10665_v35  ;;  %v8223_v56 = vpop.f32.mrb[116].mxu0  ;;  %v10670_v24 = vadd.f32 %v8922_v60, %v3953_v30 }
 0xd3d   : > { %v3885_v57 = vpop.f32.mrb[117].mxu0  ;;  %v8381_v26 = vadd.f32 %v8223_v56, %v10648_v46  ;;  %13259 = vst [vmem:[#allocation22_spill] sm:$0xff] %v10683_v22 }
 0xd3e   : > { %13257 = vst [vmem:[#allocation20_spill] sm:$0xff] %v10670_v24  ;;  %v8382_v43 = vadd.f32 %v10648_v46, %v3885_v57  ;;  %3986 = vadd.xlane.f32.xlu1 %v10670_v24  ;;  %v8224_v6 = vpop.f32.mrb[118].mxu0 }
 0xd3f   : > { %v3888_v48 = vpop.f32.mrb[119].mxu0  ;;  %v8383_v33 = vadd.f32 %v8224_v6, %v10648_v46  ;;  %v3958_v12 = vmul.f32 %v8381_v26, %v10655_v58  ;;  %v8933_v26 = vld [vmem:[%s9422_s13 + $0x60] sm:$0xff] }
 0xd40   : > { %v3956_v14 = vmul.f32 %v8382_v43, %v10655_v58  ;;  %v8384_v15 = vadd.f32 %v10648_v46, %v3888_v48  ;;  %3988 = vadd.xlane.f32.xlu0 %v10676_v49 }
 0xd41   : > { %v3959_v7 = vmul.f32 %v8383_v33, %v10655_v58  ;;  %v10698_v3 = vadd.f32 %v8927_v5, %v3958_v12 }
 0xd42   : > { %v3957_v51 = vmul.f32 %v8384_v15, %v10655_v58  ;;  %3990 = vadd.xlane.f32.xlu1 %v10683_v22  ;;  %v10689_v34 = vadd.f32 %v8925_v23, %v3956_v14  ;;  %v8935_v14 = vld [vmem:[%s9422_s13 + $0x70] sm:$0xff] }
 0xd43   : > { %13262 = vst [vmem:[#allocation25_spill] sm:$0xff] %v10698_v3  ;;  %v10702_v16 = vadd.f32 %v8928_v21, %v3959_v7 }
 0xd44   : > { %13260 = vst [vmem:[#allocation23_spill] sm:$0xff] %v10689_v34  ;;  %3992 = vadd.xlane.f32.xlu0 %v10689_v34  ;;  %v10694_v13 = vadd.f32 %v8926_v0, %v3957_v51 }
 0xd45   : > { %13263 = vst [vmem:[#allocation26_spill] sm:$0xff] %v10702_v16 }
 0xd46   : > { %13261 = vst [vmem:[#allocation24_spill] sm:$0xff] %v10694_v13  ;;  %3994 = vadd.xlane.f32.xlu1 %v10694_v13 }
 0xd48   : > { %3996 = vadd.xlane.f32.xlu0 %v10698_v3 }
 0xd4a   : > { %3998 = vadd.xlane.f32.xlu1 %v10702_v16 }
 0xd70   : > { %v8227_v11 = vpop.f32.mrb[120].mxu0 }
 0xd71   : > { %v3901_v32 = vpop.f32.mrb[121].mxu0  ;;  %v8385_v25 = vadd.f32 %v8227_v11, %v10648_v46 }
 0xd72   : > { %v8386_v61 = vadd.f32 %v10648_v46, %v3901_v32  ;;  %v8228_v1 = vpop.f32.mrb[122].mxu0 }
 0xd73   : > { %v3904_v37 = vpop.f32.mrb[123].mxu0  ;;  %v8387_v9 = vadd.f32 %v8228_v1, %v10648_v46  ;;  %v3962_v42 = vmul.f32 %v8385_v25, %v10655_v58 }
 0xd74   : > { %v3960_v41 = vmul.f32 %v8386_v61, %v10655_v58  ;;  %v8388_v27 = vadd.f32 %v10648_v46, %v3904_v37 }
 0xd75   : > { %v3963_v39 = vmul.f32 %v8387_v9, %v10655_v58  ;;  %v10722_v44 = vadd.f32 %v8931_v62, %v3962_v42 }
 0xd76   : > { %v3961_v47 = vmul.f32 %v8388_v27, %v10655_v58  ;;  %v10713_v17 = vadd.f32 %v8929_v63, %v3960_v41 }
 0xd77   : > { %13266 = vst [vmem:[#allocation29_spill] sm:$0xff] %v10722_v44  ;;  %v10726_v45 = vadd.f32 %v8932_v8, %v3963_v39 }
 0xd78   : > { %13264 = vst [vmem:[#allocation27_spill] sm:$0xff] %v10713_v17  ;;  %4000 = vadd.xlane.f32.xlu0 %v10713_v17  ;;  %v10718_v4 = vadd.f32 %v8930_v28, %v3961_v47 }
 0xd79   : > { %13267 = vst [vmem:[#allocation30_spill] sm:$0xff] %v10726_v45 }
 0xd7a   : > { %13265 = vst [vmem:[#allocation28_spill] sm:$0xff] %v10718_v4  ;;  %4002 = vadd.xlane.f32.xlu1 %v10718_v4 }
 0xd7c   : > { %4004 = vadd.xlane.f32.xlu0 %v10722_v44 }
 0xd7e   : > { %4006 = vadd.xlane.f32.xlu1 %v10726_v45 }
 0xd8b   : > { %v8231_v53 = vpop.f32.mrb[124].mxu0 }
 0xd8c   : > { %v3917_v38 = vpop.f32.mrb[125].mxu0  ;;  %v8389_v20 = vadd.f32 %v8231_v53, %v10648_v46 }
 0xd8d   : > { %v8390_v55 = vadd.f32 %v10648_v46, %v3917_v38  ;;  %v8232_v40 = vpop.f32.mrb[126].mxu0 }
 0xd8e   : > { %v3920_v30 = vpop.f32.mrb[127].mxu0  ;;  %v8391_v50 = vadd.f32 %v8232_v40, %v10648_v46  ;;  %v3966_v60 = vmul.f32 %v8389_v20, %v10655_v58 }
 0xd8f   : > { %v3964_v52 = vmul.f32 %v8390_v55, %v10655_v58  ;;  %v8392_v56 = vadd.f32 %v10648_v46, %v3920_v30  ;;  %v8936_v46 = vld [vmem:[%s9422_s13 + $0x78] sm:$0xff]  ;;  %s13359_s13 = sld [smem:[#allocation80_spill]] }
 0xd90   : > { %v3967_v6 = vmul.f32 %v8391_v50, %v10655_v58  ;;  %v10746_v33 = vadd.f32 %v8935_v14, %v3966_v60 }
 0xd91   : > { %v3965_v57 = vmul.f32 %v8392_v56, %v10655_v58  ;;  %v10737_v43 = vadd.f32 %v8933_v26, %v3964_v52 }
 0xd92   : > { %13270 = vst [vmem:[#allocation33_spill] sm:$0xff] %v10746_v33  ;;  %v10750_v15 = vadd.f32 %v8936_v46, %v3967_v6 }
 0xd93   : > { %13268 = vst [vmem:[#allocation31_spill] sm:$0xff] %v10737_v43  ;;  %4008 = vadd.xlane.f32.xlu0 %v10737_v43  ;;  %v10742_v48 = vadd.f32 %v8934_v29, %v3965_v57 }
 0xd94   : > { %13271 = vst [vmem:[#allocation34_spill] sm:$0xff] %v10750_v15 }
 0xd95   : > { %13269 = vst [vmem:[#allocation32_spill] sm:$0xff] %v10742_v48  ;;  %4010 = vadd.xlane.f32.xlu1 %v10742_v48 }
 0xd97   : > { %4012 = vadd.xlane.f32.xlu0 %v10746_v33 }
 0xd99   : > { %4014 = vadd.xlane.f32.xlu1 %v10750_v15 }
 0xdc9   : > { %v3985_v10 = vpop.xlane.xlu0 %3984 }
 0xdca   : > { %v4016_v12 = vmul.f32 0.0078125, %v3985_v10 }
 0xdcb   : > { %v3987_v58 = vpop.xlane.xlu1 %3986 }
 0xdcc   : > { %v10754_v51 = vsub.f32 %v10665_v35, %v4016_v12  ;;  %v4017_v23 = vmul.f32 0.0078125, %v3987_v58 }
 0xdcd   : > { %v3989_v7 = vpop.xlane.xlu0 %3988 }
 0xdce   : > { %v10757_v0 = vsub.f32 %v10670_v24, %v4017_v23  ;;  %v4018_v5 = vmul.f32 0.0078125, %v3989_v7  ;;  %v4048_v21 = vmul.f32 %v10754_v51, %v10754_v51 }
 0xdcf   : > { %v3991_v11 = vpop.xlane.xlu1 %3990 }
 0xdd0   : > { %v10762_v32 = vsub.f32 %v10676_v49, %v4018_v5  ;;  %v4019_v25 = vmul.f32 0.0078125, %v3991_v11  ;;  %4064 = vadd.xlane.f32.xlu0 %v4048_v21  ;;  %v4049_v61 = vmul.f32 %v10757_v0, %v10757_v0 }
 0xdd1   : > { %v3993_v1 = vpop.xlane.xlu0 %3992 }
 0xdd2   : > { %v10767_v37 = vsub.f32 %v10683_v22, %v4019_v25  ;;  %v4020_v41 = vmul.f32 0.0078125, %v3993_v1  ;;  %4066 = vadd.xlane.f32.xlu1 %v4049_v61  ;;  %v4050_v9 = vmul.f32 %v10762_v32, %v10762_v32 }
 0xdd3   : > { %v3995_v27 = vpop.xlane.xlu1 %3994 }
 0xdd4   : > { %v10772_v42 = vsub.f32 %v10689_v34, %v4020_v41  ;;  %v4021_v47 = vmul.f32 0.0078125, %v3995_v27  ;;  %4068 = vadd.xlane.f32.xlu0 %v4050_v9  ;;  %v4051_v63 = vmul.f32 %v10767_v37, %v10767_v37 }
 0xdd5   : > { %v3997_v39 = vpop.xlane.xlu0 %3996 }
 0xdd6   : > { %v10777_v28 = vsub.f32 %v10694_v13, %v4021_v47  ;;  %v4022_v62 = vmul.f32 0.0078125, %v3997_v39  ;;  %4070 = vadd.xlane.f32.xlu1 %v4051_v63  ;;  %v4052_v8 = vmul.f32 %v10772_v42, %v10772_v42 }
 0xdd7   : > { %v3999_v53 = vpop.xlane.xlu1 %3998 }
 0xdd8   : > { %v10782_v38 = vsub.f32 %v10698_v3, %v4022_v62  ;;  %v4023_v20 = vmul.f32 0.0078125, %v3999_v53  ;;  %4072 = vadd.xlane.f32.xlu0 %v4052_v8  ;;  %v4053_v55 = vmul.f32 %v10777_v28, %v10777_v28 }
 0xdda   : > { %v10787_v40 = vsub.f32 %v10702_v16, %v4023_v20  ;;  %4074 = vadd.xlane.f32.xlu1 %v4053_v55  ;;  %v4054_v30 = vmul.f32 %v10782_v38, %v10782_v38 }
 0xddc   : > { %4076 = vadd.xlane.f32.xlu0 %v4054_v30  ;;  %v4055_v52 = vmul.f32 %v10787_v40, %v10787_v40 }
 0xdde   : > { %4078 = vadd.xlane.f32.xlu1 %v4055_v52  ;;  %v4200_v52 = vld [vmem:[%s13280_s29] sm:$0xff]  ;;  %s13580_s29 = sld [smem:[#allocation82_spill]] }
 0xe05   : > { %v4001_v50 = vpop.xlane.xlu0 %4000 }
 0xe06   : > { %v4024_v56 = vmul.f32 0.0078125, %v4001_v50  ;;  %v10837_v50 = vrot.slane %v4200_v52, %v9587_v31 }
 0xe07   : > { %v4003_v60 = vpop.xlane.xlu1 %4002 }
 0xe08   : > { %v10794_v57 = vsub.f32 %v10713_v17, %v4024_v56  ;;  %v4025_v26 = vmul.f32 0.0078125, %v4003_v60  ;;  %13282 = vst [vmem:[#allocation43_spill] sm:$0xff] %v10837_v50  ;;  %v10840_v56 = vrot.slane %v4200_v52, %v9579_v19  ;;  %v10843_v60 = vsub.s32 3, %v9573_v2 }
 0xe09   : > { %v4005_v6 = vpop.xlane.xlu0 %4004 }
 0xe0a   : > { %13272 = vst [vmem:[#allocation35_spill] sm:$0xff] %v10794_v57  ;;  %v10797_v29 = vsub.f32 %v10718_v4, %v4025_v26  ;;  %v4026_v14 = vmul.f32 0.0078125, %v4005_v6  ;;  %v4056_v46 = vmul.f32 %v10794_v57, %v10794_v57  ;;  %13283 = vst [vmem:[#allocation44_spill] sm:$0xff] %v10840_v56  ;;  %v4241_v26 = vmul.f32 0.0, %v10837_v50 }
 0xe0b   : > { %v4007_v10 = vpop.xlane.xlu1 %4006  ;;  %v4308_v6 = vmul.f32 0.0, %v10840_v56 }
 0xe0c   : > { %13273 = vst [vmem:[#allocation36_spill] sm:$0xff] %v10797_v29  ;;  %v10802_v12 = vsub.f32 %v10722_v44, %v4026_v14  ;;  %v4027_v58 = vmul.f32 0.0078125, %v4007_v10  ;;  %4080 = vadd.xlane.f32.xlu0 %v4056_v46  ;;  %v4057_v23 = vmul.f32 %v10797_v29, %v10797_v29  ;;  %v10848_v14 = vrot.slane %v4200_v52, %v9736_v54 }
 0xe0d   : > { %v10851_v46 = vsub.s32 4, %v9573_v2  ;;  %v4324_v10 = vadd.f32 %v4308_v6, %v4241_v26 }
 0xe0e   : > { %13274 = vst [vmem:[#allocation37_spill] sm:$0xff] %v10802_v12  ;;  %v10807_v7 = vsub.f32 %v10726_v45, %v4027_v58  ;;  %4082 = vadd.xlane.f32.xlu1 %v4057_v23  ;;  %v4058_v5 = vmul.f32 %v10802_v12, %v10802_v12  ;;  %13284 = vst [vmem:[#allocation45_spill] sm:$0xff] %v10848_v14  ;;  %v4375_v58 = vmul.f32 0.0, %v10848_v14 }
 0xe0f   : > { %v10855_v23 = vrot.slane %v4200_v52, %v10843_v60  ;;  %v10885_v45 = vrot.slane %v10651_v36, %v10843_v60  ;;  %v4201_v36 = vld [vmem:[%s13281_s28 + $0x8] sm:$0xff] }
 0xe10   : > { %13275 = vst [vmem:[#allocation38_spill] sm:$0xff] %v10807_v7  ;;  %4084 = vadd.xlane.f32.xlu0 %v4058_v5  ;;  %v4059_v21 = vmul.f32 %v10807_v7, %v10807_v7  ;;  %v4391_v5 = vadd.f32 %v4375_v58, %v4324_v10 }
 0xe11   : > { %13285 = vst [vmem:[#allocation46_spill] sm:$0xff] %v10855_v23  ;;  %13292 = vst [vmem:[#allocation53_spill] sm:$0xff] %v10885_v45 }
 0xe12   : > { %4086 = vadd.xlane.f32.xlu1 %v4059_v21  ;;  %v4442_v21 = vmul.f32 0.0, %v10855_v23 }
 0xe20   : > { %v4009_v11 = vpop.xlane.xlu0 %4008 }
 0xe21   : > { %v4028_v25 = vmul.f32 0.0078125, %v4009_v11  ;;  %v10859_v11 = vrot.slane %v4200_v52, %v10851_v46 }
 0xe22   : > { %v4011_v61 = vpop.xlane.xlu1 %4010 }
 0xe23   : > { %v10814_v1 = vsub.f32 %v10737_v43, %v4028_v25  ;;  %v4029_v41 = vmul.f32 0.0078125, %v4011_v61  ;;  %13286 = vst [vmem:[#allocation47_spill] sm:$0xff] %v10859_v11  ;;  %v10862_v61 = vsub.s32 5, %v9573_v2 }
 0xe24   : > { %v4013_v9 = vpop.xlane.xlu0 %4012 }
 0xe25   : > { %13276 = vst [vmem:[#allocation39_spill] sm:$0xff] %v10814_v1  ;;  %v10817_v27 = vsub.f32 %v10742_v48, %v4029_v41  ;;  %v4030_v47 = vmul.f32 0.0078125, %v4013_v9  ;;  %v4060_v63 = vmul.f32 %v10814_v1, %v10814_v1  ;;  %13287 = vst [vmem:[#allocation48_spill] sm:$0xff] %v10862_v61 }
 0xe26   : > { %v4015_v39 = vpop.xlane.xlu1 %4014 }
 0xe27   : > { %13277 = vst [vmem:[#allocation40_spill] sm:$0xff] %v10817_v27  ;;  %v10822_v62 = vsub.f32 %v10746_v33, %v4030_v47  ;;  %v4031_v8 = vmul.f32 0.0078125, %v4015_v39  ;;  %4088 = vadd.xlane.f32.xlu0 %v4060_v63  ;;  %v4061_v53 = vmul.f32 %v10817_v27, %v10817_v27  ;;  %v4458_v39 = vadd.f32 %v4442_v21, %v4391_v5 }
 0xe29   : > { %13278 = vst [vmem:[#allocation41_spill] sm:$0xff] %v10822_v62  ;;  %v10827_v20 = vsub.f32 %v10750_v15, %v4031_v8  ;;  %4090 = vadd.xlane.f32.xlu1 %v4061_v53  ;;  %v4062_v55 = vmul.f32 %v10822_v62, %v10822_v62  ;;  %v4509_v8 = vmul.f32 0.0, %v10859_v11 }
 0xe2b   : > { %13279 = vst [vmem:[#allocation42_spill] sm:$0xff] %v10827_v20  ;;  %4092 = vadd.xlane.f32.xlu0 %v4062_v55  ;;  %v4063_v30 = vmul.f32 %v10827_v20, %v10827_v20  ;;  %v10866_v55 = vrot.slane %v4200_v52, %v10862_v61 }
 0xe2d   : > { %4094 = vadd.xlane.f32.xlu1 %v4063_v30  ;;  %13288 = vst [vmem:[#allocation49_spill] sm:$0xff] %v10866_v55  ;;  %v10869_v30 = vsub.s32 6, %v9573_v2  ;;  %v4576_v5 = vmul.f32 0.0, %v10866_v55 }
 0xe2f   : > { %v10873_v21 = vrot.slane %v4200_v52, %v10869_v30 }
 0xe31   : > { %13289 = vst [vmem:[#allocation50_spill] sm:$0xff] %v10873_v21 }
 0xe5d   : > { %v4065_v25 = vpop.xlane.xlu0 %4064 }
 0xe5e   : > { %v4096_v41 = vmul.f32 0.0078125, %v4065_v25  ;;  %v4525_v25 = vadd.f32 %v4509_v8, %v4458_v39  ;;  %v10881_v8 = vrot.slane %v9576_v18, %v10851_v46 }
 0xe5f   : > { %v4067_v9 = vpop.xlane.xlu1 %4066 }
 0xe60   : > { %v4112_v47 = vadd.f32 1e-06, %v4096_v41  ;;  %v4097_v63 = vmul.f32 0.0078125, %v4067_v9  ;;  %v4677_v9 = vsub.s32 7, %v9573_v2  ;;  %13291 = vst [vmem:[#allocation52_spill] sm:$0xff] %v10881_v8 }
 0xe61   : > { %v4069_v53 = vpop.xlane.xlu0 %4068 }
 0xe62   : > { %8856 = vrsqrt.f32 %v4112_v47  ;;  %v4113_v26 = vadd.f32 1e-06, %v4097_v63  ;;  %v4098_v6 = vmul.f32 0.0078125, %v4069_v53  ;;  %v4592_v63 = vadd.f32 %v4576_v5, %v4525_v25 }
 0xe63   : > { %v4071_v10 = vpop.xlane.xlu1 %4070  ;;  %v4643_v53 = vmul.f32 0.0, %v10873_v21 }
 0xe64   : > { %8858 = vrsqrt.f32 %v4113_v26  ;;  %v4114_v58 = vadd.f32 1e-06, %v4098_v6  ;;  %v4099_v15 = vmul.f32 0.0078125, %v4071_v10  ;;  %v10877_v26 = vrot.slane %v4200_v52, %v4677_v9 }
 0xe65   : > { %v4073_v41 = vpop.xlane.xlu0 %4072  ;;  %v4659_v25 = vadd.f32 %v4643_v53, %v4592_v63  ;;  %v10903_v63 = vrot.slane %v4201_v36, %v9736_v54 }
 0xe66   : > { %8860 = vrsqrt.f32 %v4114_v58  ;;  %v4100_v48 = vmul.f32 0.0078125, %v4073_v41  ;;  %v4115_v43 = vadd.f32 1e-06, %v4099_v15  ;;  %13290 = vst [vmem:[#allocation51_spill] sm:$0xff] %v10877_v26  ;;  %v4679_v41 = vmul.f32 0.0, %v10877_v26 }
 0xe67   : > { %v4075_v33 = vpop.xlane.xlu1 %4074  ;;  %13294 = vst [vmem:[#allocation55_spill] sm:$0xff] %v10903_v63 }
 0xe68   : > { %v4101_v39 = vmul.f32 0.0078125, %v4075_v33  ;;  %v4116_v58 = vadd.f32 1e-06, %v4100_v48  ;;  %8862 = vrsqrt.f32 %v4115_v43  ;;  %v10897_v48 = vrot.slane %v4201_v36, %v9587_v31 }
 0xe69   : > { %v4077_v47 = vpop.xlane.xlu0 %4076 }
 0xe6a   : > { %v4102_v6 = vmul.f32 0.0078125, %v4077_v47  ;;  %v4117_v5 = vadd.f32 1e-06, %v4101_v39  ;;  %8864 = vrsqrt.f32 %v4116_v58  ;;  %v10916_v58 = vrot.slane %v4201_v36, %v10843_v60 }
 0xe6b   : > { %v4079_v33 = vpop.xlane.xlu1 %4078 }
 0xe6c   : > { %v8857_v10 = vpop.eup %8856  ;;  %v4118_v44 = vadd.f32 1e-06, %v4102_v6  ;;  %v4103_v39 = vmul.f32 0.0078125, %v4079_v33  ;;  %v4202_v6 = vld [vmem:[%s13281_s28 + $0x10] sm:$0xff]  ;;  %8866 = vrsqrt.f32 %v4117_v5  ;;  %13295 = vst [vmem:[#allocation56_spill] sm:$0xff] %v10916_v58  ;;  %v10931_v5 = vrot.slane %v4201_v36, %v10862_v61 }
 0xe6d   : > { %v4144_v15 = vmul.f32 %v8857_v10, %v10754_v51  ;;  %v10900_v51 = vrot.slane %v4201_v36, %v9579_v19  ;;  %v10912_v10 = vadd.f32 %v4679_v41, %v4659_v25  ;;  %v10936_v4 = vrot.slane %v4202_v6, %v4677_v9 }
 0xe6e   : > { %v8859_v52 = vpop.eup %8858  ;;  %8868 = vrsqrt.f32 %v4118_v44  ;;  %13298 = vst [vmem:[#allocation59_spill] sm:$0xff] %v10931_v5  ;;  %v4119_v17 = vadd.f32 1e-06, %v4103_v39  ;;  %v10943_v44 = vrot.slane %v4202_v6, %v9579_v19  ;;  %v10957_v39 = vrot.slane %v4202_v6, %v10843_v60 }
 0xe6f   : > { %v4164_v18 = vmul.f32 %v10881_v8, %v4144_v15  ;;  %v4145_v47 = vmul.f32 %v8859_v52, %v10757_v0  ;;  %13293 = vst [vmem:[#allocation54_spill] sm:$0xff] %v10900_v51  ;;  %v10919_v15 = vrot.slane %v4201_v36, %v10851_v46  ;;  %v10921_v52 = vrot.slane %v4201_v36, %v4677_v9 }
 0xe70   : > { %v8861_v43 = vpop.eup %8860  ;;  %13300 = vst [vmem:[#allocation61_spill] sm:$0xff] %v10936_v4  ;;  %13301 = vst [vmem:[#allocation62_spill] sm:$0xff] %v10943_v44  ;;  %v10966_v34 = vrot.slane %v4202_v6, %v10851_v46  ;;  %v10969_v9 = vrot.slane %v4202_v6, %v10862_v61  ;;  %8870 = vrsqrt.f32 %v4119_v17  ;;  %v10988_v62 = vrot.slane %v4202_v6, %v10869_v30 }
 0xe71   : > { %v10906_v0 = vadd.f32 %v10885_v45, %v4164_v18  ;;  %v4165_v53 = vmul.f32 %v10881_v8, %v4145_v47  ;;  %13296 = vst [vmem:[#allocation57_spill] sm:$0xff] %v10919_v15  ;;  %13297 = vst [vmem:[#allocation58_spill] sm:$0xff] %v10921_v52  ;;  %v4146_v33 = vmul.f32 %v8861_v43, %v10762_v32  ;;  %v4203_v43 = vld [vmem:[%s13281_s28 + $0x18] sm:$0x7f] }
 0xe72   : > { %v10934_v47 = vrot.slane %v4201_v36, %v10869_v30  ;;  %v10940_v32 = vrot.slane %v4202_v6, %v9587_v31  ;;  %v10954_v36 = vrot.slane %v4202_v6, %v9736_v54  ;;  %13303 = vst [vmem:[#allocation64_spill] sm:$0xff] %v10969_v9  ;;  %13306 = vst [vmem:[#allocation65_spill] sm:$0xff] %v10988_v62 }
 0xe73   : > { %v10924_v18 = vadd.f32 %v10885_v45, %v4165_v53  ;;  %v4204_v25 = vrot.slane %v10906_v0, 1  ;;  %v4273_v41 = vrot.slane %v10906_v0, 2  ;;  %v8863_v53 = vpop.eup %8862  ;;  %v4166_v3 = vmul.f32 %v10881_v8, %v4146_v33 }
 0xe74   : > { %13299 = vst [vmem:[#allocation60_spill] sm:$0xff] %v10934_v47  ;;  %13302 = vst [vmem:[#allocation63_spill] sm:$0xff] %v10954_v36  ;;  %v4340_v20 = vrot.slane %v10906_v0, 3  ;;  %v4147_v27 = vmul.f32 %v8863_v53, %v10767_v37  ;;  %v11006_v59 = vrot.slane %v4203_v43, %v9579_v19  ;;  %v11009_v37 = vrot.slane %v4203_v43, %v9736_v54 }
 0xe75   : > { %v10950_v16 = vsel %vm4221_vm2, 0.0, %v4204_v25  ;;  %v10962_v13 = vsel %vm4288_vm3, 0.0, %v4273_v41  ;;  %v13304_v22 = vrot.slane %v10924_v18, 1  ;;  %v13305_v24 = vrot.slane %v10924_v18, 2 }
 0xe76   : > { %v4242_v33 = vmul.f32 %v10837_v50, %v10950_v16  ;;  %v11002_v6 = vadd.f32 %v10885_v45, %v4166_v3  ;;  %13308 = vst [vmem:[#allocation67_spill] sm:$0xff] %v11006_v59  ;;  %13309 = vst [vmem:[#allocation68_spill] sm:$0xff] %v11009_v37  ;;  %v13310_v7 = vrot.slane %v10924_v18, 3  ;;  %v11019_v3 = vrot.slane %v4203_v43, %v10843_v60 }
 0xe77   : > { %v10975_v49 = vsel %vm4221_vm2, %v4204_v25, %v13304_v22  ;;  %v10983_v35 = vsel %vm4288_vm3, %v4273_v41, %v13305_v24  ;;  %v10991_v22 = vrot.slane %v4203_v43, %v9587_v31  ;;  %v8865_v25 = vpop.eup %8864  ;;  %v4309_v24 = vmul.f32 %v10840_v56, %v10962_v13 }
 0xe78   : > { %v4243_v1 = vmul.f32 %v10837_v50, %v10975_v49  ;;  %v4310_v17 = vmul.f32 %v10840_v56, %v10983_v35  ;;  %v4407_v41 = vrot.slane %v10906_v0, 4  ;;  %v8867_v53 = vpop.eup %8866  ;;  %v11015_v12 = vsel %vm4355_vm4, %v4340_v20, %v13310_v7  ;;  %13311 = vst [vmem:[#allocation69_spill] sm:$0xff] %v11019_v3 }
 0xe79   : > { %13307 = vst [vmem:[#allocation66_spill] sm:$0xff] %v10991_v22  ;;  %v4325_v31 = vadd.f32 %v4309_v24, %v4242_v33  ;;  %v11022_v29 = vrot.slane %v4203_v43, %v10851_v46  ;;  %v8869_v19 = vpop.eup %8868  ;;  %v4148_v54 = vmul.f32 %v8865_v25, %v10772_v42  ;;  %v11027_v33 = vsel %vm4355_vm4, 0.0, %v4340_v20 }
 0xe7a   : > { %v4326_v57 = vadd.f32 %v4310_v17, %v4243_v1  ;;  %v11030_v24 = vrot.slane %v4203_v43, %v10862_v61  ;;  %v4167_v7 = vmul.f32 %v10881_v8, %v4147_v27  ;;  %v4376_v60 = vmul.f32 %v10848_v14, %v11027_v33 }
 0xe7b   : > { %13312 = vst [vmem:[#allocation70_spill] sm:$0xff] %v11022_v29  ;;  %v4408_v3 = vrot.slane %v10924_v18, 4  ;;  %v4474_v46 = vrot.slane %v10906_v0, 5  ;;  %v4149_v29 = vmul.f32 %v8867_v53, %v10777_v28  ;;  %v4377_v1 = vmul.f32 %v10848_v14, %v11015_v12 }
 0xe7c   : > { %13313 = vst [vmem:[#allocation71_spill] sm:$0xff] %v11030_v24  ;;  %v11043_v20 = vsel %vm4422_vm5, 0.0, %v4407_v41  ;;  %v4150_v27 = vmul.f32 %v8869_v19, %v10782_v38  ;;  %v4392_v25 = vadd.f32 %v4376_v60, %v4325_v31  ;;  %v4168_v28 = vmul.f32 %v10881_v8, %v4148_v54  ;;  %v8871_v38 = vpop.eup %8870 }
 0xe7d   : > { %v11048_v17 = vsel %vm4422_vm5, %v4407_v41, %v4408_v3  ;;  %v4443_v61 = vmul.f32 %v10855_v23, %v11043_v20  ;;  %v4393_v53 = vadd.f32 %v4377_v1, %v4326_v57  ;;  %v4475_v42 = vrot.slane %v10924_v18, 5 }
 0xe7e   : > { %v11055_v24 = vrot.slane %v4203_v43, %v10869_v30  ;;  %v11060_v19 = vsel %vm4489_vm6, 0.0, %v4474_v46  ;;  %v4541_v31 = vrot.slane %v10906_v0, 6  ;;  %v11064_v41 = vadd.f32 %v10885_v45, %v4167_v7 }
 0xe7f   : > { %v4459_v59 = vadd.f32 %v4443_v61, %v4392_v25  ;;  %v4169_v57 = vmul.f32 %v10881_v8, %v4149_v29  ;;  %v4444_v54 = vmul.f32 %v10855_v23, %v11048_v17  ;;  %v4510_v30 = vmul.f32 %v10859_v11, %v11060_v19 }
 0xe80   : > { %13314 = vst [vmem:[#allocation72_spill] sm:$0xff] %v11055_v24  ;;  %13315 = vst [vmem:[#allocation73_spill] sm:$0xff] %v11064_v41  ;;  %v4170_v61 = vmul.f32 %v10881_v8, %v4150_v27  ;;  %v13316_v43 = vrot.slane %v11002_v6, 2  ;;  %v13317_v60 = vrot.slane %v10924_v18, 2  ;;  %v11082_v7 = vsel %vm4489_vm6, %v4474_v46, %v4475_v42 }
 0xe81   : > { %v4542_v29 = vrot.slane %v10924_v18, 6  ;;  %v4460_v25 = vadd.f32 %v4444_v54, %v4393_v53  ;;  %v4526_v37 = vadd.f32 %v4510_v30, %v4459_v59  ;;  %v4571_v24 = vsel %vm4556_vm7, 0.0, %v4541_v31 }
 0xe82   : > { %v11078_v1 = vsel %vm4288_vm3, %v13317_v60, %v13316_v43  ;;  %v4608_v27 = vrot.slane %v10906_v0, 7  ;;  %v11089_v41 = vadd.f32 %v10885_v45, %v4168_v28  ;;  %v4151_v22 = vmul.f32 %v8871_v38, %v10787_v40 }
 0xe83   : > { %v13319_v43 = vrot.slane %v11002_v6, 1  ;;  %v13320_v60 = vrot.slane %v10924_v18, 1  ;;  %v4577_v59 = vmul.f32 %v10866_v55, %v4571_v24  ;;  %v11102_v53 = vadd.f32 %v10885_v45, %v4169_v57 }
 0xe84   : > { %13318 = vst [vmem:[#allocation74_spill] sm:$0xff] %v11089_v41  ;;  %v4511_v54 = vmul.f32 %v10859_v11, %v11082_v7  ;;  %v4609_v28 = vrot.slane %v10924_v18, 7  ;;  %v4638_v40 = vsel %vm4623_vm8, 0.0, %v4608_v27  ;;  %v11111_v38 = vmul.f32 %v10840_v56, %v11078_v1 }
 0xe85   : > { %v11098_v46 = vsel %vm4221_vm2, %v13320_v60, %v13319_v43  ;;  %13321 = vst [vmem:[#allocation75_spill] sm:$0xff] %v11102_v53  ;;  %v11115_v30 = vsel %vm4556_vm7, %v4541_v31, %v4542_v29  ;;  %v4593_v43 = vadd.f32 %v4577_v59, %v4526_v37  ;;  %v4644_v57 = vmul.f32 %v10873_v21, %v4638_v40 }
 0xe86   : > { %v11119_v60 = vadd.f32 %v10885_v45, %v4170_v61  ;;  %v13060_v53 = vrot.slane %v11002_v6, 3  ;;  %v4527_v4 = vadd.f32 %v4511_v54, %v4460_v25  ;;  %v4171_v62 = vmul.f32 %v10881_v8, %v4151_v22 }
 0xe87   : > { %v4660_v9 = vadd.f32 %v4644_v57, %v4593_v43  ;;  %v4680_v56 = vmul.f32 %v10877_v26, %v10906_v0  ;;  %v4717_v31 = vmul.f32 %v10897_v48, %v10950_v16  ;;  %v4578_v61 = vmul.f32 %v10866_v55, %v11115_v30 }
 0xe88   : > { %13322 = vst [vmem:[#allocation76_spill] sm:$0xff] %v11119_v60  ;;  %v11134_v41 = vsel %vm4623_vm8, %v4608_v27, %v4609_v28  ;;  %v4718_v22 = vmul.f32 %v10897_v48, %v10975_v49  ;;  %v4755_v16 = vmul.f32 %v10900_v51, %v10962_v13  ;;  %v13323_v43 = vrot.slane %v10924_v18, 3 }
 0xe89   : > { %v4696_v25 = vadd.f32 %v4680_v56, %v4660_v9  ;;  %v4733_v54 = vadd.f32 %v4717_v31, %v10912_v10  ;;  %v13324_v27 = vrot.slane %v11002_v6, 4  ;;  %v4594_v9 = vadd.f32 %v4578_v61, %v4527_v4 }
 0xe8a   : > { %v11147_v57 = vsel %vm4355_vm4, %v13323_v43, %v13060_v53  ;;  %v13061_v10 = vrot.slane %v11002_v6, 7  ;;  %v4756_v13 = vmul.f32 %v10900_v51, %v10983_v35  ;;  %v4793_v37 = vmul.f32 %v10903_v63, %v11027_v33 }
 0xe8b   : > { %v11153_v56 = vsel %vm4422_vm5, %v4408_v3, %v13324_v27  ;;  %v4734_v31 = vadd.f32 %v4718_v22, %v4696_v25  ;;  %v4771_v59 = vadd.f32 %v4755_v16, %v4733_v54  ;;  %v11161_v43 = vadd.f32 %v10885_v45, %v4171_v62 }
 0xe8c   : > { %v13326_v53 = vrot.slane %v11002_v6, 5  ;;  %v13327_v4 = vrot.slane %v11002_v6, 6  ;;  %v4645_v25 = vmul.f32 %v10873_v21, %v11134_v41  ;;  %v4794_v62 = vmul.f32 %v10903_v63, %v11015_v12 }
 0xe8d   : > { %13325 = vst [vmem:[#allocation77_spill] sm:$0xff] %v11161_v43  ;;  %v4772_v22 = vadd.f32 %v4756_v13, %v4734_v31  ;;  %v4809_v33 = vadd.f32 %v4793_v37, %v4771_v59  ;;  %v4831_v54 = vmul.f32 %v10916_v58, %v11043_v20  ;;  %v4832_v37 = vmul.f32 %v10916_v58, %v11048_v17 }
 0xe8e   : > { %v11167_v3 = vsel %vm4489_vm6, %v4475_v42, %v13326_v53  ;;  %v11173_v61 = vsel %vm4556_vm7, %v4542_v29, %v13327_v4  ;;  %v4378_v42 = vmul.f32 %v10848_v14, %v11147_v57  ;;  %v4445_v53 = vmul.f32 %v10855_v23, %v11153_v56 }
 0xe8f   : > { %v11189_v29 = vsel %vm4623_vm8, %v4609_v28, %v13061_v10  ;;  %v4661_v16 = vadd.f32 %v4645_v25, %v4594_v9  ;;  %v4810_v27 = vadd.f32 %v4794_v62, %v4772_v22  ;;  %v4847_v59 = vadd.f32 %v4831_v54, %v4809_v33 }
 0xe90   : > { %v4869_v20 = vmul.f32 %v10919_v15, %v11060_v19  ;;  %v4512_v31 = vmul.f32 %v10859_v11, %v11167_v3  ;;  %v11199_v13 = vmul.f32 %v10866_v55, %v11173_v61  ;;  %v4681_v28 = vmul.f32 %v10877_v26, %v10924_v18 }
 0xe91   : > { %v11205_v9 = vmul.f32 %v10877_v26, %v11002_v6  ;;  %v4848_v4 = vadd.f32 %v4832_v37, %v4810_v27  ;;  %v4870_v25 = vmul.f32 %v10919_v15, %v11082_v7  ;;  %v4907_v19 = vmul.f32 %v10931_v5, %v4571_v24 }
 0xe92   : > { %v4885_v22 = vadd.f32 %v4869_v20, %v4847_v59  ;;  %v11212_v62 = vmul.f32 %v10873_v21, %v11189_v29  ;;  %v4697_v33 = vadd.f32 %v4681_v28, %v4661_v16  ;;  %v4757_v54 = vmul.f32 %v10900_v51, %v11078_v1 }
 0xe93   : > { %v4795_v10 = vmul.f32 %v10903_v63, %v11147_v57  ;;  %v4886_v43 = vadd.f32 %v4870_v25, %v4848_v4  ;;  %v4908_v27 = vmul.f32 %v10931_v5, %v11115_v30  ;;  %v4945_v59 = vmul.f32 %v10934_v47, %v4638_v40 }
 0xe94   : > { %v4923_v37 = vadd.f32 %v4907_v19, %v4885_v22  ;;  %v4833_v24 = vmul.f32 %v10916_v58, %v11153_v56  ;;  %v4871_v20 = vmul.f32 %v10919_v15, %v11167_v3  ;;  %v11227_v16 = vmul.f32 %v10931_v5, %v11173_v61 }
 0xe95   : > { %v4946_v28 = vmul.f32 %v10934_v47, %v11134_v41  ;;  %v4924_v4 = vadd.f32 %v4908_v27, %v4886_v43  ;;  %v11233_v25 = vmul.f32 %v10934_v47, %v11189_v29  ;;  %v4981_v40 = vmul.f32 %v10921_v52, %v10906_v0 }
 0xe96   : > { %v4961_v22 = vadd.f32 %v4945_v59, %v4923_v37  ;;  %v4982_v60 = vmul.f32 %v10921_v52, %v10924_v18  ;;  %v11241_v5 = vmul.f32 %v10921_v52, %v11002_v6  ;;  %v5018_v15 = vmul.f32 %v10940_v32, %v10975_v49 }
 0xe97   : > { %v4244_v43 = vmul.f32 %v10837_v50, %v11098_v46  ;;  %v4962_v47 = vadd.f32 %v4946_v28, %v4924_v4  ;;  %v5055_v0 = vmul.f32 %v10943_v44, %v10983_v35  ;;  %v5056_v58 = vmul.f32 %v10943_v44, %v11078_v1 }
 0xe98   : > { %v4997_v37 = vadd.f32 %v4981_v40, %v4961_v22  ;;  %v5092_v52 = vmul.f32 %v10954_v36, %v11015_v12  ;;  %v4719_v49 = vmul.f32 %v10897_v48, %v11098_v46  ;;  %v5093_v35 = vmul.f32 %v10954_v36, %v11147_v57 }
 0xe99   : > { %v4081_v19 = vpop.xlane.xlu0 %4080  ;;  %v4327_v63 = vadd.f32 %v11111_v38, %v4244_v43  ;;  %v5019_v44 = vmul.f32 %v10940_v32, %v11098_v46  ;;  %v5129_v43 = vmul.f32 %v10957_v39, %v11048_v17 }
 0xe9a   : > { %v4104_v27 = vmul.f32 0.0078125, %v4081_v19  ;;  %v4998_v19 = vadd.f32 %v4982_v60, %v4962_v47  ;;  %v5034_v28 = vadd.f32 %v5018_v15, %v4997_v37  ;;  %v4735_v40 = vadd.f32 %v4719_v49, %v4697_v33 }
 0xe9b   : > { %v4083_v59 = vpop.xlane.xlu1 %4082  ;;  %v4394_v22 = vadd.f32 %v4378_v42, %v4327_v63  ;;  %v5130_v60 = vmul.f32 %v10957_v39, %v11153_v56  ;;  %v5166_v63 = vmul.f32 %v10966_v34, %v11082_v7  ;;  %v5167_v42 = vmul.f32 %v10966_v34, %v11167_v3 }
 0xe9c   : > { %v4120_v45 = vadd.f32 1e-06, %v4104_v27  ;;  %v4105_v50 = vmul.f32 0.0078125, %v4083_v59  ;;  %v5071_v38 = vadd.f32 %v5055_v0, %v5034_v28  ;;  %v4773_v59 = vadd.f32 %v4757_v54, %v4735_v40  ;;  %v13329_v54 = vld [vmem:[#allocation65_spill] sm:$0xff]  ;;  %v13333_v40 = vld [vmem:[#allocation67_spill] sm:$0xff] }
 0xe9d   : > { %v4085_v4 = vpop.xlane.xlu0 %4084  ;;  %v4461_v27 = vadd.f32 %v4445_v53, %v4394_v22  ;;  %v5035_v47 = vadd.f32 %v5019_v44, %v4998_v19  ;;  %v5240_v49 = vmul.f32 %v13329_v54, %v11134_v41  ;;  %v5241_v7 = vmul.f32 %v13329_v54, %v11189_v29 }
 0xe9e   : > { %8872 = vrsqrt.f32 %v4120_v45  ;;  %v4121_v12 = vadd.f32 1e-06, %v4105_v50  ;;  %v4106_v51 = vmul.f32 0.0078125, %v4085_v4  ;;  %v5108_v15 = vadd.f32 %v5092_v52, %v5071_v38  ;;  %v13328_v45 = vld [vmem:[#allocation64_spill] sm:$0xff] }
 0xe9f   : > { %v5203_v50 = vmul.f32 %v13328_v45, %v11115_v30  ;;  %v4528_v33 = vadd.f32 %v4512_v31, %v4461_v27  ;;  %v4811_v37 = vadd.f32 %v4795_v10, %v4773_v59  ;;  %v5072_v0 = vadd.f32 %v5056_v58, %v5035_v47  ;;  %v4087_v44 = vpop.xlane.xlu1 %4086  ;;  %v13330_v30 = vld [vmem:[#allocation61_spill] sm:$0xff]  ;;  %v13331_v58 = vld [vmem:[#allocation66_spill] sm:$0xff] }
 0xea0   : > { %8874 = vrsqrt.f32 %v4121_v12  ;;  %v4122_v17 = vadd.f32 1e-06, %v4106_v51  ;;  %v5145_v53 = vadd.f32 %v5129_v43, %v5108_v15  ;;  %v5204_v52 = vmul.f32 %v13328_v45, %v11173_v61  ;;  %v13332_v31 = vld [vmem:[#allocation73_spill] sm:$0xff] }
 0xea1   : > { %v4849_v19 = vadd.f32 %v4833_v24, %v4811_v37  ;;  %v5109_v28 = vadd.f32 %v5093_v35, %v5072_v0  ;;  %v5276_v10 = vmul.f32 %v13330_v30, %v10924_v18  ;;  %v5312_v51 = vmul.f32 %v13331_v58, %v11098_v46  ;;  %v13334_v35 = vld [vmem:[#allocation68_spill] sm:$0xff]  ;;  %v13335_v18 = vld [vmem:[#allocation69_spill] sm:$0xff]  ;;  %v13336_v46 = vld [vmem:[#allocation70_spill] sm:$0xff] }
 0xea2   : > { %v5182_v4 = vadd.f32 %v5166_v63, %v5145_v53  ;;  %v13090_v22 = vrot.slane %v13332_v31, 1  ;;  %v5348_v12 = vmul.f32 %v13333_v40, %v11078_v1  ;;  %v4595_v38 = vadd.f32 %v11199_v13, %v4528_v33  ;;  %v13337_v63 = vld [vmem:[#allocation71_spill] sm:$0xff] }
 0xea3   : > { %v4887_v41 = vadd.f32 %v4871_v20, %v4849_v19  ;;  %v5146_v43 = vadd.f32 %v5130_v60, %v5109_v28  ;;  %8876 = vrsqrt.f32 %v4122_v17  ;;  %v4107_v27 = vmul.f32 0.0078125, %v4087_v44  ;;  %v13338_v60 = vld [vmem:[#allocation72_spill] sm:$0xff]  ;;  %v13341_v28 = vld [vmem:[#allocation35_spill] sm:$0xff] }
 0xea4   : > { %v5219_v24 = vadd.f32 %v5203_v50, %v5182_v4  ;;  %v5384_v59 = vmul.f32 %v13334_v35, %v11147_v57  ;;  %v5420_v47 = vmul.f32 %v13335_v18, %v11153_v56  ;;  %v5456_v15 = vmul.f32 %v13336_v46, %v11167_v3 }
 0xea5   : > { %v5492_v37 = vmul.f32 %v13337_v63, %v11173_v61  ;;  %v13088_v1 = vrot.slane %v13332_v31, 2  ;;  %v11295_v33 = vmul.f32 %v13338_v60, %v11189_v29  ;;  %v13339_v57 = vrot.slane %v11002_v6, 1  ;;  %v13340_v29 = vld [vmem:[#allocation74_spill] sm:$0xff] }
 0xea6   : > { %v5256_v20 = vadd.f32 %v5240_v49, %v5219_v24  ;;  %v4925_v3 = vadd.f32 %v11227_v16, %v4887_v41  ;;  %v4662_v50 = vadd.f32 %v11212_v62, %v4595_v38  ;;  %v5183_v61 = vadd.f32 %v5167_v42, %v5146_v43  ;;  %v13354_v49 = vld [vmem:[#allocation55_spill] sm:$0xff] }
 0xea7   : > { %v4233_v56 = vsel %vm4221_vm2, %v13339_v57, %v13090_v22  ;;  %v13086_v0 = vrot.slane %v13332_v31, 3  ;;  %v13085_v17 = vrot.slane %v13332_v31, 4  ;;  %v4123_v53 = vadd.f32 1e-06, %v4107_v27 }
 0xea8   : > { %v8873_v13 = vpop.eup %8872  ;;  %v5292_v44 = vadd.f32 %v5276_v10, %v5256_v20  ;;  %v13084_v19 = vrot.slane %v13332_v31, 5  ;;  %v13342_v24 = vrot.slane %v11002_v6, 2  ;;  %v13087_v16 = vrot.slane %v13332_v31, 6 }
 0xea9   : > { %v4152_v4 = vmul.f32 %v8873_v13, %v13341_v28  ;;  %v13089_v42 = vrot.slane %v13332_v31, 7  ;;  %v4720_v10 = vmul.f32 %v10897_v48, %v4233_v56  ;;  %v4963_v43 = vadd.f32 %v11233_v25, %v4925_v3  ;;  %v13345_v3 = vld [vmem:[#allocation44_spill] sm:$0xff] }
 0xeaa   : > { %v4300_v62 = vsel %vm4288_vm3, %v13342_v24, %v13088_v1  ;;  %v8875_v38 = vpop.eup %8874  ;;  %v5328_v41 = vadd.f32 %v5312_v51, %v5292_v44  ;;  %v5020_v27 = vmul.f32 %v10940_v32, %v4233_v56  ;;  %v4698_v13 = vadd.f32 %v11205_v9, %v4662_v50 }
 0xeab   : > { %v5220_v20 = vadd.f32 %v5204_v52, %v5183_v61  ;;  %v13343_v57 = vrot.slane %v11002_v6, 3  ;;  %v13344_v51 = vrot.slane %v11002_v6, 4  ;;  %8878 = vrsqrt.f32 %v4123_v53  ;;  %v13347_v61 = vld [vmem:[#allocation36_spill] sm:$0xff] }
 0xeac   : > { %v5364_v25 = vadd.f32 %v5348_v12, %v5328_v41  ;;  %v4312_v24 = vmul.f32 %v13345_v3, %v4300_v62  ;;  %v13346_v9 = vrot.slane %v11002_v6, 5  ;;  %v4172_v50 = vmul.f32 %v10881_v8, %v4152_v4 }
 0xead   : > { %v4367_v28 = vsel %vm4355_vm4, %v13343_v57, %v13086_v0  ;;  %v4434_v44 = vsel %vm4422_vm5, %v13344_v51, %v13085_v17  ;;  %v4153_v57 = vmul.f32 %v8875_v38, %v13347_v61  ;;  %v13348_v51 = vrot.slane %v11002_v6, 6 }
 0xeae   : > { %v11341_v52 = vsel %vm4489_vm6, %v13346_v9, %v13084_v19  ;;  %v13349_v53 = vrot.slane %v11002_v6, 7  ;;  %v8877_v9 = vpop.eup %8876  ;;  %v5400_v4 = vadd.f32 %v5384_v59, %v5364_v25  ;;  %v4999_v38 = vadd.f32 %v11241_v5, %v4963_v43  ;;  %v13350_v59 = vld [vmem:[#allocation54_spill] sm:$0xff]  ;;  %v13351_v25 = vld [vmem:[#allocation53_spill] sm:$0xff] }
 0xeaf   : > { %v11351_v12 = vsel %vm4556_vm7, %v13348_v51, %v13087_v16  ;;  %v4379_v61 = vmul.f32 %v10848_v14, %v4367_v28  ;;  %v4446_v19 = vmul.f32 %v10855_v23, %v4434_v44  ;;  %v4736_v17 = vadd.f32 %v4720_v10, %v4698_v13  ;;  %v13353_v13 = vld [vmem:[#allocation37_spill] sm:$0xff]  ;;  %v13357_v14 = vld [vmem:[#allocation62_spill] sm:$0xff] }
 0xeb0   : > { %v11359_v41 = vsel %vm4623_vm8, %v13349_v53, %v13089_v42  ;;  %v5257_v0 = vadd.f32 %v5241_v7, %v5220_v20  ;;  %v4513_v51 = vmul.f32 %v10859_v11, %v11341_v52  ;;  %v11368_v16 = vmul.f32 %v10877_v26, %v13332_v31  ;;  %v13355_v11 = vld [vmem:[#allocation56_spill] sm:$0xff] }
 0xeb1   : > { %v5436_v1 = vadd.f32 %v5420_v47, %v5400_v4  ;;  %v4580_v53 = vmul.f32 %v10866_v55, %v11351_v12  ;;  %v11374_v5 = vmul.f32 %v10873_v21, %v11359_v41  ;;  %v4758_v43 = vmul.f32 %v13350_v59, %v4300_v62  ;;  %v13356_v59 = vld [vmem:[#allocation57_spill] sm:$0xff] }
 0xeb2   : > { %v11378_v10 = vadd.f32 %v13351_v25, %v4172_v50  ;;  %v4173_v7 = vmul.f32 %v10881_v8, %v4153_v57  ;;  %v4154_v20 = vmul.f32 %v8877_v9, %v13353_v13  ;;  %v5277_v42 = vmul.f32 %v13330_v30, %v11002_v6  ;;  %v13358_v13 = vld [vmem:[#allocation43_spill] sm:$0xff] }
 0xeb3   : > { %v5472_v47 = vadd.f32 %v5456_v15, %v5436_v1  ;;  %v5036_v4 = vadd.f32 %v5020_v27, %v4999_v38  ;;  %v4796_v55 = vmul.f32 %v13354_v49, %v4367_v28  ;;  %v4834_v21 = vmul.f32 %v13355_v11, %v4434_v44  ;;  %v11394_v15 = vld [vmem:[%s13359_s13] ss:$0 sm:$0xff] }
 0xeb4   : > { %13352 = vst [vmem:[#allocation64_spill] sm:$0xff] %v11378_v10  ;;  %v4089_v22 = vpop.xlane.xlu0 %4088  ;;  %v4872_v23 = vmul.f32 %v13356_v59, %v11341_v52  ;;  %v5293_v50 = vadd.f32 %v5277_v42, %v5257_v0  ;;  %v5313_v10 = vmul.f32 %v13331_v58, %v4233_v56  ;;  %v5057_v9 = vmul.f32 %v13357_v14, %v4300_v62 }
 0xeb5   : > { %v4108_v26 = vmul.f32 0.0078125, %v4089_v22  ;;  %v5508_v57 = vadd.f32 %v5492_v37, %v5472_v47  ;;  %v4245_v3 = vmul.f32 %v13358_v13, %v4233_v56  ;;  %v4774_v6 = vadd.f32 %v4758_v43, %v4736_v17  ;;  %v8879_v0 = vpop.eup %8878 }
 0xeb6   : > { %v5094_v22 = vmul.f32 %v10954_v36, %v4367_v28  ;;  %v5329_v27 = vadd.f32 %v5313_v10, %v5293_v50  ;;  %v5349_v38 = vmul.f32 %v13333_v40, %v4300_v62  ;;  %v5073_v59 = vadd.f32 %v5057_v9, %v5036_v4  ;;  %v4091_v13 = vpop.xlane.xlu1 %4090 }
 0xeb7   : > { %v4124_v1 = vadd.f32 1e-06, %v4108_v26  ;;  %v5544_v42 = vadd.f32 %v11295_v33, %v5508_v57  ;;  %v4328_v37 = vadd.f32 %v4312_v24, %v4245_v3  ;;  %v4812_v47 = vadd.f32 %v4796_v55, %v4774_v6  ;;  %v13362_v55 = vld [vmem:[#allocation59_spill] sm:$0xff]  ;;  %v13363_v6 = vld [vmem:[#allocation38_spill] sm:$0xff] }
 0xeb8   : > { %v5131_v56 = vmul.f32 %v10957_v39, %v4434_v44  ;;  %v5365_v17 = vadd.f32 %v5349_v38, %v5329_v27  ;;  %v5385_v43 = vmul.f32 %v13334_v35, %v4367_v28  ;;  %v5110_v50 = vadd.f32 %v5094_v22, %v5073_v59  ;;  %v4093_v62 = vpop.xlane.xlu0 %4092  ;;  %v13364_v38 = vld [vmem:[#allocation60_spill] sm:$0xff] }
 0xeb9   : > { %8880 = vrsqrt.f32 %v4124_v1  ;;  %v11402_v26 = vadd.f32 %v11394_v15, %v5544_v42  ;;  %v4395_v36 = vadd.f32 %v4379_v61, %v4328_v37  ;;  %v4850_v10 = vadd.f32 %v4834_v21, %v4812_v47 }
 0xeba   : > { %v11405_v40 = vadd.f32 %v13351_v25, %v4173_v7  ;;  %v4910_v33 = vmul.f32 %v13362_v55, %v11351_v12  ;;  %v5401_v3 = vadd.f32 %v5385_v43, %v5365_v17  ;;  %v5421_v24 = vmul.f32 %v13335_v18, %v4434_v44 }
 0xebb   : > { %13360 = vst [vmem:[#allocation65_spill] sm:$0xff] %v11402_v26  ;;  %5583 = vadd.xlane.f32.xlu0 %v11402_v26  ;;  %v4462_v28 = vadd.f32 %v4446_v19, %v4395_v36  ;;  %v4888_v4 = vadd.f32 %v4872_v23, %v4850_v10  ;;  %v5147_v57 = vadd.f32 %v5131_v56, %v5110_v50  ;;  %v4109_v9 = vmul.f32 0.0078125, %v4091_v13  ;;  %v13365_v23 = vld [vmem:[#allocation58_spill] sm:$0xff] }
 0xebc   : > { %13361 = vst [vmem:[#allocation61_spill] sm:$0xff] %v11405_v40  ;;  %v4174_v61 = vmul.f32 %v10881_v8, %v4154_v20  ;;  %v5437_v21 = vadd.f32 %v5421_v24, %v5401_v3  ;;  %v5457_v59 = vmul.f32 %v13336_v46, %v11341_v52  ;;  %v4110_v7 = vmul.f32 0.0078125, %v4093_v62  ;;  %v13388_v40 = vld [vmem:[#allocation43_spill] sm:$0xff] }
 0xebd   : > { %v4155_v1 = vmul.f32 %v8879_v0, %v13363_v6  ;;  %v5168_v22 = vmul.f32 %v10966_v34, %v11341_v52  ;;  %v4529_v27 = vadd.f32 %v4513_v51, %v4462_v28  ;;  %v4926_v44 = vadd.f32 %v4910_v33, %v4888_v4 }
 0xebe   : > { %v4948_v36 = vmul.f32 %v13364_v38, %v11359_v41  ;;  %v4984_v19 = vmul.f32 %v13365_v23, %v13332_v31  ;;  %v5473_v13 = vadd.f32 %v5457_v59, %v5437_v21  ;;  %v5493_v20 = vmul.f32 %v13337_v63, %v11351_v12 }
 0xebf   : > { %v5205_v42 = vmul.f32 %v13328_v45, %v11351_v12  ;;  %v4596_v37 = vadd.f32 %v4580_v53, %v4529_v27  ;;  %v5184_v0 = vadd.f32 %v5168_v22, %v5147_v57  ;;  %v4125_v47 = vadd.f32 1e-06, %v4109_v9 }
 0xec0   : > { %v5509_v56 = vadd.f32 %v5493_v20, %v5473_v13  ;;  %v5529_v52 = vmul.f32 %v13338_v60, %v11359_v41  ;;  %v4126_v51 = vadd.f32 1e-06, %v4110_v7  ;;  %v13112_v17 = vrot.slane %v13340_v29, 2 }
 0xec1   : > { %v4663_v43 = vadd.f32 %v11374_v5, %v4596_v37  ;;  %v4964_v10 = vadd.f32 %v4948_v36, %v4926_v44  ;;  %v13110_v50 = vrot.slane %v13340_v29, 3  ;;  %v13109_v62 = vrot.slane %v13340_v29, 4 }
 0xec2   : > { %v4175_v12 = vmul.f32 %v10881_v8, %v4155_v1  ;;  %v5242_v53 = vmul.f32 %v13329_v54, %v11359_v41  ;;  %v5545_v3 = vadd.f32 %v5529_v52, %v5509_v56  ;;  %v13366_v24 = vrot.slane %v13340_v29, 1 }
 0xec3   : > { %v8881_v33 = vpop.eup %8880  ;;  %v13367_v28 = vrot.slane %v13332_v31, 1  ;;  %v5221_v5 = vadd.f32 %v5205_v42, %v5184_v0  ;;  %8882 = vrsqrt.f32 %v4125_v47  ;;  %v13108_v57 = vrot.slane %v13340_v29, 5 }
 0xec4   : > { %v13107_v9 = vrot.slane %v13340_v29, 6  ;;  %v11443_v21 = vadd.f32 %v11394_v15, %v5545_v3  ;;  %8884 = vrsqrt.f32 %v4126_v51  ;;  %v13369_v41 = vrot.slane %v13332_v31, 2  ;;  %v13377_v51 = vld [vmem:[#allocation44_spill] sm:$0xff] }
 0xec5   : > { %v4232_v4 = vsel %vm4221_vm2, %v13367_v28, %v13366_v24  ;;  %v13111_v7 = vrot.slane %v13340_v29, 7  ;;  %v4699_v6 = vadd.f32 %v11368_v16, %v4663_v43  ;;  %v5000_v1 = vadd.f32 %v4984_v19, %v4964_v10  ;;  %v13374_v19 = vld [vmem:[#allocation39_spill] sm:$0xff]  ;;  %v13378_v10 = vld [vmem:[#allocation45_spill] sm:$0xff] }
 0xec6   : > { %13368 = vst [vmem:[#allocation73_spill] sm:$0xff] %v11443_v21  ;;  %v4299_v59 = vsel %vm4288_vm3, %v13369_v41, %v13112_v17  ;;  %v13370_v22 = vrot.slane %v13332_v31, 3  ;;  %v13371_v44 = vrot.slane %v13332_v31, 4  ;;  %v11466_v13 = vadd.f32 %v13351_v25, %v4174_v61  ;;  %5585 = vadd.xlane.f32.xlu1 %v11443_v21  ;;  %v13381_v41 = vld [vmem:[#allocation51_spill] sm:$0xff]  ;;  %v13386_v17 = vld [vmem:[#allocation57_spill] sm:$0xff] }
 0xec7   : > { %v11469_v16 = vadd.f32 %v13351_v25, %v4175_v12  ;;  %v4156_v20 = vmul.f32 %v8881_v33, %v13374_v19  ;;  %v4721_v42 = vmul.f32 %v10897_v48, %v4232_v4  ;;  %v5021_v37 = vmul.f32 %v10940_v32, %v4232_v4  ;;  %v13379_v12 = vld [vmem:[#allocation46_spill] sm:$0xff]  ;;  %v13387_v21 = vld [vmem:[#allocation67_spill] sm:$0xff] }
 0xec8   : > { %v4366_v27 = vsel %vm4355_vm4, %v13370_v22, %v13110_v50  ;;  %v4433_v36 = vsel %vm4422_vm5, %v13371_v44, %v13109_v62  ;;  %13372 = vst [vmem:[#allocation68_spill] sm:$0xff] %v11466_v13  ;;  %v5258_v0 = vadd.f32 %v5242_v53, %v5221_v5  ;;  %v13375_v47 = vrot.slane %v13332_v31, 5  ;;  %v13384_v62 = vld [vmem:[#allocation54_spill] sm:$0xff] }
 0xec9   : > { %13373 = vst [vmem:[#allocation69_spill] sm:$0xff] %v11469_v16  ;;  %v13376_v56 = vrot.slane %v13332_v31, 6  ;;  %v4313_v43 = vmul.f32 %v13377_v51, %v4299_v59  ;;  %v4380_v33 = vmul.f32 %v13378_v10, %v4366_v27  ;;  %v4447_v53 = vmul.f32 %v13379_v12, %v4433_v36 }
 0xeca   : > { %v4500_v61 = vsel %vm4489_vm6, %v13375_v47, %v13108_v57  ;;  %v13380_v3 = vrot.slane %v13332_v31, 7  ;;  %v4737_v28 = vadd.f32 %v4721_v42, %v4699_v6  ;;  %v5037_v5 = vadd.f32 %v5021_v37, %v5000_v1  ;;  %v13382_v47 = vld [vmem:[#allocation47_spill] sm:$0xff] }
 0xecb   : > { %v4567_v52 = vsel %vm4556_vm7, %v13376_v56, %v13107_v9  ;;  %v11500_v22 = vmul.f32 %v13381_v41, %v13340_v29  ;;  %v5278_v44 = vmul.f32 %v13330_v30, %v13332_v31  ;;  %v4176_v19 = vmul.f32 %v10881_v8, %v4156_v20  ;;  %v13383_v9 = vld [vmem:[#allocation49_spill] sm:$0xff] }
 0xecc   : > { %v11496_v24 = vsel %vm4623_vm8, %v13380_v3, %v13111_v7  ;;  %v4514_v56 = vmul.f32 %v13382_v47, %v4500_v61  ;;  %v4581_v57 = vmul.f32 %v13383_v9, %v4567_v52  ;;  %v4759_v50 = vmul.f32 %v13384_v62, %v4299_v59  ;;  %v13385_v3 = vld [vmem:[#allocation50_spill] sm:$0xff] }
 0xecd   : > { %v4648_v7 = vmul.f32 %v13385_v3, %v11496_v24  ;;  %v5058_v6 = vmul.f32 %v13357_v14, %v4299_v59  ;;  %v5294_v1 = vadd.f32 %v5278_v44, %v5258_v0  ;;  %v5314_v42 = vmul.f32 %v13331_v58, %v4232_v4  ;;  %v8883_v16 = vpop.eup %8882 }
 0xece   : > { %v4797_v37 = vmul.f32 %v13354_v49, %v4366_v27  ;;  %v4835_v31 = vmul.f32 %v13355_v11, %v4433_v36  ;;  %v4873_v20 = vmul.f32 %v13386_v17, %v4500_v61  ;;  %v5350_v26 = vmul.f32 %v13387_v21, %v4299_v59  ;;  %v8885_v3 = vpop.eup %8884  ;;  %v13390_v11 = vld [vmem:[#allocation63_spill] sm:$0xff] }
 0xecf   : > { %v5330_v13 = vadd.f32 %v5314_v42, %v5294_v1  ;;  %v4246_v41 = vmul.f32 %v13388_v40, %v4232_v4  ;;  %v4775_v9 = vadd.f32 %v4759_v50, %v4737_v28  ;;  %v5074_v47 = vadd.f32 %v5058_v6, %v5037_v5  ;;  %v13391_v42 = vld [vmem:[#allocation40_spill] sm:$0xff]  ;;  %v13392_v6 = vld [vmem:[#allocation75_spill] sm:$0xff] }
 0xed0   : > { %v11518_v14 = vadd.f32 %v13351_v25, %v4176_v19  ;;  %v4911_v0 = vmul.f32 %v13362_v55, %v4567_v52  ;;  %v4949_v44 = vmul.f32 %v13364_v38, %v11496_v24  ;;  %v5095_v58 = vmul.f32 %v13390_v11, %v4366_v27  ;;  %v13393_v38 = vld [vmem:[#allocation41_spill] sm:$0xff] }
 0xed1   : > { %v5366_v17 = vadd.f32 %v5350_v26, %v5330_v13  ;;  %v5386_v59 = vmul.f32 %v13334_v35, %v4366_v27  ;;  %v4329_v21 = vadd.f32 %v4313_v43, %v4246_v41  ;;  %v4813_v1 = vadd.f32 %v4797_v37, %v4775_v9 }
 0xed2   : > { %13389 = vst [vmem:[#allocation70_spill] sm:$0xff] %v11518_v14  ;;  %v4157_v4 = vmul.f32 %v8883_v16, %v13391_v42  ;;  %v5132_v50 = vmul.f32 %v10957_v39, %v4433_v36  ;;  %v5422_v28 = vmul.f32 %v13335_v18, %v4433_v36  ;;  %v5111_v5 = vadd.f32 %v5095_v58, %v5074_v47 }
 0xed3   : > { %v5402_v19 = vadd.f32 %v5386_v59, %v5366_v17  ;;  %v13130_v14 = vrot.slane %v13392_v6, 1  ;;  %v4396_v55 = vadd.f32 %v4380_v33, %v4329_v21  ;;  %v4851_v40 = vadd.f32 %v4835_v31, %v4813_v1 }
 0xed4   : > { %v4158_v49 = vmul.f32 %v8885_v3, %v13393_v38  ;;  %v4985_v26 = vmul.f32 %v13365_v23, %v13340_v29  ;;  %v5169_v27 = vmul.f32 %v10966_v34, %v4500_v61  ;;  %v5148_v9 = vadd.f32 %v5132_v50, %v5111_v5 }
 0xed5   : > { %v5438_v13 = vadd.f32 %v5422_v28, %v5402_v19  ;;  %v5458_v16 = vmul.f32 %v13336_v46, %v4500_v61  ;;  %v4463_v43 = vadd.f32 %v4447_v53, %v4396_v55  ;;  %v4889_v41 = vadd.f32 %v4873_v20, %v4851_v40 }
 0xed6   : > { %v5206_v58 = vmul.f32 %v13328_v45, %v4567_v52  ;;  %v5494_v17 = vmul.f32 %v13337_v63, %v4567_v52  ;;  %v5185_v36 = vadd.f32 %v5169_v27, %v5148_v9  ;;  %v13129_v21 = vrot.slane %v13392_v6, 2 }
 0xed7   : > { %v5474_v33 = vadd.f32 %v5458_v16, %v5438_v13  ;;  %v13394_v38 = vrot.slane %v13340_v29, 1  ;;  %v4530_v3 = vadd.f32 %v4514_v56, %v4463_v43  ;;  %v4927_v37 = vadd.f32 %v4911_v0, %v4889_v41 }
 0xed8   : > { %v4177_v55 = vmul.f32 %v10881_v8, %v4157_v4  ;;  %v5530_v40 = vmul.f32 %v13338_v60, %v11496_v24  ;;  %v13128_v61 = vrot.slane %v13392_v6, 3  ;;  %v13127_v52 = vrot.slane %v13392_v6, 4 }
 0xed9   : > { %v4231_v47 = vsel %vm4221_vm2, %v13394_v38, %v13130_v14  ;;  %v5510_v53 = vadd.f32 %v5494_v17, %v5474_v33  ;;  %v4597_v31 = vadd.f32 %v4581_v57, %v4530_v3  ;;  %v4965_v20 = vadd.f32 %v4949_v44, %v4927_v37 }
 0xeda   : > { %v5222_v59 = vadd.f32 %v5206_v58, %v5185_v36  ;;  %v11549_v1 = vmul.f32 %v10881_v8, %v4158_v49  ;;  %v5243_v56 = vmul.f32 %v13329_v54, %v11496_v24  ;;  %v4722_v0 = vmul.f32 %v10897_v48, %v4231_v47  ;;  %v13400_v58 = vld [vmem:[#allocation76_spill] sm:$0xff] }
 0xedb   : > { %v13395_v42 = vrot.slane %v13340_v29, 2  ;;  %v5546_v50 = vadd.f32 %v5530_v40, %v5510_v53  ;;  %v4664_v28 = vadd.f32 %v4648_v7, %v4597_v31  ;;  %v5001_v57 = vadd.f32 %v4985_v26, %v4965_v20  ;;  %v13403_v20 = vld [vmem:[#allocation62_spill] sm:$0xff] }
 0xedc   : > { %v13126_v44 = vrot.slane %v13392_v6, 5  ;;  %v5022_v49 = vmul.f32 %v10940_v32, %v4231_v47  ;;  %v13396_v24 = vrot.slane %v13340_v29, 3  ;;  %v13397_v19 = vrot.slane %v13340_v29, 4 }
 0xedd   : > { %v4298_v4 = vsel %vm4288_vm3, %v13395_v42, %v13129_v21  ;;  %v13125_v7 = vrot.slane %v13392_v6, 6  ;;  %v11576_v26 = vadd.f32 %v11394_v15, %v5546_v50  ;;  %v4700_v9 = vadd.f32 %v11500_v22, %v4664_v28  ;;  %v13405_v42 = vld [vmem:[#allocation55_spill] sm:$0xff] }
 0xede   : > { %v4365_v5 = vsel %vm4355_vm4, %v13396_v24, %v13128_v61  ;;  %v4432_v27 = vsel %vm4422_vm5, %v13397_v19, %v13127_v52  ;;  %v5259_v13 = vadd.f32 %v5243_v56, %v5222_v59  ;;  %v13131_v16 = vrot.slane %v13392_v6, 7  ;;  %v13407_v19 = vld [vmem:[#allocation43_spill] sm:$0xff]  ;;  %v13409_v52 = vld [vmem:[#allocation56_spill] sm:$0xff] }
 0xedf   : > { %13398 = vst [vmem:[#allocation71_spill] sm:$0xff] %v11576_v26  ;;  %v11581_v43 = vadd.f32 %v13351_v25, %v4177_v55  ;;  %v5038_v41 = vadd.f32 %v5022_v49, %v5001_v57  ;;  %v4314_v36 = vmul.f32 %v13377_v51, %v4298_v4  ;;  %5587 = vadd.xlane.f32.xlu0 %v11576_v26  ;;  %v13401_v22 = vrot.slane %v13340_v29, 5  ;;  %v13406_v57 = vld [vmem:[#allocation66_spill] sm:$0xff] }
 0xee0   : > { %v4738_v33 = vadd.f32 %v4722_v0, %v4700_v9  ;;  %v4381_v38 = vmul.f32 %v13378_v10, %v4365_v5  ;;  %v5279_v37 = vmul.f32 %v13330_v30, %v13340_v29  ;;  %v4448_v55 = vmul.f32 %v13379_v12, %v4432_v27 }
 0xee1   : > { %13399 = vst [vmem:[#allocation72_spill] sm:$0xff] %v11581_v43  ;;  %v4499_v3 = vsel %vm4489_vm6, %v13401_v22, %v13126_v44  ;;  %v13402_v40 = vrot.slane %v13340_v29, 6  ;;  %v4760_v31 = vmul.f32 %v13384_v62, %v4298_v4  ;;  %v5059_v59 = vmul.f32 %v13403_v20, %v4298_v4  ;;  %v13412_v43 = vld [vmem:[#allocation50_spill] sm:$0xff] }
 0xee2   : > { %v13404_v56 = vrot.slane %v13340_v29, 7  ;;  %v4798_v50 = vmul.f32 %v13405_v42, %v4365_v5  ;;  %v5295_v28 = vadd.f32 %v5279_v37, %v5259_v13  ;;  %v5315_v49 = vmul.f32 %v13406_v57, %v4231_v47  ;;  %v13410_v29 = vld [vmem:[#allocation67_spill] sm:$0xff]  ;;  %v13411_v37 = vld [vmem:[#allocation49_spill] sm:$0xff] }
 0xee3   : > { %v4566_v53 = vsel %vm4556_vm7, %v13402_v40, %v13125_v7  ;;  %v5096_v24 = vmul.f32 %v13390_v11, %v4365_v5  ;;  %v4247_v9 = vmul.f32 %v13407_v19, %v4231_v47  ;;  %v4776_v22 = vadd.f32 %v4760_v31, %v4738_v33  ;;  %v13408_v7 = vld [vmem:[#allocation47_spill] sm:$0xff] }
 0xee4   : > { %v4633_v0 = vsel %vm4623_vm8, %v13404_v56, %v13131_v16  ;;  %v5075_v40 = vadd.f32 %v5059_v59, %v5038_v41  ;;  %v4515_v44 = vmul.f32 %v13408_v7, %v4499_v3  ;;  %v4836_v61 = vmul.f32 %v13409_v52, %v4432_v27  ;;  %v13413_v41 = vld [vmem:[#allocation57_spill] sm:$0xff] }
 0xee5   : > { %v5331_v21 = vadd.f32 %v5315_v49, %v5295_v28  ;;  %v5351_v14 = vmul.f32 %v13410_v29, %v4298_v4  ;;  %v5133_v56 = vmul.f32 %v10957_v39, %v4432_v27  ;;  %v4330_v16 = vadd.f32 %v4314_v36, %v4247_v9  ;;  %v13414_v28 = vld [vmem:[#allocation51_spill] sm:$0xff] }
 0xee6   : > { %v4814_v17 = vadd.f32 %v4798_v50, %v4776_v22  ;;  %v5112_v13 = vadd.f32 %v5096_v24, %v5075_v40  ;;  %v4582_v26 = vmul.f32 %v13411_v37, %v4566_v53  ;;  %v4649_v8 = vmul.f32 %v13412_v43, %v4633_v0  ;;  %v13415_v24 = vld [vmem:[#allocation59_spill] sm:$0xff]  ;;  %v13416_v22 = vld [vmem:[#allocation60_spill] sm:$0xff] }
 0xee7   : > { %v5367_v11 = vadd.f32 %v5351_v14, %v5331_v21  ;;  %v5387_v47 = vmul.f32 %v13334_v35, %v4365_v5  ;;  %v4874_v33 = vmul.f32 %v13413_v41, %v4499_v3  ;;  %v4397_v31 = vadd.f32 %v4381_v38, %v4330_v16 }
 0xee8   : > { %v4852_v59 = vadd.f32 %v4836_v61, %v4814_v17  ;;  %v5149_v52 = vadd.f32 %v5133_v56, %v5112_v13  ;;  %v4685_v4 = vmul.f32 %v13414_v28, %v13392_v6  ;;  %v5170_v49 = vmul.f32 %v10966_v34, %v4499_v3 }
 0xee9   : > { %v5403_v36 = vadd.f32 %v5387_v47, %v5367_v11  ;;  %v5423_v50 = vmul.f32 %v13335_v18, %v4432_v27  ;;  %v4912_v9 = vmul.f32 %v13415_v24, %v4566_v53  ;;  %v4950_v40 = vmul.f32 %v13416_v22, %v4633_v0 }
 0xeea   : > { %v4464_v14 = vadd.f32 %v4448_v55, %v4397_v31  ;;  %v4890_v21 = vadd.f32 %v4874_v33, %v4852_v59  ;;  %v4986_v5 = vmul.f32 %v13365_v23, %v13392_v6  ;;  %v5459_v61 = vmul.f32 %v13336_v46, %v4499_v3  ;;  %v4095_v31 = vpop.xlane.xlu1 %4094 }
 0xeeb   : > { %v5439_v16 = vadd.f32 %v5423_v50, %v5403_v36  ;;  %v5186_v17 = vadd.f32 %v5170_v49, %v5149_v52  ;;  %v5207_v38 = vmul.f32 %v13328_v45, %v4566_v53  ;;  %v5495_v56 = vmul.f32 %v13337_v63, %v4566_v53 }
 0xeec   : > { %v4531_v11 = vadd.f32 %v4515_v44, %v4464_v14  ;;  %v4928_v13 = vadd.f32 %v4912_v9, %v4890_v21  ;;  %v5531_v47 = vmul.f32 %v13338_v60, %v4633_v0  ;;  %v13417_v22 = vrot.slane %v13400_v58, 1 }
 0xeed   : > { %v5475_v27 = vadd.f32 %v5459_v61, %v5439_v16  ;;  %v13418_v55 = vrot.slane %v13392_v6, 1  ;;  %v13141_v3 = vrot.slane %v13400_v58, 2  ;;  %v13140_v49 = vrot.slane %v13400_v58, 3 }
 0xeee   : > { %v4598_v52 = vadd.f32 %v4582_v26, %v4531_v11  ;;  %v4966_v59 = vadd.f32 %v4950_v40, %v4928_v13  ;;  %v13139_v44 = vrot.slane %v13400_v58, 4  ;;  %v5223_v36 = vadd.f32 %v5207_v38, %v5186_v17 }
 0xeef   : > { %v4230_v33 = vsel %vm4221_vm2, %v13418_v55, %v13417_v22  ;;  %v5511_v53 = vadd.f32 %v5495_v56, %v5475_v27  ;;  %v13138_v50 = vrot.slane %v13400_v58, 5  ;;  %v13137_v9 = vrot.slane %v13400_v58, 6 }
 0xef0   : > { %v5244_v14 = vmul.f32 %v13329_v54, %v4633_v0  ;;  %v4665_v21 = vadd.f32 %v4649_v8, %v4598_v52  ;;  %v4723_v22 = vmul.f32 %v10897_v48, %v4230_v33  ;;  %v4111_v16 = vmul.f32 0.0078125, %v4095_v31 }
 0xef1   : > { %v5547_v61 = vadd.f32 %v5531_v47, %v5511_v53  ;;  %v5002_v55 = vadd.f32 %v4986_v5, %v4966_v59  ;;  %v13419_v26 = vrot.slane %v13392_v6, 2  ;;  %v13136_v17 = vrot.slane %v13400_v58, 7 }
 0xef2   : > { %v4701_v38 = vadd.f32 %v4685_v4, %v4665_v21  ;;  %v5023_v56 = vmul.f32 %v10940_v32, %v4230_v33  ;;  %v13420_v8 = vrot.slane %v13392_v6, 3  ;;  %v13421_v5 = vrot.slane %v13392_v6, 4 }
 0xef3   : > { %v4297_v40 = vsel %vm4288_vm3, %v13419_v26, %v13141_v3  ;;  %v11668_v13 = vadd.f32 %v11394_v15, %v5547_v61  ;;  %v5260_v4 = vadd.f32 %v5244_v14, %v5223_v36  ;;  %v13423_v27 = vrot.slane %v13392_v6, 5 }
 0xef4   : > { %v4364_v0 = vsel %vm4355_vm4, %v13420_v8, %v13140_v49  ;;  %v4431_v11 = vsel %vm4422_vm5, %v13421_v5, %v13139_v44  ;;  %v13424_v31 = vrot.slane %v13392_v6, 6  ;;  %v11684_v59 = vadd.f32 %v13351_v25, %v11549_v1  ;;  %v13429_v25 = vld [vmem:[#allocation56_spill] sm:$0xff] }
 0xef5   : > { %13422 = vst [vmem:[#allocation74_spill] sm:$0xff] %v11668_v13  ;;  %v4498_v47 = vsel %vm4489_vm6, %v13423_v27, %v13138_v50  ;;  %v4739_v53 = vadd.f32 %v4723_v22, %v4701_v38  ;;  %v11686_v36 = vadd.f32 1e-06, %v4111_v16  ;;  %v4315_v14 = vmul.f32 %v13377_v51, %v4297_v40  ;;  %5589 = vadd.xlane.f32.xlu1 %v11668_v13  ;;  %v13428_v50 = vld [vmem:[#allocation63_spill] sm:$0xff] }
 0xef6   : > { %v4565_v52 = vsel %vm4556_vm7, %v13424_v31, %v13137_v9  ;;  %13425 = vst [vmem:[#allocation35_spill] sm:$0xff] %v11684_v59  ;;  %v5039_v21 = vadd.f32 %v5023_v56, %v5002_v55  ;;  %v4382_v61 = vmul.f32 %v13378_v10, %v4364_v0  ;;  %v13427_v26 = vrot.slane %v13392_v6, 7 }
 0xef7   : > { %13426 = vst [vmem:[#allocation36_spill] sm:$0xff] %v11686_v36  ;;  %v5280_v1 = vmul.f32 %v13330_v30, %v13392_v6  ;;  %v4449_v22 = vmul.f32 %v13379_v12, %v4431_v11  ;;  %v4516_v16 = vmul.f32 %v13408_v7, %v4498_v47  ;;  %v4583_v38 = vmul.f32 %v13411_v37, %v4565_v52 }
 0xef8   : > { %v4632_v8 = vsel %vm4623_vm8, %v13427_v26, %v13136_v17  ;;  %v4761_v55 = vmul.f32 %v13384_v62, %v4297_v40  ;;  %v4686_v56 = vmul.f32 %v13414_v28, %v13400_v58  ;;  %v5060_v5 = vmul.f32 %v13403_v20, %v4297_v40 }
 0xef9   : > { %v5296_v27 = vadd.f32 %v5280_v1, %v5260_v4  ;;  %v5316_v31 = vmul.f32 %v13406_v57, %v4230_v33  ;;  %v4650_v26 = vmul.f32 %v13412_v43, %v4632_v8  ;;  %v4799_v6 = vmul.f32 %v13405_v42, %v4364_v0 }
 0xefa   : > { %v4248_v17 = vmul.f32 %v13407_v19, %v4230_v33  ;;  %v4777_v9 = vadd.f32 %v4761_v55, %v4739_v53  ;;  %v5097_v44 = vmul.f32 %v13428_v50, %v4364_v0  ;;  %v5352_v3 = vmul.f32 %v13410_v29, %v4297_v40 }
 0xefb   : > { %v5332_v49 = vadd.f32 %v5316_v31, %v5296_v27  ;;  %v5076_v13 = vadd.f32 %v5060_v5, %v5039_v21  ;;  %v4837_v59 = vmul.f32 %v13429_v25, %v4431_v11  ;;  %v4875_v36 = vmul.f32 %v13413_v41, %v4498_v47  ;;  %v13430_v5 = vld [vmem:[#allocation77_spill] sm:$0xff] }
 0xefc   : > { %v4331_v4 = vadd.f32 %v4315_v14, %v4248_v17  ;;  %v4815_v1 = vadd.f32 %v4799_v6, %v4777_v9  ;;  %v5134_v57 = vmul.f32 %v10957_v39, %v4431_v11  ;;  %v5388_v42 = vmul.f32 %v13334_v35, %v4364_v0  ;;  %v13431_v17 = vld [vmem:[#allocation60_spill] sm:$0xff] }
 0xefd   : > { %v5368_v20 = vadd.f32 %v5352_v3, %v5332_v49  ;;  %v5113_v62 = vadd.f32 %v5097_v44, %v5076_v13  ;;  %v4913_v33 = vmul.f32 %v13415_v24, %v4565_v52  ;;  %v5171_v53 = vmul.f32 %v10966_v34, %v4498_v47 }
 0xefe   : > { %v4398_v55 = vadd.f32 %v4382_v61, %v4331_v4  ;;  %v4853_v27 = vadd.f32 %v4837_v59, %v4815_v1  ;;  %v5424_v21 = vmul.f32 %v13335_v18, %v4431_v11  ;;  %v13156_v31 = vrot.slane %v13430_v5, 1 }
 0xeff   : > { %v5404_v40 = vadd.f32 %v5388_v42, %v5368_v20  ;;  %v5150_v29 = vadd.f32 %v5134_v57, %v5113_v62  ;;  %v4951_v9 = vmul.f32 %v13431_v17, %v4632_v8  ;;  %v4987_v3 = vmul.f32 %v13365_v23, %v13400_v58 }
 0xf00   : > { %v4465_v49 = vadd.f32 %v4449_v22, %v4398_v55  ;;  %v4891_v0 = vadd.f32 %v4875_v36, %v4853_v27  ;;  %v5208_v44 = vmul.f32 %v13328_v45, %v4565_v52  ;;  %v5460_v14 = vmul.f32 %v13336_v46, %v4498_v47 }
 0xf01   : > { %v5440_v13 = vadd.f32 %v5424_v21, %v5404_v40  ;;  %v5187_v61 = vadd.f32 %v5171_v53, %v5150_v29  ;;  %v5496_v20 = vmul.f32 %v13337_v63, %v4565_v52  ;;  %v13155_v59 = vrot.slane %v13430_v5, 2 }
 0xf02   : > { %v4532_v42 = vadd.f32 %v4516_v16, %v4465_v49  ;;  %v4929_v11 = vadd.f32 %v4913_v33, %v4891_v0  ;;  %v13432_v57 = vrot.slane %v13400_v58, 1  ;;  %v13154_v22 = vrot.slane %v13430_v5, 3 }
 0xf03   : > { %v5476_v62 = vadd.f32 %v5460_v14, %v5440_v13  ;;  %v13153_v6 = vrot.slane %v13430_v5, 4  ;;  %v13152_v52 = vrot.slane %v13430_v5, 5  ;;  %v13151_v16 = vrot.slane %v13430_v5, 6 }
 0xf04   : > { %v4229_v36 = vsel %vm4221_vm2, %v13432_v57, %v13156_v31  ;;  %v4599_v47 = vadd.f32 %v4583_v38, %v4532_v42  ;;  %v4967_v29 = vadd.f32 %v4951_v9, %v4929_v11  ;;  %v5532_v1 = vmul.f32 %v13338_v60, %v4632_v8 }
 0xf05   : > { %v5512_v4 = vadd.f32 %v5496_v20, %v5476_v62  ;;  %v5224_v33 = vadd.f32 %v5208_v44, %v5187_v61  ;;  %v13150_v53 = vrot.slane %v13430_v5, 7  ;;  %v5245_v55 = vmul.f32 %v13329_v54, %v4632_v8  ;;  %v13439_v62 = vld [vmem:[#allocation64_spill] sm:$0xff] }
 0xf06   : > { %v4666_v27 = vadd.f32 %v4650_v26, %v4599_v47  ;;  %v4724_v40 = vmul.f32 %v10897_v48, %v4229_v36  ;;  %v5003_v21 = vadd.f32 %v4987_v3, %v4967_v29  ;;  %v5024_v38 = vmul.f32 %v10940_v32, %v4229_v36 }
 0xf07   : > { %v5548_v49 = vadd.f32 %v5532_v1, %v5512_v4  ;;  %v13433_v9 = vrot.slane %v13400_v58, 2  ;;  %v13434_v44 = vrot.slane %v13400_v58, 3  ;;  %v13435_v3 = vrot.slane %v13400_v58, 4 }
 0xf08   : > { %v4702_v26 = vadd.f32 %v4686_v56, %v4666_v27  ;;  %v13436_v14 = vrot.slane %v13400_v58, 5  ;;  %v13437_v20 = vrot.slane %v13400_v58, 6  ;;  %v5261_v11 = vadd.f32 %v5245_v55, %v5224_v33 }
 0xf09   : > { %v4296_v0 = vsel %vm4288_vm3, %v13433_v9, %v13155_v59  ;;  %v4363_v8 = vsel %vm4355_vm4, %v13434_v44, %v13154_v22  ;;  %v4430_v13 = vsel %vm4422_vm5, %v13435_v3, %v13153_v6  ;;  %v11773_v42 = vadd.f32 %v11394_v15, %v5548_v49 }
 0xf0a   : > { %v4497_v61 = vsel %vm4489_vm6, %v13436_v14, %v13152_v52  ;;  %v4564_v56 = vsel %vm4556_vm7, %v13437_v20, %v13151_v16  ;;  %v13440_v47 = vrot.slane %v13400_v58, 7  ;;  %v4740_v4 = vadd.f32 %v4724_v40, %v4702_v26  ;;  %v13442_v26 = vld [vmem:[#allocation62_spill] sm:$0xff]  ;;  %v13443_v20 = vld [vmem:[#allocation55_spill] sm:$0xff] }
 0xf0b   : > { %13438 = vst [vmem:[#allocation37_spill] sm:$0xff] %v11773_v42  ;;  %v5040_v1 = vadd.f32 %v5024_v38, %v5003_v21  ;;  %v4316_v27 = vmul.f32 %v13377_v51, %v4296_v0  ;;  %v4383_v9 = vmul.f32 %v13378_v10, %v4363_v8  ;;  %5591 = vadd.xlane.f32.xlu0 %v11773_v42  ;;  %v13441_v21 = vld [vmem:[#allocation54_spill] sm:$0xff] }
 0xf0c   : > { %v11782_v29 = vsel %vm4623_vm8, %v13440_v47, %v13150_v53  ;;  %v4450_v33 = vmul.f32 %v13379_v12, %v4430_v13  ;;  %v4517_v55 = vmul.f32 %v13408_v7, %v4497_v61  ;;  %v4584_v49 = vmul.f32 %v13411_v37, %v4564_v56  ;;  %v13444_v16 = vld [vmem:[#allocation66_spill] sm:$0xff] }
 0xf0d   : > { %v5281_v44 = vmul.f32 %v13330_v30, %v13400_v58  ;;  %v4651_v3 = vmul.f32 %v13412_v43, %v11782_v29  ;;  %v4687_v40 = vmul.f32 %v13414_v28, %v13430_v5  ;;  %v4762_v38 = vmul.f32 %v13441_v21, %v4296_v0  ;;  %v13445_v43 = vld [vmem:[#allocation67_spill] sm:$0xff] }
 0xf0e   : > { %v5061_v14 = vmul.f32 %v13442_v26, %v4296_v0  ;;  %v4800_v47 = vmul.f32 %v13443_v20, %v4363_v8  ;;  %v5317_v52 = vmul.f32 %v13444_v16, %v4229_v36  ;;  %v4249_v6 = vmul.f32 %v13407_v19, %v4229_v36 }
 0xf0f   : > { %v5297_v53 = vadd.f32 %v5281_v44, %v5261_v11  ;;  %v4838_v22 = vmul.f32 %v13429_v25, %v4430_v13  ;;  %v5098_v58 = vmul.f32 %v13428_v50, %v4363_v8  ;;  %v4778_v59 = vadd.f32 %v4762_v38, %v4740_v4 }
 0xf10   : > { %v5077_v31 = vadd.f32 %v5061_v14, %v5040_v1  ;;  %v4876_v57 = vmul.f32 %v13413_v41, %v4497_v61  ;;  %v5353_v28 = vmul.f32 %v13445_v43, %v4296_v0  ;;  %v4332_v37 = vadd.f32 %v4316_v27, %v4249_v6 }
 0xf11   : > { %v5333_v42 = vadd.f32 %v5317_v52, %v5297_v53  ;;  %v4914_v26 = vmul.f32 %v13415_v24, %v4564_v56  ;;  %v5135_v11 = vmul.f32 %v10957_v39, %v4430_v13  ;;  %v4816_v44 = vadd.f32 %v4800_v47, %v4778_v59 }
 0xf12   : > { %v5114_v20 = vadd.f32 %v5098_v58, %v5077_v31  ;;  %v4952_v36 = vmul.f32 %v13431_v17, %v11782_v29  ;;  %v5389_v50 = vmul.f32 %v13334_v35, %v4363_v8  ;;  %v4399_v4 = vadd.f32 %v4383_v9, %v4332_v37 }
 0xf13   : > { %v5369_v25 = vadd.f32 %v5353_v28, %v5333_v42  ;;  %v4988_v1 = vmul.f32 %v13365_v23, %v13430_v5  ;;  %v5172_v52 = vmul.f32 %v10966_v34, %v4497_v61  ;;  %v4854_v53 = vadd.f32 %v4838_v22, %v4816_v44 }
 0xf14   : > { %v5151_v6 = vadd.f32 %v5135_v11, %v5114_v20  ;;  %v5209_v0 = vmul.f32 %v13328_v45, %v4564_v56  ;;  %v5425_v59 = vmul.f32 %v13335_v18, %v4430_v13  ;;  %v4466_v31 = vadd.f32 %v4450_v33, %v4399_v4 }
 0xf15   : > { %v5405_v27 = vadd.f32 %v5389_v50, %v5369_v25  ;;  %v13446_v38 = vrot.slane %v13439_v62, 1  ;;  %v13447_v28 = vrot.slane %v13430_v5, 1  ;;  %v4892_v8 = vadd.f32 %v4876_v57, %v4854_v53 }
 0xf16   : > { %v5188_v42 = vadd.f32 %v5172_v52, %v5151_v6  ;;  %v13168_v9 = vrot.slane %v13439_v62, 2  ;;  %v5461_v22 = vmul.f32 %v13336_v46, %v4497_v61  ;;  %v4533_v20 = vadd.f32 %v4517_v55, %v4466_v31 }
 0xf17   : > { %v4228_v37 = vsel %vm4221_vm2, %v13447_v28, %v13446_v38  ;;  %v5441_v14 = vadd.f32 %v5425_v59, %v5405_v27  ;;  %v13167_v25 = vrot.slane %v13439_v62, 3  ;;  %v5497_v50 = vmul.f32 %v13337_v63, %v4564_v56 }
 0xf18   : > { %v5533_v13 = vmul.f32 %v13338_v60, %v11782_v29  ;;  %v4930_v33 = vadd.f32 %v4914_v26, %v4892_v8  ;;  %v13166_v47 = vrot.slane %v13439_v62, 4  ;;  %v4600_v11 = vadd.f32 %v4584_v49, %v4533_v20 }
 0xf19   : > { %v5477_v58 = vadd.f32 %v5461_v22, %v5441_v14  ;;  %v4725_v57 = vmul.f32 %v10897_v48, %v4228_v37  ;;  %v13165_v44 = vrot.slane %v13439_v62, 5  ;;  %v5225_v52 = vadd.f32 %v5209_v0, %v5188_v42  ;;  %v13450_v0 = vld [vmem:[#allocation36_spill] sm:$0xff] }
 0xf1a   : > { %v4968_v4 = vadd.f32 %v4952_v36, %v4930_v33  ;;  %v13448_v61 = vrot.slane %v13430_v5, 2  ;;  %v13164_v55 = vrot.slane %v13439_v62, 6  ;;  %v4667_v53 = vadd.f32 %v4651_v3, %v4600_v11 }
 0xf1b   : > { %v5513_v26 = vadd.f32 %v5497_v50, %v5477_v58  ;;  %v5025_v6 = vmul.f32 %v10940_v32, %v4228_v37  ;;  %v13449_v49 = vrot.slane %v13430_v5, 3  ;;  %8886 = vrsqrt.f32 %v13450_v0 }
 0xf1c   : > { %v4295_v56 = vsel %vm4288_vm3, %v13448_v61, %v13168_v9  ;;  %v5246_v27 = vmul.f32 %v13329_v54, %v11782_v29  ;;  %v13451_v59 = vrot.slane %v13430_v5, 4  ;;  %v13163_v31 = vrot.slane %v13439_v62, 7 }
 0xf1d   : > { %v4362_v36 = vsel %vm4355_vm4, %v13449_v49, %v13167_v25  ;;  %v5549_v38 = vadd.f32 %v5533_v13, %v5513_v26  ;;  %v4703_v28 = vadd.f32 %v4687_v40, %v4667_v53  ;;  %v5004_v8 = vadd.f32 %v4988_v1, %v4968_v4  ;;  %v13456_v53 = vld [vmem:[#allocation49_spill] sm:$0xff]  ;;  %v13457_v49 = vld [vmem:[#allocation51_spill] sm:$0xff] }
 0xf1e   : > { %v4429_v3 = vsel %vm4422_vm5, %v13451_v59, %v13166_v47  ;;  %v4317_v42 = vmul.f32 %v13377_v51, %v4295_v56  ;;  %v5262_v14 = vadd.f32 %v5246_v27, %v5225_v52  ;;  %v4384_v22 = vmul.f32 %v13378_v10, %v4362_v36  ;;  %v13458_v27 = vld [vmem:[#allocation62_spill] sm:$0xff] }
 0xf1f   : > { %v13452_v29 = vrot.slane %v13430_v5, 5  ;;  %v13453_v50 = vrot.slane %v13430_v5, 6  ;;  %v11869_v1 = vadd.f32 %v11394_v15, %v5549_v38  ;;  %v4741_v13 = vadd.f32 %v4725_v57, %v4703_v28  ;;  %v13459_v38 = vld [vmem:[#allocation55_spill] sm:$0xff] }
 0xf20   : > { %v5041_v33 = vadd.f32 %v5025_v6, %v5004_v8  ;;  %v4451_v58 = vmul.f32 %v13379_v12, %v4429_v3  ;;  %v13455_v11 = vrot.slane %v13430_v5, 7  ;;  %v4763_v52 = vmul.f32 %v13441_v21, %v4295_v56 }
 0xf21   : > { %v4496_v20 = vsel %vm4489_vm6, %v13452_v29, %v13165_v44  ;;  %v4563_v40 = vsel %vm4556_vm7, %v13453_v50, %v13164_v55  ;;  %13454 = vst [vmem:[#allocation38_spill] sm:$0xff] %v11869_v1  ;;  %v5282_v61 = vmul.f32 %v13330_v30, %v13430_v5  ;;  %v5318_v26 = vmul.f32 %v13444_v16, %v4228_v37  ;;  %v13460_v5 = vld [vmem:[#allocation50_spill] sm:$0xff]  ;;  %v13462_v44 = vld [vmem:[#allocation63_spill] sm:$0xff] }
 0xf22   : > { %v4630_v4 = vsel %vm4623_vm8, %v13455_v11, %v13163_v31  ;;  %5593 = vadd.xlane.f32.xlu1 %v11869_v1  ;;  %v4518_v57 = vmul.f32 %v13408_v7, %v4496_v20  ;;  %v4585_v6 = vmul.f32 %v13456_v53, %v4563_v40  ;;  %v4688_v0 = vmul.f32 %v13457_v49, %v13439_v62  ;;  %v13461_v31 = vld [vmem:[#allocation56_spill] sm:$0xff] }
 0xf23   : > { %v5062_v59 = vmul.f32 %v13458_v27, %v4295_v56  ;;  %v4801_v28 = vmul.f32 %v13459_v38, %v4362_v36  ;;  %v5298_v8 = vadd.f32 %v5282_v61, %v5262_v14  ;;  %v4250_v29 = vmul.f32 %v13407_v19, %v4228_v37 }
 0xf24   : > { %v4779_v50 = vadd.f32 %v4763_v52, %v4741_v13  ;;  %v4652_v11 = vmul.f32 %v13460_v5, %v4630_v4  ;;  %v4839_v55 = vmul.f32 %v13461_v31, %v4429_v3  ;;  %v5099_v47 = vmul.f32 %v13462_v44, %v4362_v36 }
 0xf25   : > { %v5078_v25 = vadd.f32 %v5062_v59, %v5041_v33  ;;  %v5334_v9 = vadd.f32 %v5318_v26, %v5298_v8  ;;  %v5354_v1 = vmul.f32 %v13445_v43, %v4295_v56  ;;  %v4333_v16 = vadd.f32 %v4317_v42, %v4250_v29  ;;  %v11897_v13 = vpop.eup %8886  ;;  %v13464_v42 = vld [vmem:[#allocation61_spill] sm:$0xff] }
 0xf26   : > { %v4817_v21 = vadd.f32 %v4801_v28, %v4779_v50  ;;  %v4877_v27 = vmul.f32 %v13413_v41, %v4496_v20  ;;  %v4915_v38 = vmul.f32 %v13415_v24, %v4563_v40  ;;  %v5136_v14 = vmul.f32 %v10957_v39, %v4429_v3  ;;  %13463 = vst [vmem:[#allocation58_spill] sm:$0xff] %v11897_v13 }
 0xf27   : > { %v5115_v37 = vadd.f32 %v5099_v47, %v5078_v25  ;;  %v5370_v52 = vadd.f32 %v5354_v1, %v5334_v9  ;;  %v5390_v61 = vmul.f32 %v13334_v35, %v4362_v36  ;;  %v4400_v31 = vadd.f32 %v4384_v22, %v4333_v16 }
 0xf28   : > { %v4855_v44 = vadd.f32 %v4839_v55, %v4817_v21  ;;  %v4953_v33 = vmul.f32 %v13431_v17, %v4630_v4  ;;  %v5173_v56 = vmul.f32 %v10966_v34, %v4496_v20  ;;  %v13178_v26 = vrot.slane %v13464_v42, 1 }
 0xf29   : > { %v5152_v59 = vadd.f32 %v5136_v14, %v5115_v37  ;;  %v5406_v28 = vadd.f32 %v5390_v61, %v5370_v52  ;;  %v5426_v8 = vmul.f32 %v13335_v18, %v4429_v3  ;;  %v4467_v29 = vadd.f32 %v4451_v58, %v4400_v31 }
 0xf2a   : > { %v4893_v50 = vadd.f32 %v4877_v27, %v4855_v44  ;;  %v4989_v25 = vmul.f32 %v13365_v23, %v13439_v62  ;;  %v5210_v9 = vmul.f32 %v13328_v45, %v4563_v40  ;;  %v13177_v16 = vrot.slane %v13464_v42, 2 }
 0xf2b   : > { %v5189_v47 = vadd.f32 %v5173_v56, %v5152_v59  ;;  %v5442_v21 = vadd.f32 %v5426_v8, %v5406_v28  ;;  %v5462_v55 = vmul.f32 %v13336_v46, %v4496_v20  ;;  %v4534_v36 = vadd.f32 %v4518_v57, %v4467_v29 }
 0xf2c   : > { %v4931_v22 = vadd.f32 %v4915_v38, %v4893_v50  ;;  %v5498_v1 = vmul.f32 %v13337_v63, %v4563_v40  ;;  %v13465_v3 = vrot.slane %v13439_v62, 1  ;;  %v13176_v31 = vrot.slane %v13464_v42, 3 }
 0xf2d   : > { %v13175_v58 = vrot.slane %v13464_v42, 4  ;;  %v5478_v27 = vadd.f32 %v5462_v55, %v5442_v21  ;;  %v4601_v14 = vadd.f32 %v4585_v6, %v4534_v36  ;;  %v13174_v20 = vrot.slane %v13464_v42, 5 }
 0xf2e   : > { %v4227_v44 = vsel %vm4221_vm2, %v13465_v3, %v13178_v26  ;;  %v4969_v37 = vadd.f32 %v4953_v33, %v4931_v22  ;;  %v5534_v57 = vmul.f32 %v13338_v60, %v4630_v4  ;;  %v5226_v38 = vadd.f32 %v5210_v9, %v5189_v47  ;;  %v13470_v22 = vld [vmem:[#allocation68_spill] sm:$0xff] }
 0xf2f   : > { %v13466_v40 = vrot.slane %v13439_v62, 2  ;;  %v13173_v61 = vrot.slane %v13464_v42, 6  ;;  %v5514_v56 = vadd.f32 %v5498_v1, %v5478_v27  ;;  %v4668_v59 = vadd.f32 %v4652_v11, %v4601_v14  ;;  %v13479_v26 = vld [vmem:[#allocation56_spill] sm:$0xff] }
 0xf30   : > { %v5005_v28 = vadd.f32 %v4989_v25, %v4969_v37  ;;  %v13172_v6 = vrot.slane %v13464_v42, 7  ;;  %v5247_v33 = vmul.f32 %v13329_v54, %v4630_v4  ;;  %v4726_v8 = vmul.f32 %v10897_v48, %v4227_v44 }
 0xf31   : > { %v4294_v52 = vsel %vm4288_vm3, %v13466_v40, %v13177_v16  ;;  %v5026_v29 = vmul.f32 %v10940_v32, %v4227_v44  ;;  %v13467_v50 = vrot.slane %v13439_v62, 3  ;;  %v5550_v47 = vadd.f32 %v5534_v57, %v5514_v56 }
 0xf32   : > { %v4704_v21 = vadd.f32 %v4688_v0, %v4668_v59  ;;  %v13468_v11 = vrot.slane %v13439_v62, 4  ;;  %v13469_v25 = vrot.slane %v13439_v62, 5  ;;  %v5263_v36 = vadd.f32 %v5247_v33, %v5226_v38 }
 0xf33   : > { %v4361_v9 = vsel %vm4355_vm4, %v13467_v50, %v13176_v31  ;;  %v4318_v3 = vmul.f32 %v13377_v51, %v4294_v52  ;;  %v13471_v0 = vrot.slane %v13439_v62, 6  ;;  %v11958_v14 = vadd.f32 %v11394_v15, %v5550_v47  ;;  %v13475_v47 = vld [vmem:[#allocation62_spill] sm:$0xff] }
 0xf34   : > { %v4428_v4 = vsel %vm4422_vm5, %v13468_v11, %v13175_v58  ;;  %v4495_v55 = vsel %vm4489_vm6, %v13469_v25, %v13174_v20  ;;  %v4742_v37 = vadd.f32 %v4726_v8, %v4704_v21  ;;  %v5042_v57 = vadd.f32 %v5026_v29, %v5005_v28  ;;  %v13474_v8 = vld [vmem:[#allocation54_spill] sm:$0xff]  ;;  %v13478_v20 = vld [vmem:[#allocation63_spill] sm:$0xff] }
 0xf35   : > { %v4562_v27 = vsel %vm4556_vm7, %v13471_v0, %v13173_v61  ;;  %13472 = vst [vmem:[#allocation39_spill] sm:$0xff] %v11958_v14  ;;  %v13473_v38 = vrot.slane %v13439_v62, 7  ;;  %v4385_v56 = vmul.f32 %v13378_v10, %v4361_v9  ;;  %v4452_v59 = vmul.f32 %v13379_v12, %v4428_v4  ;;  %5595 = vadd.xlane.f32.xlu0 %v11958_v14  ;;  %v13476_v0 = vld [vmem:[#allocation66_spill] sm:$0xff]  ;;  %v13477_v61 = vld [vmem:[#allocation55_spill] sm:$0xff] }
 0xf36   : > { %v4519_v33 = vmul.f32 %v13408_v7, %v4495_v55  ;;  %v5283_v50 = vmul.f32 %v13330_v30, %v13439_v62  ;;  %v4586_v15 = vmul.f32 %v13456_v53, %v4562_v27  ;;  %v4689_v28 = vmul.f32 %v13457_v49, %v13464_v42 }
 0xf37   : > { %v4629_v40 = vsel %vm4623_vm8, %v13473_v38, %v13172_v6  ;;  %v4764_v29 = vmul.f32 %v13474_v8, %v4294_v52  ;;  %v5063_v21 = vmul.f32 %v13475_v47, %v4294_v52  ;;  %v5319_v38 = vmul.f32 %v13476_v0, %v4227_v44 }
 0xf38   : > { %v4653_v11 = vmul.f32 %v13460_v5, %v4629_v40  ;;  %v5299_v25 = vadd.f32 %v5283_v50, %v5263_v36  ;;  %v4251_v6 = vmul.f32 %v13407_v19, %v4227_v44  ;;  %v4802_v62 = vmul.f32 %v13477_v61, %v4361_v9 }
 0xf39   : > { %v5100_v58 = vmul.f32 %v13478_v20, %v4361_v9  ;;  %v4780_v31 = vadd.f32 %v4764_v29, %v4742_v37  ;;  %v5079_v16 = vadd.f32 %v5063_v21, %v5042_v57  ;;  %v4840_v1 = vmul.f32 %v13479_v26, %v4428_v4 }
 0xf3a   : > { %v5335_v14 = vadd.f32 %v5319_v38, %v5299_v25  ;;  %v5355_v13 = vmul.f32 %v13445_v43, %v4294_v52  ;;  %v4334_v49 = vadd.f32 %v4318_v3, %v4251_v6  ;;  %v4878_v47 = vmul.f32 %v13413_v41, %v4495_v55 }
 0xf3b   : > { %v5137_v36 = vmul.f32 %v10957_v39, %v4428_v4  ;;  %v4818_v50 = vadd.f32 %v4802_v62, %v4780_v31  ;;  %v5116_v5 = vadd.f32 %v5100_v58, %v5079_v16  ;;  %v4916_v44 = vmul.f32 %v13415_v24, %v4562_v27 }
 0xf3c   : > { %v5371_v19 = vadd.f32 %v5355_v13, %v5335_v14  ;;  %v5391_v0 = vmul.f32 %v13334_v35, %v4361_v9  ;;  %v4401_v20 = vadd.f32 %v4385_v56, %v4334_v49  ;;  %v4954_v37 = vmul.f32 %v13431_v17, %v4629_v40 }
 0xf3d   : > { %v5174_v57 = vmul.f32 %v10966_v34, %v4495_v55  ;;  %v4856_v29 = vadd.f32 %v4840_v1, %v4818_v50  ;;  %v5153_v21 = vadd.f32 %v5137_v36, %v5116_v5  ;;  %v4990_v52 = vmul.f32 %v13365_v23, %v13464_v42 }
 0xf3e   : > { %v5407_v6 = vadd.f32 %v5391_v0, %v5371_v19  ;;  %v5427_v3 = vmul.f32 %v13335_v18, %v4428_v4  ;;  %v4468_v31 = vadd.f32 %v4452_v59, %v4401_v20  ;;  %v5211_v16 = vmul.f32 %v13328_v45, %v4562_v27 }
 0xf3f   : > { %v5463_v13 = vmul.f32 %v13336_v46, %v4495_v55  ;;  %v4894_v58 = vadd.f32 %v4878_v47, %v4856_v29  ;;  %v5190_v9 = vadd.f32 %v5174_v57, %v5153_v21  ;;  %v13188_v56 = vrot.slane %v13470_v22, 2 }
 0xf40   : > { %v5443_v49 = vadd.f32 %v5427_v3, %v5407_v6  ;;  %v4535_v14 = vadd.f32 %v4519_v33, %v4468_v31  ;;  %v13187_v1 = vrot.slane %v13470_v22, 3  ;;  %v5248_v5 = vmul.f32 %v13329_v54, %v4629_v40 }
 0xf41   : > { %v5499_v25 = vmul.f32 %v13337_v63, %v4562_v27  ;;  %v4932_v19 = vadd.f32 %v4916_v44, %v4894_v58  ;;  %v13186_v4 = vrot.slane %v13470_v22, 4  ;;  %v13480_v59 = vrot.slane %v13470_v22, 1 }
 0xf42   : > { %v5479_v20 = vadd.f32 %v5463_v13, %v5443_v49  ;;  %v13481_v55 = vrot.slane %v13464_v42, 1  ;;  %v4602_v33 = vadd.f32 %v4586_v15, %v4535_v14  ;;  %v13185_v0 = vrot.slane %v13470_v22, 5 }
 0xf43   : > { %v5535_v38 = vmul.f32 %v13338_v60, %v4629_v40  ;;  %v4970_v62 = vadd.f32 %v4954_v37, %v4932_v19  ;;  %v5227_v36 = vadd.f32 %v5211_v16, %v5190_v9  ;;  %v13184_v27 = vrot.slane %v13470_v22, 6  ;;  %v12047_v19 = vld [vmem:[%s13359_s13] ss:$0 sm:$0xff] }
 0xf44   : > { %v4226_v47 = vsel %vm4221_vm2, %v13481_v55, %v13480_v59  ;;  %v5515_v50 = vadd.f32 %v5499_v25, %v5479_v20  ;;  %v4669_v44 = vadd.f32 %v4653_v11, %v4602_v33  ;;  %v13482_v57 = vrot.slane %v13464_v42, 2 }
 0xf45   : > { %v13483_v15 = vrot.slane %v13464_v42, 3  ;;  %v4727_v37 = vmul.f32 %v10897_v48, %v4226_v47  ;;  %v5006_v21 = vadd.f32 %v4990_v52, %v4970_v62  ;;  %v13484_v11 = vrot.slane %v13464_v42, 4 }
 0xf46   : > { %v4293_v29 = vsel %vm4288_vm3, %v13482_v57, %v13188_v56  ;;  %v13183_v3 = vrot.slane %v13470_v22, 7  ;;  %v5551_v31 = vadd.f32 %v5535_v38, %v5515_v50  ;;  %v4705_v16 = vadd.f32 %v4689_v28, %v4669_v44  ;;  %v13489_v57 = vld [vmem:[#allocation51_spill] sm:$0xff] }
 0xf47   : > { %v4360_v40 = vsel %vm4355_vm4, %v13483_v15, %v13187_v1  ;;  %v4427_v6 = vsel %vm4422_vm5, %v13484_v11, %v13186_v4  ;;  %v5027_v13 = vmul.f32 %v10940_v32, %v4226_v47  ;;  %v13485_v58 = vrot.slane %v13464_v42, 5 }
 0xf48   : > { %v5264_v9 = vadd.f32 %v5248_v5, %v5227_v36  ;;  %v4319_v49 = vmul.f32 %v13377_v51, %v4293_v29  ;;  %v4386_v14 = vmul.f32 %v13378_v10, %v4360_v40  ;;  %v13486_v25 = vrot.slane %v13464_v42, 6 }
 0xf49   : > { %v4494_v52 = vsel %vm4489_vm6, %v13485_v58, %v13185_v0  ;;  %v12050_v20 = vadd.f32 %v12047_v19, %v5551_v31  ;;  %v4743_v5 = vadd.f32 %v4727_v37, %v4705_v16  ;;  %v5043_v59 = vadd.f32 %v5027_v13, %v5006_v21  ;;  %v13490_v21 = vld [vmem:[#allocation62_spill] sm:$0xff]  ;;  %v13492_v58 = vld [vmem:[#allocation43_spill] sm:$0xff] }
 0xf4a   : > { %v4561_v28 = vsel %vm4556_vm7, %v13486_v25, %v13184_v27  ;;  %v4453_v55 = vmul.f32 %v13379_v12, %v4427_v6  ;;  %v4520_v33 = vmul.f32 %v13408_v7, %v4494_v52  ;;  %v13488_v38 = vrot.slane %v13464_v42, 7  ;;  %v13491_v16 = vld [vmem:[#allocation66_spill] sm:$0xff]  ;;  %v13494_v0 = vld [vmem:[#allocation63_spill] sm:$0xff] }
 0xf4b   : > { %13487 = vst [vmem:[#allocation44_spill] sm:$0xff] %v12050_v20  ;;  %v4765_v36 = vmul.f32 %v13474_v8, %v4293_v29  ;;  %v5284_v50 = vmul.f32 %v13330_v30, %v13464_v42  ;;  %5597 = vadd.xlane.f32.xlu1 %v12050_v20  ;;  %v4587_v44 = vmul.f32 %v13456_v53, %v4561_v28 }
 0xf4c   : > { %v4628_v62 = vsel %vm4623_vm8, %v13488_v38, %v13183_v3  ;;  %v4690_v15 = vmul.f32 %v13489_v57, %v13470_v22  ;;  %v4803_v37 = vmul.f32 %v13477_v61, %v4360_v40  ;;  %v5064_v11 = vmul.f32 %v13490_v21, %v4293_v29  ;;  %v13493_v3 = vld [vmem:[#allocation50_spill] sm:$0xff] }
 0xf4d   : > { %v5300_v31 = vadd.f32 %v5284_v50, %v5264_v9  ;;  %v5320_v13 = vmul.f32 %v13491_v16, %v4226_v47  ;;  %v4252_v25 = vmul.f32 %v13492_v58, %v4226_v47  ;;  %v4781_v38 = vadd.f32 %v4765_v36, %v4743_v5 }
 0xf4e   : > { %v4654_v27 = vmul.f32 %v13493_v3, %v4628_v62  ;;  %v4841_v42 = vmul.f32 %v13479_v26, %v4427_v6  ;;  %v5101_v4 = vmul.f32 %v13494_v0, %v4360_v40  ;;  %v5080_v1 = vadd.f32 %v5064_v11, %v5043_v59  ;;  %v13495_v11 = vld [vmem:[#allocation69_spill] sm:$0xff] }
 0xf4f   : > { %v5336_v56 = vadd.f32 %v5320_v13, %v5300_v31  ;;  %v5356_v20 = vmul.f32 %v13445_v43, %v4293_v29  ;;  %v4335_v57 = vadd.f32 %v4319_v49, %v4252_v25  ;;  %v4819_v61 = vadd.f32 %v4803_v37, %v4781_v38 }
 0xf50   : > { %v4879_v21 = vmul.f32 %v13413_v41, %v4494_v52  ;;  %v4917_v9 = vmul.f32 %v13415_v24, %v4561_v28  ;;  %v5138_v50 = vmul.f32 %v10957_v39, %v4427_v6  ;;  %v5117_v47 = vadd.f32 %v5101_v4, %v5080_v1 }
 0xf51   : > { %v5372_v5 = vadd.f32 %v5356_v20, %v5336_v56  ;;  %v5392_v36 = vmul.f32 %v13334_v35, %v4360_v40  ;;  %v4402_v3 = vadd.f32 %v4386_v14, %v4335_v57  ;;  %v4857_v26 = vadd.f32 %v4841_v42, %v4819_v61 }
 0xf52   : > { %v4955_v0 = vmul.f32 %v13431_v17, %v4628_v62  ;;  %v5175_v59 = vmul.f32 %v10966_v34, %v4494_v52  ;;  %v13197_v29 = vrot.slane %v13495_v11, 1  ;;  %v5154_v49 = vadd.f32 %v5138_v50, %v5117_v47 }
 0xf53   : > { %v5408_v37 = vadd.f32 %v5392_v36, %v5372_v5  ;;  %v5428_v31 = vmul.f32 %v13335_v18, %v4427_v6  ;;  %v4469_v13 = vadd.f32 %v4453_v55, %v4402_v3  ;;  %v4895_v25 = vadd.f32 %v4879_v21, %v4857_v26 }
 0xf54   : > { %v4991_v1 = vmul.f32 %v13365_v23, %v13470_v22  ;;  %v5212_v56 = vmul.f32 %v13328_v45, %v4561_v28  ;;  %v5464_v4 = vmul.f32 %v13336_v46, %v4494_v52  ;;  %v5191_v61 = vadd.f32 %v5175_v59, %v5154_v49 }
 0xf55   : > { %v5444_v40 = vadd.f32 %v5428_v31, %v5408_v37  ;;  %v5500_v14 = vmul.f32 %v13337_v63, %v4561_v28  ;;  %v4536_v20 = vadd.f32 %v4520_v33, %v4469_v13  ;;  %v4933_v57 = vadd.f32 %v4917_v9, %v4895_v25 }
 0xf56   : > { %v13496_v38 = vrot.slane %v13470_v22, 1  ;;  %v13196_v6 = vrot.slane %v13495_v11, 2  ;;  %v13195_v3 = vrot.slane %v13495_v11, 3  ;;  %v13194_v55 = vrot.slane %v13495_v11, 4 }
 0xf57   : > { %v5480_v52 = vadd.f32 %v5464_v4, %v5444_v40  ;;  %v4603_v21 = vadd.f32 %v4587_v44, %v4536_v20  ;;  %v4971_v42 = vadd.f32 %v4955_v0, %v4933_v57  ;;  %v13193_v28 = vrot.slane %v13495_v11, 5  ;;  %v13501_v40 = vld [vmem:[#allocation42_spill] sm:$0xff] }
 0xf58   : > { %v4225_v26 = vsel %vm4221_vm2, %v13496_v38, %v13197_v29  ;;  %v5249_v33 = vmul.f32 %v13329_v54, %v4628_v62  ;;  %v5536_v9 = vmul.f32 %v13338_v60, %v4628_v62  ;;  %v5228_v50 = vadd.f32 %v5212_v56, %v5191_v61  ;;  %v13503_v38 = vld [vmem:[#allocation70_spill] sm:$0xff] }
 0xf59   : > { %v13192_v47 = vrot.slane %v13495_v11, 6  ;;  %v5516_v5 = vadd.f32 %v5500_v14, %v5480_v52  ;;  %v4670_v36 = vadd.f32 %v4654_v27, %v4603_v21  ;;  %v4728_v59 = vmul.f32 %v10897_v48, %v4225_v26  ;;  %v13502_v14 = vld [vmem:[#allocation58_spill] sm:$0xff] }
 0xf5a   : > { %v5007_v49 = vadd.f32 %v4991_v1, %v4971_v42  ;;  %v5028_v37 = vmul.f32 %v10940_v32, %v4225_v26  ;;  %v13497_v0 = vrot.slane %v13470_v22, 2  ;;  %v13498_v62 = vrot.slane %v13470_v22, 3  ;;  %v13511_v52 = vld [vmem:[#allocation50_spill] sm:$0xff] }
 0xf5b   : > { %v13499_v27 = vrot.slane %v13470_v22, 4  ;;  %v5552_v25 = vadd.f32 %v5536_v9, %v5516_v5  ;;  %v4706_v1 = vadd.f32 %v4690_v15, %v4670_v36  ;;  %v13500_v56 = vrot.slane %v13470_v22, 5 }
 0xf5c   : > { %v4292_v44 = vsel %vm4288_vm3, %v13497_v0, %v13196_v6  ;;  %v4359_v31 = vsel %vm4355_vm4, %v13498_v62, %v13195_v3  ;;  %v13198_v61 = vrot.slane %v13495_v11, 7  ;;  %v12130_v20 = vmul.f32 %v13502_v14, %v13501_v40  ;;  %v13510_v3 = vld [vmem:[#allocation63_spill] sm:$0xff] }
 0xf5d   : > { %v4426_v13 = vsel %vm4422_vm5, %v13499_v27, %v13194_v55  ;;  %v4493_v4 = vsel %vm4489_vm6, %v13500_v56, %v13193_v28  ;;  %v5265_v57 = vadd.f32 %v5249_v33, %v5228_v50  ;;  %v13504_v15 = vrot.slane %v13470_v22, 6  ;;  %v13508_v56 = vld [vmem:[#allocation51_spill] sm:$0xff] }
 0xf5e   : > { %v12140_v42 = vadd.f32 %v12047_v19, %v5552_v25  ;;  %v4744_v9 = vadd.f32 %v4728_v59, %v4706_v1  ;;  %v5044_v5 = vadd.f32 %v5028_v37, %v5007_v49  ;;  %v4320_v36 = vmul.f32 %v13377_v51, %v4292_v44  ;;  %v13507_v25 = vld [vmem:[#allocation62_spill] sm:$0xff]  ;;  %v13509_v28 = vld [vmem:[#allocation55_spill] sm:$0xff] }
 0xf5f   : > { %v4560_v21 = vsel %vm4556_vm7, %v13504_v15, %v13192_v47  ;;  %v4387_v0 = vmul.f32 %v13378_v10, %v4359_v31  ;;  %v4454_v33 = vmul.f32 %v13379_v12, %v4426_v13  ;;  %v4521_v50 = vmul.f32 %v13408_v7, %v4493_v4 }
 0xf60   : > { %13505 = vst [vmem:[#allocation45_spill] sm:$0xff] %v12140_v42  ;;  %v5285_v62 = vmul.f32 %v13330_v30, %v13470_v22  ;;  %5599 = vadd.xlane.f32.xlu0 %v12140_v42  ;;  %v4588_v27 = vmul.f32 %v13456_v53, %v4560_v21  ;;  %v13506_v59 = vrot.slane %v13470_v22, 7  ;;  %v4766_v37 = vmul.f32 %v13474_v8, %v4292_v44 }
 0xf61   : > { %v5065_v1 = vmul.f32 %v13507_v25, %v4292_v44  ;;  %v4691_v40 = vmul.f32 %v13508_v56, %v13495_v11  ;;  %v5321_v15 = vmul.f32 %v13491_v16, %v4225_v26  ;;  %v4253_v47 = vmul.f32 %v13492_v58, %v4225_v26  ;;  %v13512_v25 = vld [vmem:[#allocation56_spill] sm:$0xff] }
 0xf62   : > { %v4627_v49 = vsel %vm4623_vm8, %v13506_v59, %v13198_v61  ;;  %v5301_v14 = vadd.f32 %v5285_v62, %v5265_v57  ;;  %v4804_v55 = vmul.f32 %v13509_v28, %v4359_v31  ;;  %v5102_v6 = vmul.f32 %v13510_v3, %v4359_v31 }
 0xf63   : > { %v4782_v22 = vadd.f32 %v4766_v37, %v4744_v9  ;;  %v5081_v29 = vadd.f32 %v5065_v1, %v5044_v5  ;;  %v4655_v59 = vmul.f32 %v13511_v52, %v4627_v49  ;;  %v5357_v42 = vmul.f32 %v13445_v43, %v4292_v44 }
 0xf64   : > { %v5337_v61 = vadd.f32 %v5321_v15, %v5301_v14  ;;  %v4336_v53 = vadd.f32 %v4320_v36, %v4253_v47  ;;  %v4842_v7 = vmul.f32 %v13512_v25, %v4426_v13  ;;  %v5139_v57 = vmul.f32 %v10957_v39, %v4426_v13 }
 0xf65   : > { %v4820_v62 = vadd.f32 %v4804_v55, %v4782_v22  ;;  %v5118_v56 = vadd.f32 %v5102_v6, %v5081_v29  ;;  %v4880_v26 = vmul.f32 %v13413_v41, %v4493_v4  ;;  %v5393_v16 = vmul.f32 %v13334_v35, %v4359_v31 }
 0xf66   : > { %v5373_v58 = vadd.f32 %v5357_v42, %v5337_v61  ;;  %v4403_v3 = vadd.f32 %v4387_v0, %v4336_v53  ;;  %v4918_v9 = vmul.f32 %v13415_v24, %v4560_v21  ;;  %v5176_v5 = vmul.f32 %v10966_v34, %v4493_v4 }
 0xf67   : > { %v4858_v37 = vadd.f32 %v4842_v7, %v4820_v62  ;;  %v5155_v1 = vadd.f32 %v5139_v57, %v5118_v56  ;;  %v4956_v47 = vmul.f32 %v13431_v17, %v4627_v49  ;;  %v5429_v36 = vmul.f32 %v13335_v18, %v4426_v13 }
 0xf68   : > { %v5409_v44 = vadd.f32 %v5393_v16, %v5373_v58  ;;  %v4470_v14 = vadd.f32 %v4454_v33, %v4403_v3  ;;  %v4992_v29 = vmul.f32 %v13365_v23, %v13495_v11  ;;  %v5213_v6 = vmul.f32 %v13328_v45, %v4560_v21 }
 0xf69   : > { %v4896_v55 = vadd.f32 %v4880_v26, %v4858_v37  ;;  %v5192_v31 = vadd.f32 %v5176_v5, %v5155_v1  ;;  %v5465_v61 = vmul.f32 %v13336_v46, %v4493_v4  ;;  %v13208_v7 = vrot.slane %v13503_v38, 2 }
 0xf6a   : > { %v5445_v53 = vadd.f32 %v5429_v36, %v5409_v44  ;;  %v4537_v42 = vadd.f32 %v4521_v50, %v4470_v14  ;;  %v5250_v0 = vmul.f32 %v13329_v54, %v4627_v49  ;;  %v13513_v16 = vrot.slane %v13503_v38, 1 }
 0xf6b   : > { %v13514_v58 = vrot.slane %v13495_v11, 1  ;;  %v4934_v13 = vadd.f32 %v4918_v9, %v4896_v55  ;;  %v13207_v33 = vrot.slane %v13503_v38, 3  ;;  %v5501_v15 = vmul.f32 %v13337_v63, %v4560_v21 }
 0xf6c   : > { %v5481_v56 = vadd.f32 %v5465_v61, %v5445_v53  ;;  %v4604_v22 = vadd.f32 %v4588_v27, %v4537_v42  ;;  %v13206_v4 = vrot.slane %v13503_v38, 4  ;;  %v5537_v50 = vmul.f32 %v13338_v60, %v4627_v49 }
 0xf6d   : > { %v4224_v3 = vsel %vm4221_vm2, %v13514_v58, %v13513_v16  ;;  %v4972_v57 = vadd.f32 %v4956_v47, %v4934_v13  ;;  %v5229_v62 = vadd.f32 %v5213_v6, %v5192_v31  ;;  %v13205_v26 = vrot.slane %v13503_v38, 5  ;;  %v13518_v31 = vld [vmem:[#allocation52_spill] sm:$0xff] }
 0xf6e   : > { %v5517_v5 = vadd.f32 %v5501_v15, %v5481_v56  ;;  %v4671_v37 = vadd.f32 %v4655_v59, %v4604_v22  ;;  %v4729_v1 = vmul.f32 %v10897_v48, %v4224_v3  ;;  %v13515_v9 = vrot.slane %v13495_v11, 2 }
 0xf6f   : > { %v5008_v27 = vadd.f32 %v4992_v29, %v4972_v57  ;;  %v5029_v44 = vmul.f32 %v10940_v32, %v4224_v3  ;;  %v13516_v49 = vrot.slane %v13495_v11, 3  ;;  %v13204_v59 = vrot.slane %v13503_v38, 6 }
 0xf70   : > { %v4291_v21 = vsel %vm4288_vm3, %v13515_v9, %v13208_v7  ;;  %v5553_v36 = vadd.f32 %v5537_v50, %v5517_v5  ;;  %v4707_v14 = vadd.f32 %v4691_v40, %v4671_v37  ;;  %v13517_v6 = vrot.slane %v13495_v11, 4 }
 0xf71   : > { %v4358_v47 = vsel %vm4355_vm4, %v13516_v49, %v13207_v33  ;;  %v13209_v55 = vrot.slane %v13503_v38, 7  ;;  %v12215_v53 = vmul.f32 %v13518_v31, %v12130_v20  ;;  %v5266_v61 = vadd.f32 %v5250_v0, %v5229_v62  ;;  %v13523_v62 = vld [vmem:[#allocation47_spill] sm:$0xff] }
 0xf72   : > { %v4425_v29 = vsel %vm4422_vm5, %v13517_v6, %v13206_v4  ;;  %v4321_v42 = vmul.f32 %v13377_v51, %v4291_v21  ;;  %v13520_v40 = vrot.slane %v13495_v11, 5  ;;  %v12225_v58 = vadd.f32 %v12047_v19, %v5553_v36  ;;  %v13526_v36 = vld [vmem:[#allocation66_spill] sm:$0xff]  ;;  %v13527_v6 = vld [vmem:[#allocation43_spill] sm:$0xff] }
 0xf73   : > { %13519 = vst [vmem:[#allocation46_spill] sm:$0xff] %v12215_v53  ;;  %v4745_v13 = vadd.f32 %v4729_v1, %v4707_v14  ;;  %v5045_v56 = vadd.f32 %v5029_v44, %v5008_v27  ;;  %v4388_v15 = vmul.f32 %v13378_v10, %v4358_v47  ;;  %v4455_v20 = vmul.f32 %v13379_v12, %v4425_v29  ;;  %v13525_v27 = vld [vmem:[#allocation62_spill] sm:$0xff]  ;;  %v13529_v4 = vld [vmem:[#allocation63_spill] sm:$0xff] }
 0xf74   : > { %v4492_v16 = vsel %vm4489_vm6, %v13520_v40, %v13205_v26  ;;  %13521 = vst [vmem:[#allocation40_spill] sm:$0xff] %v12225_v58  ;;  %v13522_v0 = vrot.slane %v13495_v11, 6  ;;  %v4767_v50 = vmul.f32 %v13474_v8, %v4291_v21  ;;  %v5286_v57 = vmul.f32 %v13330_v30, %v13495_v11  ;;  %5601 = vadd.xlane.f32.xlu1 %v12225_v58 }
 0xf75   : > { %v4522_v5 = vmul.f32 %v13523_v62, %v4492_v16  ;;  %v13524_v37 = vrot.slane %v13495_v11, 7  ;;  %v4805_v9 = vmul.f32 %v13509_v28, %v4358_v47  ;;  %v5066_v44 = vmul.f32 %v13525_v27, %v4291_v21 }
 0xf76   : > { %v4559_v22 = vsel %vm4556_vm7, %v13522_v0, %v13204_v59  ;;  %v5302_v49 = vadd.f32 %v5286_v57, %v5266_v61  ;;  %v5322_v14 = vmul.f32 %v13526_v36, %v4224_v3  ;;  %v4254_v31 = vmul.f32 %v13527_v6, %v4224_v3  ;;  %v13528_v0 = vld [vmem:[#allocation49_spill] sm:$0xff] }
 0xf77   : > { %v4626_v1 = vsel %vm4623_vm8, %v13524_v37, %v13209_v55  ;;  %v4783_v40 = vadd.f32 %v4767_v50, %v4745_v13  ;;  %v4589_v59 = vmul.f32 %v13528_v0, %v4559_v22  ;;  %v4843_v26 = vmul.f32 %v13512_v25, %v4425_v29 }
 0xf78   : > { %v5103_v33 = vmul.f32 %v13529_v4, %v4358_v47  ;;  %v5082_v11 = vadd.f32 %v5066_v44, %v5045_v56  ;;  %v5338_v7 = vadd.f32 %v5322_v14, %v5302_v49  ;;  %v5358_v37 = vmul.f32 %v13445_v43, %v4291_v21  ;;  %v13530_v44 = vld [vmem:[#allocation72_spill] sm:$0xff] }
 0xf79   : > { %v4337_v55 = vadd.f32 %v4321_v42, %v4254_v31  ;;  %v4821_v58 = vadd.f32 %v4805_v9, %v4783_v40  ;;  %v4656_v53 = vmul.f32 %v13511_v52, %v4626_v1  ;;  %v4881_v61 = vmul.f32 %v13413_v41, %v4492_v16 }
 0xf7a   : > { %v5140_v57 = vmul.f32 %v10957_v39, %v4425_v29  ;;  %v5119_v3 = vadd.f32 %v5103_v33, %v5082_v11  ;;  %v5374_v13 = vadd.f32 %v5358_v37, %v5338_v7  ;;  %v5394_v50 = vmul.f32 %v13334_v35, %v4358_v47 }
 0xf7b   : > { %v4404_v28 = vadd.f32 %v4388_v15, %v4337_v55  ;;  %v4859_v25 = vadd.f32 %v4843_v26, %v4821_v58  ;;  %v4919_v4 = vmul.f32 %v13415_v24, %v4559_v22  ;;  %v5177_v56 = vmul.f32 %v10966_v34, %v4492_v16 }
 0xf7c   : > { %v13218_v21 = vrot.slane %v13530_v44, 1  ;;  %v5156_v42 = vadd.f32 %v5140_v57, %v5119_v3  ;;  %v5410_v9 = vadd.f32 %v5394_v50, %v5374_v13  ;;  %v5430_v49 = vmul.f32 %v13335_v18, %v4425_v29 }
 0xf7d   : > { %v4471_v14 = vadd.f32 %v4455_v20, %v4404_v28  ;;  %v4897_v31 = vadd.f32 %v4881_v61, %v4859_v25  ;;  %v4957_v40 = vmul.f32 %v13431_v17, %v4626_v1  ;;  %v4993_v7 = vmul.f32 %v13365_v23, %v13503_v38 }
 0xf7e   : > { %v5214_v33 = vmul.f32 %v13328_v45, %v4559_v22  ;;  %v5193_v26 = vadd.f32 %v5177_v56, %v5156_v42  ;;  %v5446_v47 = vadd.f32 %v5430_v49, %v5410_v9  ;;  %v5466_v55 = vmul.f32 %v13336_v46, %v4492_v16 }
 0xf7f   : > { %v4538_v58 = vadd.f32 %v4522_v5, %v4471_v14  ;;  %v4935_v15 = vadd.f32 %v4919_v4, %v4897_v31  ;;  %v5502_v11 = vmul.f32 %v13337_v63, %v4559_v22  ;;  %v13531_v28 = vrot.slane %v13503_v38, 1  ;;  %v13532_v4 = vld [vmem:[#allocation51_spill] sm:$0xff] }
 0xf80   : > { %v13217_v29 = vrot.slane %v13530_v44, 2  ;;  %v13216_v20 = vrot.slane %v13530_v44, 3  ;;  %v5482_v37 = vadd.f32 %v5466_v55, %v5446_v47  ;;  %v13215_v16 = vrot.slane %v13530_v44, 4 }
 0xf81   : > { %v4223_v25 = vsel %vm4221_vm2, %v13531_v28, %v13218_v21  ;;  %v4605_v61 = vadd.f32 %v4589_v59, %v4538_v58  ;;  %v4973_v57 = vadd.f32 %v4957_v40, %v4935_v15  ;;  %v4692_v5 = vmul.f32 %v13532_v4, %v13503_v38 }
 0xf82   : > { %v5230_v22 = vadd.f32 %v5214_v33, %v5193_v26  ;;  %v13214_v3 = vrot.slane %v13530_v44, 5  ;;  %v13213_v13 = vrot.slane %v13530_v44, 6  ;;  %v5518_v50 = vadd.f32 %v5502_v11, %v5482_v37 }
 0xf83   : > { %v5538_v56 = vmul.f32 %v13338_v60, %v4626_v1  ;;  %v4672_v42 = vadd.f32 %v4656_v53, %v4605_v61  ;;  %v5009_v9 = vadd.f32 %v4993_v7, %v4973_v57  ;;  %v5251_v49 = vmul.f32 %v13329_v54, %v4626_v1 }
 0xf84   : > { %v4730_v59 = vmul.f32 %v10897_v48, %v4223_v25  ;;  %v5030_v14 = vmul.f32 %v10940_v32, %v4223_v25  ;;  %v13533_v31 = vrot.slane %v13503_v38, 2  ;;  %v13534_v53 = vrot.slane %v13503_v38, 3 }
 0xf85   : > { %v5554_v33 = vadd.f32 %v5538_v56, %v5518_v50  ;;  %v4708_v26 = vadd.f32 %v4692_v5, %v4672_v42  ;;  %v13535_v7 = vrot.slane %v13503_v38, 4  ;;  %v5267_v55 = vadd.f32 %v5251_v49, %v5230_v22  ;;  %v13539_v22 = vld [vmem:[#allocation35_spill] sm:$0xff] }
 0xf86   : > { %v4290_v40 = vsel %vm4288_vm3, %v13533_v31, %v13217_v29  ;;  %v4357_v1 = vsel %vm4355_vm4, %v13534_v53, %v13216_v20  ;;  %v13536_v58 = vrot.slane %v13503_v38, 5  ;;  %v13537_v11 = vrot.slane %v13503_v38, 6 }
 0xf87   : > { %v4424_v47 = vsel %vm4422_vm5, %v13535_v7, %v13215_v16  ;;  %v13222_v37 = vrot.slane %v13530_v44, 7  ;;  %v12317_v61 = vadd.f32 %v12047_v19, %v5554_v33  ;;  %v4746_v57 = vadd.f32 %v4730_v59, %v4708_v26  ;;  %v13542_v16 = vld [vmem:[#allocation63_spill] sm:$0xff] }
 0xf88   : > { %v4491_v15 = vsel %vm4489_vm6, %v13536_v58, %v13214_v3  ;;  %v4558_v28 = vsel %vm4556_vm7, %v13537_v11, %v13213_v13  ;;  %v5046_v5 = vadd.f32 %v5030_v14, %v5009_v9  ;;  %v4322_v56 = vmul.f32 %v13377_v51, %v4290_v40  ;;  %v13541_v13 = vld [vmem:[#allocation55_spill] sm:$0xff] }
 0xf89   : > { %13538 = vst [vmem:[#allocation75_spill] sm:$0xff] %v12317_v61  ;;  %v4389_v42 = vmul.f32 %v13378_v10, %v4357_v1  ;;  %v4456_v49 = vmul.f32 %v13379_v12, %v4424_v47  ;;  %v5287_v31 = vmul.f32 %v13330_v30, %v13503_v38  ;;  %5603 = vadd.xlane.f32.xlu0 %v12317_v61  ;;  %v13540_v14 = vrot.slane %v13503_v38, 7 }
 0xf8a   : > { %v4523_v53 = vmul.f32 %v13523_v62, %v4491_v15  ;;  %v4590_v33 = vmul.f32 %v13528_v0, %v4558_v28  ;;  %v4768_v59 = vmul.f32 %v13474_v8, %v4290_v40  ;;  %v5067_v9 = vmul.f32 %v13525_v27, %v4290_v40  ;;  %v13543_v27 = vld [vmem:[#allocation56_spill] sm:$0xff] }
 0xf8b   : > { %v4625_v26 = vsel %vm4623_vm8, %v13540_v14, %v13222_v37  ;;  %v5303_v7 = vadd.f32 %v5287_v31, %v5267_v55  ;;  %v5323_v58 = vmul.f32 %v13526_v36, %v4223_v25  ;;  %v4255_v11 = vmul.f32 %v13527_v6, %v4223_v25 }
 0xf8c   : > { %v4806_v3 = vmul.f32 %v13541_v13, %v4357_v1  ;;  %v5104_v20 = vmul.f32 %v13542_v16, %v4357_v1  ;;  %v4784_v29 = vadd.f32 %v4768_v59, %v4746_v57  ;;  %v5083_v21 = vadd.f32 %v5067_v9, %v5046_v5 }
 0xf8d   : > { %v4693_v50 = vmul.f32 %v13532_v4, %v13530_v44  ;;  %v5339_v61 = vadd.f32 %v5323_v58, %v5303_v7  ;;  %v5359_v38 = vmul.f32 %v13445_v43, %v4290_v40  ;;  %v4338_v0 = vadd.f32 %v4322_v56, %v4255_v11 }
 0xf8e   : > { %v4844_v14 = vmul.f32 %v13543_v27, %v4424_v47  ;;  %v5141_v55 = vmul.f32 %v10957_v39, %v4424_v47  ;;  %v4822_v31 = vadd.f32 %v4806_v3, %v4784_v29  ;;  %v5120_v37 = vadd.f32 %v5104_v20, %v5083_v21 }
 0xf8f   : > { %v4657_v25 = vmul.f32 %v13511_v52, %v4625_v26  ;;  %v5375_v6 = vadd.f32 %v5359_v38, %v5339_v61  ;;  %v5395_v16 = vmul.f32 %v13334_v35, %v4357_v1  ;;  %v4405_v57 = vadd.f32 %v4389_v42, %v4338_v0 }
 0xf90   : > { %v4882_v5 = vmul.f32 %v13413_v41, %v4491_v15  ;;  %v5178_v59 = vmul.f32 %v10966_v34, %v4491_v15  ;;  %v4860_v9 = vadd.f32 %v4844_v14, %v4822_v31  ;;  %v5157_v7 = vadd.f32 %v5141_v55, %v5120_v37 }
 0xf91   : > { %v4920_v40 = vmul.f32 %v13415_v24, %v4558_v28  ;;  %v5411_v56 = vadd.f32 %v5395_v16, %v5375_v6  ;;  %v5431_v58 = vmul.f32 %v13335_v18, %v4424_v47  ;;  %v4472_v11 = vadd.f32 %v4456_v49, %v4405_v57 }
 0xf92   : > { %v4958_v21 = vmul.f32 %v13431_v17, %v4625_v26  ;;  %v4994_v29 = vmul.f32 %v13365_v23, %v13530_v44  ;;  %v4898_v20 = vadd.f32 %v4882_v5, %v4860_v9  ;;  %v5194_v3 = vadd.f32 %v5178_v59, %v5157_v7 }
 0xf93   : > { %v5447_v0 = vadd.f32 %v5431_v58, %v5411_v56  ;;  %v5467_v1 = vmul.f32 %v13336_v46, %v4491_v15  ;;  %v4539_v61 = vadd.f32 %v4523_v53, %v4472_v11  ;;  %v13229_v42 = vrot.slane %v13539_v22, 2 }
 0xf94   : > { %v5215_v37 = vmul.f32 %v13328_v45, %v4558_v28  ;;  %v5503_v6 = vmul.f32 %v13337_v63, %v4558_v28  ;;  %v4936_v16 = vadd.f32 %v4920_v40, %v4898_v20  ;;  %v13228_v47 = vrot.slane %v13539_v22, 3 }
 0xf95   : > { %v5483_v49 = vadd.f32 %v5467_v1, %v5447_v0  ;;  %v13544_v38 = vrot.slane %v13539_v22, 1  ;;  %v13545_v14 = vrot.slane %v13530_v44, 1  ;;  %v4606_v31 = vadd.f32 %v4590_v33, %v4539_v61  ;;  %v13549_v1 = vld [vmem:[#allocation46_spill] sm:$0xff]  ;;  %v13550_v61 = vld [vmem:[#allocation53_spill] sm:$0xff] }
 0xf96   : > { %v13226_v15 = vrot.slane %v13539_v22, 4  ;;  %v5252_v53 = vmul.f32 %v13329_v54, %v4625_v26  ;;  %v4974_v57 = vadd.f32 %v4958_v21, %v4936_v16  ;;  %v5231_v5 = vadd.f32 %v5215_v37, %v5194_v3 }
 0xf97   : > { %v4222_v55 = vsel %vm4221_vm2, %v13545_v14, %v13544_v38  ;;  %v13225_v28 = vrot.slane %v13539_v22, 5  ;;  %v5519_v59 = vadd.f32 %v5503_v6, %v5483_v49  ;;  %v5539_v9 = vmul.f32 %v13338_v60, %v4625_v26 }
 0xf98   : > { %v4673_v7 = vadd.f32 %v4657_v25, %v4606_v31  ;;  %v13546_v40 = vrot.slane %v13530_v44, 2  ;;  %v4731_v33 = vmul.f32 %v10897_v48, %v4222_v55  ;;  %v5010_v58 = vadd.f32 %v4994_v29, %v4974_v57 }
 0xf99   : > { %v5031_v11 = vmul.f32 %v10940_v32, %v4222_v55  ;;  %v13547_v21 = vrot.slane %v13530_v44, 3  ;;  %v5555_v25 = vadd.f32 %v5539_v9, %v5519_v59  ;;  %v13548_v3 = vrot.slane %v13530_v44, 4 }
 0xf9a   : > { %v4289_v56 = vsel %vm4288_vm3, %v13546_v40, %v13229_v42  ;;  %v4709_v20 = vadd.f32 %v4693_v50, %v4673_v7  ;;  %v13224_v29 = vrot.slane %v13539_v22, 6  ;;  %v12392_v37 = vadd.f32 %v13550_v61, %v13549_v1  ;;  %v13556_v61 = vld [vmem:[#allocation63_spill] sm:$0xff] }
 0xf9b   : > { %v4356_v26 = vsel %vm4355_vm4, %v13547_v21, %v13228_v47  ;;  %v4423_v0 = vsel %vm4422_vm5, %v13548_v3, %v13226_v15  ;;  %v5268_v6 = vadd.f32 %v5252_v53, %v5231_v5  ;;  %v4323_v16 = vmul.f32 %v13377_v51, %v4289_v56  ;;  %v13554_v21 = vld [vmem:[#allocation43_spill] sm:$0xff]  ;;  %v13557_v15 = vld [vmem:[#allocation49_spill] sm:$0xff] }
 0xf9c   : > { %v13551_v50 = vrot.slane %v13530_v44, 5  ;;  %v12402_v38 = vadd.f32 %v12047_v19, %v5555_v25  ;;  %v4747_v14 = vadd.f32 %v4731_v33, %v4709_v20  ;;  %v5047_v31 = vadd.f32 %v5031_v11, %v5010_v58  ;;  %v13553_v33 = vld [vmem:[#allocation62_spill] sm:$0xff] }
 0xf9d   : > { %v13227_v57 = vrot.slane %v13539_v22, 7  ;;  %v4390_v59 = vmul.f32 %v13378_v10, %v4356_v26  ;;  %v4457_v53 = vmul.f32 %v13379_v12, %v4423_v0  ;;  %v4769_v51 = vmul.f32 %v13474_v8, %v4289_v56 }
 0xf9e   : > { %v4490_v49 = vsel %vm4489_vm6, %v13551_v50, %v13225_v28  ;;  %v5288_v5 = vmul.f32 %v13330_v30, %v13530_v44  ;;  %5605 = vadd.xlane.f32.xlu1 %v12402_v38  ;;  %v13552_v7 = vrot.slane %v13530_v44, 6  ;;  %v4807_v10 = vmul.f32 %v13541_v13, %v4356_v26 }
 0xf9f   : > { %v4524_v9 = vmul.f32 %v13523_v62, %v4490_v49  ;;  %v5068_v12 = vmul.f32 %v13553_v33, %v4289_v56  ;;  %v5324_v11 = vmul.f32 %v13526_v36, %v4222_v55  ;;  %v4256_v25 = vmul.f32 %v13554_v21, %v4222_v55 }
 0xfa0   : > { %v4557_v40 = vsel %vm4556_vm7, %v13552_v7, %v13224_v29  ;;  %v5304_v58 = vadd.f32 %v5288_v5, %v5268_v6  ;;  %v4785_v20 = vadd.f32 %v4769_v51, %v4747_v14  ;;  %v13555_v62 = vrot.slane %v13530_v44, 7 }
 0xfa1   : > { %v4845_v1 = vmul.f32 %v13543_v27, %v4423_v0  ;;  %v5105_v50 = vmul.f32 %v13556_v61, %v4356_v26  ;;  %v5084_v7 = vadd.f32 %v5068_v12, %v5047_v31  ;;  %v5360_v6 = vmul.f32 %v13445_v43, %v4289_v56 }
 0xfa2   : > { %v4624_v3 = vsel %vm4623_vm8, %v13555_v62, %v13227_v57  ;;  %v5340_v29 = vadd.f32 %v5324_v11, %v5304_v58  ;;  %v4339_v5 = vadd.f32 %v4323_v16, %v4256_v25  ;;  %v4823_v28 = vadd.f32 %v4807_v10, %v4785_v20 }
 0xfa3   : > { %v4591_v55 = vmul.f32 %v13557_v15, %v4557_v40  ;;  %v4883_v14 = vmul.f32 %v13413_v41, %v4490_v49  ;;  %v5142_v51 = vmul.f32 %v10957_v39, %v4423_v0  ;;  %v5121_v44 = vadd.f32 %v5105_v50, %v5084_v7 }
 0xfa4   : > { %v5376_v21 = vadd.f32 %v5360_v6, %v5340_v29  ;;  %v5396_v62 = vmul.f32 %v13334_v35, %v4356_v26  ;;  %v4406_v57 = vadd.f32 %v4390_v59, %v4339_v5  ;;  %v4861_v47 = vadd.f32 %v4845_v1, %v4823_v28 }
 0xfa5   : > { %v4921_v42 = vmul.f32 %v13415_v24, %v4557_v40  ;;  %v5179_v31 = vmul.f32 %v10966_v34, %v4490_v49  ;;  %v4711_v56 = vrot.slane %v12392_v37, 1  ;;  %v5158_v16 = vadd.f32 %v5142_v51, %v5121_v44 }
 0xfa6   : > { %v5412_v10 = vadd.f32 %v5396_v62, %v5376_v21  ;;  %v5432_v15 = vmul.f32 %v13335_v18, %v4423_v0  ;;  %v4473_v12 = vadd.f32 %v4457_v53, %v4406_v57  ;;  %v4899_v58 = vadd.f32 %v4883_v14, %v4861_v47 }
 0xfa7   : > { %v4658_v11 = vmul.f32 %v13511_v52, %v4624_v3  ;;  %v4959_v29 = vmul.f32 %v13431_v17, %v4624_v3  ;;  %v5216_v26 = vmul.f32 %v13328_v45, %v4557_v40  ;;  %v5195_v59 = vadd.f32 %v5179_v31, %v5158_v16 }
 0xfa8   : > { %v5448_v28 = vadd.f32 %v5432_v15, %v5412_v10  ;;  %v5468_v25 = vmul.f32 %v13336_v46, %v4490_v49  ;;  %v4540_v20 = vadd.f32 %v4524_v9, %v4473_v12  ;;  %v4937_v1 = vadd.f32 %v4921_v42, %v4899_v58 }
 0xfa9   : > { %v4995_v50 = vmul.f32 %v13365_v23, %v13539_v22  ;;  %v13558_v0 = vrot.slane %v13539_v22, 1  ;;  %v5232_v47 = vadd.f32 %v5216_v26, %v5195_v59  ;;  %v4749_v57 = vrot.slane %v12392_v37, 2 }
 0xfaa   : > { %v5484_v53 = vadd.f32 %v5468_v25, %v5448_v28  ;;  %v5504_v7 = vmul.f32 %v13337_v63, %v4557_v40  ;;  %v4607_v6 = vadd.f32 %v4591_v55, %v4540_v20  ;;  %v4975_v49 = vadd.f32 %v4959_v29, %v4937_v1 }
 0xfab   : > { %v4712_v52 = vsel %vm4221_vm2, %v13558_v0, %v4711_v56  ;;  %v4694_v42 = vmul.f32 %v13532_v4, %v13539_v22  ;;  %v5253_v9 = vmul.f32 %v13329_v54, %v4624_v3  ;;  %v5540_v5 = vmul.f32 %v13338_v60, %v4624_v3 }
 0xfac   : > { %v4787_v14 = vrot.slane %v12392_v37, 3  ;;  %v5520_v51 = vadd.f32 %v5504_v7, %v5484_v53  ;;  %v4674_v44 = vadd.f32 %v4658_v11, %v4607_v6  ;;  %v5011_v21 = vadd.f32 %v4995_v50, %v4975_v49 }
 0xfad   : > { %v5032_v62 = vmul.f32 %v10940_v32, %v4712_v52  ;;  %v5269_v31 = vadd.f32 %v5253_v9, %v5232_v47  ;;  %v13559_v40 = vrot.slane %v13539_v22, 2  ;;  %v4825_v4 = vrot.slane %v12392_v37, 4 }
 0xfae   : > { %v5556_v16 = vadd.f32 %v5540_v5, %v5520_v51  ;;  %v4710_v10 = vadd.f32 %v4694_v42, %v4674_v44  ;;  %v4732_v3 = vmul.f32 %v10897_v48, %v4712_v52  ;;  %v13560_v12 = vrot.slane %v13539_v22, 3 }
 0xfaf   : > { %v4750_v55 = vsel %vm4288_vm3, %v13559_v40, %v4749_v57  ;;  %v5048_v15 = vadd.f32 %v5032_v62, %v5011_v21  ;;  %v4863_v11 = vrot.slane %v12392_v37, 5  ;;  %v5289_v29 = vmul.f32 %v13330_v30, %v13539_v22 }
 0xfb0   : > { %v4788_v58 = vsel %vm4355_vm4, %v13560_v12, %v4787_v14  ;;  %v12477_v26 = vadd.f32 %v12047_v19, %v5556_v16  ;;  %v4748_v59 = vadd.f32 %v4732_v3, %v4710_v10  ;;  %v4770_v28 = vmul.f32 %v13474_v8, %v4750_v55 }
 0xfb1   : > { %v5069_v48 = vmul.f32 %v13553_v33, %v4750_v55  ;;  %v13561_v25 = vrot.slane %v13539_v22, 4  ;;  %v4901_v1 = vrot.slane %v12392_v37, 6  ;;  %v5305_v50 = vadd.f32 %v5289_v29, %v5269_v31 }
 0xfb2   : > { %v5325_v0 = vmul.f32 %v13526_v36, %v4712_v52  ;;  %5607 = vadd.xlane.f32.xlu0 %v12477_v26  ;;  %v4808_v47 = vmul.f32 %v13541_v13, %v4788_v58  ;;  %v5106_v8 = vmul.f32 %v13556_v61, %v4788_v58  ;;  %v4786_v53 = vadd.f32 %v4770_v28, %v4748_v59 }
 0xfb3   : > { %v4826_v20 = vsel %vm4422_vm5, %v13561_v25, %v4825_v4  ;;  %v5085_v7 = vadd.f32 %v5069_v48, %v5048_v15  ;;  %v13562_v6 = vrot.slane %v13539_v22, 5  ;;  %v4939_v42 = vrot.slane %v12392_v37, 7 }
 0xfb4   : > { %v5341_v9 = vadd.f32 %v5325_v0, %v5305_v50  ;;  %v5361_v52 = vmul.f32 %v13445_v43, %v4750_v55  ;;  %v4846_v5 = vmul.f32 %v13543_v27, %v4826_v20  ;;  %v5143_v13 = vmul.f32 %v10957_v39, %v4826_v20 }
 0xfb5   : > { %v4864_v49 = vsel %vm4489_vm6, %v13562_v6, %v4863_v11  ;;  %v4824_v51 = vadd.f32 %v4808_v47, %v4786_v53  ;;  %v5122_v44 = vadd.f32 %v5106_v8, %v5085_v7  ;;  %v13563_v21 = vrot.slane %v13539_v22, 6 }
 0xfb6   : > { %v5377_v31 = vadd.f32 %v5361_v52, %v5341_v9  ;;  %v5397_v40 = vmul.f32 %v13334_v35, %v4788_v58  ;;  %v4884_v16 = vmul.f32 %v13413_v41, %v4864_v49  ;;  %v5180_v55 = vmul.f32 %v10966_v34, %v4864_v49 }
 0xfb7   : > { %v4902_v62 = vsel %vm4556_vm7, %v13563_v21, %v4901_v1  ;;  %v4862_v10 = vadd.f32 %v4846_v5, %v4824_v51  ;;  %v5159_v27 = vadd.f32 %v5143_v13, %v5122_v44  ;;  %v13564_v3 = vrot.slane %v13539_v22, 7 }
 0xfb8   : > { %v5413_v12 = vadd.f32 %v5397_v40, %v5377_v31  ;;  %v5433_v29 = vmul.f32 %v13335_v18, %v4826_v20  ;;  %v4922_v59 = vmul.f32 %v13415_v24, %v4902_v62  ;;  %v5217_v28 = vmul.f32 %v13328_v45, %v4902_v62 }
 0xfb9   : > { %v4940_v15 = vsel %vm4623_vm8, %v13564_v3, %v4939_v42  ;;  %v4900_v48 = vadd.f32 %v4884_v16, %v4862_v10  ;;  %v5196_v58 = vadd.f32 %v5180_v55, %v5159_v27  ;;  %v5469_v41 = vmul.f32 %v13336_v46, %v4864_v49  ;;  %v5584_v27 = vpop.xlane.xlu0 %5583 }
 0xfba   : > { %v5449_v25 = vadd.f32 %v5433_v29, %v5413_v12  ;;  %v4960_v50 = vmul.f32 %v13431_v17, %v4940_v15  ;;  %v5254_v0 = vmul.f32 %v13329_v54, %v4940_v15  ;;  %v4996_v8 = vmul.f32 %v13365_v23, %v12392_v37 }
 0xfbb   : > { %v4938_v22 = vadd.f32 %v4922_v59, %v4900_v48  ;;  %v5233_v47 = vadd.f32 %v5217_v28, %v5196_v58  ;;  %v5013_v24 = vsel %vm4221_vm2, %v4711_v56, 0.0  ;;  %v5505_v53 = vmul.f32 %v13337_v63, %v4902_v62 }
 0xfbc   : > { %v5485_v20 = vadd.f32 %v5469_v41, %v5449_v25  ;;  %v5290_v7 = vmul.f32 %v13330_v30, %v12392_v37  ;;  %v5050_v49 = vsel %vm4288_vm3, %v4749_v57, 0.0  ;;  %v5541_v23 = vmul.f32 %v13338_v60, %v4940_v15 }
 0xfbd   : > { %v4976_v6 = vadd.f32 %v4960_v50, %v4938_v22  ;;  %v5270_v17 = vadd.f32 %v5254_v0, %v5233_v47  ;;  %v5033_v52 = vmul.f32 %v10940_v32, %v5013_v24  ;;  %v5326_v13 = vmul.f32 %v13526_v36, %v5013_v24  ;;  %v5588_v58 = vpop.xlane.xlu0 %5587  ;;  %v13565_v24 = vld [vmem:[#allocation65_spill] sm:$0xff] }
 0xfbe   : > { %v5521_v9 = vadd.f32 %v5505_v53, %v5485_v20  ;;  %v5070_v44 = vmul.f32 %v13553_v33, %v5050_v49  ;;  %v5087_v21 = vsel %vm4355_vm4, %v4787_v14, 0.0  ;;  %v5124_v57 = vsel %vm4422_vm5, %v4825_v4, 0.0 }
 0xfbf   : > { %v5012_v5 = vadd.f32 %v4996_v8, %v4976_v6  ;;  %v5306_v56 = vadd.f32 %v5290_v7, %v5270_v17  ;;  %v5362_v32 = vmul.f32 %v13445_v43, %v5050_v49  ;;  %v5107_v16 = vmul.f32 %v13556_v61, %v5087_v21  ;;  %v13566_v49 = vld [vmem:[#allocation71_spill] sm:$0xff] }
 0xfc0   : > { %v5557_v51 = vadd.f32 %v5541_v23, %v5521_v9  ;;  %v5398_v55 = vmul.f32 %v13334_v35, %v5087_v21  ;;  %v5144_v14 = vmul.f32 %v10957_v39, %v5124_v57  ;;  %v5161_v4 = vsel %vm4489_vm6, %v4863_v11, 0.0 }
 0xfc1   : > { %v5049_v62 = vadd.f32 %v5033_v52, %v5012_v5  ;;  %v5342_v31 = vadd.f32 %v5326_v13, %v5306_v56  ;;  %v5198_v3 = vsel %vm4556_vm7, %v4901_v1, 0.0  ;;  %v5434_v15 = vmul.f32 %v13335_v18, %v5124_v57  ;;  %v5592_v53 = vpop.xlane.xlu0 %5591  ;;  %v5586_v52 = vpop.xlane.xlu1 %5585 }
 0xfc2   : > { %v12548_v40 = vadd.f32 %v12047_v19, %v5557_v51  ;;  %v5235_v29 = vsel %vm4623_vm8, %v4939_v42, 0.0  ;;  %v5181_v39 = vmul.f32 %v10966_v34, %v5161_v4  ;;  %v5470_v28 = vmul.f32 %v13336_v46, %v5161_v4  ;;  %v13569_v4 = vld [vmem:[#allocation73_spill] sm:$0xff] }
 0xfc3   : > { %v5378_v33 = vadd.f32 %v5362_v32, %v5342_v31  ;;  %v5086_v10 = vadd.f32 %v5070_v44, %v5049_v62  ;;  %v5218_v11 = vmul.f32 %v13328_v45, %v5198_v3  ;;  %v5506_v25 = vmul.f32 %v13337_v63, %v5198_v3 }
 0xfc4   : > { %5609 = vadd.xlane.f32.xlu1 %v12548_v40  ;;  %v5615_v41 = vmul.f32 0.0078125, %v5584_v27  ;;  %v5255_v50 = vmul.f32 %v13329_v54, %v5235_v29  ;;  %v5291_v0 = vmul.f32 0.0, %v13330_v30  ;;  %v5542_v42 = vmul.f32 %v13338_v60, %v5235_v29 }
 0xfc5   : > { %v5414_v61 = vadd.f32 %v5398_v55, %v5378_v33  ;;  %v5123_v12 = vadd.f32 %v5107_v16, %v5086_v10  ;;  %v5327_v22 = vmul.f32 0.0, %v13526_v36  ;;  %v5617_v20 = vmul.f32 0.0078125, %v5588_v58  ;;  %v5596_v5 = vpop.xlane.xlu0 %5595  ;;  %v5590_v32 = vpop.xlane.xlu1 %5589 }
 0xfc6   : > { %v12574_v45 = vsub.f32 %v13565_v24, %v5615_v41  ;;  %v5363_v54 = vmul.f32 0.0, %v13445_v43  ;;  %v5399_v30 = vmul.f32 0.0, %v13334_v35  ;;  %v5619_v23 = vmul.f32 0.0078125, %v5592_v53  ;;  %v13567_v35 = vld [vmem:[#allocation37_spill] sm:$0xff]  ;;  %v8555_v24 = vld [vmem:[#allocation7 + $0x10] ss:$8 sps:$4 sm:$0xff]  }
 0xfc7   : > { %v5450_v59 = vadd.f32 %v5434_v15, %v5414_v61  ;;  %v5160_v48 = vadd.f32 %v5144_v14, %v5123_v12  ;;  %v12585_v9 = vsub.f32 %v13566_v49, %v5617_v20  ;;  %v5471_v13 = vmul.f32 0.0, %v13336_v46  ;;  %v13568_v46 = vld [vmem:[#allocation39_spill] sm:$0xff]  ;;  %v8938_v61 = vld [vmem:[%s13359_s13] ss:$0 sm:$0xff]  ;;  %v13570_v12 = vld [vmem:[#allocation74_spill] sm:$0xff] }
 0xfc8   : > { %v5647_v36 = vmul.f32 %v12574_v45, %v12574_v45  ;;  %v12590_v51 = vsub.f32 %v13567_v35, %v5619_v23  ;;  %v5621_v21 = vmul.f32 0.0078125, %v5596_v5  ;;  %v5507_v57 = vmul.f32 0.0, %v13337_v63  ;;  %v8560_v53 = vld [vmem:[#allocation7 + $0x24] ss:$8 sps:$4 sm:$0xff]   ;;  %v8569_v49 = vld [vmem:[#allocation7 + $0x54] ss:$8 sps:$4 sm:$0xff]  }
 0xfc9   : > { %v5486_v37 = vadd.f32 %v5470_v28, %v5450_v59  ;;  %v5197_v1 = vadd.f32 %v5181_v39, %v5160_v48  ;;  %v5649_v44 = vmul.f32 %v12585_v9, %v12585_v9  ;;  %v5543_v31 = vmul.f32 0.0, %v13338_v60  ;;  %v5594_v60 = vpop.xlane.xlu1 %5593  ;;  %v13571_v48 = vld [vmem:[#allocation38_spill] sm:$0xff]  ;;  %v8567_v5 = vld [vmem:[#allocation7 + $0x50] ss:$8 sps:$4 sm:$0xff]  }
 0xfca   : > { %v5616_v33 = vmul.f32 0.0078125, %v5586_v52  ;;  %v12599_v55 = vsub.f32 %v13568_v46, %v5621_v21  ;;  %v5618_v3 = vmul.f32 0.0078125, %v5590_v32  ;;  %v5620_v59 = vmul.f32 0.0078125, %v5594_v60  ;;  %v8570_v35 = vld [vmem:[#allocation7 + $0x60] ss:$8 sps:$4 sm:$0xff]  }
 0xfcb   : > { %v5522_v2 = vadd.f32 %v5506_v25, %v5486_v37  ;;  %v5234_v34 = vadd.f32 %v5218_v11, %v5197_v1  ;;  %v13572_v1 = vld [vmem:[#allocation44_spill] sm:$0xff] }
 0xfcc   : > { %v12602_v27 = vsub.f32 %v13569_v4, %v5616_v33  ;;  %v5653_v63 = vmul.f32 %v12599_v55, %v12599_v55  ;;  %v12613_v29 = vsub.f32 %v13570_v12, %v5618_v3  ;;  %v12618_v11 = vsub.f32 %v13571_v48, %v5620_v59  ;;  %v8573_v21 = vld [vmem:[#allocation7 + $0x70] ss:$8 sps:$4 sm:$0xff]  }
 0xfcd   : > { %v5558_v47 = vadd.f32 %v5542_v42, %v5522_v2  ;;  %v5271_v8 = vadd.f32 %v5255_v50, %v5234_v34  ;;  %v8552_v42 = vld [vmem:[#allocation7] ss:$8 sps:$4 sm:$0xff]   ;;  %v8554_v34 = vld [vmem:[#allocation7 + $0x4] ss:$8 sps:$4 sm:$0xff]  }
 0xfce   : > { %v5648_v39 = vmul.f32 %v12602_v27, %v12602_v27  ;;  %v5650_v58 = vmul.f32 %v12613_v29, %v12613_v29  ;;  %v5652_v25 = vmul.f32 %v12618_v11, %v12618_v11  ;;  %5883 = vmatprep.subr.bf16.mxu1 %v8554_v34 }
 0xfcf   : > { %v12577_v7 = vadd.f32 %v12047_v19, %v5558_v47  ;;  %v5307_v6 = vadd.f32 %v5291_v0, %v5271_v8  ;;  %v5435_v19 = vmul.f32 0.0, %v13335_v18  ;;  %v5651_v18 = vmul.f32 %v12590_v51, %v12590_v51  ;;  %v13573_v47 = vld [vmem:[#allocation45_spill] sm:$0xff]  ;;  %5884 = vmatpush1.bf16.msra.mxu1 %v8552_v42 }
 0xfd1   : > { %5611 = vadd.xlane.f32.xlu0 %v12577_v7  ;;  %v5343_v17 = vadd.f32 %v5327_v22, %v5307_v6  ;;  %v8557_v22 = vld [vmem:[#allocation7 + $0x14] ss:$8 sps:$4 sm:$0xff]   ;;  %v8558_v6 = vld [vmem:[#allocation7 + $0x20] ss:$8 sps:$4 sm:$0xff]  }
 0xfd2   : > { %5885 = vmatprep.subr.bf16.mxu1 %v8557_v22 }
 0xfd3   : > { %v5379_v56 = vadd.f32 %v5363_v54, %v5343_v17  ;;  %5886 = vmatpush1.bf16.msra.mxu1 %v8555_v24  ;;  %v8563_v54 = vld [vmem:[#allocation7 + $0x34] ss:$8 sps:$4 sm:$0xff]   ;;  %v8566_v17 = vld [vmem:[#allocation7 + $0x44] ss:$8 sps:$4 sm:$0xff]  }
 0xfd4   : > { %5887 = vmatprep.subr.bf16.mxu1 %v8560_v53 }
 0xfd5   : > { %v5415_v43 = vadd.f32 %v5399_v30, %v5379_v56  ;;  %5663 = vadd.xlane.f32.xlu0 %v5647_v36  ;;  %v8561_v30 = vld [vmem:[#allocation7 + $0x30] ss:$8 sps:$4 sm:$0xff]   ;;  %v8564_v36 = vld [vmem:[#allocation7 + $0x40] ss:$8 sps:$4 sm:$0xff]   ;;  %v8572_v56 = vld [vmem:[#allocation7 + $0x64] ss:$8 sps:$4 sm:$0xff]  }
 0xfd7   : > { %v5451_v62 = vadd.f32 %v5435_v19, %v5415_v43  ;;  %5888 = vmatpush1.bf16.msra.mxu1 %v8558_v6  ;;  %v13574_v19 = vld [vmem:[#allocation40_spill] sm:$0xff] }
 0xfd8   : > { %v5598_v28 = vpop.xlane.xlu1 %5597  ;;  %5889 = vmatprep.subr.bf16.mxu1 %v8563_v54 }
 0xfd9   : > { %v5487_v16 = vadd.f32 %v5471_v13, %v5451_v62  ;;  %5667 = vadd.xlane.f32.xlu0 %v5649_v44  ;;  %v5622_v37 = vmul.f32 0.0078125, %v5598_v28  ;;  %v8575_v44 = vld [vmem:[#allocation7 + $0x74] ss:$8 sps:$4 sm:$0xff]  }
 0xfdb   : > { %v5523_v10 = vadd.f32 %v5507_v57, %v5487_v16  ;;  %v12625_v41 = vsub.f32 %v13572_v1, %v5622_v37  ;;  %5890 = vmatpush1.bf16.msra.mxu1 %v8561_v30  ;;  %v8578_v16 = vld [vmem:[#allocation7 + $0x84] ss:$8 sps:$4 sm:$0xff]  }
 0xfdc   : > { %5891 = vmatprep.subr.bf16.mxu1 %v8566_v17 }
 0xfdd   : > { %v5559_v14 = vadd.f32 %v5543_v31, %v5523_v10  ;;  %5671 = vadd.xlane.f32.xlu0 %v5651_v18  ;;  %v5654_v50 = vmul.f32 %v12625_v41, %v12625_v41  ;;  %v13575_v31 = vld [vmem:[#allocation75_spill] sm:$0xff] }
 0xfdf   : > { %v12609_v15 = vadd.f32 %v8938_v61, %v5559_v14  ;;  %5892 = vmatpush1.bf16.msra.mxu1 %v8564_v36 }
 0xfe0   : > { %5893 = vmatprep.subr.bf16.mxu1 %v8569_v49 }
 0xfe1   : > { %5613 = vadd.xlane.f32.xlu1 %v12609_v15  ;;  %5675 = vadd.xlane.f32.xlu0 %v5653_v63 }
 0xfe3   : > { %5894 = vmatpush1.bf16.msra.mxu1 %v8567_v5 }
 0xfe4   : > { %5895 = vmatprep.subr.bf16.mxu1 %v8572_v56 }
 0xfe5   : > { %5665 = vadd.xlane.f32.xlu1 %v5648_v39 }
 0xfe7   : > { %5896 = vmatpush1.bf16.msra.mxu1 %v8570_v35 }
 0xfe8   : > { %5897 = vmatprep.subr.bf16.mxu1 %v8575_v44  ;;  %v8576_v44 = vld [vmem:[#allocation7 + $0x80] ss:$8 sps:$4 sm:$0xff]  }
 0xfe9   : > { %5669 = vadd.xlane.f32.xlu1 %v5650_v58 }
 0xfeb   : > { %5898 = vmatpush1.bf16.msra.mxu1 %v8573_v21 }
 0xfec   : > { %6427 = vmatprep.subr.bf16.mxu1 %v8578_v16 }
 0xfed   : > { %5673 = vadd.xlane.f32.xlu1 %v5652_v25  ;;  %v5600_v0 = vpop.xlane.xlu0 %5599 }
 0xfee   : > { %v5623_v2 = vmul.f32 0.0078125, %v5600_v0 }
 0xff0   : > { %v12630_v8 = vsub.f32 %v13573_v47, %v5623_v2 }
 0xff1   : > { %5677 = vadd.xlane.f32.xlu1 %v5654_v50 }
 0xff2   : > { %v5655_v20 = vmul.f32 %v12630_v8, %v12630_v8 }
 0xff4   : > { %5679 = vadd.xlane.f32.xlu0 %v5655_v20 }
0x1001   : > { %v5602_v23 = vpop.xlane.xlu1 %5601 }
0x1002   : > { %v5624_v52 = vmul.f32 0.0078125, %v5602_v23 }
0x1004   : > { %v12635_v13 = vsub.f32 %v13574_v19, %v5624_v52 }
0x1006   : > { %v5656_v43 = vmul.f32 %v12635_v13, %v12635_v13 }
0x1008   : > { %5681 = vadd.xlane.f32.xlu1 %v5656_v43 }
0x1016   : > { %v5604_v62 = vpop.xlane.xlu0 %5603 }
0x1017   : > { %v5625_v57 = vmul.f32 0.0078125, %v5604_v62  ;;  %v8581_v62 = vld [vmem:[#allocation7 + $0x94] ss:$8 sps:$4 sm:$0xff]  }
0x1019   : > { %v12640_v32 = vsub.f32 %v13575_v31, %v5625_v57 }
0x101b   : > { %v5657_v33 = vmul.f32 %v12640_v32, %v12640_v32 }
0x101d   : > { %5683 = vadd.xlane.f32.xlu0 %v5657_v33 }
0x102b   : > { %v5606_v18 = vpop.xlane.xlu1 %5605 }
0x102c   : > { %v5626_v46 = vmul.f32 0.0078125, %v5606_v18  ;;  %v13576_v18 = vmov 0  }
0x102e   : > { %v12645_v10 = vsub.f32 %v12402_v38, %v5626_v46  ;;  %v8579_v46 = vld [vmem:[#allocation7 + $0x90] ss:$8 sps:$4 sm:$0xff]  }
0x1030   : > { %v5658_v14 = vmul.f32 %v12645_v10, %v12645_v10 }
0x1032   : > { %5685 = vadd.xlane.f32.xlu1 %v5658_v14 }
0x103f   : > { %v5608_v4 = vpop.xlane.xlu0 %5607 }
0x1040   : > { %v5627_v3 = vmul.f32 0.0078125, %v5608_v4  ;;  %v8582_v4 = vld [vmem:[#allocation7 + $0xa0] ss:$8 sps:$4 sm:$0xff]  }
0x1042   : > { %v12650_v63 = vsub.f32 %v12477_v26, %v5627_v3 }
0x1044   : > { %v5659_v60 = vmul.f32 %v12650_v63, %v12650_v63 }
0x1046   : > { %5687 = vadd.xlane.f32.xlu0 %v5659_v60  ;;  %v8587_v60 = vld [vmem:[#allocation7 + $0xb4] ss:$8 sps:$4 sm:$0xff]  }
0x1051   : > { %v5610_v61 = vpop.xlane.xlu1 %5609 }
0x1052   : > { %v5628_v12 = vmul.f32 0.0078125, %v5610_v61 }
0x1054   : > { %v12655_v39 = vsub.f32 %v12548_v40, %v5628_v12 }
0x1056   : > { %v5660_v38 = vmul.f32 %v12655_v39, %v12655_v39 }
0x1058   : > { %5689 = vadd.xlane.f32.xlu1 %v5660_v38 }
0x105e   : > { %v5612_v59 = vpop.xlane.xlu0 %5611 }
0x105f   : > { %v5629_v28 = vmul.f32 0.0078125, %v5612_v59  ;;  %v8590_v59 = vld [vmem:[#allocation7 + $0xc4] ss:$8 sps:$4 sm:$0xff]  }
0x1061   : > { %v12660_v48 = vsub.f32 %v12577_v7, %v5629_v28 }
0x1062   : > { %v5664_v58 = vpop.xlane.xlu0 %5663 }
0x1063   : > { %v5661_v26 = vmul.f32 %v12660_v48, %v12660_v48  ;;  %v5695_v37 = vmul.f32 0.0078125, %v5664_v58  ;;  %v8588_v58 = vld [vmem:[#allocation7 + $0xc0] ss:$8 sps:$4 sm:$0xff]  }
0x1065   : > { %5691 = vadd.xlane.f32.xlu0 %v5661_v26  ;;  %v5711_v50 = vadd.f32 1e-06, %v5695_v37 }
0x1066   : > { %v5668_v2 = vpop.xlane.xlu0 %5667 }
0x1067   : > { %8888 = vrsqrt.f32 %v5711_v50  ;;  %v5697_v22 = vmul.f32 0.0078125, %v5668_v2  ;;  %v8596_v2 = vld [vmem:[#allocation7 + $0xe4] ss:$8 sps:$4 sm:$0xff]  }
0x1069   : > { %v5713_v20 = vadd.f32 1e-06, %v5697_v22  ;;  %v8594_v22 = vld [vmem:[#allocation7 + $0xe0] ss:$8 sps:$4 sm:$0xff]  }
0x106a   : > { %v5672_v6 = vpop.xlane.xlu0 %5671 }
0x106b   : > { %v5699_v30 = vmul.f32 0.0078125, %v5672_v6 }
0x106d   : > { %v5715_v5 = vadd.f32 1e-06, %v5699_v30 }
0x106e   : > { %v5614_v25 = vpop.xlane.xlu1 %5613  ;;  %v5676_v23 = vpop.xlane.xlu0 %5675 }
0x106f   : > { %v5630_v1 = vmul.f32 0.0078125, %v5614_v25  ;;  %v5701_v35 = vmul.f32 0.0078125, %v5676_v23  ;;  %v8593_v25 = vld [vmem:[#allocation7 + $0xd4] ss:$8 sps:$4 sm:$0xff]  }
0x1071   : > { %v12665_v40 = vsub.f32 %v12609_v15, %v5630_v1  ;;  %v8889_v36 = vpop.eup %8888  ;;  %v5717_v33 = vadd.f32 1e-06, %v5701_v35  ;;  %v8601_v35 = vld [vmem:[#allocation8] sm:$0xff]  }
0x1072   : > { %v5666_v0 = vpop.xlane.xlu1 %5665  ;;  %v5743_v19 = vmul.f32 %v8889_v36, %v12574_v45 }
0x1073   : > { %v5662_v42 = vmul.f32 %v12665_v40, %v12665_v40  ;;  %v5696_v34 = vmul.f32 0.0078125, %v5666_v0 }
0x1075   : > { %5693 = vadd.xlane.f32.xlu1 %v5662_v42  ;;  %v5712_v7 = vadd.f32 1e-06, %v5696_v34 }
0x1076   : > { %v5670_v47 = vpop.xlane.xlu1 %5669 }
0x1077   : > { %8890 = vrsqrt.f32 %v5712_v7  ;;  %v5698_v24 = vmul.f32 0.0078125, %v5670_v47 }
0x1079   : > { %v5714_v53 = vadd.f32 1e-06, %v5698_v24  ;;  %v8599_v24 = vld [vmem:[#allocation7 + $0xf4] ss:$8 sps:$4 sm:$0xff]  }
0x107a   : > { %v5674_v54 = vpop.xlane.xlu1 %5673 }
0x107b   : > { %8892 = vrsqrt.f32 %v5714_v53  ;;  %v5700_v15 = vmul.f32 0.0078125, %v5674_v54 }
0x107c   : > { %8894 = vrsqrt.f32 %v5713_v20  ;;  %v8597_v20 = vld [vmem:[#allocation7 + $0xf0] ss:$8 sps:$4 sm:$0xff]  }
0x107d   : > { %v5716_v49 = vadd.f32 1e-06, %v5700_v15 }
0x107e   : > { %v5678_v17 = vpop.xlane.xlu1 %5677 }
0x107f   : > { %v5702_v56 = vmul.f32 0.0078125, %v5678_v17  ;;  %8896 = vrsqrt.f32 %v5716_v49 }
0x1080   : > { %8898 = vrsqrt.f32 %v5715_v5 }
0x1081   : > { %v8891_v52 = vpop.eup %8890  ;;  %v5718_v31 = vadd.f32 1e-06, %v5702_v56  ;;  %v5680_v26 = vpop.xlane.xlu0 %5679 }
0x1082   : > { %v5744_v43 = vmul.f32 %v8891_v52, %v12602_v27  ;;  %v8584_v27 = vld [vmem:[#allocation7 + $0xa4] ss:$8 sps:$4 sm:$0xff]   ;;  %v5703_v50 = vmul.f32 0.0078125, %v5680_v26 }
0x1083   : > { %8900 = vrsqrt.f32 %v5718_v31 }
0x1084   : > { %v12671_v21 = vpack.c.bf16 %v5744_v43, %v5743_v19  ;;  %8902 = vrsqrt.f32 %v5717_v33  ;;  %v5719_v42 = vadd.f32 1e-06, %v5703_v50  ;;  %v8600_v43 = vld [vmem:[#allocation8 + $0x40] sm:$0xff]   ;;  %v8607_v33 = vld [vmem:[#allocation8 + $0x18] sm:$0xff]  }
0x1085   : > { %v8893_v57 = vpop.eup %8892  ;;  %7569 = vmatprep.subr.bf16.mxu0 %v8600_v43 }
0x1086   : > { %5916 = vmatmul.mubr.bf16.vlgmr.msra.gmra.mrb[112].mxu1 %v12671_v21  ;;  %v8895_v16 = vpop.eup %8894  ;;  %v5746_v45 = vmul.f32 %v8893_v57, %v12613_v29  ;;  %v8585_v29 = vld [vmem:[#allocation7 + $0xb0] ss:$8 sps:$4 sm:$0xff]   ;;  %8904 = vrsqrt.f32 %v5719_v42  ;;  %7570 = vmatpush3.bf16.msra.mxu0 %v8601_v35 }
0x1087   : > { %5925 = vmatprep.mubr.bf16.mxu1 %v13576_v18  ;;  %6428 = vmatpush1.bf16.msra.mxu1 %v8576_v44  ;;  %v5745_v14 = vmul.f32 %v8895_v16, %v12585_v9  ;;  %v8602_v44 = vld [vmem:[#allocation8 + $0x48] sm:$0xff]   ;;  %v8604_v57 = vld [vmem:[#allocation8 + $0x50] sm:$0xff]  }
0x1088   : > { %6429 = vmatprep.subr.bf16.mxu1 %v8581_v62  ;;  %v8603_v62 = vld [vmem:[#allocation8 + $0x8] sm:$0xff]   ;;  %7571 = vmatprep.subr.bf16.mxu0 %v8602_v44  ;;  %v8605_v16 = vld [vmem:[#allocation8 + $0x10] sm:$0xff]  }
0x1089   : > { %v12677_v3 = vpack.c.bf16 %v5746_v45, %v5745_v14  ;;  %v8897_v61 = vpop.eup %8896  ;;  %v8609_v14 = vld [vmem:[#allocation8 + $0x20] sm:$0xff]  }
0x108a   : > { %v8899_v12 = vpop.eup %8898  ;;  %v5748_v38 = vmul.f32 %v8897_v61, %v12618_v11  ;;  %v8591_v11 = vld [vmem:[#allocation7 + $0xd0] ss:$8 sps:$4 sm:$0xff]   ;;  %7572 = vmatpush3.bf16.msra.mxu0 %v8603_v62 }
0x108b   : > { %6430 = vmatpush1.bf16.msra.mxu1 %v8579_v46  ;;  %v5747_v9 = vmul.f32 %v8899_v12, %v12590_v51  ;;  %7573 = vmatprep.subr.bf16.mxu0 %v8604_v57  ;;  %v8608_v46 = vld [vmem:[#allocation8 + $0x60] sm:$0xff]   ;;  %v8611_v12 = vld [vmem:[#allocation8 + $0x28] sm:$0xff]  }
0x108c   : > { %6431 = vmatprep.subr.bf16.mxu1 %v8584_v27 }
0x108d   : > { %v8901_v28 = vpop.eup %8900  ;;  %v12683_v37 = vpack.c.bf16 %v5748_v38, %v5747_v9  ;;  %v8613_v38 = vld [vmem:[#allocation8 + $0x30] sm:$0xff]   ;;  %v8615_v9 = vld [vmem:[#allocation8 + $0x38] sm:$0xff]  }
0x108e   : > { %5926 = vmatmul.mubr.bf16.gmra.mrb[116].mxu1 %v12677_v3  ;;  %v8903_v1 = vpop.eup %8902  ;;  %v5750_v0 = vmul.f32 %v8901_v28, %v12625_v41  ;;  %7574 = vmatpush3.bf16.msra.mxu0 %v8605_v16 }
0x108f   : > { %5935 = vmatprep.mubr.bf16.mxu1 %v13576_v18  ;;  %6432 = vmatpush1.bf16.msra.mxu1 %v8582_v4  ;;  %v5749_v51 = vmul.f32 %v8903_v1, %v12599_v55 }
0x1090   : > { %6433 = vmatprep.subr.bf16.mxu1 %v8587_v60  ;;  %v8905_v55 = vpop.eup %8904  ;;  %v8610_v60 = vld [vmem:[#allocation8 + $0x68] sm:$0xff]  }
0x1091   : > { %v12689_v34 = vpack.c.bf16 %v5750_v0, %v5749_v51  ;;  %v5751_v6 = vmul.f32 %v8905_v55, %v12630_v8  ;;  %v12739_v55 = vld [vmem:[#allocation8 + $0xd8] sm:$0xff]  }
0x1093   : > { %6434 = vmatpush1.bf16.msra.mxu1 %v8585_v29  ;;  %v8612_v29 = vld [vmem:[#allocation8 + $0x70] sm:$0xff]  }
0x1094   : > { %6435 = vmatprep.subr.bf16.mxu1 %v8590_v59  ;;  %v8614_v59 = vld [vmem:[#allocation8 + $0x78] sm:$0xff]  }
0x1095   : > { %v5682_v7 = vpop.xlane.xlu1 %5681 }
0x1096   : > { %5936 = vmatmul.mubr.bf16.gmra.mrb[120].mxu1 %v12683_v37  ;;  %v5704_v47 = vmul.f32 0.0078125, %v5682_v7  ;;  %v8616_v7 = vld [vmem:[#allocation8 + $0xc0] sm:$0xff]  }
0x1097   : > { %5945 = vmatprep.mubr.bf16.mxu1 %v13576_v18  ;;  %6436 = vmatpush1.bf16.msra.mxu1 %v8588_v58 }
0x1098   : > { %6437 = vmatprep.subr.bf16.mxu1 %v8593_v25  ;;  %v5720_v41 = vadd.f32 1e-06, %v5704_v47 }
0x109a   : > { %8906 = vrsqrt.f32 %v5720_v41  ;;  %v8617_v41 = vld [vmem:[#allocation8 + $0x80] sm:$0xff]  }
0x109b   : > { %6438 = vmatpush1.bf16.msra.mxu1 %v8591_v11 }
0x109c   : > { %6439 = vmatprep.subr.bf16.mxu1 %v8596_v2 }
0x109e   : > { %5946 = vmatmul.mubr.bf16.gmra.mrb[124].mxu1 %v12689_v34 }
0x109f   : > { %5955 = vmatprep.mubr.bf16.mxu1 %v13576_v18  ;;  %6440 = vmatpush1.bf16.msra.mxu1 %v8594_v22 }
0x10a0   : > { %6441 = vmatprep.subr.bf16.mxu1 %v8599_v24 }
0x10a3   : > { %6442 = vmatpush1.bf16.msra.mxu1 %v8597_v20  ;;  %v12719_v20 = vld [vmem:[#allocation8 + $0xd0] sm:$0xff]  }
0x10a4   : > { %v8907_v53 = vpop.eup %8906  ;;  %8361 = vmatprep.subr.bf16.mxu1 %v8616_v7 }
0x10a5   : > { %v5752_v54 = vmul.f32 %v8907_v53, %v12635_v13  ;;  %v13579_v53 = vld [vmem:[#allocation17_spill] sm:$0xff] }
0x10a7   : > { %v12695_v15 = vpack.c.bf16 %v5752_v54, %v5751_v6  ;;  %v12744_v54 = vld [vmem:[#allocation8 + $0x98] sm:$0xff]  }
0x10a9   : > { %5956 = vmatmul.mubr.bf16.gmra.mrb[128].mxu1 %v12695_v15 }
0x10aa   : > { %5965 = vmatprep.mubr.bf16.mxu1 %v13576_v18  ;;  %v5684_v30 = vpop.xlane.xlu0 %5683 }
0x10ab   : > { %v5705_v17 = vmul.f32 0.0078125, %v5684_v30 }
0x10ad   : > { %v5721_v36 = vadd.f32 1e-06, %v5705_v17 }
0x10af   : > { %8908 = vrsqrt.f32 %v5721_v36 }
0x10b9   : > { %v8909_v5 = vpop.eup %8908 }
0x10ba   : > { %v5753_v8 = vmul.f32 %v8909_v5, %v12640_v32  ;;  %v8606_v32 = vld [vmem:[#allocation8 + $0x58] sm:$0xff]  }
0x10bb   : > { %7575 = vmatprep.subr.bf16.mxu0 %v8606_v32 }
0x10bc   : > { %7576 = vmatpush3.bf16.msra.mxu0 %v8607_v33 }
0x10bd   : > { %7577 = vmatprep.subr.bf16.mxu0 %v8608_v46 }
0x10bf   : > { %v5686_v49 = vpop.xlane.xlu1 %5685 }
0x10c0   : > { %v5706_v23 = vmul.f32 0.0078125, %v5686_v49  ;;  %7578 = vmatpush3.bf16.msra.mxu0 %v8609_v14 }
0x10c1   : > { %7579 = vmatprep.subr.bf16.mxu0 %v8610_v60 }
0x10c2   : > { %v5722_v52 = vadd.f32 1e-06, %v5706_v23 }
0x10c4   : > { %8910 = vrsqrt.f32 %v5722_v52  ;;  %7580 = vmatpush3.bf16.msra.mxu0 %v8611_v12 }
0x10c5   : > { %7581 = vmatprep.subr.bf16.mxu0 %v8612_v29 }
0x10c8   : > { %7582 = vmatpush3.bf16.msra.mxu0 %v8613_v38 }
0x10c9   : > { %7583 = vmatprep.subr.bf16.mxu0 %v8614_v59 }
0x10cc   : > { %7584 = vmatpush3.bf16.msra.mxu0 %v8615_v9 }
0x10cd   : > { %7633 = vmatprep.subr.bf16.mxu0 %v8616_v7 }
0x10ce   : > { %v8911_v56 = vpop.eup %8910 }
0x10cf   : > { %v5754_v13 = vmul.f32 %v8911_v56, %v12645_v10 }
0x10d1   : > { %v12701_v19 = vpack.c.bf16 %v5754_v13, %v5753_v8 }
0x10d3   : > { %5966 = vmatmul.mubr.bf16.gmra.mrb[132].mxu1 %v12701_v19  ;;  %v5688_v31 = vpop.xlane.xlu0 %5687 }
0x10d4   : > { %5975 = vmatprep.mubr.bf16.mxu1 %v13576_v18  ;;  %v5707_v10 = vmul.f32 0.0078125, %v5688_v31 }
0x10d6   : > { %v5723_v45 = vadd.f32 1e-06, %v5707_v10 }
0x10d8   : > { %8912 = vrsqrt.f32 %v5723_v45 }
0x10e2   : > { %v8913_v28 = vpop.eup %8912 }
0x10e3   : > { %v5755_v58 = vmul.f32 %v8913_v28, %v12650_v63 }
0x10e5   : > { %v5690_v27 = vpop.xlane.xlu1 %5689 }
0x10e6   : > { %v5708_v4 = vmul.f32 0.0078125, %v5690_v27 }
0x10e8   : > { %v5724_v61 = vadd.f32 1e-06, %v5708_v4 }
0x10ea   : > { %8914 = vrsqrt.f32 %v5724_v61 }
0x10f2   : > { %v5692_v50 = vpop.xlane.xlu0 %5691 }
0x10f3   : > { %v5709_v0 = vmul.f32 0.0078125, %v5692_v50 }
0x10f4   : > { %v8915_v26 = vpop.eup %8914 }
0x10f5   : > { %v5756_v25 = vmul.f32 %v8915_v26, %v12655_v39  ;;  %v5725_v11 = vadd.f32 1e-06, %v5709_v0 }
0x10f7   : > { %v5765_v1 = vpack.c.bf16 %v5756_v25, %v5755_v58  ;;  %8916 = vrsqrt.f32 %v5725_v11 }
0x10f9   : > { %5976 = vmatmul.mubr.bf16.gmra.mrb[136].mxu1 %v5765_v1 }
0x10fa   : > { %5985 = vmatprep.mubr.bf16.mxu1 %v13576_v18 }
0x1101   : > { %v8917_v22 = vpop.eup %8916 }
0x1102   : > { %v5694_v51 = vpop.xlane.xlu1 %5693  ;;  %v5757_v39 = vmul.f32 %v8917_v22, %v12660_v48  ;;  %v8618_v48 = vld [vmem:[#allocation8 + $0xc8] sm:$0xff]  }
0x1103   : > { %v5710_v2 = vmul.f32 0.0078125, %v5694_v51 }
0x1105   : > { %v5726_v42 = vadd.f32 1e-06, %v5710_v2 }
0x1107   : > { %8918 = vrsqrt.f32 %v5726_v42 }
0x1111   : > { %v8919_v63 = vpop.eup %8918 }
0x1112   : > { %v5758_v47 = vmul.f32 %v8919_v63, %v12665_v40  ;;  %v12717_v40 = vld [vmem:[#allocation8 + $0x88] sm:$0xff]  }
0x1114   : > { %v5766_v24 = vpack.c.bf16 %v5758_v47, %v5757_v39 }
0x1116   : > { %5986 = vmatmul.mubr.bf16.gmra.mrb[140].mxu1 %v5766_v24 }
0x1117   : > { %6459 = vmatprep.mubr.bf16.mxu1 %v13576_v18 }
0x111e   : > { %6460 = vmatmul.mubr.bf16.vlgmr.msra.gmra.mrb[144].mxu1 %v12671_v21  ;;  %v12724_v21 = vld [vmem:[#allocation8 + $0x90] sm:$0xff]  }
0x111f   : > { %6469 = vmatprep.mubr.bf16.mxu1 %v13576_v18  ;;  %8369 = vmatpush3.bf16.msra.mxu1 %v8617_v41 }
0x1120   : > { %8362 = vmatprep.subr.bf16.mxu1 %v8618_v48 }
0x1123   : > { %8370 = vmatpush3.bf16.msra.mxu1 %v12717_v40 }
0x1124   : > { %8363 = vmatprep.subr.bf16.mxu1 %v12719_v20 }
0x1126   : > { %6470 = vmatmul.mubr.bf16.gmra.mrb[148].mxu1 %v12677_v3  ;;  %v5791_v3 = vld [vmem:[%s13577_s19] sm:$0x3] }
0x1127   : > { %6479 = vmatprep.mubr.bf16.mxu1 %v13576_v18  ;;  %8371 = vmatpush3.bf16.msra.mxu1 %v12724_v21  ;;  %v12742_v6 = vrot.slane %v5791_v3, %v13579_v53 }
0x1128   : > { %8364 = vmatprep.subr.bf16.mxu1 %v12739_v55 }
0x112b   : > { %8372 = vmatpush3.bf16.msra.mxu1 %v12744_v54 }
0x112e   : > { %6480 = vmatmul.mubr.bf16.gmra.mrb[152].mxu1 %v12683_v37  ;;  %v13578_v37 = vld [vmem:[#allocation18_spill] sm:$0xff] }
0x112f   : > { %6489 = vmatprep.mubr.bf16.mxu1 %v13576_v18 }
0x1136   : > { %6490 = vmatmul.mubr.bf16.gmra.mrb[156].mxu1 %v12689_v34  ;;  %v12737_v34 = vrot.slane %v5791_v3, %v13578_v37 }
0x1137   : > { %6499 = vmatprep.mubr.bf16.mxu1 %v13576_v18 }
0x113e   : > { %6500 = vmatmul.mubr.bf16.gmra.mrb[160].mxu1 %v12695_v15 }
0x113f   : > { %6509 = vmatprep.mubr.bf16.mxu1 %v13576_v18 }
0x1146   : > { %6510 = vmatmul.mubr.bf16.gmra.mrb[164].mxu1 %v12701_v19 }
0x1147   : > { %6519 = vmatprep.mubr.bf16.mxu1 %v13576_v18 }
0x114e   : > { %6520 = vmatmul.mubr.bf16.gmra.mrb[168].mxu1 %v5765_v1 }
0x114f   : > { %6529 = vmatprep.mubr.bf16.mxu1 %v13576_v18 }
0x1156   : > { %6530 = vmatmul.mubr.bf16.gmra.mrb[172].mxu1 %v5766_v24 }
0x1159   : > { %v5917_v15 = vpop.f32.mrb[112].mxu1 }
0x115a   : > { %v5918_v18 = vadd.f32 %v5917_v15, %v12737_v34  ;;  %v5919_v30 = vpop.f32.mrb[113].mxu1 }
0x115b   : > { %v5920_v17 = vadd.f32 %v5919_v30, %v12742_v6  ;;  %v5921_v36 = vpop.f32.mrb[114].mxu1  ;;  %v8624_v30 = vld [vmem:[#allocation8 + $0xe0] sm:$0xff]  }
0x115c   : > { %v5996_v49 = vmax.f32 %v5918_v18, 0.0  ;;  %v5922_v23 = vadd.f32 %v5921_v36, %v12737_v34  ;;  %v5923_v52 = vpop.f32.mrb[115].mxu1  ;;  %8365 = vmatprep.subr.bf16.mxu1 %v8624_v30 }
0x115d   : > { %v5997_v5 = vmax.f32 %v5920_v17, 0.0  ;;  %v5924_v56 = vadd.f32 %v5923_v52, %v12742_v6  ;;  %v8625_v17 = vld [vmem:[#allocation8 + $0xa0] sm:$0xff]  }
0x115e   : > { %v5998_v8 = vmax.f32 %v5922_v23, 0.0  ;;  %v6028_v19 = vmul.f32 %v5996_v49, %v5996_v49  ;;  %8373 = vmatpush3.bf16.msra.mxu1 %v8625_v17 }
0x115f   : > { %v5999_v13 = vmax.f32 %v5924_v56, 0.0  ;;  %v6029_v35 = vmul.f32 %v5997_v5, %v5997_v5  ;;  %v8626_v56 = vld [vmem:[#allocation8 + $0xe8] sm:$0xff]  }
0x1160   : > { %v6030_v43 = vmul.f32 %v5998_v8, %v5998_v8  ;;  %8366 = vmatprep.subr.bf16.mxu1 %v8626_v56 }
0x1161   : > { %v6031_v44 = vmul.f32 %v5999_v13, %v5999_v13  ;;  %v5927_v62 = vpop.f32.mrb[116].mxu1 }
0x1162   : > { %v6060_v57 = vpack.c.bf16 %v6030_v43, %v6028_v19  ;;  %v5928_v31 = vadd.f32 %v5927_v62, %v12737_v34  ;;  %v5929_v16 = vpop.f32.mrb[117].mxu1  ;;  %v8628_v62 = vld [vmem:[#allocation8 + $0xf0] sm:$0xff]  }
0x1163   : > { %v6061_v32 = vpack.c.bf16 %v6031_v44, %v6029_v35  ;;  %v5930_v10 = vadd.f32 %v5929_v16, %v12742_v6  ;;  %v5931_v33 = vpop.f32.mrb[118].mxu1  ;;  %v8627_v35 = vld [vmem:[#allocation8 + $0xa8] sm:$0xff]  }
0x1164   : > { %v6000_v46 = vmax.f32 %v5928_v31, 0.0  ;;  %v5932_v45 = vadd.f32 %v5931_v33, %v12737_v34  ;;  %v5933_v27 = vpop.f32.mrb[119].mxu1  ;;  %8374 = vmatpush3.bf16.msra.mxu1 %v8627_v35  ;;  %v8630_v31 = vld [vmem:[#allocation8 + $0xf8] sm:$0xff]  }
0x1165   : > { %v6001_v14 = vmax.f32 %v5930_v10, 0.0  ;;  %v5934_v4 = vadd.f32 %v5933_v27, %v12742_v6  ;;  %6236 = vmatprep.mubr.bf16.mxu0 %v6061_v32  ;;  %8367 = vmatprep.subr.bf16.mxu1 %v8628_v62  ;;  %v8631_v32 = vld [vmem:[#allocation8 + $0xb8] sm:$0xff]  }
0x1166   : > { %v6002_v60 = vmax.f32 %v5932_v45, 0.0  ;;  %6237 = vmatmul.mubr.bf16.vlgmr.msra.gmra.mrb[144].mxu0 %v6060_v57  ;;  %v6032_v12 = vmul.f32 %v6000_v46, %v6000_v46  ;;  %v8629_v57 = vld [vmem:[#allocation8 + $0xb0] sm:$0xff]  }
0x1167   : > { %v6003_v61 = vmax.f32 %v5934_v4, 0.0  ;;  %7634 = vmatpush3.bf16.msra.mxu0 %v8617_v41  ;;  %v6033_v38 = vmul.f32 %v6001_v14, %v6001_v14 }
0x1168   : > { %v6034_v29 = vmul.f32 %v6002_v60, %v6002_v60  ;;  %7635 = vmatprep.subr.bf16.mxu0 %v8618_v48  ;;  %8375 = vmatpush3.bf16.msra.mxu1 %v8629_v57 }
0x1169   : > { %v6035_v59 = vmul.f32 %v6003_v61, %v6003_v61  ;;  %v5937_v9 = vpop.f32.mrb[120].mxu1  ;;  %8368 = vmatprep.subr.bf16.mxu1 %v8630_v31 }
0x116a   : > { %v6062_v28 = vpack.c.bf16 %v6034_v29, %v6032_v12  ;;  %v5938_v26 = vadd.f32 %v5937_v9, %v12737_v34  ;;  %v5939_v58 = vpop.f32.mrb[121].mxu1 }
0x116b   : > { %v6063_v25 = vpack.c.bf16 %v6035_v59, %v6033_v38  ;;  %v5940_v1 = vadd.f32 %v5939_v58, %v12742_v6  ;;  %v5941_v50 = vpop.f32.mrb[122].mxu1  ;;  %7636 = vmatpush3.bf16.msra.mxu0 %v12717_v40 }
0x116c   : > { %v6004_v0 = vmax.f32 %v5938_v26, 0.0  ;;  %v5942_v11 = vadd.f32 %v5941_v50, %v12737_v34  ;;  %v5943_v51 = vpop.f32.mrb[123].mxu1  ;;  %7637 = vmatprep.subr.bf16.mxu0 %v12719_v20  ;;  %8376 = vmatpush3.bf16.msra.mxu1 %v8631_v32 }
0x116d   : > { %v6005_v2 = vmax.f32 %v5940_v1, 0.0  ;;  %v5944_v42 = vadd.f32 %v5943_v51, %v12742_v6  ;;  %6244 = vmatprep.mubr.bf16.mxu0 %v6063_v25 }
0x116e   : > { %v6006_v7 = vmax.f32 %v5942_v11, 0.0  ;;  %6245 = vmatmul.mubr.bf16.gmra.mrb[148].mxu0 %v6062_v28  ;;  %v6036_v63 = vmul.f32 %v6004_v0, %v6004_v0 }
0x116f   : > { %v6007_v22 = vmax.f32 %v5944_v42, 0.0  ;;  %7638 = vmatpush3.bf16.msra.mxu0 %v12724_v21  ;;  %v6037_v47 = vmul.f32 %v6005_v2, %v6005_v2 }
0x1170   : > { %v6038_v39 = vmul.f32 %v6006_v7, %v6006_v7  ;;  %7639 = vmatprep.subr.bf16.mxu0 %v12739_v55 }
0x1171   : > { %v6039_v24 = vmul.f32 %v6007_v22, %v6007_v22  ;;  %v5947_v41 = vpop.f32.mrb[124].mxu1 }
0x1172   : > { %v6064_v48 = vpack.c.bf16 %v6038_v39, %v6036_v63  ;;  %v5948_v40 = vadd.f32 %v5947_v41, %v12737_v34  ;;  %v5949_v20 = vpop.f32.mrb[125].mxu1 }
0x1173   : > { %v6065_v3 = vpack.c.bf16 %v6039_v24, %v6037_v47  ;;  %v5950_v15 = vadd.f32 %v5949_v20, %v12742_v6  ;;  %v5951_v18 = vpop.f32.mrb[126].mxu1  ;;  %7640 = vmatpush3.bf16.msra.mxu0 %v12744_v54 }
0x1174   : > { %v6008_v21 = vmax.f32 %v5948_v40, 0.0  ;;  %v5952_v36 = vadd.f32 %v5951_v18, %v12737_v34  ;;  %v5953_v49 = vpop.f32.mrb[127].mxu1  ;;  %7641 = vmatprep.subr.bf16.mxu0 %v8624_v30 }
0x1175   : > { %6252 = vmatprep.mubr.bf16.mxu0 %v6065_v3  ;;  %v6009_v55 = vmax.f32 %v5950_v15, 0.0  ;;  %v5954_v23 = vadd.f32 %v5953_v49, %v12742_v6 }
0x1176   : > { %6253 = vmatmul.mubr.bf16.gmra.mrb[152].mxu0 %v6064_v48  ;;  %v6010_v52 = vmax.f32 %v5952_v36, 0.0  ;;  %v6040_v8 = vmul.f32 %v6008_v21, %v6008_v21 }
0x1177   : > { %v6011_v5 = vmax.f32 %v5954_v23, 0.0  ;;  %7642 = vmatpush3.bf16.msra.mxu0 %v8625_v17  ;;  %v6041_v13 = vmul.f32 %v6009_v55, %v6009_v55 }
0x1178   : > { %v6042_v54 = vmul.f32 %v6010_v52, %v6010_v52  ;;  %7643 = vmatprep.subr.bf16.mxu0 %v8626_v56 }
0x1179   : > { %v6043_v19 = vmul.f32 %v6011_v5, %v6011_v5 }
0x117a   : > { %v6066_v43 = vpack.c.bf16 %v6042_v54, %v6040_v8 }
0x117b   : > { %v6067_v44 = vpack.c.bf16 %v6043_v19, %v6041_v13  ;;  %7644 = vmatpush3.bf16.msra.mxu0 %v8627_v35 }
0x117c   : > { %7645 = vmatprep.subr.bf16.mxu0 %v8628_v62  ;;  %v5957_v16 = vpop.f32.mrb[128].mxu1 }
0x117d   : > { %6260 = vmatprep.mubr.bf16.mxu0 %v6067_v44  ;;  %v5958_v10 = vadd.f32 %v5957_v16, %v12737_v34  ;;  %v5959_v33 = vpop.f32.mrb[129].mxu1  ;;  %v7229_v16 = vld [vmem:[%s13577_s19 + $0x2] sm:$0x3] }
0x117e   : > { %6261 = vmatmul.mubr.bf16.gmra.mrb[156].mxu0 %v6066_v43  ;;  %v5960_v46 = vadd.f32 %v5959_v33, %v12742_v6  ;;  %v5961_v45 = vpop.f32.mrb[130].mxu1 }
0x117f   : > { %7646 = vmatpush3.bf16.msra.mxu0 %v8629_v57  ;;  %v6012_v27 = vmax.f32 %v5958_v10, 0.0  ;;  %v5962_v14 = vadd.f32 %v5961_v45, %v12737_v34  ;;  %v5963_v4 = vpop.f32.mrb[131].mxu1 }
0x1180   : > { %7647 = vmatprep.subr.bf16.mxu0 %v8630_v31  ;;  %v6013_v60 = vmax.f32 %v5960_v46, 0.0  ;;  %v5964_v61 = vadd.f32 %v5963_v4, %v12742_v6 }
0x1181   : > { %v6014_v12 = vmax.f32 %v5962_v14, 0.0  ;;  %v6044_v38 = vmul.f32 %v6012_v27, %v6012_v27  ;;  %v12789_v14 = vrot.slane %v7229_v16, %v13578_v37 }
0x1182   : > { %v6015_v29 = vmax.f32 %v5964_v61, 0.0  ;;  %v6045_v9 = vmul.f32 %v6013_v60, %v6013_v60  ;;  %v12792_v60 = vrot.slane %v7229_v16, %v13579_v53 }
0x1183   : > { %7648 = vmatpush3.bf16.msra.mxu0 %v8631_v32  ;;  %v6046_v59 = vmul.f32 %v6014_v12, %v6014_v12 }
0x1184   : > { %v6047_v28 = vmul.f32 %v6015_v29, %v6015_v29 }
0x1185   : > { %v6068_v26 = vpack.c.bf16 %v6046_v59, %v6044_v38 }
0x1186   : > { %v6069_v58 = vpack.c.bf16 %v6047_v28, %v6045_v9 }
0x1188   : > { %6268 = vmatprep.mubr.bf16.mxu0 %v6069_v58 }
0x1189   : > { %6269 = vmatmul.mubr.bf16.gmra.mrb[160].mxu0 %v6068_v26 }
0x11a6   : > { %v5967_v25 = vpop.f32.mrb[132].mxu1 }
0x11a7   : > { %v5968_v1 = vadd.f32 %v5967_v25, %v12737_v34  ;;  %v5969_v50 = vpop.f32.mrb[133].mxu1 }
0x11a8   : > { %v5970_v0 = vadd.f32 %v5969_v50, %v12742_v6  ;;  %v5971_v11 = vpop.f32.mrb[134].mxu1 }
0x11a9   : > { %v6016_v51 = vmax.f32 %v5968_v1, 0.0  ;;  %v5972_v2 = vadd.f32 %v5971_v11, %v12737_v34  ;;  %v5973_v42 = vpop.f32.mrb[135].mxu1 }
0x11aa   : > { %v6017_v7 = vmax.f32 %v5970_v0, 0.0  ;;  %v5974_v22 = vadd.f32 %v5973_v42, %v12742_v6 }
0x11ab   : > { %v6018_v63 = vmax.f32 %v5972_v2, 0.0  ;;  %v6048_v47 = vmul.f32 %v6016_v51, %v6016_v51 }
0x11ac   : > { %v6019_v39 = vmax.f32 %v5974_v22, 0.0  ;;  %v6049_v41 = vmul.f32 %v6017_v7, %v6017_v7 }
0x11ad   : > { %v6050_v24 = vmul.f32 %v6018_v63, %v6018_v63 }
0x11ae   : > { %v6051_v48 = vmul.f32 %v6019_v39, %v6019_v39 }
0x11af   : > { %v6070_v40 = vpack.c.bf16 %v6050_v24, %v6048_v47 }
0x11b0   : > { %v6071_v20 = vpack.c.bf16 %v6051_v48, %v6049_v41 }
0x11b2   : > { %6276 = vmatprep.mubr.bf16.mxu0 %v6071_v20 }
0x11b3   : > { %6277 = vmatmul.mubr.bf16.gmra.mrb[164].mxu0 %v6070_v40 }
0x11cc   : > { %v5977_v3 = vpop.f32.mrb[136].mxu1 }
0x11cd   : > { %v5978_v15 = vadd.f32 %v5977_v3, %v12737_v34  ;;  %v5979_v18 = vpop.f32.mrb[137].mxu1 }
0x11ce   : > { %v5980_v30 = vadd.f32 %v5979_v18, %v12742_v6  ;;  %v5981_v17 = vpop.f32.mrb[138].mxu1 }
0x11cf   : > { %v6020_v21 = vmax.f32 %v5978_v15, 0.0  ;;  %v5982_v36 = vadd.f32 %v5981_v17, %v12737_v34  ;;  %v5983_v49 = vpop.f32.mrb[139].mxu1 }
0x11d0   : > { %v6021_v55 = vmax.f32 %v5980_v30, 0.0  ;;  %v5984_v23 = vadd.f32 %v5983_v49, %v12742_v6 }
0x11d1   : > { %v6022_v52 = vmax.f32 %v5982_v36, 0.0  ;;  %v6052_v56 = vmul.f32 %v6020_v21, %v6020_v21 }
0x11d2   : > { %v6023_v5 = vmax.f32 %v5984_v23, 0.0  ;;  %v6053_v54 = vmul.f32 %v6021_v55, %v6021_v55 }
0x11d3   : > { %v6054_v8 = vmul.f32 %v6022_v52, %v6022_v52 }
0x11d4   : > { %v6055_v13 = vmul.f32 %v6023_v5, %v6023_v5 }
0x11d5   : > { %v6072_v19 = vpack.c.bf16 %v6054_v8, %v6052_v56 }
0x11d6   : > { %v6073_v43 = vpack.c.bf16 %v6055_v13, %v6053_v54 }
0x11d8   : > { %6284 = vmatprep.mubr.bf16.mxu0 %v6073_v43 }
0x11d9   : > { %6285 = vmatmul.mubr.bf16.gmra.mrb[168].mxu0 %v6072_v19 }
0x11e9   : > { %v5987_v35 = vpop.f32.mrb[140].mxu1 }
0x11ea   : > { %v5988_v44 = vadd.f32 %v5987_v35, %v12737_v34  ;;  %v5989_v62 = vpop.f32.mrb[141].mxu1 }
0x11eb   : > { %v5990_v57 = vadd.f32 %v5989_v62, %v12742_v6  ;;  %v5991_v31 = vpop.f32.mrb[142].mxu1 }
0x11ec   : > { %v6024_v32 = vmax.f32 %v5988_v44, 0.0  ;;  %v5992_v10 = vadd.f32 %v5991_v31, %v12737_v34  ;;  %v5993_v33 = vpop.f32.mrb[143].mxu1 }
0x11ed   : > { %v6025_v46 = vmax.f32 %v5990_v57, 0.0  ;;  %v5994_v45 = vadd.f32 %v5993_v33, %v12742_v6 }
0x11ee   : > { %v6026_v27 = vmax.f32 %v5992_v10, 0.0  ;;  %v6056_v61 = vmul.f32 %v6024_v32, %v6024_v32 }
0x11ef   : > { %v6027_v4 = vmax.f32 %v5994_v45, 0.0  ;;  %v6057_v29 = vmul.f32 %v6025_v46, %v6025_v46 }
0x11f0   : > { %v6058_v12 = vmul.f32 %v6026_v27, %v6026_v27 }
0x11f1   : > { %v6059_v38 = vmul.f32 %v6027_v4, %v6027_v4  ;;  %v6461_v59 = vpop.f32.mrb[144].mxu1 }
0x11f2   : > { %v6074_v9 = vpack.c.bf16 %v6058_v12, %v6056_v61  ;;  %v6462_v34 = vadd.f32 %v6461_v59, %v12789_v14  ;;  %v6463_v28 = vpop.f32.mrb[145].mxu1 }
0x11f3   : > { %v6075_v26 = vpack.c.bf16 %v6059_v38, %v6057_v29  ;;  %v6464_v6 = vadd.f32 %v6463_v28, %v12792_v60  ;;  %v6465_v58 = vpop.f32.mrb[146].mxu1 }
0x11f4   : > { %v6540_v25 = vmax.f32 %v6462_v34, 0.0  ;;  %v6466_v37 = vadd.f32 %v6465_v58, %v12789_v14  ;;  %v6467_v1 = vpop.f32.mrb[147].mxu1 }
0x11f5   : > { %v6541_v50 = vmax.f32 %v6464_v6, 0.0  ;;  %v6468_v53 = vadd.f32 %v6467_v1, %v12792_v60  ;;  %6292 = vmatprep.mubr.bf16.mxu0 %v6075_v26 }
0x11f6   : > { %v6542_v0 = vmax.f32 %v6466_v37, 0.0  ;;  %6293 = vmatmul.mubr.bf16.gmra.mrb[172].mxu0 %v6074_v9  ;;  %v6572_v51 = vmul.f32 %v6540_v25, %v6540_v25 }
0x11f7   : > { %v6543_v11 = vmax.f32 %v6468_v53, 0.0  ;;  %v6573_v42 = vmul.f32 %v6541_v50, %v6541_v50 }
0x11f8   : > { %v6574_v2 = vmul.f32 %v6542_v0, %v6542_v0 }
0x11f9   : > { %v6575_v7 = vmul.f32 %v6543_v11, %v6543_v11  ;;  %v6471_v22 = vpop.f32.mrb[148].mxu1 }
0x11fa   : > { %v6604_v63 = vpack.c.bf16 %v6574_v2, %v6572_v51  ;;  %v6472_v39 = vadd.f32 %v6471_v22, %v12789_v14  ;;  %v6473_v47 = vpop.f32.mrb[149].mxu1 }
0x11fb   : > { %v6605_v24 = vpack.c.bf16 %v6575_v7, %v6573_v42  ;;  %v6474_v41 = vadd.f32 %v6473_v47, %v12792_v60  ;;  %v6475_v48 = vpop.f32.mrb[150].mxu1 }
0x11fc   : > { %v6544_v40 = vmax.f32 %v6472_v39, 0.0  ;;  %v6476_v20 = vadd.f32 %v6475_v48, %v12789_v14  ;;  %v6477_v3 = vpop.f32.mrb[151].mxu1 }
0x11fd   : > { %v6545_v15 = vmax.f32 %v6474_v41, 0.0  ;;  %v6478_v18 = vadd.f32 %v6477_v3, %v12792_v60  ;;  %6781 = vmatprep.mubr.bf16.mxu0 %v6605_v24 }
0x11fe   : > { %v6546_v30 = vmax.f32 %v6476_v20, 0.0  ;;  %6782 = vmatmul.mubr.bf16.vlgmr.msra.gmra.mrb[176].mxu0 %v6604_v63  ;;  %v6576_v21 = vmul.f32 %v6544_v40, %v6544_v40 }
0x11ff   : > { %v6547_v17 = vmax.f32 %v6478_v18, 0.0  ;;  %v6577_v49 = vmul.f32 %v6545_v15, %v6545_v15 }
0x1200   : > { %v6578_v36 = vmul.f32 %v6546_v30, %v6546_v30 }
0x1201   : > { %v6579_v55 = vmul.f32 %v6547_v17, %v6547_v17  ;;  %v6481_v23 = vpop.f32.mrb[152].mxu1 }
0x1202   : > { %v6606_v52 = vpack.c.bf16 %v6578_v36, %v6576_v21  ;;  %v6482_v5 = vadd.f32 %v6481_v23, %v12789_v14  ;;  %v6483_v56 = vpop.f32.mrb[153].mxu1 }
0x1203   : > { %v6607_v8 = vpack.c.bf16 %v6579_v55, %v6577_v49  ;;  %v6484_v54 = vadd.f32 %v6483_v56, %v12792_v60  ;;  %v6485_v13 = vpop.f32.mrb[154].mxu1 }
0x1204   : > { %v6548_v19 = vmax.f32 %v6482_v5, 0.0  ;;  %v6486_v43 = vadd.f32 %v6485_v13, %v12789_v14  ;;  %v6487_v35 = vpop.f32.mrb[155].mxu1 }
0x1205   : > { %v6549_v44 = vmax.f32 %v6484_v54, 0.0  ;;  %v6488_v62 = vadd.f32 %v6487_v35, %v12792_v60  ;;  %6789 = vmatprep.mubr.bf16.mxu0 %v6607_v8 }
0x1206   : > { %v6550_v57 = vmax.f32 %v6486_v43, 0.0  ;;  %6790 = vmatmul.mubr.bf16.gmra.mrb[180].mxu0 %v6606_v52  ;;  %v6580_v16 = vmul.f32 %v6548_v19, %v6548_v19 }
0x1207   : > { %v6551_v31 = vmax.f32 %v6488_v62, 0.0  ;;  %v6581_v10 = vmul.f32 %v6549_v44, %v6549_v44 }
0x1208   : > { %v6582_v32 = vmul.f32 %v6550_v57, %v6550_v57 }
0x1209   : > { %v6583_v33 = vmul.f32 %v6551_v31, %v6551_v31  ;;  %v6491_v46 = vpop.f32.mrb[156].mxu1 }
0x120a   : > { %v6608_v45 = vpack.c.bf16 %v6582_v32, %v6580_v16  ;;  %v6492_v27 = vadd.f32 %v6491_v46, %v12789_v14  ;;  %v6493_v4 = vpop.f32.mrb[157].mxu1 }
0x120b   : > { %v6609_v61 = vpack.c.bf16 %v6583_v33, %v6581_v10  ;;  %v6494_v12 = vadd.f32 %v6493_v4, %v12792_v60  ;;  %v6495_v29 = vpop.f32.mrb[158].mxu1 }
0x120c   : > { %v6552_v38 = vmax.f32 %v6492_v27, 0.0  ;;  %v6496_v59 = vadd.f32 %v6495_v29, %v12789_v14  ;;  %v6497_v9 = vpop.f32.mrb[159].mxu1 }
0x120d   : > { %v6553_v34 = vmax.f32 %v6494_v12, 0.0  ;;  %v6498_v28 = vadd.f32 %v6497_v9, %v12792_v60  ;;  %6797 = vmatprep.mubr.bf16.mxu0 %v6609_v61 }
0x120e   : > { %v6554_v26 = vmax.f32 %v6496_v59, 0.0  ;;  %6798 = vmatmul.mubr.bf16.gmra.mrb[184].mxu0 %v6608_v45  ;;  %v6584_v58 = vmul.f32 %v6552_v38, %v6552_v38 }
0x120f   : > { %v6555_v6 = vmax.f32 %v6498_v28, 0.0  ;;  %v6585_v37 = vmul.f32 %v6553_v34, %v6553_v34 }
0x1210   : > { %v6586_v25 = vmul.f32 %v6554_v26, %v6554_v26 }
0x1211   : > { %v6587_v1 = vmul.f32 %v6555_v6, %v6555_v6  ;;  %v6501_v50 = vpop.f32.mrb[160].mxu1 }
0x1212   : > { %v6610_v53 = vpack.c.bf16 %v6586_v25, %v6584_v58  ;;  %v6502_v0 = vadd.f32 %v6501_v50, %v12789_v14  ;;  %v6503_v11 = vpop.f32.mrb[161].mxu1 }
0x1213   : > { %v6611_v51 = vpack.c.bf16 %v6587_v1, %v6585_v37  ;;  %v6504_v2 = vadd.f32 %v6503_v11, %v12792_v60  ;;  %v6505_v42 = vpop.f32.mrb[162].mxu1 }
0x1214   : > { %v6556_v7 = vmax.f32 %v6502_v0, 0.0  ;;  %v6506_v22 = vadd.f32 %v6505_v42, %v12789_v14  ;;  %v6507_v63 = vpop.f32.mrb[163].mxu1 }
0x1215   : > { %v6557_v39 = vmax.f32 %v6504_v2, 0.0  ;;  %v6508_v47 = vadd.f32 %v6507_v63, %v12792_v60  ;;  %6805 = vmatprep.mubr.bf16.mxu0 %v6611_v51 }
0x1216   : > { %v6558_v24 = vmax.f32 %v6506_v22, 0.0  ;;  %6806 = vmatmul.mubr.bf16.gmra.mrb[188].mxu0 %v6610_v53  ;;  %v6588_v48 = vmul.f32 %v6556_v7, %v6556_v7 }
0x1217   : > { %v6559_v41 = vmax.f32 %v6508_v47, 0.0  ;;  %v6589_v20 = vmul.f32 %v6557_v39, %v6557_v39 }
0x1218   : > { %v6590_v40 = vmul.f32 %v6558_v24, %v6558_v24 }
0x1219   : > { %v6591_v3 = vmul.f32 %v6559_v41, %v6559_v41  ;;  %v6511_v15 = vpop.f32.mrb[164].mxu1 }
0x121a   : > { %v6612_v18 = vpack.c.bf16 %v6590_v40, %v6588_v48  ;;  %v6512_v30 = vadd.f32 %v6511_v15, %v12789_v14  ;;  %v6513_v17 = vpop.f32.mrb[165].mxu1 }
0x121b   : > { %v6613_v21 = vpack.c.bf16 %v6591_v3, %v6589_v20  ;;  %v6514_v36 = vadd.f32 %v6513_v17, %v12792_v60  ;;  %v6515_v49 = vpop.f32.mrb[166].mxu1 }
0x121c   : > { %v6560_v55 = vmax.f32 %v6512_v30, 0.0  ;;  %v6516_v23 = vadd.f32 %v6515_v49, %v12789_v14  ;;  %v6517_v52 = vpop.f32.mrb[167].mxu1 }
0x121d   : > { %v6561_v5 = vmax.f32 %v6514_v36, 0.0  ;;  %v6518_v56 = vadd.f32 %v6517_v52, %v12792_v60  ;;  %6813 = vmatprep.mubr.bf16.mxu0 %v6613_v21 }
0x121e   : > { %v6562_v8 = vmax.f32 %v6516_v23, 0.0  ;;  %6814 = vmatmul.mubr.bf16.gmra.mrb[192].mxu0 %v6612_v18  ;;  %v6592_v13 = vmul.f32 %v6560_v55, %v6560_v55 }
0x121f   : > { %v6563_v54 = vmax.f32 %v6518_v56, 0.0  ;;  %v6593_v43 = vmul.f32 %v6561_v5, %v6561_v5 }
0x1220   : > { %v6594_v19 = vmul.f32 %v6562_v8, %v6562_v8 }
0x1221   : > { %v6595_v35 = vmul.f32 %v6563_v54, %v6563_v54  ;;  %v6521_v44 = vpop.f32.mrb[168].mxu1 }
0x1222   : > { %v6614_v62 = vpack.c.bf16 %v6594_v19, %v6592_v13  ;;  %v6522_v57 = vadd.f32 %v6521_v44, %v12789_v14  ;;  %v6523_v31 = vpop.f32.mrb[169].mxu1 }
0x1223   : > { %v6615_v16 = vpack.c.bf16 %v6595_v35, %v6593_v43  ;;  %v6524_v32 = vadd.f32 %v6523_v31, %v12792_v60  ;;  %v6525_v10 = vpop.f32.mrb[170].mxu1 }
0x1224   : > { %v6564_v33 = vmax.f32 %v6522_v57, 0.0  ;;  %v6526_v46 = vadd.f32 %v6525_v10, %v12789_v14  ;;  %v6527_v45 = vpop.f32.mrb[171].mxu1 }
0x1225   : > { %v6565_v27 = vmax.f32 %v6524_v32, 0.0  ;;  %v6528_v4 = vadd.f32 %v6527_v45, %v12792_v60  ;;  %6821 = vmatprep.mubr.bf16.mxu0 %v6615_v16 }
0x1226   : > { %v6566_v61 = vmax.f32 %v6526_v46, 0.0  ;;  %6822 = vmatmul.mubr.bf16.gmra.mrb[196].mxu0 %v6614_v62  ;;  %v6596_v29 = vmul.f32 %v6564_v33, %v6564_v33 }
0x1227   : > { %v6567_v12 = vmax.f32 %v6528_v4, 0.0  ;;  %v6597_v59 = vmul.f32 %v6565_v27, %v6565_v27 }
0x1228   : > { %v6598_v38 = vmul.f32 %v6566_v61, %v6566_v61 }
0x1229   : > { %v6599_v9 = vmul.f32 %v6567_v12, %v6567_v12  ;;  %v6531_v34 = vpop.f32.mrb[172].mxu1 }
0x122a   : > { %v6616_v28 = vpack.c.bf16 %v6598_v38, %v6596_v29  ;;  %v6532_v26 = vadd.f32 %v6531_v34, %v12789_v14  ;;  %v6533_v6 = vpop.f32.mrb[173].mxu1 }
0x122b   : > { %v6617_v58 = vpack.c.bf16 %v6599_v9, %v6597_v59  ;;  %v6534_v25 = vadd.f32 %v6533_v6, %v12792_v60  ;;  %v6535_v37 = vpop.f32.mrb[174].mxu1 }
0x122c   : > { %v6568_v1 = vmax.f32 %v6532_v26, 0.0  ;;  %v6536_v50 = vadd.f32 %v6535_v37, %v12789_v14  ;;  %v6537_v53 = vpop.f32.mrb[175].mxu1 }
0x122d   : > { %v6569_v0 = vmax.f32 %v6534_v25, 0.0  ;;  %v6538_v11 = vadd.f32 %v6537_v53, %v12792_v60  ;;  %6829 = vmatprep.mubr.bf16.mxu1 %v6617_v58  ;;  %v12853_v58 = vld [vmem:[%s13580_s29] ss:$0 sm:$0xff]  ;;  %s9060_s29 = scalar_lea.vmem %s9059_s11, 4096 }
0x122e   : > { %v6570_v51 = vmax.f32 %v6536_v50, 0.0  ;;  %6830 = vmatmul.mubr.bf16.vlgmr.msra.gmra.mrb[176].mxu1 %v6616_v28  ;;  %v6600_v42 = vmul.f32 %v6568_v1, %v6568_v1  ;;  %v8939_v53 = vld [vmem:[%s9571_s20] sm:$0x3f]  ;;  %s12867_s20 = scalar_lea.vmem [#allocation10], %s7052_s23  ;;  %s7268_s23 = sshll.u32 %s9241_s17, 11 }
0x122f   : > { %v6571_v2 = vmax.f32 %v6538_v11, 0.0  ;;  %v6601_v22 = vmul.f32 %v6569_v0, %v6569_v0  ;;  %v13581_v0 = vld [vmem:[#allocation48_spill] sm:$0xff]  ;;  %s6928_s24 = sshll.u32 %s12867_s20, 4  ;;  %s12941_s21 = scalar_lea.hbm %s13597_s2, %s7268_s23  ;;  %s12943_s24 = int_to_ptr.vmem [resolvable:$true] %s6928_s24 }
0x1230   : > { %v6602_v7 = vmul.f32 %v6570_v51, %v6570_v51  ;;  %v12858_v11 = vrot.slane %v8939_v53, %v13581_v0  ;;  %s6915_s17 = scalar_lea.sflag [#allocation4], %s9416_s18  ;;  %s9054_s9 = scalar_lea.vmem %s12943_s24, 2048 }
0x1231   : > { %v6603_v63 = vmul.f32 %v6571_v2, %v6571_v2  ;;  %p9055_p3 = scmp.ne.s32.totalorder %s12943_s24, %s9054_s9  ;;  %p9061_p2 = scmp.lt.s32.totalorder %s12943_s24, %s9059_s11 }
0x1232   : > { %v6618_v39 = vpack.c.bf16 %v6602_v7, %v6600_v42  ;;  %p9062_p1 = scmp.lt.s32.totalorder %s9060_s29, %s9054_s9 }
0x1233   : > { %v6619_v47 = vpack.c.bf16 %v6603_v63, %v6601_v22  ;;  %p9056_p7 = pnand %p9055_p3, %p9365_p5 }
0x1234   : > { %p9063_p4 = por %p9062_p1, %p9061_p2 }
0x1235   : > { %6837 = vmatprep.mubr.bf16.mxu1 %v6619_v47  ;;  %v13582_v47 = vld [vmem:[#allocation19_spill] sm:$0xff]  ;;  %p9057_p12 = pneg %p9056_p7 }
0x1236   : > { %6838 = vmatmul.mubr.bf16.gmra.mrb[180].mxu1 %v6618_v39 }
0x1237   : > { %p9064_p9 = pnand %p9063_p4, %p9057_p12 }
0x1239   : > { %v7585_v24 = vpop.f32.mrb[144].mxu0 }
0x123a   : > { %v7586_v41 = vpop.f32.mrb[145].mxu0 }
0x123b   : > { %v7587_v48 = vadd.f32 %v7586_v41, %v7585_v24  ;;  %v7588_v14 = vpop.f32.mrb[146].mxu0 }
0x123c   : > { %v7589_v40 = vpop.f32.mrb[147].mxu0 }
0x123d   : > { %v7590_v20 = vadd.f32 %v7589_v40, %v7588_v14  ;;  %v6301_v1 = vadd.f32 %v7587_v48, %v12853_v58 }
0x123f   : > { %v6302_v42 = vadd.f32 %v7590_v20, %v12853_v58  ;;  %v13583_v20 = vld [vmem:[#allocation20_spill] sm:$0xff] }
0x1241   : > { %v7591_v3 = vpop.f32.mrb[148].mxu0 }
0x1242   : > { %v7592_v60 = vpop.f32.mrb[149].mxu0 }
0x1243   : > { %v7593_v15 = vadd.f32 %v7592_v60, %v7591_v3  ;;  %v7594_v18 = vpop.f32.mrb[150].mxu0 }
0x1244   : > { %v7595_v30 = vpop.f32.mrb[151].mxu0 }
0x1245   : > { %v7596_v17 = vadd.f32 %v7595_v30, %v7594_v18  ;;  %v6303_v40 = vadd.f32 %v7593_v15, %v12853_v58 }
0x1249   : > { %v7597_v21 = vpop.f32.mrb[152].mxu0 }
0x124a   : > { %v7598_v36 = vpop.f32.mrb[153].mxu0 }
0x124b   : > { %v12826_v49 = vadd.f32 %v7598_v36, %v7597_v21  ;;  %v7600_v55 = vpop.f32.mrb[154].mxu0  ;;  %v6304_v21 = vadd.f32 %v7596_v17, %v12853_v58 }
0x124c   : > { %v7601_v23 = vpop.f32.mrb[155].mxu0 }
0x124d   : > { %v12828_v52 = vadd.f32 %v7601_v23, %v7600_v55 }
0x1251   : > { %v7603_v5 = vpop.f32.mrb[156].mxu0 }
0x1252   : > { %v7604_v56 = vpop.f32.mrb[157].mxu0 }
0x1253   : > { %v12830_v8 = vadd.f32 %v7604_v56, %v7603_v5  ;;  %v7606_v54 = vpop.f32.mrb[158].mxu0  ;;  %v13584_v5 = vld [vmem:[#allocation21_spill] sm:$0xff] }
0x1254   : > { %v7607_v13 = vpop.f32.mrb[159].mxu0 }
0x1255   : > { %v12832_v19 = vadd.f32 %v7607_v13, %v7606_v54 }
0x1257   : > { %v6308_v53 = vadd.f32 %v12832_v19, %v12853_v58 }
0x125c   : > { %v7609_v43 = vpop.f32.mrb[160].mxu0 }
0x125d   : > { %v7610_v35 = vpop.f32.mrb[161].mxu0 }
0x125e   : > { %v12834_v44 = vadd.f32 %v7610_v35, %v7609_v43  ;;  %v7612_v62 = vpop.f32.mrb[162].mxu0  ;;  %v6305_v35 = vadd.f32 %v12826_v49, %v12853_v58 }
0x125f   : > { %v7613_v57 = vpop.f32.mrb[163].mxu0 }
0x1260   : > { %v12836_v31 = vadd.f32 %v7613_v57, %v7612_v62  ;;  %v13585_v62 = vld [vmem:[#allocation22_spill] sm:$0xff] }
0x1286   : > { %v7615_v16 = vpop.f32.mrb[164].mxu0 }
0x1287   : > { %v7616_v32 = vpop.f32.mrb[165].mxu0 }
0x1288   : > { %v12838_v10 = vadd.f32 %v7616_v32, %v7615_v16  ;;  %v7618_v33 = vpop.f32.mrb[166].mxu0 }
0x1289   : > { %v7619_v46 = vpop.f32.mrb[167].mxu0 }
0x128a   : > { %v12840_v45 = vadd.f32 %v7619_v46, %v7618_v33  ;;  %v6306_v33 = vadd.f32 %v12828_v52, %v12853_v58 }
0x12ac   : > { %v7621_v27 = vpop.f32.mrb[168].mxu0 }
0x12ad   : > { %v7622_v4 = vpop.f32.mrb[169].mxu0 }
0x12ae   : > { %v12842_v61 = vadd.f32 %v7622_v4, %v7621_v27  ;;  %v7624_v12 = vpop.f32.mrb[170].mxu0 }
0x12af   : > { %v7625_v29 = vpop.f32.mrb[171].mxu0 }
0x12b0   : > { %v12844_v38 = vadd.f32 %v7625_v29, %v7624_v12  ;;  %v13586_v29 = vld [vmem:[#allocation23_spill] sm:$0xff] }
0x12c9   : > { %v7627_v59 = vpop.f32.mrb[172].mxu0 }
0x12ca   : > { %v7628_v9 = vpop.f32.mrb[173].mxu0 }
0x12cb   : > { %v12846_v34 = vadd.f32 %v7628_v9, %v7627_v59  ;;  %v7630_v28 = vpop.f32.mrb[174].mxu0 }
0x12cc   : > { %v7631_v26 = vpop.f32.mrb[175].mxu0 }
0x12cd   : > { %v12848_v6 = vadd.f32 %v7631_v26, %v7630_v28  ;;  %v6307_v26 = vadd.f32 %v12830_v8, %v12853_v58 }
0x12d1   : > { %v7649_v25 = vpop.f32.mrb[176].mxu0 }
0x12d2   : > { %v7650_v37 = vpop.f32.mrb[177].mxu0 }
0x12d3   : > { %v7651_v50 = vadd.f32 %v7650_v37, %v7649_v25  ;;  %v7652_v51 = vpop.f32.mrb[178].mxu0  ;;  %v13587_v25 = vld [vmem:[#allocation24_spill] sm:$0xff] }
0x12d4   : > { %v7653_v2 = vpop.f32.mrb[179].mxu0 }
0x12d5   : > { %v6846_v7 = vadd.f32 %v7651_v50, %v6301_v1  ;;  %v7654_v22 = vadd.f32 %v7653_v2, %v7652_v51 }
0x12d7   : > { %v6866_v63 = vmul.f32 %v12858_v11, %v6846_v7  ;;  %v6847_v39 = vadd.f32 %v7654_v22, %v6302_v42  ;;  %v13588_v7 = vld [vmem:[#allocation25_spill] sm:$0xff] }
0x12d9   : > { %v6882_v24 = vadd.f32 %v6866_v63, %v13582_v47  ;;  %v6867_v41 = vmul.f32 %v12858_v11, %v6847_v39  ;;  %v7655_v48 = vpop.f32.mrb[180].mxu0  ;;  %v6309_v47 = vadd.f32 %v12834_v44, %v12853_v58 }
0x12da   : > { %v7656_v14 = vpop.f32.mrb[181].mxu0 }
0x12db   : > { %6898 = vst [vmem:[%s12867_s20] sm:$0xff] %v6882_v24  ;;  %v6883_v3 = vadd.f32 %v6867_v41, %v13583_v20  ;;  %v7657_v60 = vadd.f32 %v7656_v14, %v7655_v48  ;;  %v7658_v18 = vpop.f32.mrb[182].mxu0  ;;  %v13589_v24 = vld [vmem:[#allocation26_spill] sm:$0xff] }
0x12dc   : > { %v7659_v30 = vpop.f32.mrb[183].mxu0 }
0x12dd   : > { %6899 = vst [vmem:[%s12867_s20 + $0x8] sm:$0xff] %v6883_v3  ;;  %v6848_v36 = vadd.f32 %v7657_v60, %v6303_v40  ;;  %v7660_v55 = vadd.f32 %v7659_v30, %v7658_v18  ;;  %v6310_v40 = vadd.f32 %v12836_v31, %v12853_v58  ;;  %v13590_v30 = vld [vmem:[#allocation27_spill] sm:$0xff] }
0x12df   : > { %v6868_v15 = vmul.f32 %v12858_v11, %v6848_v36  ;;  %v6849_v23 = vadd.f32 %v7660_v55, %v6304_v21 }
0x12e1   : > { %v6884_v56 = vadd.f32 %v6868_v15, %v13584_v5  ;;  %v6869_v54 = vmul.f32 %v12858_v11, %v6849_v23  ;;  %v7661_v13 = vpop.f32.mrb[184].mxu0  ;;  %v6311_v15 = vadd.f32 %v12838_v10, %v12853_v58  ;;  %v13591_v23 = vld [vmem:[#allocation28_spill] sm:$0xff] }
0x12e2   : > { %v7662_v43 = vpop.f32.mrb[185].mxu0 }
0x12e3   : > { %6900 = vst [vmem:[%s12867_s20 + $0x10] sm:$0xff] %v6884_v56  ;;  %v6885_v17 = vadd.f32 %v6869_v54, %v13585_v62  ;;  %v7663_v57 = vadd.f32 %v7662_v43, %v7661_v13  ;;  %v7664_v16 = vpop.f32.mrb[186].mxu0  ;;  %v6312_v13 = vadd.f32 %v12840_v45, %v12853_v58 }
0x12e4   : > { %v7665_v32 = vpop.f32.mrb[187].mxu0 }
0x12e5   : > { %6901 = vst [vmem:[%s12867_s20 + $0x18] sm:$0xff] %v6885_v17  ;;  %v6850_v46 = vadd.f32 %v7663_v57, %v6305_v35  ;;  %v7666_v27 = vadd.f32 %v7665_v32, %v7664_v16  ;;  %v13592_v57 = vld [vmem:[#allocation29_spill] sm:$0xff] }
0x12e7   : > { %v6870_v4 = vmul.f32 %v12858_v11, %v6850_v46  ;;  %v6851_v12 = vadd.f32 %v7666_v27, %v6306_v33  ;;  %v6313_v46 = vadd.f32 %v12842_v61, %v12853_v58  ;;  %v13593_v27 = vld [vmem:[#allocation30_spill] sm:$0xff] }
0x12e9   : > { %v6886_v59 = vadd.f32 %v6870_v4, %v13586_v29  ;;  %v6871_v49 = vmul.f32 %v12858_v11, %v6851_v12  ;;  %v7667_v9 = vpop.f32.mrb[188].mxu0 }
0x12ea   : > { %v7668_v28 = vpop.f32.mrb[189].mxu0 }
0x12eb   : > { %6902 = vst [vmem:[%s12867_s20 + $0x20] sm:$0xff] %v6886_v59  ;;  %v6887_v52 = vadd.f32 %v6871_v49, %v13587_v25  ;;  %v7669_v37 = vadd.f32 %v7668_v28, %v7667_v9  ;;  %v7670_v1 = vpop.f32.mrb[190].mxu0  ;;  %v6314_v59 = vadd.f32 %v12844_v38, %v12853_v58  ;;  %v13594_v25 = vld [vmem:[#allocation31_spill] sm:$0xff]  ;;  %v13595_v38 = vld [vmem:[#allocation32_spill] sm:$0xff] }
0x12ec   : > { %v7671_v50 = vpop.f32.mrb[191].mxu0 }
0x12ed   : > { %6903 = vst [vmem:[%s12867_s20 + $0x28] sm:$0xff] %v6887_v52  ;;  %v6852_v0 = vadd.f32 %v7669_v37, %v6307_v26  ;;  %v7672_v51 = vadd.f32 %v7671_v50, %v7670_v1  ;;  %v6315_v50 = vadd.f32 %v12846_v34, %v12853_v58  ;;  %v13596_v34 = vld [vmem:[#allocation33_spill] sm:$0xff] }
0x12ef   : > { %v6872_v2 = vmul.f32 %v12858_v11, %v6852_v0  ;;  %v6853_v42 = vadd.f32 %v7672_v51, %v6308_v53 }
0x12f1   : > { %v6888_v22 = vadd.f32 %v6872_v2, %v13588_v7  ;;  %v6873_v8 = vmul.f32 %v12858_v11, %v6853_v42  ;;  %v7673_v63 = vpop.f32.mrb[192].mxu0  ;;  %v6316_v42 = vadd.f32 %v12848_v6, %v12853_v58  ;;  %v13598_v6 = vld [vmem:[#allocation34_spill] sm:$0xff] }
0x12f2   : > { %v7674_v39 = vpop.f32.mrb[193].mxu0 }
0x12f3   : > { %6904 = vst [vmem:[%s12867_s20 + $0x30] sm:$0xff] %v6888_v22  ;;  %v6889_v19 = vadd.f32 %v6873_v8, %v13589_v24  ;;  %v7675_v41 = vadd.f32 %v7674_v39, %v7673_v63  ;;  %v7676_v48 = vpop.f32.mrb[194].mxu0 }
0x12f4   : > { %v7677_v14 = vpop.f32.mrb[195].mxu0 }
0x12f5   : > { %6905 = vst [vmem:[%s12867_s20 + $0x38] sm:$0xff] %v6889_v19  ;;  %v6854_v20 = vadd.f32 %v7675_v41, %v6309_v47  ;;  %v7678_v3 = vadd.f32 %v7677_v14, %v7676_v48 }
0x12f7   : > { %v6874_v60 = vmul.f32 %v12858_v11, %v6854_v20  ;;  %v6855_v18 = vadd.f32 %v7678_v3, %v6310_v40 }
0x12f9   : > { %v6890_v21 = vadd.f32 %v6874_v60, %v13590_v30  ;;  %v6875_v44 = vmul.f32 %v12858_v11, %v6855_v18  ;;  %v7679_v36 = vpop.f32.mrb[196].mxu0 }
0x12fa   : > { %v7680_v55 = vpop.f32.mrb[197].mxu0 }
0x12fb   : > { %6906 = vst [vmem:[%s12867_s20 + $0x40] sm:$0xff] %v6890_v21  ;;  %v6891_v31 = vadd.f32 %v6875_v44, %v13591_v23  ;;  %v7681_v5 = vadd.f32 %v7680_v55, %v7679_v36  ;;  %v7682_v56 = vpop.f32.mrb[198].mxu0 }
0x12fc   : > { %v7683_v54 = vpop.f32.mrb[199].mxu0 }
0x12fd   : > { %6907 = vst [vmem:[%s12867_s20 + $0x48] sm:$0xff] %v6891_v31  ;;  %v6856_v43 = vadd.f32 %v7681_v5, %v6311_v15  ;;  %v7684_v35 = vadd.f32 %v7683_v54, %v7682_v56 }
0x12ff   : > { %v6876_v62 = vmul.f32 %v12858_v11, %v6856_v43  ;;  %v6857_v17 = vadd.f32 %v7684_v35, %v6312_v13 }
0x1301   : > { %v6892_v16 = vadd.f32 %v6876_v62, %v13592_v57  ;;  %v6877_v10 = vmul.f32 %v12858_v11, %v6857_v17  ;;  %v7685_v32 = vpop.f32.mrb[176].mxu1 }
0x1302   : > { %v7686_v33 = vpop.f32.mrb[177].mxu1 }
0x1303   : > { %6908 = vst [vmem:[%s12867_s20 + $0x50] sm:$0xff] %v6892_v16  ;;  %v6893_v45 = vadd.f32 %v6877_v10, %v13593_v27  ;;  %v7687_v4 = vadd.f32 %v7686_v33, %v7685_v32  ;;  %v7688_v12 = vpop.f32.mrb[178].mxu1 }
0x1304   : > { %v7689_v29 = vpop.f32.mrb[179].mxu1 }
0x1305   : > { %6909 = vst [vmem:[%s12867_s20 + $0x58] sm:$0xff] %v6893_v45  ;;  %v6858_v49 = vadd.f32 %v7687_v4, %v6313_v46  ;;  %v7690_v9 = vadd.f32 %v7689_v29, %v7688_v12 }
0x1307   : > { %v6878_v28 = vmul.f32 %v12858_v11, %v6858_v49  ;;  %v6859_v26 = vadd.f32 %v7690_v9, %v6314_v59 }
0x1309   : > { %v6894_v52 = vadd.f32 %v6878_v28, %v13594_v25  ;;  %v6879_v61 = vmul.f32 %v12858_v11, %v6859_v26  ;;  %v7691_v37 = vpop.f32.mrb[180].mxu1 }
0x130a   : > { %v7692_v1 = vpop.f32.mrb[181].mxu1 }
0x130b   : > { %6910 = vst [vmem:[%s12867_s20 + $0x60] sm:$0xff] %v6894_v52  ;;  %v6895_v53 = vadd.f32 %v6879_v61, %v13595_v38  ;;  %v7693_v0 = vadd.f32 %v7692_v1, %v7691_v37  ;;  %v7694_v51 = vpop.f32.mrb[182].mxu1 }
0x130c   : > { %v7695_v2 = vpop.f32.mrb[183].mxu1 }
0x130d   : > { %6911 = vst [vmem:[%s12867_s20 + $0x68] sm:$0xff] %v6895_v53  ;;  %v6860_v7 = vadd.f32 %v7693_v0, %v6315_v50  ;;  %v7696_v22 = vadd.f32 %v7695_v2, %v7694_v51 }
0x130f   : > { %v6880_v8 = vmul.f32 %v12858_v11, %v6860_v7  ;;  %v6861_v63 = vadd.f32 %v7696_v22, %v6316_v42 }
0x1311   : > { %v6896_v39 = vadd.f32 %v6880_v8, %v13596_v34  ;;  %v6881_v47 = vmul.f32 %v12858_v11, %v6861_v63 }
0x1313   : > { %6912 = vst [vmem:[%s12867_s20 + $0x70] sm:$0xff] %v6896_v39  ;;  %v6897_v58 = vadd.f32 %v6881_v47, %v13598_v6 }
0x1315   : > { %6913 = vst [vmem:[%s12867_s20 + $0x78] sm:$0xff] %v6897_v58 }
0x1316   : > { %9067 = shalt.err (!%p9064_p9)
}
0x1317   : > { %s9068_s20 = scalar_lea.hbm %s12941_s21, 2048  ;;  %s9072_s26 = scalar_lea.hbm %s13597_s2, 4096 }
0x1318   : > { %p9069_p0 = scmp.ne.s32.totalorder %s12941_s21, %s9068_s20  ;;  %p9073_p13 = scmp.lt.u32.totalorder %s12941_s21, %s13597_s2 }
0x1319   : > { %p9074_p6 = scmp.lt.u32.totalorder %s9072_s26, %s9068_s20  ;;  %p9076_p3 = scmp.lt.u32.totalorder %s9068_s20, %s12941_s21 }
0x131a   : > { %p9070_p11 = pnand %p9069_p0, %p9365_p5 }
0x131b   : > { %p9075_p10 = por %p9074_p6, %p9073_p13 }
0x131c   : > { %p9071_p8 = pneg %p9070_p11 }
0x131d   : > { %p9077_p7 = por %p9076_p3, %p9075_p10 }
0x131f   : > { %p9078_p12 = pnand %p9077_p7, %p9071_p8 }
0x1321   : > { %9081 = shalt.err (!%p9078_p12)
}
0x1322   : > { %s9143_s9 = smov 128   ;;  %s9144_s29 = smov 8  }
0x1323   : > { %8439 = dma.vmem_to_hbm [thread:$0]  (%p9365_p5), %s12943_s24, 2048, %s12941_s21, %s6915_s17, %s9143_s9, %s9143_s9, %s9144_s29  }
0x1324 PF: > { %s13599_s23 = sld [smem:[#allocation15_spill]]  ;;  %s13600_s14 = sld [smem:[#allocation16_spill]] }
0x1325   : > { %p13602_p1 = scmp.ge.s32.totalorder %s9128_s16, 2 }
0x132a   : > { %s6943_s8 = sand.u32 1, %s13599_s23   ;;  %p13601_p2 = scmp.ne.s32.totalorder %s13600_s14, 0 }
0x132b   : > { %s6944_s20 = scalar_lea.sflag [#allocation4], %s6943_s8 }
0x132c   : > { %p8456_p4 = pnand %p13602_p1, %p13601_p2 }
0x132e   : > { %9111 = dma.done.wait (!%p8456_p4), %s6944_s20, 2048  }
0x132f   : > { %9113 = vsyncadd (!%p8456_p4), %s6944_s20, 4294965248  ;;  %p29_p9 = scmp.ge.s32.totalorder %s9351_s27, 4   ;;  %s13603_s29 = smov %s9120_s30 }
0x1330   : > { %s13604_s30 = smov %s9124_s15  ;;  %s13605_s15 = smov %s9361_s22 }
0x1331   : > { %s13606_s16 = smov %s9351_s27  ;;  %31 = sbr.rel (!%p29_p9) target bundleno = 14 (0xe), region = 140 }
0x1338   :  { %6949 = vsyncpa [#allocation3], 1 }
0x1339   :  { %6951 = vsyncpa [#allocation3 + $0x1], 1 }
0x133a   :  { %6952 = vsyncpa [#allocation6], 1 }
0x133b   :  { %6953 = vsyncpa [#allocation9], 1 }
0x133c   :  { %6954 = vsyncpa [#allocation4], 1 }
0x133d   :  { %6956 = vsyncpa [#allocation4 + $0x1], 1 }

</bundles_post_ra>
